<compile_context>
chip_gen: v7x
topology: tpu7x:2x2x1
jax: 0.10.0
libtpu: 0.0.40
codegen_flags: <defaults>
</compile_context>

<pallas_src>
import functools

import jax
import jax.numpy as jnp
from jax.experimental import pallas as pl
from jax.experimental.pallas import tpu as pltpu

_KMAX = 2048  # K-reduction tile: keeps per-step VMEM small even on v7x (64 MiB)


# ---------------------------------------------------------------------------
# Fused matmul (+ bias + ReLU) kernel: out = relu?(A @ B + bias)
# ---------------------------------------------------------------------------
def _mm_kernel(a_ref, b_ref, bias_ref, o_ref, acc_ref, *, relu):
    @pl.when(pl.program_id(1) == 0)
    def _init():
        acc_ref[...] = jnp.zeros_like(acc_ref)

    acc_ref[...] += jnp.dot(a_ref[...], b_ref[...],
                            preferred_element_type=jnp.float32)

    @pl.when(pl.program_id(1) == pl.num_programs(1) - 1)
    def _finish():
        y = acc_ref[...] + bias_ref[...]
        if relu:
            y = jnp.maximum(y, 0.0)
        o_ref[...] = y.astype(o_ref.dtype)


def matmul_bias_act(a, b, bias, *, relu, out_dtype=jnp.bfloat16):
    """A:(M,K) @ B:(K,Co) in bf16 on the MXU, f32 accumulate, +bias (+ReLU)."""
    M, K = a.shape
    Co = b.shape[1]
    a = a.astype(jnp.bfloat16)
    b = b.astype(jnp.bfloat16)
    bias = bias.astype(jnp.float32).reshape(1, Co)

    # K-reduction tiling (zero-pad K so the tile divides exactly; zeros add 0).
    if K > _KMAX:
        nk = pl.cdiv(K, _KMAX)
        kp = nk * _KMAX
        a = jnp.pad(a, ((0, 0), (0, kp - K)))
        b = jnp.pad(b, ((0, kp - K), (0, 0)))
        tk = _KMAX
    else:
        nk, tk = 1, K

    # Adaptive row tile: single whole-M step when it comfortably fits VMEM
    # (amortizes per-step overhead and handles tiny-M tail layers); otherwise
    # 512-row tiles with a cdiv grid (ragged last tile handled by Pallas).
    approx_vmem = 4 * M * tk + 8 * M * Co + 4 * tk * Co
    tm = M if approx_vmem <= 12 * 1024 * 1024 else 512
    grid = (pl.cdiv(M, tm), nk)

    out = pl.pallas_call(
        functools.partial(_mm_kernel, relu=relu),
        out_shape=jax.ShapeDtypeStruct((M, Co), out_dtype),
        grid=grid,
        in_specs=[
            pl.BlockSpec((tm, tk), lambda i, k: (i, k)),
            pl.BlockSpec((tk, Co), lambda i, k: (k, 0)),
            pl.BlockSpec((1, Co), lambda i, k: (0, 0)),
        ],
        out_specs=pl.BlockSpec((tm, Co), lambda i, k: (i, 0)),
        scratch_shapes=[pltpu.VMEM((tm, Co), jnp.float32)],
        compiler_params=pltpu.CompilerParams(
            dimension_semantics=("parallel", "arbitrary")),
    )(a, b, bias)
    return out


# ---------------------------------------------------------------------------
# Conv2d (bias=False) + BatchNorm(eps=1e-3, eval) + ReLU, fused
# ---------------------------------------------------------------------------
def conv_bn_relu(x, w, gamma, beta, mean, var, *, stride=1, padding=(0, 0),
                 eps=1e-3, relu=True):
    """x: NHWC bf16; w: (Kh, Kw, Ci, Co) f32 (HWIO)."""
    N, H, W, Ci = x.shape
    Kh, Kw, _, Co = w.shape
    ph, pw = padding
    if ph or pw:
        x = jnp.pad(x, ((0, 0), (ph, ph), (pw, pw), (0, 0)))
    Hp, Wp = H + 2 * ph, W + 2 * pw
    Ho = (Hp - Kh) // stride + 1
    Wo = (Wp - Kw) // stride + 1

    # Fold BN affine into the weights / bias (conv itself has no bias).
    inv = gamma / jnp.sqrt(var + eps)
    wmat = (w.reshape(Kh * Kw * Ci, Co) * inv[None, :]).astype(jnp.bfloat16)
    bias = beta - inv * mean

    if Kh == 1 and Kw == 1 and stride == 1:
        a = x.reshape(N * Ho * Wo, Ci)          # 1x1 conv: no patch expansion
    else:
        # TODO(synk): build the Kh*Kw patch expansion inside the kernel (halo
        # BlockSpec / manual DMA) instead of materializing it (bf16) in HBM.
        cols = []
        for i in range(Kh):
            for j in range(Kw):
                cols.append(x[:, i:i + (Ho - 1) * stride + 1:stride,
                              j:j + (Wo - 1) * stride + 1:stride, :])
        a = jnp.concatenate(cols, axis=-1).reshape(N * Ho * Wo, Kh * Kw * Ci)

    out = matmul_bias_act(a, wmat, bias, relu=relu, out_dtype=jnp.bfloat16)
    return out.reshape(N, Ho, Wo, Co)


# ---------------------------------------------------------------------------
# Pooling kernels
# ---------------------------------------------------------------------------
def _max9_kernel(*refs):
    o_ref = refs[-1]
    m = refs[0][...]
    for r in refs[1:-1]:
        m = jnp.maximum(m, r[...])
    o_ref[...] = m


def max_pool_3x3_s2(x):
    """MaxPool2d(kernel=3, stride=2, padding=0) on NHWC (bf16)."""
    N, H, W, C = x.shape
    Ho, Wo = (H - 3) // 2 + 1, (W - 3) // 2 + 1
    M = N * Ho * Wo
    views = [x[:, di:di + 2 * Ho - 1:2, dj:dj + 2 * Wo - 1:2, :].reshape(M, C)
             for di in range(3) for dj in range(3)]
    tm = M if M <= 1024 else 512
    out = pl.pallas_call(
        _max9_kernel,
        out_shape=jax.ShapeDtypeStruct((M, C), x.dtype),
        grid=(pl.cdiv(M, tm),),
        in_specs=[pl.BlockSpec((tm, C), lambda i: (i, 0))] * 9,
        out_specs=pl.BlockSpec((tm, C), lambda i: (i, 0)),
        compiler_params=pltpu.CompilerParams(dimension_semantics=("parallel",)),
    )(*views)
    return out.reshape(N, Ho, Wo, C)


def _avgpool3x3_kernel(x_ref, o_ref):
    # x_ref: (1, H+2, W+2, C) zero-padded image; o_ref: (1, H, W, C)
    _, Ho, Wo, C = o_ref.shape
    acc = jnp.zeros((1, Ho, Wo, C), jnp.float32)
    for di in range(3):
        for dj in range(3):
            acc = acc + x_ref[:, pl.ds(di, Ho), pl.ds(dj, Wo), :].astype(
                jnp.float32)
    o_ref[...] = (acc * (1.0 / 9.0)).astype(o_ref.dtype)  # count_include_pad


def avg_pool_3x3_s1_p1(x):
    """F.avg_pool2d(kernel=3, stride=1, padding=1) (count_include_pad=True)."""
    N, H, W, C = x.shape
    xp = jnp.pad(x, ((0, 0), (1, 1), (1, 1), (0, 0)))
    return pl.pallas_call(
        _avgpool3x3_kernel,
        out_shape=jax.ShapeDtypeStruct((N, H, W, C), x.dtype),
        grid=(N,),
        in_specs=[pl.BlockSpec((1, H + 2, W + 2, C), lambda n: (n, 0, 0, 0))],
        out_specs=pl.BlockSpec((1, H, W, C), lambda n: (n, 0, 0, 0)),
        compiler_params=pltpu.CompilerParams(dimension_semantics=("parallel",)),
    )(xp)


# ---------------------------------------------------------------------------
# Fused classifier head: global average pool + Linear(2048 -> num_classes)
# ---------------------------------------------------------------------------
def _gap_fc_kernel(x_ref, w_ref, b_ref, o_ref):
    _, H, W, C = x_ref.shape
    x = x_ref[...].astype(jnp.float32).reshape(H * W, C)
    pooled = jnp.sum(x, axis=0, keepdims=True) * (1.0 / (H * W))   # (1, C)
    y = jnp.dot(pooled.astype(jnp.bfloat16), w_ref[...],
                preferred_element_type=jnp.float32) + b_ref[...]
    o_ref[...] = y.reshape(o_ref.shape)


def classifier_head(x, w, b):
    """adaptive_avg_pool2d -> flatten -> dropout(eval=id) -> fc, one kernel."""
    N, H, W, C = x.shape
    nc = w.shape[1]
    out = pl.pallas_call(
        _gap_fc_kernel,
        out_shape=jax.ShapeDtypeStruct((N, 1, nc), jnp.float32),
        grid=(N,),
        in_specs=[
            pl.BlockSpec((1, H, W, C), lambda n: (n, 0, 0, 0)),
            pl.BlockSpec((C, nc), lambda n: (0, 0)),
            pl.BlockSpec((1, nc), lambda n: (0, 0)),
        ],
        out_specs=pl.BlockSpec((1, 1, nc), lambda n: (n, 0, 0)),
        compiler_params=pltpu.CompilerParams(dimension_semantics=("parallel",)),
    )(x, w.astype(jnp.bfloat16), b.astype(jnp.float32).reshape(1, nc))
    return out.reshape(N, nc)


# ---------------------------------------------------------------------------
# Parameters (BasicConv2d = conv(bias=False) + BN(eps=1e-3) + ReLU)
# ---------------------------------------------------------------------------
def basic_conv_params(key, cin, cout, kh, kw):
    k1, k2, k3, k4, k5 = jax.random.split(key, 5)
    fan_in = cin * kh * kw
    return dict(
        w=jax.random.normal(k1, (kh, kw, cin, cout), jnp.float32)
          * (2.0 / fan_in) ** 0.5,
        gamma=1.0 + 0.1 * jax.random.normal(k2, (cout,), jnp.float32),
        beta=0.05 * jax.random.normal(k3, (cout,), jnp.float32),
        mean=0.05 * jax.random.normal(k4, (cout,), jnp.float32),
        var=1.0 + 0.1 * jax.random.uniform(k5, (cout,), jnp.float32),
    )


def basic_conv(p, x, *, stride=1, padding=(0, 0), relu=True):
    return conv_bn_relu(x, p["w"], p["gamma"], p["beta"], p["mean"], p["var"],
                        stride=stride, padding=padding, relu=relu)


def inception_a_params(key, cin, pool_features):
    k = jax.random.split(key, 7)
    return dict(
        b1=basic_conv_params(k[0], cin, 64, 1, 1),
        b5_1=basic_conv_params(k[1], cin, 48, 1, 1),
        b5_2=basic_conv_params(k[2], 48, 64, 5, 5),
        b3_1=basic_conv_params(k[3], cin, 64, 1, 1),
        b3_2=basic_conv_params(k[4], 64, 96, 3, 3),
        b3_3=basic_conv_params(k[5], 96, 96, 3, 3),
        bp=basic_conv_params(k[6], cin, pool_features, 1, 1),
    )


def inception_a(p, x):
    b1 = basic_conv(p["b1"], x)
    b5 = basic_conv(p["b5_1"], x)
    b5 = basic_conv(p["b5_2"], b5, padding=(2, 2))
    b3 = basic_conv(p["b3_1"], x)
    b3 = basic_conv(p["b3_2"], b3, padding=(1, 1))
    b3 = basic_conv(p["b3_3"], b3, padding=(1, 1))
    bp = basic_conv(p["bp"], avg_pool_3x3_s1_p1(x))
    return jnp.concatenate([b1, b5, b3, bp], axis=-1)


def inception_b_params(key, cin):
    k = jax.random.split(key, 4)
    return dict(
        b3=basic_conv_params(k[0], cin, 384, 3, 3),
        bd_1=basic_conv_params(k[1], cin, 64, 1, 1),
        bd_2=basic_conv_params(k[2], 64, 96, 3, 3),
        bd_3=basic_conv_params(k[3], 96, 96, 3, 3),
    )


def inception_b(p, x):
    b3 = basic_conv(p["b3"], x, stride=2)
    bd = basic_conv(p["bd_1"], x)
    bd = basic_conv(p["bd_2"], bd, padding=(1, 1))
    bd = basic_conv(p["bd_3"], bd, stride=2)
    bp = max_pool_3x3_s2(x)
    return jnp.concatenate([b3, bd, bp], axis=-1)


def inception_c_params(key, cin, c7):
    k = jax.random.split(key, 10)
    return dict(
        b1=basic_conv_params(k[0], cin, 192, 1, 1),
        b7_1=basic_conv_params(k[1], cin, c7, 1, 1),
        b7_2=basic_conv_params(k[2], c7, c7, 1, 7),
        b7_3=basic_conv_params(k[3], c7, 192, 7, 1),
        bd_1=basic_conv_params(k[4], cin, c7, 1, 1),
        bd_2=basic_conv_params(k[5], c7, c7, 7, 1),
        bd_3=basic_conv_params(k[6], c7, c7, 1, 7),
        bd_4=basic_conv_params(k[7], c7, c7, 7, 1),
        bd_5=basic_conv_params(k[8], c7, 192, 1, 7),
        bp=basic_conv_params(k[9], cin, 192, 1, 1),
    )


def inception_c(p, x):
    b1 = basic_conv(p["b1"], x)
    b7 = basic_conv(p["b7_1"], x)
    b7 = basic_conv(p["b7_2"], b7, padding=(0, 3))
    b7 = basic_conv(p["b7_3"], b7, padding=(3, 0))
    bd = basic_conv(p["bd_1"], x)
    bd = basic_conv(p["bd_2"], bd, padding=(3, 0))
    bd = basic_conv(p["bd_3"], bd, padding=(0, 3))
    bd = basic_conv(p["bd_4"], bd, padding=(3, 0))
    bd = basic_conv(p["bd_5"], bd, padding=(0, 3))
    bp = basic_conv(p["bp"], avg_pool_3x3_s1_p1(x))
    return jnp.concatenate([b1, b7, bd, bp], axis=-1)


def inception_d_params(key, cin):
    k = jax.random.split(key, 6)
    return dict(
        b3_1=basic_conv_params(k[0], cin, 192, 1, 1),
        b3_2=basic_conv_params(k[1], 192, 320, 3, 3),
        b7_1=basic_conv_params(k[2], cin, 192, 1, 1),
        b7_2=basic_conv_params(k[3], 192, 192, 1, 7),
        b7_3=basic_conv_params(k[4], 192, 192, 7, 1),
        b7_4=basic_conv_params(k[5], 192, 192, 3, 3),
    )


def inception_d(p, x):
    b3 = basic_conv(p["b3_1"], x)
    b3 = basic_conv(p["b3_2"], b3, stride=2)
    b7 = basic_conv(p["b7_1"], x)
    b7 = basic_conv(p["b7_2"], b7, padding=(0, 3))
    b7 = basic_conv(p["b7_3"], b7, padding=(3, 0))
    b7 = basic_conv(p["b7_4"], b7, stride=2)
    bp = max_pool_3x3_s2(x)
    return jnp.concatenate([b3, b7, bp], axis=-1)


def inception_e_params(key, cin):
    k = jax.random.split(key, 9)
    return dict(
        b1=basic_conv_params(k[0], cin, 320, 1, 1),
        b3_1=basic_conv_params(k[1], cin, 384, 1, 1),
        b3_2a=basic_conv_params(k[2], 384, 384, 1, 3),
        b3_2b=basic_conv_params(k[3], 384, 384, 3, 1),
        bd_1=basic_conv_params(k[4], cin, 448, 1, 1),
        bd_2=basic_conv_params(k[5], 448, 384, 3, 3),
        bd_3a=basic_conv_params(k[6], 384, 384, 1, 3),
        bd_3b=basic_conv_params(k[7], 384, 384, 3, 1),
        bp=basic_conv_params(k[8], cin, 192, 1, 1),
    )


def inception_e(p, x):
    b1 = basic_conv(p["b1"], x)
    b3 = basic_conv(p["b3_1"], x)
    b3 = jnp.concatenate([
        basic_conv(p["b3_2a"], b3, padding=(0, 1)),
        basic_conv(p["b3_2b"], b3, padding=(1, 0)),
    ], axis=-1)
    bd = basic_conv(p["bd_1"], x)
    bd = basic_conv(p["bd_2"], bd, padding=(1, 1))
    bd = jnp.concatenate([
        basic_conv(p["bd_3a"], bd, padding=(0, 1)),
        basic_conv(p["bd_3b"], bd, padding=(1, 0)),
    ], axis=-1)
    bp = basic_conv(p["bp"], avg_pool_3x3_s1_p1(x))
    return jnp.concatenate([b1, b3, bd, bp], axis=-1)


def init_params(key):
    ks = iter(jax.random.split(key, 32))
    p = {}
    p["Conv2d_1a_3x3"] = basic_conv_params(next(ks), 3, 32, 3, 3)
    p["Conv2d_2a_3x3"] = basic_conv_params(next(ks), 32, 32, 3, 3)
    p["Conv2d_2b_3x3"] = basic_conv_params(next(ks), 32, 64, 3, 3)
    p["Conv2d_3b_1x1"] = basic_conv_params(next(ks), 64, 80, 1, 1)
    p["Conv2d_4a_3x3"] = basic_conv_params(next(ks), 80, 192, 3, 3)
    p["Mixed_5b"] = inception_a_params(next(ks), 192, 32)
    p["Mixed_5c"] = inception_a_params(next(ks), 256, 64)
    p["Mixed_5d"] = inception_a_params(next(ks), 288, 64)
    p["Mixed_6a"] = inception_b_params(next(ks), 288)
    p["Mixed_6b"] = inception_c_params(next(ks), 768, 128)
    p["Mixed_6c"] = inception_c_params(next(ks), 768, 160)
    p["Mixed_6d"] = inception_c_params(next(ks), 768, 160)
    p["Mixed_6e"] = inception_c_params(next(ks), 768, 192)
    p["Mixed_7a"] = inception_d_params(next(ks), 768)
    p["Mixed_7b"] = inception_e_params(next(ks), 1280)
    p["Mixed_7c"] = inception_e_params(next(ks), 2048)
    kf = next(ks)
    k1, _ = jax.random.split(kf)
    p["fc"] = dict(w=0.01 * jax.random.normal(k1, (2048, 2), jnp.float32),
                   b=jnp.zeros((2,), jnp.float32))
    return p


# ---------------------------------------------------------------------------
# Forward (torchvision Inception3 eval-mode graph, fc -> 2)
# ---------------------------------------------------------------------------
_TORCH_MEAN = (0.485, 0.456, 0.406)
_TORCH_STD = (0.229, 0.224, 0.225)


def _transform_input(x):
    # transform_input=True (set by models.inception_v3(pretrained=True)).
    chans = [x[:, c:c + 1] * (_TORCH_STD[c] / 0.5) + (_TORCH_MEAN[c] - 0.5) / 0.5
             for c in range(3)]
    return jnp.concatenate(chans, axis=1)


def inception_v3_forward(params, x_nchw):
    x = _transform_input(x_nchw.astype(jnp.float32))
    x = jnp.transpose(x, (0, 2, 3, 1)).astype(jnp.bfloat16)  # NCHW -> NHWC
    x = basic_conv(params["Conv2d_1a_3x3"], x, stride=2)
    x = basic_conv(params["Conv2d_2a_3x3"], x)
    x = basic_conv(params["Conv2d_2b_3x3"], x, padding=(1, 1))
    x = max_pool_3x3_s2(x)
    x = basic_conv(params["Conv2d_3b_1x1"], x)
    x = basic_conv(params["Conv2d_4a_3x3"], x)
    x = max_pool_3x3_s2(x)
    x = inception_a(params["Mixed_5b"], x)
    x = inception_a(params["Mixed_5c"], x)
    x = inception_a(params["Mixed_5d"], x)
    x = inception_b(params["Mixed_6a"], x)
    x = inception_c(params["Mixed_6b"], x)
    x = inception_c(params["Mixed_6c"], x)
    x = inception_c(params["Mixed_6d"], x)
    x = inception_c(params["Mixed_6e"], x)
    # TODO(synk): AuxLogits branch runs only in training mode; skipped in eval.
    x = inception_d(params["Mixed_7a"], x)
    x = inception_e(params["Mixed_7b"], x)
    x = inception_e(params["Mixed_7c"], x)
    # global avg pool + flatten + dropout(eval = identity) + fc, fused.
    logits = classifier_head(x, params["fc"]["w"], params["fc"]["b"])
    return logits


if __name__ == "__main__":
    key = jax.random.PRNGKey(0)
    pkey, xkey = jax.random.split(key)
    params = init_params(pkey)
    # 75x75 is the smallest spatial size the InceptionV3 conv/pool stack admits
    # (Mixed_7 blocks end up at 1x1); batch kept small at 2.
    x = jax.random.normal(xkey, (2, 3, 75, 75), jnp.float32)
    logits = jax.block_until_ready(inception_v3_forward(params, x))
    assert logits.shape == (2, 2), logits.shape
    assert bool(jnp.all(jnp.isfinite(logits)))
    print("KERNEL_OK")
</pallas_src>

<mosaic_0001>
module attributes {stable_mosaic.version = 11 : i64} {
  func.func @_mm_kernel(%arg0: i32, %arg1: i32, %arg2: memref<2738x27xbf16, #tpu.memory_space<vmem>>, %arg3: memref<27x32xbf16, #tpu.memory_space<vmem>>, %arg4: memref<1x32xf32, #tpu.memory_space<vmem>>, %arg5: memref<2738x32xbf16, #tpu.memory_space<vmem>>, %arg6: memref<2738x32xf32, #tpu.memory_space<vmem>>) attributes {dimension_semantics = [#tpu.dimension_semantics<parallel>, #tpu.dimension_semantics<arbitrary>], iteration_bounds = array<i64: 1, 1>, scalar_prefetch = 0 : i64, scratch_operands = 1 : i64, tpu.core_type = #tpu.core_type<tc>, window_params = [{transform_indices = @transform_0, window_bounds = array<i64: 2738, 27>}, {transform_indices = @transform_1, window_bounds = array<i64: 27, 32>}, {pipeline_mode = #tpu.pipeline_mode<synchronous>, transform_indices = @transform_2, window_bounds = array<i64: 1, 32>}, {transform_indices = @transform_3, window_bounds = array<i64: 2738, 32>}]} {
    %c0_i32 = arith.constant 0 : i32
    %0 = arith.cmpi eq, %arg1, %c0_i32 : i32
    %1 = arith.extui %0 : i1 to i32
    %c0_i32_0 = arith.constant 0 : i32
    %2 = arith.cmpi ne, %1, %c0_i32_0 : i32
    scf.if %2 {
      %cst_10 = arith.constant 0.000000e+00 : f32
      %12 = vector.broadcast %cst_10 : f32 to vector<2738x32xf32>
      %c0_11 = arith.constant 0 : index
      %c0_12 = arith.constant 0 : index
      %13 = vector.load %arg6[%c0_11, %c0_12] : memref<2738x32xf32, #tpu.memory_space<vmem>>, vector<2738x32xf32>
      tpu.vector_store %arg6[%c0_11, %c0_12], %12 {strides = array<i32>} : memref<2738x32xf32, #tpu.memory_space<vmem>>, vector<2738x32xf32>,
    } else {
    }
    %c0 = arith.constant 0 : index
    %c0_1 = arith.constant 0 : index
    %3 = vector.load %arg6[%c0, %c0_1] : memref<2738x32xf32, #tpu.memory_space<vmem>>, vector<2738x32xf32>
    %c0_2 = arith.constant 0 : index
    %c0_3 = arith.constant 0 : index
    %4 = vector.load %arg2[%c0_2, %c0_3] : memref<2738x27xbf16, #tpu.memory_space<vmem>>, vector<2738x27xbf16>
    %c0_4 = arith.constant 0 : index
    %c0_5 = arith.constant 0 : index
    %5 = vector.load %arg3[%c0_4, %c0_5] : memref<27x32xbf16, #tpu.memory_space<vmem>>, vector<27x32xbf16>
    %cst = arith.constant dense<0.000000e+00> : vector<2738x32xf32>
    %6 = tpu.matmul %4, %5, %cst {dimension_numbers = #tpu.dot_dimension_numbers<[1], [0], [0], [1], [0, 0, 1, 1], [], []>} : vector<2738x27xbf16>, vector<27x32xbf16>, vector<2738x32xf32> -> vector<2738x32xf32>
    %7 = arith.addf %3, %6 : vector<2738x32xf32>
    %c0_6 = arith.constant 0 : index
    %c0_7 = arith.constant 0 : index
    %8 = vector.load %arg6[%c0_6, %c0_7] : memref<2738x32xf32, #tpu.memory_space<vmem>>, vector<2738x32xf32>
    tpu.vector_store %arg6[%c0_6, %c0_7], %7 {strides = array<i32>} : memref<2738x32xf32, #tpu.memory_space<vmem>>, vector<2738x32xf32>,
    %c0_i32_8 = arith.constant 0 : i32
    %9 = arith.cmpi eq, %arg1, %c0_i32_8 : i32
    %10 = arith.extui %9 : i1 to i32
    %c0_i32_9 = arith.constant 0 : i32
    %11 = arith.cmpi ne, %10, %c0_i32_9 : i32
    scf.if %11 {
      %c0_10 = arith.constant 0 : index
      %c0_11 = arith.constant 0 : index
      %12 = vector.load %arg6[%c0_10, %c0_11] : memref<2738x32xf32, #tpu.memory_space<vmem>>, vector<2738x32xf32>
      %c0_12 = arith.constant 0 : index
      %c0_13 = arith.constant 0 : index
      %13 = vector.load %arg4[%c0_12, %c0_13] : memref<1x32xf32, #tpu.memory_space<vmem>>, vector<1x32xf32>
      %14 = vector.broadcast %13 : vector<1x32xf32> to vector<2738x32xf32>
      %15 = arith.addf %12, %14 : vector<2738x32xf32>
      %cst_14 = arith.constant 0.000000e+00 : f32
      %16 = vector.broadcast %cst_14 : f32 to vector<2738x32xf32>
      %17 = arith.maximumf %15, %16 : vector<2738x32xf32>
      %18 = arith.truncf %17 : vector<2738x32xf32> to vector<2738x32xbf16>
      %c0_15 = arith.constant 0 : index
      %c0_16 = arith.constant 0 : index
      %19 = vector.load %arg5[%c0_15, %c0_16] : memref<2738x32xbf16, #tpu.memory_space<vmem>>, vector<2738x32xbf16>
      tpu.vector_store %arg5[%c0_15, %c0_16], %18 {strides = array<i32>} : memref<2738x32xbf16, #tpu.memory_space<vmem>>, vector<2738x32xbf16>,
    } else {
    }
    return
  }
  func.func @transform_0(%arg0: i32, %arg1: i32) -> (i32, i32) {
    %c0_i32 = arith.constant 0 : i32
    return %arg0, %arg1 : i32, i32
  }
  func.func @transform_1(%arg0: i32, %arg1: i32) -> (i32, i32) {
    %c0_i32 = arith.constant 0 : i32
    %c0_i32_0 = arith.constant 0 : i32
    return %arg1, %c0_i32 : i32, i32
  }
  func.func @transform_2(%arg0: i32, %arg1: i32) -> (i32, i32) {
    %c0_i32 = arith.constant 0 : i32
    %c0_i32_0 = arith.constant 0 : i32
    %c0_i32_1 = arith.constant 0 : i32
    return %c0_i32, %c0_i32_0 : i32, i32
  }
  func.func @transform_3(%arg0: i32, %arg1: i32) -> (i32, i32) {
    %c0_i32 = arith.constant 0 : i32
    %c0_i32_0 = arith.constant 0 : i32
    return %arg0, %c0_i32 : i32, i32
  }
}

</mosaic_0001>

<bundles_post_ra>
// kernel: tpu_custom_call.1
= control target key start
LH: loop header
LB: loop body
LE: loop exit
PB: predicated region body
PF: predicated region fallthrough
CT: control target
= control target key end

     0   :  { %vm2440_vm0 = vcmask 1044480   ;;  %vm2441_vm1 = vcmask 1045504   ;;  %vm1923_vm2 = vcmask 220160   ;;  %v9045_v1 = vmov 65535   ;;  %s12545_s1 = inlined_call_operand.vmem [shape: bf16[27,32], index: 1, kind: input, shape index: {}]   ;;  %s12546_s0 = inlined_call_operand.vmem [shape: bf16[2738,27], index: 0, kind: input, shape index: {}]   ;;  %s12547_s2 = inlined_call_operand.vmem [shape: f32[1,32], index: 2, kind: input, shape index: {}]   ;;  %s12548_s3 = inlined_call_operand.vmem [shape: bf16[2738,32], index: 3, kind: output, shape index: {}]  }
   0x1   :  { %v8865_v0 = vld [vmem:[%s12545_s1] sm:$0xff]   ;;  %v2442_v2 = vsel %vm2440_vm0, 4294967295, %v9045_v1  ;;  %v8866_v3 = vld [vmem:[%s12545_s1 + $0x8] sm:$0x3f]   ;;  %v8868_v7 = vld [vmem:[%s12546_s0 + $0x2b0] sm:$0xff]   ;;  %vm19_vm3 = vcmask 261120  }
   0x2   :  { %8511 = vmatprep.subr.bf16.mxu0 %v8865_v0  ;;  %8859 = vmatprep.subr.bf16.mxu1 %v8865_v0  ;;  %v2443_v4 = vsel %vm2441_vm1, %v2442_v2, 0  ;;  %v8867_v5 = vld [vmem:[%s12546_s0] sm:$0xff]   ;;  %v8869_v8 = vld [vmem:[%s12546_s0 + $0x8] sm:$0xff]   ;;  %v8870_v9 = vld [vmem:[%s12546_s0 + $0x2b8] sm:$0xff]   ;;  %v9046_v52 = vmov 0.0   ;;  %vm6955_vm4 = vcmask 257024  }
   0x3   :  { %8512 = vmatpush3.bf16.msra.mxu0 %v8865_v0  ;;  %8861 = vmatpush3.bf16.msra.mxu1 %v8865_v0  ;;  %v2445_v6 = vand.u32 %v8866_v3, %v2443_v4  ;;  %v8871_v10 = vld [vmem:[%s12546_s0 + $0x10] sm:$0xff]   ;;  %v8872_v11 = vld [vmem:[%s12546_s0 + $0x2c0] sm:$0xff]   ;;  %v8873_v12 = vld [vmem:[%s12546_s0 + $0x18] sm:$0xff]   ;;  %22 = vst.msk [vmem:[#allocation2 + $0x10] sm:$0xff] %vm19_vm3, %v9046_v52  ;;  %vm362_vm5 = vcmask 254976   ;;  %vm7298_vm6 = vcmask 253952  }
   0x4   :  { %8515 = vmatprep.mubr.msk.bf16.mxu0 %vm1923_vm2, %v8867_v5  ;;  %8687 = vmatprep.mubr.msk.bf16.mxu1 %vm1923_vm2, %v8868_v7  ;;  %v8874_v13 = vld [vmem:[%s12546_s0 + $0x2c8] sm:$0xff]   ;;  %v8875_v14 = vld [vmem:[%s12546_s0 + $0x20] sm:$0xff]   ;;  %v8876_v15 = vld [vmem:[%s12546_s0 + $0x2d0] sm:$0xff]   ;;  %20 = vst.msk [vmem:[#allocation2] sm:$0xff] %vm19_vm3, %v9046_v52 }
   0x5   :  { %8513 = vmatprep.subr.bf16.mxu0 %v2445_v6  ;;  %8860 = vmatprep.subr.bf16.mxu1 %v2445_v6  ;;  %v8877_v16 = vld [vmem:[%s12546_s0 + $0x28] sm:$0xff]   ;;  %v8878_v17 = vld [vmem:[%s12546_s0 + $0x2d8] sm:$0xff]   ;;  %v8879_v18 = vld [vmem:[%s12546_s0 + $0x30] sm:$0xff]   ;;  %21 = vst.msk [vmem:[#allocation2 + $0x8] sm:$0xff] %vm19_vm3, %v9046_v52 }
   0x6   :  { %v8880_v19 = vld [vmem:[%s12546_s0 + $0x2e0] sm:$0xff]   ;;  %v8881_v20 = vld [vmem:[%s12546_s0 + $0x38] sm:$0xff]   ;;  %v8882_v21 = vld [vmem:[%s12546_s0 + $0x2e8] sm:$0xff]   ;;  %23 = vst.msk [vmem:[#allocation2 + $0x18] sm:$0xff] %vm19_vm3, %v9046_v52 }
   0x7   :  { %8514 = vmatpush3.bf16.msra.mxu0 %v2445_v6  ;;  %8862 = vmatpush3.bf16.msra.mxu1 %v2445_v6  ;;  %v8883_v22 = vld [vmem:[%s12546_s0 + $0x40] sm:$0xff]   ;;  %v8884_v23 = vld [vmem:[%s12546_s0 + $0x2f0] sm:$0xff]   ;;  %v8885_v24 = vld [vmem:[%s12546_s0 + $0x48] sm:$0xff]   ;;  %24 = vst.msk [vmem:[#allocation2 + $0x20] sm:$0xff] %vm19_vm3, %v9046_v52 }
   0x8   :  { %v8886_v25 = vld [vmem:[%s12546_s0 + $0x2f8] sm:$0xff]   ;;  %v8887_v26 = vld [vmem:[%s12546_s0 + $0x50] sm:$0xff]   ;;  %v8888_v27 = vld [vmem:[%s12546_s0 + $0x300] sm:$0xff]   ;;  %25 = vst.msk [vmem:[#allocation2 + $0x28] sm:$0xff] %vm19_vm3, %v9046_v52 }
   0x9   :  { %v8889_v28 = vld [vmem:[%s12546_s0 + $0x58] sm:$0xff]   ;;  %v8890_v29 = vld [vmem:[%s12546_s0 + $0x308] sm:$0xff]   ;;  %v8891_v30 = vld [vmem:[%s12546_s0 + $0x60] sm:$0xff]   ;;  %26 = vst.msk [vmem:[#allocation2 + $0x30] sm:$0xff] %vm19_vm3, %v9046_v52 }
   0xa   :  { %8516 = vmatmul.mubr.msk.bf16.vlgmr.msra.gmra.mrb[0].mxu0 %vm1923_vm2, %v8869_v8  ;;  %8688 = vmatmul.mubr.msk.bf16.vlgmr.msra.gmra.mrb[0].mxu1 %vm1923_vm2, %v8870_v9  ;;  %v8892_v31 = vld [vmem:[%s12546_s0 + $0x310] sm:$0xff]   ;;  %v8893_v32 = vld [vmem:[%s12546_s0 + $0x68] sm:$0xff]   ;;  %v8894_v33 = vld [vmem:[%s12546_s0 + $0x318] sm:$0xff]   ;;  %27 = vst.msk [vmem:[#allocation2 + $0x38] sm:$0xff] %vm19_vm3, %v9046_v52 }
   0xb   :  { %8519 = vmatprep.mubr.msk.bf16.mxu0 %vm1923_vm2, %v8871_v10  ;;  %8691 = vmatprep.mubr.msk.bf16.mxu1 %vm1923_vm2, %v8872_v11  ;;  %v8895_v34 = vld [vmem:[%s12546_s0 + $0x70] sm:$0xff]   ;;  %v8896_v35 = vld [vmem:[%s12546_s0 + $0x320] sm:$0xff]   ;;  %v8897_v36 = vld [vmem:[%s12546_s0 + $0x78] sm:$0xff]   ;;  %28 = vst.msk [vmem:[#allocation2 + $0x40] sm:$0xff] %vm19_vm3, %v9046_v52 }
   0xc   :  { %v8898_v37 = vld [vmem:[%s12546_s0 + $0x328] sm:$0xff]   ;;  %v8899_v38 = vld [vmem:[%s12546_s0 + $0x80] sm:$0xff]   ;;  %v8900_v39 = vld [vmem:[%s12546_s0 + $0x330] sm:$0xff]   ;;  %29 = vst.msk [vmem:[#allocation2 + $0x48] sm:$0xff] %vm19_vm3, %v9046_v52 }
   0xd   :  { %v8901_v40 = vld [vmem:[%s12546_s0 + $0x88] sm:$0xff]   ;;  %v8902_v41 = vld [vmem:[%s12546_s0 + $0x338] sm:$0xff]   ;;  %v8903_v42 = vld [vmem:[%s12546_s0 + $0x90] sm:$0xff]   ;;  %30 = vst.msk [vmem:[#allocation2 + $0x50] sm:$0xff] %vm19_vm3, %v9046_v52 }
   0xe   :  { %v8904_v43 = vld [vmem:[%s12546_s0 + $0x340] sm:$0xff]   ;;  %v8905_v44 = vld [vmem:[%s12546_s0 + $0x98] sm:$0xff]   ;;  %v8906_v45 = vld [vmem:[%s12546_s0 + $0x348] sm:$0xff]   ;;  %31 = vst.msk [vmem:[#allocation2 + $0x58] sm:$0xff] %vm19_vm3, %v9046_v52 }
   0xf   :  { %v8907_v46 = vld [vmem:[%s12546_s0 + $0xa0] sm:$0xff]   ;;  %v8908_v47 = vld [vmem:[%s12546_s0 + $0x350] sm:$0xff]   ;;  %v9244_v48 = vld [vmem:[%s12546_s0 + $0xa8] sm:$0xff]   ;;  %32 = vst.msk [vmem:[#allocation2 + $0x60] sm:$0xff] %vm19_vm3, %v9046_v52 }
  0x10   :  { %v9249_v49 = vld [vmem:[%s12546_s0 + $0x358] sm:$0xff]   ;;  %v9254_v50 = vld [vmem:[%s12546_s0 + $0xb0] sm:$0xff]   ;;  %v9259_v51 = vld [vmem:[%s12546_s0 + $0x360] sm:$0xff]   ;;  %33 = vst.msk [vmem:[#allocation2 + $0x68] sm:$0xff] %vm19_vm3, %v9046_v52 }
  0x11   :  { %34 = vst.msk [vmem:[#allocation2 + $0x70] sm:$0xff] %vm19_vm3, %v9046_v52  ;;  %35 = vst.msk [vmem:[#allocation2 + $0x78] sm:$0xff] %vm19_vm3, %v9046_v52  ;;  %v8913_v53 = vld [vmem:[%s12546_s0 + $0xb8] sm:$0xff]   ;;  %v8914_v54 = vld [vmem:[%s12546_s0 + $0x368] sm:$0xff]  }
  0x12   :  { %8520 = vmatmul.mubr.msk.bf16.gmra.mrb[4].mxu0 %vm1923_vm2, %v8873_v12  ;;  %8692 = vmatmul.mubr.msk.bf16.gmra.mrb[4].mxu1 %vm1923_vm2, %v8874_v13  ;;  %36 = vst.msk [vmem:[#allocation2 + $0x80] sm:$0xff] %vm19_vm3, %v9046_v52  ;;  %37 = vst.msk [vmem:[#allocation2 + $0x88] sm:$0xff] %vm19_vm3, %v9046_v52  ;;  %v8915_v55 = vld [vmem:[%s12546_s0 + $0xc0] sm:$0xff]   ;;  %v8916_v56 = vld [vmem:[%s12546_s0 + $0x370] sm:$0xff]  }
  0x13   :  { %8523 = vmatprep.mubr.msk.bf16.mxu0 %vm1923_vm2, %v8875_v14  ;;  %8695 = vmatprep.mubr.msk.bf16.mxu1 %vm1923_vm2, %v8876_v15  ;;  %38 = vst.msk [vmem:[#allocation2 + $0x90] sm:$0xff] %vm19_vm3, %v9046_v52  ;;  %39 = vst.msk [vmem:[#allocation2 + $0x98] sm:$0xff] %vm19_vm3, %v9046_v52  ;;  %v8917_v57 = vld [vmem:[%s12546_s0 + $0xc8] sm:$0xff]   ;;  %v8918_v58 = vld [vmem:[%s12546_s0 + $0x378] sm:$0xff]  }
  0x14   :  { %40 = vst.msk [vmem:[#allocation2 + $0xa0] sm:$0xff] %vm19_vm3, %v9046_v52  ;;  %41 = vst.msk [vmem:[#allocation2 + $0xa8] sm:$0xff] %vm19_vm3, %v9046_v52  ;;  %v8919_v59 = vld [vmem:[%s12546_s0 + $0xd0] sm:$0xff]   ;;  %v8920_v60 = vld [vmem:[%s12546_s0 + $0x380] sm:$0xff]  }
  0x15   :  { %42 = vst.msk [vmem:[#allocation2 + $0xb0] sm:$0xff] %vm19_vm3, %v9046_v52  ;;  %43 = vst.msk [vmem:[#allocation2 + $0xb8] sm:$0xff] %vm19_vm3, %v9046_v52  ;;  %v8921_v61 = vld [vmem:[%s12546_s0 + $0xd8] sm:$0xff]   ;;  %v8922_v62 = vld [vmem:[%s12546_s0 + $0x388] sm:$0xff]  }
  0x16   :  { %44 = vst.msk [vmem:[#allocation2 + $0xc0] sm:$0xff] %vm19_vm3, %v9046_v52  ;;  %45 = vst.msk [vmem:[#allocation2 + $0xc8] sm:$0xff] %vm19_vm3, %v9046_v52  ;;  %v8923_v63 = vld [vmem:[%s12546_s0 + $0xe0] sm:$0xff]   ;;  %v8924_v0 = vld [vmem:[%s12546_s0 + $0x390] sm:$0xff]  }
  0x17   :  { %46 = vst.msk [vmem:[#allocation2 + $0xd0] sm:$0xff] %vm19_vm3, %v9046_v52  ;;  %47 = vst.msk [vmem:[#allocation2 + $0xd8] sm:$0xff] %vm19_vm3, %v9046_v52  ;;  %v8925_v1 = vld [vmem:[%s12546_s0 + $0xe8] sm:$0xff]   ;;  %v8926_v2 = vld [vmem:[%s12546_s0 + $0x398] sm:$0xff]  }
  0x18   :  { %48 = vst.msk [vmem:[#allocation2 + $0xe0] sm:$0xff] %vm19_vm3, %v9046_v52  ;;  %49 = vst.msk [vmem:[#allocation2 + $0xe8] sm:$0xff] %vm19_vm3, %v9046_v52  ;;  %v8927_v3 = vld [vmem:[%s12546_s0 + $0xf0] sm:$0xff]   ;;  %v8928_v4 = vld [vmem:[%s12546_s0 + $0x3a0] sm:$0xff]  }
  0x19   :  { %50 = vst.msk [vmem:[#allocation2 + $0xf0] sm:$0xff] %vm19_vm3, %v9046_v52  ;;  %51 = vst.msk [vmem:[#allocation2 + $0xf8] sm:$0xff] %vm19_vm3, %v9046_v52  ;;  %v8929_v5 = vld [vmem:[%s12546_s0 + $0xf8] sm:$0xff]   ;;  %v8930_v6 = vld [vmem:[%s12546_s0 + $0x3a8] sm:$0xff]  }
  0x1a   :  { %8524 = vmatmul.mubr.msk.bf16.gmra.mrb[8].mxu0 %vm1923_vm2, %v8877_v16  ;;  %8696 = vmatmul.mubr.msk.bf16.gmra.mrb[8].mxu1 %vm1923_vm2, %v8878_v17  ;;  %52 = vst.msk [vmem:[#allocation2 + $0x100] sm:$0xff] %vm19_vm3, %v9046_v52  ;;  %53 = vst.msk [vmem:[#allocation2 + $0x108] sm:$0xff] %vm19_vm3, %v9046_v52  ;;  %v8931_v7 = vld [vmem:[%s12546_s0 + $0x100] sm:$0xff]   ;;  %v8932_v8 = vld [vmem:[%s12546_s0 + $0x3b0] sm:$0xff]  }
  0x1b   :  { %8527 = vmatprep.mubr.msk.bf16.mxu0 %vm1923_vm2, %v8879_v18  ;;  %8699 = vmatprep.mubr.msk.bf16.mxu1 %vm1923_vm2, %v8880_v19  ;;  %54 = vst.msk [vmem:[#allocation2 + $0x110] sm:$0xff] %vm19_vm3, %v9046_v52  ;;  %55 = vst.msk [vmem:[#allocation2 + $0x118] sm:$0xff] %vm19_vm3, %v9046_v52  ;;  %v8933_v9 = vld [vmem:[%s12546_s0 + $0x108] sm:$0xff]   ;;  %v8934_v10 = vld [vmem:[%s12546_s0 + $0x3b8] sm:$0xff]  }
  0x1c   :  { %56 = vst.msk [vmem:[#allocation2 + $0x120] sm:$0xff] %vm19_vm3, %v9046_v52  ;;  %57 = vst.msk [vmem:[#allocation2 + $0x128] sm:$0xff] %vm19_vm3, %v9046_v52  ;;  %v8935_v11 = vld [vmem:[%s12546_s0 + $0x110] sm:$0xff]   ;;  %v8936_v12 = vld [vmem:[%s12546_s0 + $0x3c0] sm:$0xff]  }
  0x1d   :  { %58 = vst.msk [vmem:[#allocation2 + $0x130] sm:$0xff] %vm19_vm3, %v9046_v52  ;;  %59 = vst.msk [vmem:[#allocation2 + $0x138] sm:$0xff] %vm19_vm3, %v9046_v52  ;;  %v8937_v13 = vld [vmem:[%s12546_s0 + $0x118] sm:$0xff]   ;;  %v8938_v14 = vld [vmem:[%s12546_s0 + $0x3c8] sm:$0xff]  }
  0x1e   :  { %60 = vst.msk [vmem:[#allocation2 + $0x140] sm:$0xff] %vm19_vm3, %v9046_v52  ;;  %61 = vst.msk [vmem:[#allocation2 + $0x148] sm:$0xff] %vm19_vm3, %v9046_v52  ;;  %v8939_v15 = vld [vmem:[%s12546_s0 + $0x120] sm:$0xff]   ;;  %v8940_v16 = vld [vmem:[%s12546_s0 + $0x3d0] sm:$0xff]  }
  0x1f   :  { %62 = vst.msk [vmem:[#allocation2 + $0x150] sm:$0xff] %vm19_vm3, %v9046_v52  ;;  %63 = vst.msk [vmem:[#allocation2 + $0x158] sm:$0xff] %vm19_vm3, %v9046_v52  ;;  %v8941_v17 = vld [vmem:[%s12546_s0 + $0x128] sm:$0xff]   ;;  %v8942_v18 = vld [vmem:[%s12546_s0 + $0x3d8] sm:$0xff]  }
  0x20   :  { %64 = vst.msk [vmem:[#allocation2 + $0x160] sm:$0xff] %vm19_vm3, %v9046_v52  ;;  %65 = vst.msk [vmem:[#allocation2 + $0x168] sm:$0xff] %vm19_vm3, %v9046_v52  ;;  %v8943_v19 = vld [vmem:[%s12546_s0 + $0x130] sm:$0xff]  }
  0x21   :  { %66 = vst.msk [vmem:[#allocation2 + $0x170] sm:$0xff] %vm19_vm3, %v9046_v52  ;;  %67 = vst.msk [vmem:[#allocation2 + $0x178] sm:$0xff] %vm19_vm3, %v9046_v52 }
  0x22   :  { %8528 = vmatmul.mubr.msk.bf16.gmra.mrb[12].mxu0 %vm1923_vm2, %v8881_v20  ;;  %8700 = vmatmul.mubr.msk.bf16.gmra.mrb[12].mxu1 %vm1923_vm2, %v8882_v21  ;;  %68 = vst.msk [vmem:[#allocation2 + $0x180] sm:$0xff] %vm19_vm3, %v9046_v52  ;;  %69 = vst.msk [vmem:[#allocation2 + $0x188] sm:$0xff] %vm19_vm3, %v9046_v52  ;;  %v8944_v20 = vld [vmem:[%s12546_s0 + $0x3e0] sm:$0xff]   ;;  %v8945_v21 = vld [vmem:[%s12546_s0 + $0x138] sm:$0xff]  }
  0x23   :  { %8531 = vmatprep.mubr.msk.bf16.mxu0 %vm1923_vm2, %v8883_v22  ;;  %8703 = vmatprep.mubr.msk.bf16.mxu1 %vm1923_vm2, %v8884_v23  ;;  %70 = vst.msk [vmem:[#allocation2 + $0x190] sm:$0xff] %vm19_vm3, %v9046_v52  ;;  %71 = vst.msk [vmem:[#allocation2 + $0x198] sm:$0xff] %vm19_vm3, %v9046_v52  ;;  %v8946_v22 = vld [vmem:[%s12546_s0 + $0x3e8] sm:$0xff]   ;;  %v8947_v23 = vld [vmem:[%s12546_s0 + $0x140] sm:$0xff]  }
  0x24   :  { %72 = vst.msk [vmem:[#allocation2 + $0x1a0] sm:$0xff] %vm19_vm3, %v9046_v52  ;;  %73 = vst.msk [vmem:[#allocation2 + $0x1a8] sm:$0xff] %vm19_vm3, %v9046_v52 }
  0x25   :  { %74 = vst.msk [vmem:[#allocation2 + $0x1b0] sm:$0xff] %vm19_vm3, %v9046_v52  ;;  %75 = vst.msk [vmem:[#allocation2 + $0x1b8] sm:$0xff] %vm19_vm3, %v9046_v52 }
  0x26   :  { %76 = vst.msk [vmem:[#allocation2 + $0x1c0] sm:$0xff] %vm19_vm3, %v9046_v52  ;;  %77 = vst.msk [vmem:[#allocation2 + $0x1c8] sm:$0xff] %vm19_vm3, %v9046_v52 }
  0x27   :  { %78 = vst.msk [vmem:[#allocation2 + $0x1d0] sm:$0xff] %vm19_vm3, %v9046_v52  ;;  %79 = vst.msk [vmem:[#allocation2 + $0x1d8] sm:$0xff] %vm19_vm3, %v9046_v52 }
  0x28   :  { %80 = vst.msk [vmem:[#allocation2 + $0x1e0] sm:$0xff] %vm19_vm3, %v9046_v52  ;;  %81 = vst.msk [vmem:[#allocation2 + $0x1e8] sm:$0xff] %vm19_vm3, %v9046_v52 }
  0x29   :  { %82 = vst.msk [vmem:[#allocation2 + $0x1f0] sm:$0xff] %vm19_vm3, %v9046_v52  ;;  %83 = vst.msk [vmem:[#allocation2 + $0x1f8] sm:$0xff] %vm19_vm3, %v9046_v52 }
  0x2a   :  { %8532 = vmatmul.mubr.msk.bf16.gmra.mrb[16].mxu0 %vm1923_vm2, %v8885_v24  ;;  %8704 = vmatmul.mubr.msk.bf16.gmra.mrb[16].mxu1 %vm1923_vm2, %v8886_v25  ;;  %84 = vst.msk [vmem:[#allocation2 + $0x200] sm:$0xff] %vm19_vm3, %v9046_v52  ;;  %85 = vst.msk [vmem:[#allocation2 + $0x208] sm:$0xff] %vm19_vm3, %v9046_v52  ;;  %v8948_v24 = vld [vmem:[%s12546_s0 + $0x3f0] sm:$0xff]   ;;  %v8949_v25 = vld [vmem:[%s12546_s0 + $0x148] sm:$0xff]  }
  0x2b   :  { %8535 = vmatprep.mubr.msk.bf16.mxu0 %vm1923_vm2, %v8887_v26  ;;  %8707 = vmatprep.mubr.msk.bf16.mxu1 %vm1923_vm2, %v8888_v27  ;;  %86 = vst.msk [vmem:[#allocation2 + $0x210] sm:$0xff] %vm19_vm3, %v9046_v52  ;;  %87 = vst.msk [vmem:[#allocation2 + $0x218] sm:$0xff] %vm19_vm3, %v9046_v52  ;;  %v8950_v26 = vld [vmem:[%s12546_s0 + $0x3f8] sm:$0xff]   ;;  %v8951_v27 = vld [vmem:[%s12546_s0 + $0x150] sm:$0xff]  }
  0x2c   :  { %88 = vst.msk [vmem:[#allocation2 + $0x220] sm:$0xff] %vm19_vm3, %v9046_v52  ;;  %89 = vst.msk [vmem:[#allocation2 + $0x228] sm:$0xff] %vm19_vm3, %v9046_v52 }
  0x2d   :  { %90 = vst.msk [vmem:[#allocation2 + $0x230] sm:$0xff] %vm19_vm3, %v9046_v52  ;;  %91 = vst.msk [vmem:[#allocation2 + $0x238] sm:$0xff] %vm19_vm3, %v9046_v52 }
  0x2e   :  { %92 = vst.msk [vmem:[#allocation2 + $0x240] sm:$0xff] %vm19_vm3, %v9046_v52  ;;  %93 = vst.msk [vmem:[#allocation2 + $0x248] sm:$0xff] %vm19_vm3, %v9046_v52 }
  0x2f   :  { %94 = vst.msk [vmem:[#allocation2 + $0x250] sm:$0xff] %vm19_vm3, %v9046_v52  ;;  %95 = vst.msk [vmem:[#allocation2 + $0x258] sm:$0xff] %vm19_vm3, %v9046_v52 }
  0x30   :  { %96 = vst.msk [vmem:[#allocation2 + $0x260] sm:$0xff] %vm19_vm3, %v9046_v52  ;;  %97 = vst.msk [vmem:[#allocation2 + $0x268] sm:$0xff] %vm19_vm3, %v9046_v52 }
  0x31   :  { %98 = vst.msk [vmem:[#allocation2 + $0x270] sm:$0xff] %vm19_vm3, %v9046_v52  ;;  %99 = vst.msk [vmem:[#allocation2 + $0x278] sm:$0xff] %vm19_vm3, %v9046_v52 }
  0x32   :  { %8536 = vmatmul.mubr.msk.bf16.gmra.mrb[20].mxu0 %vm1923_vm2, %v8889_v28  ;;  %8708 = vmatmul.mubr.msk.bf16.gmra.mrb[20].mxu1 %vm1923_vm2, %v8890_v29  ;;  %100 = vst.msk [vmem:[#allocation2 + $0x280] sm:$0xff] %vm19_vm3, %v9046_v52  ;;  %101 = vst.msk [vmem:[#allocation2 + $0x288] sm:$0xff] %vm19_vm3, %v9046_v52  ;;  %v8952_v28 = vld [vmem:[%s12546_s0 + $0x400] sm:$0xff]   ;;  %v8953_v29 = vld [vmem:[%s12546_s0 + $0x158] sm:$0xff]  }
  0x33   :  { %8539 = vmatprep.mubr.msk.bf16.mxu0 %vm1923_vm2, %v8891_v30  ;;  %8711 = vmatprep.mubr.msk.bf16.mxu1 %vm1923_vm2, %v8892_v31  ;;  %102 = vst.msk [vmem:[#allocation2 + $0x290] sm:$0xff] %vm19_vm3, %v9046_v52  ;;  %103 = vst.msk [vmem:[#allocation2 + $0x298] sm:$0xff] %vm19_vm3, %v9046_v52  ;;  %v8954_v30 = vld [vmem:[%s12546_s0 + $0x408] sm:$0xff]   ;;  %v8955_v31 = vld [vmem:[%s12546_s0 + $0x160] sm:$0xff]  }
  0x34   :  { %104 = vst.msk [vmem:[#allocation2 + $0x2a0] sm:$0xff] %vm19_vm3, %v9046_v52  ;;  %105 = vst.msk [vmem:[#allocation2 + $0x2a8] sm:$0xff] %vm19_vm3, %v9046_v52 }
  0x35   :  { %106 = vst.msk [vmem:[#allocation2 + $0x2b0] sm:$0xff] %vm19_vm3, %v9046_v52  ;;  %107 = vst.msk [vmem:[#allocation2 + $0x2b8] sm:$0xff] %vm19_vm3, %v9046_v52 }
  0x36   :  { %108 = vst.msk [vmem:[#allocation2 + $0x2c0] sm:$0xff] %vm19_vm3, %v9046_v52  ;;  %109 = vst.msk [vmem:[#allocation2 + $0x2c8] sm:$0xff] %vm19_vm3, %v9046_v52 }
  0x37   :  { %110 = vst.msk [vmem:[#allocation2 + $0x2d0] sm:$0xff] %vm19_vm3, %v9046_v52  ;;  %111 = vst.msk [vmem:[#allocation2 + $0x2d8] sm:$0xff] %vm19_vm3, %v9046_v52 }
  0x38   :  { %112 = vst.msk [vmem:[#allocation2 + $0x2e0] sm:$0xff] %vm19_vm3, %v9046_v52  ;;  %113 = vst.msk [vmem:[#allocation2 + $0x2e8] sm:$0xff] %vm19_vm3, %v9046_v52 }
  0x39   :  { %114 = vst.msk [vmem:[#allocation2 + $0x2f0] sm:$0xff] %vm19_vm3, %v9046_v52  ;;  %115 = vst.msk [vmem:[#allocation2 + $0x2f8] sm:$0xff] %vm19_vm3, %v9046_v52 }
  0x3a   :  { %8540 = vmatmul.mubr.msk.bf16.gmra.mrb[24].mxu0 %vm1923_vm2, %v8893_v32  ;;  %8712 = vmatmul.mubr.msk.bf16.gmra.mrb[24].mxu1 %vm1923_vm2, %v8894_v33  ;;  %116 = vst.msk [vmem:[#allocation2 + $0x300] sm:$0xff] %vm19_vm3, %v9046_v52  ;;  %117 = vst.msk [vmem:[#allocation2 + $0x308] sm:$0xff] %vm19_vm3, %v9046_v52  ;;  %v8956_v32 = vld [vmem:[%s12546_s0 + $0x410] sm:$0xff]   ;;  %v8957_v33 = vld [vmem:[%s12546_s0 + $0x168] sm:$0xff]  }
  0x3b   :  { %8543 = vmatprep.mubr.msk.bf16.mxu0 %vm1923_vm2, %v8895_v34  ;;  %8715 = vmatprep.mubr.msk.bf16.mxu1 %vm1923_vm2, %v8896_v35  ;;  %118 = vst.msk [vmem:[#allocation2 + $0x310] sm:$0xff] %vm19_vm3, %v9046_v52  ;;  %119 = vst.msk [vmem:[#allocation2 + $0x318] sm:$0xff] %vm19_vm3, %v9046_v52  ;;  %v8958_v34 = vld [vmem:[%s12546_s0 + $0x418] sm:$0xff]   ;;  %v8959_v35 = vld [vmem:[%s12546_s0 + $0x170] sm:$0xff]  }
  0x3c   :  { %120 = vst.msk [vmem:[#allocation2 + $0x320] sm:$0xff] %vm19_vm3, %v9046_v52  ;;  %121 = vst.msk [vmem:[#allocation2 + $0x328] sm:$0xff] %vm19_vm3, %v9046_v52 }
  0x3d   :  { %122 = vst.msk [vmem:[#allocation2 + $0x330] sm:$0xff] %vm19_vm3, %v9046_v52  ;;  %123 = vst.msk [vmem:[#allocation2 + $0x338] sm:$0xff] %vm19_vm3, %v9046_v52 }
  0x3e   :  { %124 = vst.msk [vmem:[#allocation2 + $0x340] sm:$0xff] %vm19_vm3, %v9046_v52  ;;  %125 = vst.msk [vmem:[#allocation2 + $0x348] sm:$0xff] %vm19_vm3, %v9046_v52 }
  0x3f   :  { %126 = vst.msk [vmem:[#allocation2 + $0x350] sm:$0xff] %vm19_vm3, %v9046_v52  ;;  %127 = vst.msk [vmem:[#allocation2 + $0x358] sm:$0xff] %vm19_vm3, %v9046_v52 }
  0x40   :  { %128 = vst.msk [vmem:[#allocation2 + $0x360] sm:$0xff] %vm19_vm3, %v9046_v52  ;;  %129 = vst.msk [vmem:[#allocation2 + $0x368] sm:$0xff] %vm19_vm3, %v9046_v52 }
  0x41   :  { %130 = vst.msk [vmem:[#allocation2 + $0x370] sm:$0xff] %vm19_vm3, %v9046_v52  ;;  %131 = vst.msk [vmem:[#allocation2 + $0x378] sm:$0xff] %vm19_vm3, %v9046_v52 }
  0x42   :  { %8544 = vmatmul.mubr.msk.bf16.gmra.mrb[28].mxu0 %vm1923_vm2, %v8897_v36  ;;  %8716 = vmatmul.mubr.msk.bf16.gmra.mrb[28].mxu1 %vm1923_vm2, %v8898_v37  ;;  %132 = vst.msk [vmem:[#allocation2 + $0x380] sm:$0xff] %vm19_vm3, %v9046_v52  ;;  %133 = vst.msk [vmem:[#allocation2 + $0x388] sm:$0xff] %vm19_vm3, %v9046_v52  ;;  %v8960_v36 = vld [vmem:[%s12546_s0 + $0x420] sm:$0xff]   ;;  %v8961_v37 = vld [vmem:[%s12546_s0 + $0x178] sm:$0xff]  }
  0x43   :  { %8547 = vmatprep.mubr.msk.bf16.mxu0 %vm1923_vm2, %v8899_v38  ;;  %8719 = vmatprep.mubr.msk.bf16.mxu1 %vm1923_vm2, %v8900_v39  ;;  %134 = vst.msk [vmem:[#allocation2 + $0x390] sm:$0xff] %vm19_vm3, %v9046_v52  ;;  %135 = vst.msk [vmem:[#allocation2 + $0x398] sm:$0xff] %vm19_vm3, %v9046_v52  ;;  %v8962_v38 = vld [vmem:[%s12546_s0 + $0x428] sm:$0xff]   ;;  %v8963_v39 = vld [vmem:[%s12546_s0 + $0x180] sm:$0xff]  }
  0x44   :  { %136 = vst.msk [vmem:[#allocation2 + $0x3a0] sm:$0xff] %vm19_vm3, %v9046_v52  ;;  %137 = vst.msk [vmem:[#allocation2 + $0x3a8] sm:$0xff] %vm19_vm3, %v9046_v52 }
  0x45   :  { %138 = vst.msk [vmem:[#allocation2 + $0x3b0] sm:$0xff] %vm19_vm3, %v9046_v52  ;;  %139 = vst.msk [vmem:[#allocation2 + $0x3b8] sm:$0xff] %vm19_vm3, %v9046_v52 }
  0x46   :  { %140 = vst.msk [vmem:[#allocation2 + $0x3c0] sm:$0xff] %vm19_vm3, %v9046_v52  ;;  %141 = vst.msk [vmem:[#allocation2 + $0x3c8] sm:$0xff] %vm19_vm3, %v9046_v52 }
  0x47   :  { %142 = vst.msk [vmem:[#allocation2 + $0x3d0] sm:$0xff] %vm19_vm3, %v9046_v52  ;;  %143 = vst.msk [vmem:[#allocation2 + $0x3d8] sm:$0xff] %vm19_vm3, %v9046_v52 }
  0x48   :  { %144 = vst.msk [vmem:[#allocation2 + $0x3e0] sm:$0xff] %vm19_vm3, %v9046_v52  ;;  %145 = vst.msk [vmem:[#allocation2 + $0x3e8] sm:$0xff] %vm19_vm3, %v9046_v52 }
  0x49   :  { %146 = vst.msk [vmem:[#allocation2 + $0x3f0] sm:$0xff] %vm19_vm3, %v9046_v52  ;;  %147 = vst.msk [vmem:[#allocation2 + $0x3f8] sm:$0xff] %vm19_vm3, %v9046_v52 }
  0x4a   :  { %8548 = vmatmul.mubr.msk.bf16.gmra.mrb[32].mxu0 %vm1923_vm2, %v8901_v40  ;;  %8720 = vmatmul.mubr.msk.bf16.gmra.mrb[32].mxu1 %vm1923_vm2, %v8902_v41  ;;  %148 = vst.msk [vmem:[#allocation2 + $0x400] sm:$0xff] %vm19_vm3, %v9046_v52  ;;  %149 = vst.msk [vmem:[#allocation2 + $0x408] sm:$0xff] %vm19_vm3, %v9046_v52  ;;  %v8964_v40 = vld [vmem:[%s12546_s0 + $0x430] sm:$0xff]   ;;  %v8965_v41 = vld [vmem:[%s12546_s0 + $0x188] sm:$0xff]  }
  0x4b   :  { %8551 = vmatprep.mubr.msk.bf16.mxu0 %vm1923_vm2, %v8903_v42  ;;  %8723 = vmatprep.mubr.msk.bf16.mxu1 %vm1923_vm2, %v8904_v43  ;;  %150 = vst.msk [vmem:[#allocation2 + $0x410] sm:$0xff] %vm19_vm3, %v9046_v52  ;;  %151 = vst.msk [vmem:[#allocation2 + $0x418] sm:$0xff] %vm19_vm3, %v9046_v52  ;;  %v8966_v42 = vld [vmem:[%s12546_s0 + $0x438] sm:$0xff]   ;;  %v8967_v43 = vld [vmem:[%s12546_s0 + $0x190] sm:$0xff]  }
  0x4c   :  { %152 = vst.msk [vmem:[#allocation2 + $0x420] sm:$0xff] %vm19_vm3, %v9046_v52  ;;  %153 = vst.msk [vmem:[#allocation2 + $0x428] sm:$0xff] %vm19_vm3, %v9046_v52 }
  0x4d   :  { %154 = vst.msk [vmem:[#allocation2 + $0x430] sm:$0xff] %vm19_vm3, %v9046_v52  ;;  %155 = vst.msk [vmem:[#allocation2 + $0x438] sm:$0xff] %vm19_vm3, %v9046_v52 }
  0x4e   :  { %156 = vst.msk [vmem:[#allocation2 + $0x440] sm:$0xff] %vm19_vm3, %v9046_v52  ;;  %157 = vst.msk [vmem:[#allocation2 + $0x448] sm:$0xff] %vm19_vm3, %v9046_v52 }
  0x4f   :  { %158 = vst.msk [vmem:[#allocation2 + $0x450] sm:$0xff] %vm19_vm3, %v9046_v52  ;;  %159 = vst.msk [vmem:[#allocation2 + $0x458] sm:$0xff] %vm19_vm3, %v9046_v52 }
  0x50   :  { %160 = vst.msk [vmem:[#allocation2 + $0x460] sm:$0xff] %vm19_vm3, %v9046_v52  ;;  %161 = vst.msk [vmem:[#allocation2 + $0x468] sm:$0xff] %vm19_vm3, %v9046_v52 }
  0x51   :  { %162 = vst.msk [vmem:[#allocation2 + $0x470] sm:$0xff] %vm19_vm3, %v9046_v52  ;;  %163 = vst.msk [vmem:[#allocation2 + $0x478] sm:$0xff] %vm19_vm3, %v9046_v52 }
  0x52   :  { %8552 = vmatmul.mubr.msk.bf16.gmra.mrb[36].mxu0 %vm1923_vm2, %v8905_v44  ;;  %8724 = vmatmul.mubr.msk.bf16.gmra.mrb[36].mxu1 %vm1923_vm2, %v8906_v45  ;;  %164 = vst.msk [vmem:[#allocation2 + $0x480] sm:$0xff] %vm19_vm3, %v9046_v52  ;;  %165 = vst.msk [vmem:[#allocation2 + $0x488] sm:$0xff] %vm19_vm3, %v9046_v52  ;;  %v8968_v44 = vld [vmem:[%s12546_s0 + $0x440] sm:$0xff]   ;;  %v8969_v45 = vld [vmem:[%s12546_s0 + $0x198] sm:$0xff]  }
  0x53   :  { %8555 = vmatprep.mubr.msk.bf16.mxu0 %vm1923_vm2, %v8907_v46  ;;  %8727 = vmatprep.mubr.msk.bf16.mxu1 %vm1923_vm2, %v8908_v47  ;;  %166 = vst.msk [vmem:[#allocation2 + $0x490] sm:$0xff] %vm19_vm3, %v9046_v52  ;;  %167 = vst.msk [vmem:[#allocation2 + $0x498] sm:$0xff] %vm19_vm3, %v9046_v52  ;;  %v8970_v46 = vld [vmem:[%s12546_s0 + $0x448] sm:$0xff]   ;;  %v8971_v47 = vld [vmem:[%s12546_s0 + $0x1a0] sm:$0xff]  }
  0x54   :  { %168 = vst.msk [vmem:[#allocation2 + $0x4a0] sm:$0xff] %vm19_vm3, %v9046_v52  ;;  %169 = vst.msk [vmem:[#allocation2 + $0x4a8] sm:$0xff] %vm19_vm3, %v9046_v52 }
  0x55   :  { %170 = vst.msk [vmem:[#allocation2 + $0x4b0] sm:$0xff] %vm19_vm3, %v9046_v52  ;;  %171 = vst.msk [vmem:[#allocation2 + $0x4b8] sm:$0xff] %vm19_vm3, %v9046_v52 }
  0x56   :  { %172 = vst.msk [vmem:[#allocation2 + $0x4c0] sm:$0xff] %vm19_vm3, %v9046_v52  ;;  %173 = vst.msk [vmem:[#allocation2 + $0x4c8] sm:$0xff] %vm19_vm3, %v9046_v52 }
  0x57   :  { %174 = vst.msk [vmem:[#allocation2 + $0x4d0] sm:$0xff] %vm19_vm3, %v9046_v52  ;;  %175 = vst.msk [vmem:[#allocation2 + $0x4d8] sm:$0xff] %vm19_vm3, %v9046_v52 }
  0x58   :  { %176 = vst.msk [vmem:[#allocation2 + $0x4e0] sm:$0xff] %vm19_vm3, %v9046_v52  ;;  %177 = vst.msk [vmem:[#allocation2 + $0x4e8] sm:$0xff] %vm19_vm3, %v9046_v52 }
  0x59   :  { %178 = vst.msk [vmem:[#allocation2 + $0x4f0] sm:$0xff] %vm19_vm3, %v9046_v52  ;;  %179 = vst.msk [vmem:[#allocation2 + $0x4f8] sm:$0xff] %vm19_vm3, %v9046_v52 }
  0x5a   :  { %180 = vst.msk [vmem:[#allocation2 + $0x500] sm:$0xff] %vm19_vm3, %v9046_v52  ;;  %181 = vst.msk [vmem:[#allocation2 + $0x508] sm:$0xff] %vm19_vm3, %v9046_v52  ;;  %8556 = vmatmul.mubr.msk.bf16.gmra.mrb[40].mxu0 %vm1923_vm2, %v9244_v48  ;;  %8728 = vmatmul.mubr.msk.bf16.gmra.mrb[40].mxu1 %vm1923_vm2, %v9249_v49  ;;  %v8972_v48 = vld [vmem:[%s12546_s0 + $0x450] sm:$0xff]   ;;  %v8973_v49 = vld [vmem:[%s12546_s0 + $0x1a8] sm:$0xff]  }
  0x5b   :  { %182 = vst.msk [vmem:[#allocation2 + $0x510] sm:$0xff] %vm19_vm3, %v9046_v52  ;;  %183 = vst.msk [vmem:[#allocation2 + $0x518] sm:$0xff] %vm19_vm3, %v9046_v52  ;;  %8559 = vmatprep.mubr.msk.bf16.mxu0 %vm1923_vm2, %v9254_v50  ;;  %8731 = vmatprep.mubr.msk.bf16.mxu1 %vm1923_vm2, %v9259_v51  ;;  %v8974_v50 = vld [vmem:[%s12546_s0 + $0x458] sm:$0xff]   ;;  %v8975_v51 = vld [vmem:[%s12546_s0 + $0x1b0] sm:$0xff]  }
  0x5c   :  { %184 = vst.msk [vmem:[#allocation2 + $0x520] sm:$0xff] %vm19_vm3, %v9046_v52  ;;  %185 = vst.msk [vmem:[#allocation2 + $0x528] sm:$0xff] %vm19_vm3, %v9046_v52 }
  0x5d   :  { %186 = vst.msk [vmem:[#allocation2 + $0x530] sm:$0xff] %vm19_vm3, %v9046_v52  ;;  %187 = vst.msk [vmem:[#allocation2 + $0x538] sm:$0xff] %vm19_vm3, %v9046_v52 }
  0x5e   :  { %188 = vst.msk [vmem:[#allocation2 + $0x540] sm:$0xff] %vm19_vm3, %v9046_v52  ;;  %189 = vst.msk [vmem:[#allocation2 + $0x548] sm:$0xff] %vm19_vm3, %v9046_v52 }
  0x5f   :  { %190 = vst.msk [vmem:[#allocation2 + $0x550] sm:$0xff] %vm19_vm3, %v9046_v52  ;;  %191 = vst.msk [vmem:[#allocation2 + $0x558] sm:$0xff] %vm19_vm3, %v9046_v52 }
  0x60   :  { %192 = vst.msk [vmem:[#allocation2 + $0x560] sm:$0xff] %vm19_vm3, %v9046_v52  ;;  %193 = vst.msk [vmem:[#allocation2 + $0x568] sm:$0xff] %vm19_vm3, %v9046_v52 }
  0x61   :  { %194 = vst.msk [vmem:[#allocation2 + $0x570] sm:$0xff] %vm19_vm3, %v9046_v52  ;;  %195 = vst.msk [vmem:[#allocation2 + $0x578] sm:$0xff] %vm19_vm3, %v9046_v52 }
  0x62   :  { %196 = vst.msk [vmem:[#allocation2 + $0x580] sm:$0xff] %vm19_vm3, %v9046_v52  ;;  %197 = vst.msk [vmem:[#allocation2 + $0x588] sm:$0xff] %vm19_vm3, %v9046_v52  ;;  %8560 = vmatmul.mubr.msk.bf16.gmra.mrb[44].mxu0 %vm1923_vm2, %v8913_v53  ;;  %8732 = vmatmul.mubr.msk.bf16.gmra.mrb[44].mxu1 %vm1923_vm2, %v8914_v54  ;;  %v8976_v53 = vld [vmem:[%s12546_s0 + $0x460] sm:$0xff]   ;;  %v366_v54 = vld [vmem:[#allocation2 + $0x10] sm:$0xff] }
  0x63   :  { %198 = vst.msk [vmem:[#allocation2 + $0x590] sm:$0xff] %vm19_vm3, %v9046_v52  ;;  %199 = vst.msk [vmem:[#allocation2 + $0x598] sm:$0xff] %vm19_vm3, %v9046_v52  ;;  %8563 = vmatprep.mubr.msk.bf16.mxu0 %vm1923_vm2, %v8915_v55  ;;  %8735 = vmatprep.mubr.msk.bf16.mxu1 %vm1923_vm2, %v8916_v56  ;;  %v364_v56 = vld [vmem:[#allocation2] sm:$0xff] }
  0x64   :  { %200 = vst.msk [vmem:[#allocation2 + $0x5a0] sm:$0xff] %vm19_vm3, %v9046_v52  ;;  %201 = vst.msk [vmem:[#allocation2 + $0x5a8] sm:$0xff] %vm19_vm3, %v9046_v52 }
  0x65   :  { %202 = vst.msk [vmem:[#allocation2 + $0x5b0] sm:$0xff] %vm19_vm3, %v9046_v52  ;;  %203 = vst.msk [vmem:[#allocation2 + $0x5b8] sm:$0xff] %vm19_vm3, %v9046_v52 }
  0x66   :  { %204 = vst.msk [vmem:[#allocation2 + $0x5c0] sm:$0xff] %vm19_vm3, %v9046_v52  ;;  %205 = vst.msk [vmem:[#allocation2 + $0x5c8] sm:$0xff] %vm19_vm3, %v9046_v52 }
  0x67   :  { %206 = vst.msk [vmem:[#allocation2 + $0x5d0] sm:$0xff] %vm19_vm3, %v9046_v52  ;;  %207 = vst.msk [vmem:[#allocation2 + $0x5d8] sm:$0xff] %vm19_vm3, %v9046_v52 }
  0x68   :  { %208 = vst.msk [vmem:[#allocation2 + $0x5e0] sm:$0xff] %vm19_vm3, %v9046_v52  ;;  %209 = vst.msk [vmem:[#allocation2 + $0x5e8] sm:$0xff] %vm19_vm3, %v9046_v52  ;;  %v538_v55 = vld [vmem:[#allocation2 + $0x570] sm:$0xff] }
  0x69   :  { %210 = vst.msk [vmem:[#allocation2 + $0x5f0] sm:$0xff] %vm19_vm3, %v9046_v52  ;;  %211 = vst.msk [vmem:[#allocation2 + $0x5f8] sm:$0xff] %vm19_vm3, %v9046_v52 }
  0x6a   :  { %212 = vst.msk [vmem:[#allocation2 + $0x600] sm:$0xff] %vm19_vm3, %v9046_v52  ;;  %213 = vst.msk [vmem:[#allocation2 + $0x608] sm:$0xff] %vm19_vm3, %v9046_v52  ;;  %8564 = vmatmul.mubr.msk.bf16.gmra.mrb[48].mxu0 %vm1923_vm2, %v8917_v57  ;;  %8736 = vmatmul.mubr.msk.bf16.gmra.mrb[48].mxu1 %vm1923_vm2, %v8918_v58  ;;  %v536_v57 = vld [vmem:[#allocation2 + $0x560] sm:$0xff] }
  0x6b   :  { %214 = vst.msk [vmem:[#allocation2 + $0x610] sm:$0xff] %vm19_vm3, %v9046_v52  ;;  %215 = vst.msk [vmem:[#allocation2 + $0x618] sm:$0xff] %vm19_vm3, %v9046_v52  ;;  %8567 = vmatprep.mubr.msk.bf16.mxu0 %vm1923_vm2, %v8919_v59  ;;  %8739 = vmatprep.mubr.msk.bf16.mxu1 %vm1923_vm2, %v8920_v60  ;;  %v367_v60 = vld [vmem:[#allocation2 + $0x18] sm:$0xff] }
  0x6c   :  { %216 = vst.msk [vmem:[#allocation2 + $0x620] sm:$0xff] %vm19_vm3, %v9046_v52  ;;  %217 = vst.msk [vmem:[#allocation2 + $0x628] sm:$0xff] %vm19_vm3, %v9046_v52 }
  0x6d   :  { %218 = vst.msk [vmem:[#allocation2 + $0x630] sm:$0xff] %vm19_vm3, %v9046_v52  ;;  %219 = vst.msk [vmem:[#allocation2 + $0x638] sm:$0xff] %vm19_vm3, %v9046_v52 }
  0x6e   :  { %220 = vst.msk [vmem:[#allocation2 + $0x640] sm:$0xff] %vm19_vm3, %v9046_v52  ;;  %221 = vst.msk [vmem:[#allocation2 + $0x648] sm:$0xff] %vm19_vm3, %v9046_v52 }
  0x6f   :  { %222 = vst.msk [vmem:[#allocation2 + $0x650] sm:$0xff] %vm19_vm3, %v9046_v52  ;;  %223 = vst.msk [vmem:[#allocation2 + $0x658] sm:$0xff] %vm19_vm3, %v9046_v52 }
  0x70   :  { %224 = vst.msk [vmem:[#allocation2 + $0x660] sm:$0xff] %vm19_vm3, %v9046_v52  ;;  %225 = vst.msk [vmem:[#allocation2 + $0x668] sm:$0xff] %vm19_vm3, %v9046_v52 }
  0x71   :  { %226 = vst.msk [vmem:[#allocation2 + $0x670] sm:$0xff] %vm19_vm3, %v9046_v52  ;;  %227 = vst.msk [vmem:[#allocation2 + $0x678] sm:$0xff] %vm19_vm3, %v9046_v52 }
  0x72   :  { %228 = vst.msk [vmem:[#allocation2 + $0x680] sm:$0xff] %vm19_vm3, %v9046_v52  ;;  %229 = vst.msk [vmem:[#allocation2 + $0x688] sm:$0xff] %vm19_vm3, %v9046_v52  ;;  %8568 = vmatmul.mubr.msk.bf16.gmra.mrb[52].mxu0 %vm1923_vm2, %v8921_v61  ;;  %8740 = vmatmul.mubr.msk.bf16.gmra.mrb[52].mxu1 %vm1923_vm2, %v8922_v62  ;;  %v539_v61 = vld [vmem:[#allocation2 + $0x578] sm:$0xff]  ;;  %v365_v62 = vld [vmem:[#allocation2 + $0x8] sm:$0xff] }
  0x73   :  { %230 = vst.msk [vmem:[#allocation2 + $0x690] sm:$0xff] %vm19_vm3, %v9046_v52  ;;  %231 = vst.msk [vmem:[#allocation2 + $0x698] sm:$0xff] %vm19_vm3, %v9046_v52  ;;  %8571 = vmatprep.mubr.msk.bf16.mxu0 %vm1923_vm2, %v8923_v63  ;;  %8743 = vmatprep.mubr.msk.bf16.mxu1 %vm1923_vm2, %v8924_v0 }
  0x74   :  { %232 = vst.msk [vmem:[#allocation2 + $0x6a0] sm:$0xff] %vm19_vm3, %v9046_v52  ;;  %233 = vst.msk [vmem:[#allocation2 + $0x6a8] sm:$0xff] %vm19_vm3, %v9046_v52 }
  0x75   :  { %234 = vst.msk [vmem:[#allocation2 + $0x6b0] sm:$0xff] %vm19_vm3, %v9046_v52  ;;  %235 = vst.msk [vmem:[#allocation2 + $0x6b8] sm:$0xff] %vm19_vm3, %v9046_v52 }
  0x76   :  { %236 = vst.msk [vmem:[#allocation2 + $0x6c0] sm:$0xff] %vm19_vm3, %v9046_v52  ;;  %237 = vst.msk [vmem:[#allocation2 + $0x6c8] sm:$0xff] %vm19_vm3, %v9046_v52 }
  0x77   :  { %238 = vst.msk [vmem:[#allocation2 + $0x6d0] sm:$0xff] %vm19_vm3, %v9046_v52  ;;  %239 = vst.msk [vmem:[#allocation2 + $0x6d8] sm:$0xff] %vm19_vm3, %v9046_v52 }
  0x78   :  { %240 = vst.msk [vmem:[#allocation2 + $0x6e0] sm:$0xff] %vm19_vm3, %v9046_v52  ;;  %241 = vst.msk [vmem:[#allocation2 + $0x6e8] sm:$0xff] %vm19_vm3, %v9046_v52 }
  0x79   :  { %242 = vst.msk [vmem:[#allocation2 + $0x6f0] sm:$0xff] %vm19_vm3, %v9046_v52  ;;  %243 = vst.msk [vmem:[#allocation2 + $0x6f8] sm:$0xff] %vm19_vm3, %v9046_v52 }
  0x7a   :  { %244 = vst.msk [vmem:[#allocation2 + $0x700] sm:$0xff] %vm19_vm3, %v9046_v52  ;;  %245 = vst.msk [vmem:[#allocation2 + $0x708] sm:$0xff] %vm19_vm3, %v9046_v52  ;;  %8572 = vmatmul.mubr.msk.bf16.gmra.mrb[56].mxu0 %vm1923_vm2, %v8925_v1  ;;  %8744 = vmatmul.mubr.msk.bf16.gmra.mrb[56].mxu1 %vm1923_vm2, %v8926_v2 }
  0x7b   :  { %246 = vst.msk [vmem:[#allocation2 + $0x710] sm:$0xff] %vm19_vm3, %v9046_v52  ;;  %247 = vst.msk [vmem:[#allocation2 + $0x718] sm:$0xff] %vm19_vm3, %v9046_v52  ;;  %8575 = vmatprep.mubr.msk.bf16.mxu0 %vm1923_vm2, %v8927_v3  ;;  %8747 = vmatprep.mubr.msk.bf16.mxu1 %vm1923_vm2, %v8928_v4  ;;  %v537_v3 = vld [vmem:[#allocation2 + $0x568] sm:$0xff]  ;;  %v8977_v4 = vld [vmem:[%s12546_s0 + $0x1b8] sm:$0xff]  }
  0x7c   :  { %248 = vst.msk [vmem:[#allocation2 + $0x720] sm:$0xff] %vm19_vm3, %v9046_v52  ;;  %249 = vst.msk [vmem:[#allocation2 + $0x728] sm:$0xff] %vm19_vm3, %v9046_v52 }
  0x7d   :  { %250 = vst.msk [vmem:[#allocation2 + $0x730] sm:$0xff] %vm19_vm3, %v9046_v52  ;;  %251 = vst.msk [vmem:[#allocation2 + $0x738] sm:$0xff] %vm19_vm3, %v9046_v52 }
  0x7e   :  { %252 = vst.msk [vmem:[#allocation2 + $0x740] sm:$0xff] %vm19_vm3, %v9046_v52  ;;  %253 = vst.msk [vmem:[#allocation2 + $0x748] sm:$0xff] %vm19_vm3, %v9046_v52 }
  0x7f   :  { %254 = vst.msk [vmem:[#allocation2 + $0x750] sm:$0xff] %vm19_vm3, %v9046_v52  ;;  %255 = vst.msk [vmem:[#allocation2 + $0x758] sm:$0xff] %vm19_vm3, %v9046_v52 }
  0x80   :  { %256 = vst.msk [vmem:[#allocation2 + $0x760] sm:$0xff] %vm19_vm3, %v9046_v52  ;;  %257 = vst.msk [vmem:[#allocation2 + $0x768] sm:$0xff] %vm19_vm3, %v9046_v52 }
  0x81   :  { %258 = vst.msk [vmem:[#allocation2 + $0x770] sm:$0xff] %vm19_vm3, %v9046_v52  ;;  %259 = vst.msk [vmem:[#allocation2 + $0x778] sm:$0xff] %vm19_vm3, %v9046_v52 }
  0x82   :  { %260 = vst.msk [vmem:[#allocation2 + $0x780] sm:$0xff] %vm19_vm3, %v9046_v52  ;;  %261 = vst.msk [vmem:[#allocation2 + $0x788] sm:$0xff] %vm19_vm3, %v9046_v52  ;;  %8576 = vmatmul.mubr.msk.bf16.gmra.mrb[60].mxu0 %vm1923_vm2, %v8929_v5  ;;  %8748 = vmatmul.mubr.msk.bf16.gmra.mrb[60].mxu1 %vm1923_vm2, %v8930_v6  ;;  %v8978_v5 = vld [vmem:[%s12546_s0 + $0x468] sm:$0xff]  }
  0x83   :  { %262 = vst.msk [vmem:[#allocation2 + $0x790] sm:$0xff] %vm19_vm3, %v9046_v52  ;;  %263 = vst.msk [vmem:[#allocation2 + $0x798] sm:$0xff] %vm19_vm3, %v9046_v52  ;;  %8579 = vmatprep.mubr.msk.bf16.mxu0 %vm1923_vm2, %v8931_v7  ;;  %8751 = vmatprep.mubr.msk.bf16.mxu1 %vm1923_vm2, %v8932_v8 }
  0x84   :  { %264 = vst.msk [vmem:[#allocation2 + $0x7a0] sm:$0xff] %vm19_vm3, %v9046_v52  ;;  %265 = vst.msk [vmem:[#allocation2 + $0x7a8] sm:$0xff] %vm19_vm3, %v9046_v52 }
  0x85   :  { %266 = vst.msk [vmem:[#allocation2 + $0x7b0] sm:$0xff] %vm19_vm3, %v9046_v52  ;;  %267 = vst.msk [vmem:[#allocation2 + $0x7b8] sm:$0xff] %vm19_vm3, %v9046_v52 }
  0x86   :  { %268 = vst.msk [vmem:[#allocation2 + $0x7c0] sm:$0xff] %vm19_vm3, %v9046_v52  ;;  %269 = vst.msk [vmem:[#allocation2 + $0x7c8] sm:$0xff] %vm19_vm3, %v9046_v52 }
  0x87   :  { %270 = vst.msk [vmem:[#allocation2 + $0x7d0] sm:$0xff] %vm19_vm3, %v9046_v52  ;;  %271 = vst.msk [vmem:[#allocation2 + $0x7d8] sm:$0xff] %vm19_vm3, %v9046_v52 }
  0x88   :  { %272 = vst.msk [vmem:[#allocation2 + $0x7e0] sm:$0xff] %vm19_vm3, %v9046_v52  ;;  %273 = vst.msk [vmem:[#allocation2 + $0x7e8] sm:$0xff] %vm19_vm3, %v9046_v52 }
  0x89   :  { %274 = vst.msk [vmem:[#allocation2 + $0x7f0] sm:$0xff] %vm19_vm3, %v9046_v52  ;;  %275 = vst.msk [vmem:[#allocation2 + $0x7f8] sm:$0xff] %vm19_vm3, %v9046_v52 }
  0x8a   :  { %276 = vst.msk [vmem:[#allocation2 + $0x800] sm:$0xff] %vm19_vm3, %v9046_v52  ;;  %277 = vst.msk [vmem:[#allocation2 + $0x808] sm:$0xff] %vm19_vm3, %v9046_v52  ;;  %8580 = vmatmul.mubr.msk.bf16.gmra.mrb[64].mxu0 %vm1923_vm2, %v8933_v9  ;;  %8752 = vmatmul.mubr.msk.bf16.gmra.mrb[64].mxu1 %vm1923_vm2, %v8934_v10  ;;  %v8979_v10 = vld [vmem:[%s12546_s0 + $0x1c0] sm:$0xff]  }
  0x8b   :  { %278 = vst.msk [vmem:[#allocation2 + $0x810] sm:$0xff] %vm19_vm3, %v9046_v52  ;;  %279 = vst.msk [vmem:[#allocation2 + $0x818] sm:$0xff] %vm19_vm3, %v9046_v52  ;;  %8583 = vmatprep.mubr.msk.bf16.mxu0 %vm1923_vm2, %v8935_v11  ;;  %8755 = vmatprep.mubr.msk.bf16.mxu1 %vm1923_vm2, %v8936_v12  ;;  %v8980_v11 = vld [vmem:[%s12546_s0 + $0x470] sm:$0xff]  }
  0x8c   :  { %280 = vst.msk [vmem:[#allocation2 + $0x820] sm:$0xff] %vm19_vm3, %v9046_v52  ;;  %281 = vst.msk [vmem:[#allocation2 + $0x828] sm:$0xff] %vm19_vm3, %v9046_v52 }
  0x8d   :  { %282 = vst.msk [vmem:[#allocation2 + $0x830] sm:$0xff] %vm19_vm3, %v9046_v52  ;;  %283 = vst.msk [vmem:[#allocation2 + $0x838] sm:$0xff] %vm19_vm3, %v9046_v52 }
  0x8e   :  { %284 = vst.msk [vmem:[#allocation2 + $0x840] sm:$0xff] %vm19_vm3, %v9046_v52  ;;  %285 = vst.msk [vmem:[#allocation2 + $0x848] sm:$0xff] %vm19_vm3, %v9046_v52 }
  0x8f   :  { %286 = vst.msk [vmem:[#allocation2 + $0x850] sm:$0xff] %vm19_vm3, %v9046_v52  ;;  %287 = vst.msk [vmem:[#allocation2 + $0x858] sm:$0xff] %vm19_vm3, %v9046_v52 }
  0x90   :  { %288 = vst.msk [vmem:[#allocation2 + $0x860] sm:$0xff] %vm19_vm3, %v9046_v52  ;;  %289 = vst.msk [vmem:[#allocation2 + $0x868] sm:$0xff] %vm19_vm3, %v9046_v52 }
  0x91   :  { %290 = vst.msk [vmem:[#allocation2 + $0x870] sm:$0xff] %vm19_vm3, %v9046_v52  ;;  %291 = vst.msk [vmem:[#allocation2 + $0x878] sm:$0xff] %vm19_vm3, %v9046_v52 }
  0x92   :  { %292 = vst.msk [vmem:[#allocation2 + $0x880] sm:$0xff] %vm19_vm3, %v9046_v52  ;;  %293 = vst.msk [vmem:[#allocation2 + $0x888] sm:$0xff] %vm19_vm3, %v9046_v52  ;;  %8584 = vmatmul.mubr.msk.bf16.gmra.mrb[68].mxu0 %vm1923_vm2, %v8937_v13  ;;  %8756 = vmatmul.mubr.msk.bf16.gmra.mrb[68].mxu1 %vm1923_vm2, %v8938_v14 }
  0x93   :  { %294 = vst.msk [vmem:[#allocation2 + $0x890] sm:$0xff] %vm19_vm3, %v9046_v52  ;;  %295 = vst.msk [vmem:[#allocation2 + $0x898] sm:$0xff] %vm19_vm3, %v9046_v52  ;;  %8587 = vmatprep.mubr.msk.bf16.mxu0 %vm1923_vm2, %v8939_v15  ;;  %8759 = vmatprep.mubr.msk.bf16.mxu1 %vm1923_vm2, %v8940_v16 }
  0x94   :  { %296 = vst.msk [vmem:[#allocation2 + $0x8a0] sm:$0xff] %vm19_vm3, %v9046_v52  ;;  %297 = vst.msk [vmem:[#allocation2 + $0x8a8] sm:$0xff] %vm19_vm3, %v9046_v52 }
  0x95   :  { %298 = vst.msk [vmem:[#allocation2 + $0x8b0] sm:$0xff] %vm19_vm3, %v9046_v52  ;;  %299 = vst.msk [vmem:[#allocation2 + $0x8b8] sm:$0xff] %vm19_vm3, %v9046_v52 }
  0x96   :  { %300 = vst.msk [vmem:[#allocation2 + $0x8c0] sm:$0xff] %vm19_vm3, %v9046_v52  ;;  %301 = vst.msk [vmem:[#allocation2 + $0x8c8] sm:$0xff] %vm19_vm3, %v9046_v52 }
  0x97   :  { %302 = vst.msk [vmem:[#allocation2 + $0x8d0] sm:$0xff] %vm19_vm3, %v9046_v52  ;;  %303 = vst.msk [vmem:[#allocation2 + $0x8d8] sm:$0xff] %vm19_vm3, %v9046_v52 }
  0x98   :  { %304 = vst.msk [vmem:[#allocation2 + $0x8e0] sm:$0xff] %vm19_vm3, %v9046_v52  ;;  %305 = vst.msk [vmem:[#allocation2 + $0x8e8] sm:$0xff] %vm19_vm3, %v9046_v52 }
  0x99   :  { %306 = vst.msk [vmem:[#allocation2 + $0x8f0] sm:$0xff] %vm19_vm3, %v9046_v52  ;;  %307 = vst.msk [vmem:[#allocation2 + $0x8f8] sm:$0xff] %vm19_vm3, %v9046_v52 }
  0x9a   :  { %308 = vst.msk [vmem:[#allocation2 + $0x900] sm:$0xff] %vm19_vm3, %v9046_v52  ;;  %309 = vst.msk [vmem:[#allocation2 + $0x908] sm:$0xff] %vm19_vm3, %v9046_v52  ;;  %8588 = vmatmul.mubr.msk.bf16.gmra.mrb[72].mxu0 %vm1923_vm2, %v8941_v17  ;;  %8760 = vmatmul.mubr.msk.bf16.gmra.mrb[72].mxu1 %vm1923_vm2, %v8942_v18  ;;  %v10232_v18 = vld [vmem:[%s12547_s2] ss:$0 sm:$0xff] }
  0x9b   :  { %310 = vst.msk [vmem:[#allocation2 + $0x910] sm:$0xff] %vm19_vm3, %v9046_v52  ;;  %311 = vst.msk [vmem:[#allocation2 + $0x918] sm:$0xff] %vm19_vm3, %v9046_v52  ;;  %8591 = vmatprep.mubr.msk.bf16.mxu0 %vm1923_vm2, %v8943_v19  ;;  %8763 = vmatprep.mubr.msk.bf16.mxu1 %vm1923_vm2, %v8944_v20  ;;  %v370_v19 = vld [vmem:[#allocation2 + $0x30] sm:$0xff] }
  0x9c   :  { %312 = vst.msk [vmem:[#allocation2 + $0x920] sm:$0xff] %vm19_vm3, %v9046_v52  ;;  %313 = vst.msk [vmem:[#allocation2 + $0x928] sm:$0xff] %vm19_vm3, %v9046_v52  ;;  %v542_v20 = vld [vmem:[#allocation2 + $0x590] sm:$0xff] }
  0x9d   :  { %314 = vst.msk [vmem:[#allocation2 + $0x930] sm:$0xff] %vm19_vm3, %v9046_v52  ;;  %315 = vst.msk [vmem:[#allocation2 + $0x938] sm:$0xff] %vm19_vm3, %v9046_v52 }
  0x9e   :  { %316 = vst.msk [vmem:[#allocation2 + $0x940] sm:$0xff] %vm19_vm3, %v9046_v52  ;;  %317 = vst.msk [vmem:[#allocation2 + $0x948] sm:$0xff] %vm19_vm3, %v9046_v52 }
  0x9f   :  { %318 = vst.msk [vmem:[#allocation2 + $0x950] sm:$0xff] %vm19_vm3, %v9046_v52  ;;  %319 = vst.msk [vmem:[#allocation2 + $0x958] sm:$0xff] %vm19_vm3, %v9046_v52 }
  0xa0   :  { %320 = vst.msk [vmem:[#allocation2 + $0x960] sm:$0xff] %vm19_vm3, %v9046_v52  ;;  %321 = vst.msk [vmem:[#allocation2 + $0x968] sm:$0xff] %vm19_vm3, %v9046_v52 }
  0xa1   :  { %322 = vst.msk [vmem:[#allocation2 + $0x970] sm:$0xff] %vm19_vm3, %v9046_v52  ;;  %323 = vst.msk [vmem:[#allocation2 + $0x978] sm:$0xff] %vm19_vm3, %v9046_v52 }
  0xa2   :  { %324 = vst.msk [vmem:[#allocation2 + $0x980] sm:$0xff] %vm19_vm3, %v9046_v52  ;;  %325 = vst.msk [vmem:[#allocation2 + $0x988] sm:$0xff] %vm19_vm3, %v9046_v52  ;;  %8592 = vmatmul.mubr.msk.bf16.gmra.mrb[76].mxu0 %vm1923_vm2, %v8945_v21  ;;  %8764 = vmatmul.mubr.msk.bf16.gmra.mrb[76].mxu1 %vm1923_vm2, %v8946_v22  ;;  %v368_v21 = vld [vmem:[#allocation2 + $0x20] sm:$0xff] }
  0xa3   :  { %326 = vst.msk [vmem:[#allocation2 + $0x990] sm:$0xff] %vm19_vm3, %v9046_v52  ;;  %327 = vst.msk [vmem:[#allocation2 + $0x998] sm:$0xff] %vm19_vm3, %v9046_v52  ;;  %8595 = vmatprep.mubr.msk.bf16.mxu0 %vm1923_vm2, %v8947_v23  ;;  %8767 = vmatprep.mubr.msk.bf16.mxu1 %vm1923_vm2, %v8948_v24  ;;  %v540_v22 = vld [vmem:[#allocation2 + $0x580] sm:$0xff]  ;;  %v371_v23 = vld [vmem:[#allocation2 + $0x38] sm:$0xff] }
  0xa4   :  { %328 = vst.msk [vmem:[#allocation2 + $0x9a0] sm:$0xff] %vm19_vm3, %v9046_v52  ;;  %329 = vst.msk [vmem:[#allocation2 + $0x9a8] sm:$0xff] %vm19_vm3, %v9046_v52 }
  0xa5   :  { %330 = vst.msk [vmem:[#allocation2 + $0x9b0] sm:$0xff] %vm19_vm3, %v9046_v52  ;;  %331 = vst.msk [vmem:[#allocation2 + $0x9b8] sm:$0xff] %vm19_vm3, %v9046_v52 }
  0xa6   :  { %332 = vst.msk [vmem:[#allocation2 + $0x9c0] sm:$0xff] %vm19_vm3, %v9046_v52  ;;  %333 = vst.msk [vmem:[#allocation2 + $0x9c8] sm:$0xff] %vm19_vm3, %v9046_v52 }
  0xa7   :  { %334 = vst.msk [vmem:[#allocation2 + $0x9d0] sm:$0xff] %vm19_vm3, %v9046_v52  ;;  %335 = vst.msk [vmem:[#allocation2 + $0x9d8] sm:$0xff] %vm19_vm3, %v9046_v52 }
  0xa8   :  { %336 = vst.msk [vmem:[#allocation2 + $0x9e0] sm:$0xff] %vm19_vm3, %v9046_v52  ;;  %337 = vst.msk [vmem:[#allocation2 + $0x9e8] sm:$0xff] %vm19_vm3, %v9046_v52 }
  0xa9   :  { %338 = vst.msk [vmem:[#allocation2 + $0x9f0] sm:$0xff] %vm19_vm3, %v9046_v52  ;;  %339 = vst.msk [vmem:[#allocation2 + $0x9f8] sm:$0xff] %vm19_vm3, %v9046_v52 }
  0xaa   :  { %340 = vst.msk [vmem:[#allocation2 + $0xa00] sm:$0xff] %vm19_vm3, %v9046_v52  ;;  %341 = vst.msk [vmem:[#allocation2 + $0xa08] sm:$0xff] %vm19_vm3, %v9046_v52  ;;  %8596 = vmatmul.mubr.msk.bf16.gmra.mrb[80].mxu0 %vm1923_vm2, %v8949_v25  ;;  %8768 = vmatmul.mubr.msk.bf16.gmra.mrb[80].mxu1 %vm1923_vm2, %v8950_v26  ;;  %v543_v26 = vld [vmem:[#allocation2 + $0x598] sm:$0xff] }
  0xab   :  { %342 = vst.msk [vmem:[#allocation2 + $0xa10] sm:$0xff] %vm19_vm3, %v9046_v52  ;;  %343 = vst.msk [vmem:[#allocation2 + $0xa18] sm:$0xff] %vm19_vm3, %v9046_v52  ;;  %8599 = vmatprep.mubr.msk.bf16.mxu0 %vm1923_vm2, %v8951_v27  ;;  %8771 = vmatprep.mubr.msk.bf16.mxu1 %vm1923_vm2, %v8952_v28  ;;  %v369_v27 = vld [vmem:[#allocation2 + $0x28] sm:$0xff] }
  0xac   :  { %344 = vst.msk [vmem:[#allocation2 + $0xa20] sm:$0xff] %vm19_vm3, %v9046_v52  ;;  %345 = vst.msk [vmem:[#allocation2 + $0xa28] sm:$0xff] %vm19_vm3, %v9046_v52  ;;  %v541_v28 = vld [vmem:[#allocation2 + $0x588] sm:$0xff] }
  0xad   :  { %346 = vst.msk [vmem:[#allocation2 + $0xa30] sm:$0xff] %vm19_vm3, %v9046_v52  ;;  %347 = vst.msk [vmem:[#allocation2 + $0xa38] sm:$0xff] %vm19_vm3, %v9046_v52 }
  0xae   :  { %348 = vst.msk [vmem:[#allocation2 + $0xa40] sm:$0xff] %vm19_vm3, %v9046_v52  ;;  %349 = vst.msk [vmem:[#allocation2 + $0xa48] sm:$0xff] %vm19_vm3, %v9046_v52 }
  0xaf   :  { %350 = vst.msk [vmem:[#allocation2 + $0xa50] sm:$0xff] %vm19_vm3, %v9046_v52  ;;  %351 = vst.msk [vmem:[#allocation2 + $0xa58] sm:$0xff] %vm19_vm3, %v9046_v52 }
  0xb0   :  { %352 = vst.msk [vmem:[#allocation2 + $0xa60] sm:$0xff] %vm19_vm3, %v9046_v52  ;;  %353 = vst.msk [vmem:[#allocation2 + $0xa68] sm:$0xff] %vm19_vm3, %v9046_v52 }
  0xb1   :  { %354 = vst.msk [vmem:[#allocation2 + $0xa70] sm:$0xff] %vm19_vm3, %v9046_v52  ;;  %355 = vst.msk [vmem:[#allocation2 + $0xa78] sm:$0xff] %vm19_vm3, %v9046_v52 }
  0xb2   :  { %356 = vst.msk [vmem:[#allocation2 + $0xa80] sm:$0xff] %vm19_vm3, %v9046_v52  ;;  %357 = vst.msk [vmem:[#allocation2 + $0xa88] sm:$0xff] %vm19_vm3, %v9046_v52  ;;  %8600 = vmatmul.mubr.msk.bf16.gmra.mrb[84].mxu0 %vm1923_vm2, %v8953_v29  ;;  %8772 = vmatmul.mubr.msk.bf16.gmra.mrb[84].mxu1 %vm1923_vm2, %v8954_v30 }
  0xb3   :  { %358 = vst.msk [vmem:[#allocation2 + $0xa90] sm:$0xff] %vm19_vm3, %v9046_v52  ;;  %359 = vst.msk [vmem:[#allocation2 + $0xa98] sm:$0xff] %vm19_vm3, %v9046_v52  ;;  %8603 = vmatprep.mubr.msk.bf16.mxu0 %vm1923_vm2, %v8955_v31  ;;  %8775 = vmatprep.mubr.msk.bf16.mxu1 %vm1923_vm2, %v8956_v32 }
  0xb4   :  { %360 = vst.msk [vmem:[#allocation2 + $0xaa0] sm:$0xff] %vm19_vm3, %v9046_v52  ;;  %361 = vst.msk [vmem:[#allocation2 + $0xaa8] sm:$0xff] %vm19_vm3, %v9046_v52 }
  0xb5   :  { %363 = vst.msk [vmem:[#allocation2 + $0xab0] sm:$0x3] %vm362_vm5, %v9046_v52 }
  0xba   :  { %8604 = vmatmul.mubr.msk.bf16.gmra.mrb[88].mxu0 %vm1923_vm2, %v8957_v33  ;;  %8776 = vmatmul.mubr.msk.bf16.gmra.mrb[88].mxu1 %vm1923_vm2, %v8958_v34  ;;  %v8981_v33 = vld [vmem:[%s12546_s0 + $0x1c8] sm:$0xff]   ;;  %v8982_v34 = vld [vmem:[%s12546_s0 + $0x478] sm:$0xff]  }
  0xbb   :  { %8607 = vmatprep.mubr.msk.bf16.mxu0 %vm1923_vm2, %v8959_v35  ;;  %8779 = vmatprep.mubr.msk.bf16.mxu1 %vm1923_vm2, %v8960_v36  ;;  %v8983_v35 = vld [vmem:[%s12546_s0 + $0x1d0] sm:$0xff]  }
  0xc2   :  { %8608 = vmatmul.mubr.msk.bf16.gmra.mrb[92].mxu0 %vm1923_vm2, %v8961_v37  ;;  %8780 = vmatmul.mubr.msk.bf16.gmra.mrb[92].mxu1 %vm1923_vm2, %v8962_v38 }
  0xc3   :  { %8611 = vmatprep.mubr.msk.bf16.mxu0 %vm1923_vm2, %v8963_v39  ;;  %8783 = vmatprep.mubr.msk.bf16.mxu1 %vm1923_vm2, %v8964_v40 }
  0xca   :  { %8612 = vmatmul.mubr.msk.bf16.gmra.mrb[96].mxu0 %vm1923_vm2, %v8965_v41  ;;  %8784 = vmatmul.mubr.msk.bf16.gmra.mrb[96].mxu1 %vm1923_vm2, %v8966_v42  ;;  %v8984_v42 = vld [vmem:[%s12546_s0 + $0x480] sm:$0xff]  }
  0xcb   :  { %8615 = vmatprep.mubr.msk.bf16.mxu0 %vm1923_vm2, %v8967_v43  ;;  %8787 = vmatprep.mubr.msk.bf16.mxu1 %vm1923_vm2, %v8968_v44 }
  0xd2   :  { %8616 = vmatmul.mubr.msk.bf16.gmra.mrb[100].mxu0 %vm1923_vm2, %v8969_v45  ;;  %8788 = vmatmul.mubr.msk.bf16.gmra.mrb[100].mxu1 %vm1923_vm2, %v8970_v46 }
  0xd3   :  { %8619 = vmatprep.mubr.msk.bf16.mxu0 %vm1923_vm2, %v8971_v47  ;;  %8791 = vmatprep.mubr.msk.bf16.mxu1 %vm1923_vm2, %v8972_v48 }
  0xda   :  { %8620 = vmatmul.mubr.msk.bf16.gmra.mrb[104].mxu0 %vm1923_vm2, %v8973_v49  ;;  %8792 = vmatmul.mubr.msk.bf16.gmra.mrb[104].mxu1 %vm1923_vm2, %v8974_v50 }
  0xdb   :  { %8623 = vmatprep.mubr.msk.bf16.mxu0 %vm1923_vm2, %v8975_v51  ;;  %8795 = vmatprep.mubr.msk.bf16.mxu1 %vm1923_vm2, %v8976_v53 }
  0xdd   :  { %v8517_v58 = vpop.f32.mrb[0].mxu0  ;;  %v8689_v59 = vpop.f32.mrb[0].mxu1 }
  0xde   :  { %v3857_v63 = vadd.f32 %v8517_v58, %v366_v54  ;;  %v4029_v0 = vadd.f32 %v8689_v59, %v538_v55  ;;  %v2481_v1 = vpop.f32.mrb[1].mxu0  ;;  %v3169_v2 = vpop.f32.mrb[1].mxu1 }
  0xdf   :  { %v3855_v6 = vadd.f32 %v2481_v1, %v364_v56  ;;  %v4027_v7 = vadd.f32 %v3169_v2, %v536_v57  ;;  %v8518_v8 = vpop.f32.mrb[2].mxu0  ;;  %v8690_v9 = vpop.f32.mrb[2].mxu1 }
  0xe0   :  { %4201 = vst.msk [vmem:[#allocation2 + $0x10] sm:$0xff] %vm19_vm3, %v3857_v63  ;;  %4373 = vst.msk [vmem:[#allocation2 + $0x570] sm:$0xff] %vm19_vm3, %v4029_v0  ;;  %v3858_v12 = vadd.f32 %v8518_v8, %v367_v60  ;;  %v4030_v13 = vadd.f32 %v8690_v9, %v539_v61  ;;  %v2484_v14 = vpop.f32.mrb[3].mxu0  ;;  %v3172_v15 = vpop.f32.mrb[3].mxu1 }
  0xe1   :  { %4199 = vst.msk [vmem:[#allocation2] sm:$0xff] %vm19_vm3, %v3855_v6  ;;  %4371 = vst.msk [vmem:[#allocation2 + $0x560] sm:$0xff] %vm19_vm3, %v4027_v7  ;;  %v3856_v16 = vadd.f32 %v2484_v14, %v365_v62  ;;  %v4028_v17 = vadd.f32 %v3172_v15, %v537_v3  ;;  %v372_v6 = vld [vmem:[#allocation2 + $0x40] sm:$0xff] }
  0xe2   :  { %4202 = vst.msk [vmem:[#allocation2 + $0x18] sm:$0xff] %vm19_vm3, %v3858_v12  ;;  %4374 = vst.msk [vmem:[#allocation2 + $0x578] sm:$0xff] %vm19_vm3, %v4030_v13  ;;  %8624 = vmatmul.mubr.msk.bf16.gmra.mrb[108].mxu0 %vm1923_vm2, %v8977_v4  ;;  %8796 = vmatmul.mubr.msk.bf16.gmra.mrb[108].mxu1 %vm1923_vm2, %v8978_v5  ;;  %v374_v4 = vld [vmem:[#allocation2 + $0x50] sm:$0xff]  ;;  %v375_v12 = vld [vmem:[#allocation2 + $0x58] sm:$0xff] }
  0xe3   :  { %4200 = vst.msk [vmem:[#allocation2 + $0x8] sm:$0xff] %vm19_vm3, %v3856_v16  ;;  %4372 = vst.msk [vmem:[#allocation2 + $0x568] sm:$0xff] %vm19_vm3, %v4028_v17  ;;  %8627 = vmatprep.mubr.msk.bf16.mxu0 %vm1923_vm2, %v8979_v10  ;;  %8799 = vmatprep.mubr.msk.bf16.mxu1 %vm1923_vm2, %v8980_v11  ;;  %v546_v5 = vld [vmem:[#allocation2 + $0x5b0] sm:$0xff]  ;;  %v544_v11 = vld [vmem:[#allocation2 + $0x5a0] sm:$0xff] }
  0xe4   :  { %v547_v13 = vld [vmem:[#allocation2 + $0x5b8] sm:$0xff] }
  0xe5   :  { %v8521_v24 = vpop.f32.mrb[4].mxu0  ;;  %v8693_v25 = vpop.f32.mrb[4].mxu1 }
  0xe6   :  { %v3861_v29 = vadd.f32 %v8521_v24, %v370_v19  ;;  %v4033_v30 = vadd.f32 %v8693_v25, %v542_v20  ;;  %v2497_v31 = vpop.f32.mrb[5].mxu0  ;;  %v3185_v32 = vpop.f32.mrb[5].mxu1 }
  0xe7   :  { %v4548_v36 = vld [vmem:[#allocation2 + $0x10] sm:$0xff]  ;;  %v3859_v38 = vadd.f32 %v2497_v31, %v368_v21  ;;  %v4031_v39 = vadd.f32 %v3185_v32, %v540_v22  ;;  %v8522_v40 = vpop.f32.mrb[6].mxu0  ;;  %v8694_v41 = vpop.f32.mrb[6].mxu1  ;;  %v373_v21 = vld [vmem:[#allocation2 + $0x48] sm:$0xff]  ;;  %v8987_v31 = vld [vmem:[%s12546_s0 + $0x1e0] sm:$0xff]  }
  0xe8   :  { %v4720_v37 = vld [vmem:[#allocation2 + $0x570] sm:$0xff]  ;;  %v4898_v43 = vadd.f32 %v10232_v18, %v4548_v36  ;;  %v4546_v45 = vld [vmem:[#allocation2] sm:$0xff]  ;;  %4205 = vst.msk [vmem:[#allocation2 + $0x30] sm:$0xff] %vm19_vm3, %v3861_v29  ;;  %4377 = vst.msk [vmem:[#allocation2 + $0x590] sm:$0xff] %vm19_vm3, %v4033_v30  ;;  %v3862_v47 = vadd.f32 %v8522_v40, %v371_v23  ;;  %v4034_v48 = vadd.f32 %v8694_v41, %v543_v26  ;;  %v2500_v49 = vpop.f32.mrb[7].mxu0  ;;  %v3188_v50 = vpop.f32.mrb[7].mxu1 }
  0xe9   :  { %v5070_v44 = vadd.f32 %v10232_v18, %v4720_v37  ;;  %v4718_v46 = vld [vmem:[#allocation2 + $0x560] sm:$0xff]  ;;  %v4896_v51 = vadd.f32 %v10232_v18, %v4546_v45  ;;  %v4549_v54 = vld [vmem:[#allocation2 + $0x18] sm:$0xff]  ;;  %4203 = vst.msk [vmem:[#allocation2 + $0x20] sm:$0xff] %vm19_vm3, %v3859_v38  ;;  %4375 = vst.msk [vmem:[#allocation2 + $0x580] sm:$0xff] %vm19_vm3, %v4031_v39  ;;  %v3860_v56 = vadd.f32 %v2500_v49, %v369_v27 }
  0xea   :  { %v5068_v53 = vadd.f32 %v10232_v18, %v4718_v46  ;;  %v4721_v55 = vld [vmem:[#allocation2 + $0x578] sm:$0xff]  ;;  %v4032_v57 = vadd.f32 %v3188_v50, %v541_v28  ;;  %v5241_v58 = vmax.f32 %v4898_v43, 0.0  ;;  %v4899_v60 = vadd.f32 %v10232_v18, %v4549_v54  ;;  %v4547_v62 = vld [vmem:[#allocation2 + $0x8] sm:$0xff]  ;;  %4206 = vst.msk [vmem:[#allocation2 + $0x38] sm:$0xff] %vm19_vm3, %v3862_v47  ;;  %4378 = vst.msk [vmem:[#allocation2 + $0x598] sm:$0xff] %vm19_vm3, %v4034_v48 }
  0xeb   :  { %v5413_v59 = vmax.f32 %v5070_v44, 0.0  ;;  %v5071_v61 = vadd.f32 %v10232_v18, %v4721_v55  ;;  %v4719_v63 = vld [vmem:[#allocation2 + $0x568] sm:$0xff]  ;;  %8628 = vmatmul.mubr.msk.bf16.gmra.mrb[112].mxu0 %vm1923_vm2, %v8981_v33  ;;  %8800 = vmatmul.mubr.msk.bf16.gmra.mrb[112].mxu1 %vm1923_vm2, %v8982_v34  ;;  %v5239_v0 = vmax.f32 %v4896_v51, 0.0  ;;  %v4897_v2 = vadd.f32 %v10232_v18, %v4547_v62  ;;  %4204 = vst.msk [vmem:[#allocation2 + $0x28] sm:$0xff] %vm19_vm3, %v3860_v56  ;;  %v8985_v29 = vld [vmem:[%s12546_s0 + $0x1d8] sm:$0xff]   ;;  %v8988_v40 = vld [vmem:[%s12546_s0 + $0x490] sm:$0xff]  }
  0xec   :  { %v5411_v1 = vmax.f32 %v5068_v53, 0.0  ;;  %v5069_v3 = vadd.f32 %v10232_v18, %v4719_v63  ;;  %4376 = vst.msk [vmem:[#allocation2 + $0x588] sm:$0xff] %vm19_vm3, %v4032_v57  ;;  %8631 = vmatprep.mubr.msk.bf16.mxu0 %vm1923_vm2, %v8983_v35  ;;  %8803 = vmatprep.mubr.msk.bf16.mxu1 %vm1923_vm2, %v8984_v42  ;;  %v7996_v7 = vpack.c.bf16 %v5241_v58, %v5241_v58  ;;  %v5242_v9 = vmax.f32 %v4899_v60, 0.0  ;;  %v545_v22 = vld [vmem:[#allocation2 + $0x5a8] sm:$0xff] }
  0xed   :  { %v8168_v8 = vpack.c.bf16 %v5413_v59, %v5413_v59  ;;  %v5414_v10 = vmax.f32 %v5071_v61, 0.0  ;;  %v7994_v14 = vpack.c.bf16 %v5239_v0, %v5239_v0  ;;  %v5240_v16 = vmax.f32 %v4897_v2, 0.0  ;;  %v8525_v19 = vpop.f32.mrb[8].mxu0  ;;  %v8697_v20 = vpop.f32.mrb[8].mxu1  ;;  %v8986_v30 = vld [vmem:[%s12546_s0 + $0x488] sm:$0xff]   ;;  %v378_v2 = vld [vmem:[#allocation2 + $0x70] sm:$0xff] }
  0xee   :  { %v8166_v15 = vpack.c.bf16 %v5411_v1, %v5411_v1  ;;  %v5412_v17 = vmax.f32 %v5069_v3, 0.0  ;;  %6958 = vst.msk [vmem:[%s12548_s3 + $0x8] sm:$0xf] %vm6955_vm4, %v7996_v7  ;;  %v7997_v23 = vpack.c.bf16 %v5242_v9, %v5242_v9  ;;  %v3865_v25 = vadd.f32 %v8525_v19, %v374_v4  ;;  %v2513_v27 = vpop.f32.mrb[9].mxu0  ;;  %v3201_v28 = vpop.f32.mrb[9].mxu1  ;;  %v550_v3 = vld [vmem:[#allocation2 + $0x5d0] sm:$0xff] }
  0xef   :  { %7130 = vst.msk [vmem:[%s12548_s3 + $0x2b8] sm:$0xf] %vm6955_vm4, %v8168_v8  ;;  %v8169_v24 = vpack.c.bf16 %v5414_v10, %v5414_v10  ;;  %v4037_v26 = vadd.f32 %v8697_v20, %v546_v5  ;;  %6956 = vst.msk [vmem:[%s12548_s3] sm:$0xf] %vm6955_vm4, %v7994_v14  ;;  %v7995_v32 = vpack.c.bf16 %v5240_v16, %v5240_v16  ;;  %v4552_v34 = vld [vmem:[#allocation2 + $0x30] sm:$0xff]  ;;  %v8526_v38 = vpop.f32.mrb[10].mxu0 }
  0xf0   :  { %7128 = vst.msk [vmem:[%s12548_s3 + $0x2b0] sm:$0xf] %vm6955_vm4, %v8166_v15  ;;  %v8167_v33 = vpack.c.bf16 %v5412_v17, %v5412_v17  ;;  %v4724_v35 = vld [vmem:[#allocation2 + $0x590] sm:$0xff]  ;;  %v3863_v36 = vadd.f32 %v2513_v27, %v372_v6  ;;  %v4035_v37 = vadd.f32 %v3201_v28, %v544_v11  ;;  %v8698_v39 = vpop.f32.mrb[10].mxu1  ;;  %6959 = vst.msk [vmem:[%s12548_s3 + $0xc] sm:$0xf] %vm6955_vm4, %v7997_v23 }
  0xf1   :  { %7131 = vst.msk [vmem:[%s12548_s3 + $0x2bc] sm:$0xf] %vm6955_vm4, %v8169_v24  ;;  %v4902_v41 = vadd.f32 %v10232_v18, %v4552_v34  ;;  %v5074_v42 = vadd.f32 %v10232_v18, %v4724_v35  ;;  %v4550_v43 = vld [vmem:[#allocation2 + $0x20] sm:$0xff]  ;;  %v3866_v45 = vadd.f32 %v8526_v38, %v375_v12  ;;  %v4038_v46 = vadd.f32 %v8698_v39, %v547_v13  ;;  %v2516_v47 = vpop.f32.mrb[11].mxu0  ;;  %v3204_v48 = vpop.f32.mrb[11].mxu1  ;;  %v4553_v51 = vld [vmem:[#allocation2 + $0x38] sm:$0xff] }
  0xf2   :  { %v4722_v44 = vld [vmem:[#allocation2 + $0x580] sm:$0xff]  ;;  %4209 = vst.msk [vmem:[#allocation2 + $0x50] sm:$0xff] %vm19_vm3, %v3865_v25  ;;  %4381 = vst.msk [vmem:[#allocation2 + $0x5b0] sm:$0xff] %vm19_vm3, %v4037_v26  ;;  %v4900_v49 = vadd.f32 %v10232_v18, %v4550_v43  ;;  %v4725_v53 = vld [vmem:[#allocation2 + $0x598] sm:$0xff]  ;;  %v3864_v54 = vadd.f32 %v2516_v47, %v373_v21  ;;  %v4036_v55 = vadd.f32 %v3204_v48, %v545_v22 }
  0xf3   :  { %6957 = vst.msk [vmem:[%s12548_s3 + $0x4] sm:$0xf] %vm6955_vm4, %v7995_v32  ;;  %7129 = vst.msk [vmem:[%s12548_s3 + $0x2b4] sm:$0xf] %vm6955_vm4, %v8167_v33  ;;  %v5072_v50 = vadd.f32 %v10232_v18, %v4722_v44  ;;  %v5245_v56 = vmax.f32 %v4902_v41, 0.0  ;;  %v5417_v57 = vmax.f32 %v5074_v42, 0.0  ;;  %v4903_v58 = vadd.f32 %v10232_v18, %v4553_v51  ;;  %8632 = vmatmul.mubr.msk.bf16.gmra.mrb[116].mxu0 %vm1923_vm2, %v8985_v29 }
  0xf4   :  { %4207 = vst.msk [vmem:[#allocation2 + $0x40] sm:$0xff] %vm19_vm3, %v3863_v36  ;;  %4379 = vst.msk [vmem:[#allocation2 + $0x5a0] sm:$0xff] %vm19_vm3, %v4035_v37  ;;  %v5075_v59 = vadd.f32 %v10232_v18, %v4725_v53  ;;  %v4551_v60 = vld [vmem:[#allocation2 + $0x28] sm:$0xff]  ;;  %8804 = vmatmul.mubr.msk.bf16.gmra.mrb[116].mxu1 %vm1923_vm2, %v8986_v30  ;;  %v5243_v62 = vmax.f32 %v4900_v49, 0.0  ;;  %v376_v4 = vld [vmem:[#allocation2 + $0x60] sm:$0xff]  ;;  %8635 = vmatprep.mubr.msk.bf16.mxu0 %vm1923_vm2, %v8987_v31 }
  0xf5   :  { %v4723_v61 = vld [vmem:[#allocation2 + $0x588] sm:$0xff]  ;;  %4210 = vst.msk [vmem:[#allocation2 + $0x58] sm:$0xff] %vm19_vm3, %v3866_v45  ;;  %4382 = vst.msk [vmem:[#allocation2 + $0x5b8] sm:$0xff] %vm19_vm3, %v4038_v46  ;;  %v5415_v63 = vmax.f32 %v5072_v50, 0.0  ;;  %v4901_v0 = vadd.f32 %v10232_v18, %v4551_v60  ;;  %8807 = vmatprep.mubr.msk.bf16.mxu1 %vm1923_vm2, %v8988_v40  ;;  %v8000_v5 = vpack.c.bf16 %v5245_v56, %v5245_v56  ;;  %v5246_v7 = vmax.f32 %v4903_v58, 0.0  ;;  %v548_v9 = vld [vmem:[#allocation2 + $0x5c0] sm:$0xff] }
  0xf6   :  { %v5073_v1 = vadd.f32 %v10232_v18, %v4723_v61  ;;  %4208 = vst.msk [vmem:[#allocation2 + $0x48] sm:$0xff] %vm19_vm3, %v3864_v54  ;;  %4380 = vst.msk [vmem:[#allocation2 + $0x5a8] sm:$0xff] %vm19_vm3, %v4036_v55  ;;  %v8172_v6 = vpack.c.bf16 %v5417_v57, %v5417_v57  ;;  %v5418_v8 = vmax.f32 %v5075_v59, 0.0  ;;  %v379_v10 = vld [vmem:[#allocation2 + $0x78] sm:$0xff]  ;;  %v7998_v12 = vpack.c.bf16 %v5243_v62, %v5243_v62  ;;  %v8529_v16 = vpop.f32.mrb[12].mxu0  ;;  %v8701_v17 = vpop.f32.mrb[12].mxu1 }
  0xf7   :  { %v551_v11 = vld [vmem:[#allocation2 + $0x5d8] sm:$0xff]  ;;  %v8170_v13 = vpack.c.bf16 %v5415_v63, %v5415_v63  ;;  %v5244_v14 = vmax.f32 %v4901_v0, 0.0  ;;  %v377_v19 = vld [vmem:[#allocation2 + $0x68] sm:$0xff]  ;;  %6962 = vst.msk [vmem:[%s12548_s3 + $0x18] sm:$0xf] %vm6955_vm4, %v8000_v5  ;;  %v8001_v21 = vpack.c.bf16 %v5246_v7, %v5246_v7  ;;  %v3869_v23 = vadd.f32 %v8529_v16, %v378_v2  ;;  %v2529_v25 = vpop.f32.mrb[13].mxu0 }
  0xf8   :  { %v5416_v15 = vmax.f32 %v5073_v1, 0.0  ;;  %v549_v20 = vld [vmem:[#allocation2 + $0x5c8] sm:$0xff]  ;;  %7134 = vst.msk [vmem:[%s12548_s3 + $0x2c8] sm:$0xf] %vm6955_vm4, %v8172_v6  ;;  %v8173_v22 = vpack.c.bf16 %v5418_v8, %v5418_v8  ;;  %v4041_v24 = vadd.f32 %v8701_v17, %v550_v3  ;;  %v3217_v26 = vpop.f32.mrb[13].mxu1  ;;  %v8990_v28 = vld [vmem:[%s12546_s0 + $0x498] sm:$0xff]   ;;  %v3867_v34 = vadd.f32 %v2529_v25, %v376_v4 }
  0xf9   :  { %v8989_v27 = vld [vmem:[%s12546_s0 + $0x1e8] sm:$0xff]   ;;  %v8991_v29 = vld [vmem:[%s12546_s0 + $0x1f0] sm:$0xff]   ;;  %6960 = vst.msk [vmem:[%s12548_s3 + $0x10] sm:$0xf] %vm6955_vm4, %v7998_v12  ;;  %7132 = vst.msk [vmem:[%s12548_s3 + $0x2c0] sm:$0xf] %vm6955_vm4, %v8170_v13  ;;  %v7999_v30 = vpack.c.bf16 %v5244_v14, %v5244_v14  ;;  %v4039_v35 = vadd.f32 %v3217_v26, %v548_v9 }
  0xfa   :  { %v8171_v31 = vpack.c.bf16 %v5416_v15, %v5416_v15  ;;  %v4556_v32 = vld [vmem:[#allocation2 + $0x50] sm:$0xff]  ;;  %v8530_v36 = vpop.f32.mrb[14].mxu0  ;;  %v8702_v37 = vpop.f32.mrb[14].mxu1  ;;  %v8992_v38 = vld [vmem:[%s12546_s0 + $0x4a0] sm:$0xff]   ;;  %6963 = vst.msk [vmem:[%s12548_s3 + $0x1c] sm:$0xf] %vm6955_vm4, %v8001_v21 }
  0xfb   :  { %v4728_v33 = vld [vmem:[#allocation2 + $0x5b0] sm:$0xff]  ;;  %7135 = vst.msk [vmem:[%s12548_s3 + $0x2cc] sm:$0xf] %vm6955_vm4, %v8173_v22  ;;  %v4906_v39 = vadd.f32 %v10232_v18, %v4556_v32  ;;  %v4554_v41 = vld [vmem:[#allocation2 + $0x40] sm:$0xff]  ;;  %v3870_v43 = vadd.f32 %v8530_v36, %v379_v10  ;;  %v4042_v44 = vadd.f32 %v8702_v37, %v551_v11  ;;  %v2532_v45 = vpop.f32.mrb[15].mxu0  ;;  %v3220_v46 = vpop.f32.mrb[15].mxu1  ;;  %8636 = vmatmul.mubr.msk.bf16.gmra.mrb[120].mxu0 %vm1923_vm2, %v8989_v27 }
  0xfc   :  { %v5078_v40 = vadd.f32 %v10232_v18, %v4728_v33  ;;  %v4726_v42 = vld [vmem:[#allocation2 + $0x5a0] sm:$0xff]  ;;  %4213 = vst.msk [vmem:[#allocation2 + $0x70] sm:$0xff] %vm19_vm3, %v3869_v23  ;;  %4385 = vst.msk [vmem:[#allocation2 + $0x5d0] sm:$0xff] %vm19_vm3, %v4041_v24  ;;  %v4904_v47 = vadd.f32 %v10232_v18, %v4554_v41  ;;  %v4557_v49 = vld [vmem:[#allocation2 + $0x58] sm:$0xff]  ;;  %v3868_v51 = vadd.f32 %v2532_v45, %v377_v19  ;;  %8808 = vmatmul.mubr.msk.bf16.gmra.mrb[120].mxu1 %vm1923_vm2, %v8990_v28 }
  0xfd   :  { %6961 = vst.msk [vmem:[%s12548_s3 + $0x14] sm:$0xf] %vm6955_vm4, %v7999_v30  ;;  %7133 = vst.msk [vmem:[%s12548_s3 + $0x2c4] sm:$0xf] %vm6955_vm4, %v8171_v31  ;;  %v5076_v48 = vadd.f32 %v10232_v18, %v4726_v42  ;;  %v4729_v50 = vld [vmem:[#allocation2 + $0x5b8] sm:$0xff]  ;;  %v4040_v53 = vadd.f32 %v3220_v46, %v549_v20  ;;  %v5249_v54 = vmax.f32 %v4906_v39, 0.0  ;;  %v4907_v56 = vadd.f32 %v10232_v18, %v4557_v49 }
  0xfe   :  { %4211 = vst.msk [vmem:[#allocation2 + $0x60] sm:$0xff] %vm19_vm3, %v3867_v34  ;;  %4383 = vst.msk [vmem:[#allocation2 + $0x5c0] sm:$0xff] %vm19_vm3, %v4039_v35  ;;  %v5421_v55 = vmax.f32 %v5078_v40, 0.0  ;;  %v5079_v57 = vadd.f32 %v10232_v18, %v4729_v50  ;;  %v4555_v58 = vld [vmem:[#allocation2 + $0x48] sm:$0xff]  ;;  %v5247_v60 = vmax.f32 %v4904_v47, 0.0  ;;  %v382_v0 = vld [vmem:[#allocation2 + $0x90] sm:$0xff]  ;;  %8639 = vmatprep.mubr.msk.bf16.mxu0 %vm1923_vm2, %v8991_v29  ;;  %8811 = vmatprep.mubr.msk.bf16.mxu1 %vm1923_vm2, %v8992_v38 }
  0xff   :  { %v4727_v59 = vld [vmem:[#allocation2 + $0x5a8] sm:$0xff]  ;;  %4214 = vst.msk [vmem:[#allocation2 + $0x78] sm:$0xff] %vm19_vm3, %v3870_v43  ;;  %4386 = vst.msk [vmem:[#allocation2 + $0x5d8] sm:$0xff] %vm19_vm3, %v4042_v44  ;;  %v5419_v61 = vmax.f32 %v5076_v48, 0.0  ;;  %v4905_v62 = vadd.f32 %v10232_v18, %v4555_v58  ;;  %v554_v1 = vld [vmem:[#allocation2 + $0x5f0] sm:$0xff]  ;;  %v8004_v3 = vpack.c.bf16 %v5249_v54, %v5249_v54  ;;  %v5250_v5 = vmax.f32 %v4907_v56, 0.0 }
 0x100   :  { %v5077_v63 = vadd.f32 %v10232_v18, %v4727_v59  ;;  %4212 = vst.msk [vmem:[#allocation2 + $0x68] sm:$0xff] %vm19_vm3, %v3868_v51  ;;  %4384 = vst.msk [vmem:[#allocation2 + $0x5c8] sm:$0xff] %vm19_vm3, %v4040_v53  ;;  %v380_v2 = vld [vmem:[#allocation2 + $0x80] sm:$0xff]  ;;  %v8176_v4 = vpack.c.bf16 %v5421_v55, %v5421_v55  ;;  %v5422_v6 = vmax.f32 %v5079_v57, 0.0  ;;  %v383_v8 = vld [vmem:[#allocation2 + $0x98] sm:$0xff]  ;;  %v8002_v10 = vpack.c.bf16 %v5247_v60, %v5247_v60  ;;  %v8533_v14 = vpop.f32.mrb[16].mxu0 }
 0x101   :  { %v552_v7 = vld [vmem:[#allocation2 + $0x5e0] sm:$0xff]  ;;  %v555_v9 = vld [vmem:[#allocation2 + $0x5f8] sm:$0xff]  ;;  %v8174_v11 = vpack.c.bf16 %v5419_v61, %v5419_v61  ;;  %v5248_v12 = vmax.f32 %v4905_v62, 0.0  ;;  %v8705_v15 = vpop.f32.mrb[16].mxu1  ;;  %v381_v16 = vld [vmem:[#allocation2 + $0x88] sm:$0xff]  ;;  %v8005_v19 = vpack.c.bf16 %v5250_v5, %v5250_v5  ;;  %v3873_v21 = vadd.f32 %v8533_v14, %v382_v0  ;;  %v2545_v23 = vpop.f32.mrb[17].mxu0 }
 0x102   :  { %v5420_v13 = vmax.f32 %v5077_v63, 0.0  ;;  %v553_v17 = vld [vmem:[#allocation2 + $0x5e8] sm:$0xff]  ;;  %6966 = vst.msk [vmem:[%s12548_s3 + $0x28] sm:$0xf] %vm6955_vm4, %v8004_v3  ;;  %7138 = vst.msk [vmem:[%s12548_s3 + $0x2d8] sm:$0xf] %vm6955_vm4, %v8176_v4  ;;  %v8177_v20 = vpack.c.bf16 %v5422_v6, %v5422_v6  ;;  %v4045_v22 = vadd.f32 %v8705_v15, %v554_v1  ;;  %v3871_v32 = vadd.f32 %v2545_v23, %v380_v2 }
 0x103   :  { %v3233_v24 = vpop.f32.mrb[17].mxu1  ;;  %v8993_v25 = vld [vmem:[%s12546_s0 + $0x1f8] sm:$0xff]   ;;  %v8994_v26 = vld [vmem:[%s12546_s0 + $0x4a8] sm:$0xff]   ;;  %v8995_v27 = vld [vmem:[%s12546_s0 + $0x200] sm:$0xff]   ;;  %6964 = vst.msk [vmem:[%s12548_s3 + $0x20] sm:$0xf] %vm6955_vm4, %v8002_v10  ;;  %v8003_v28 = vpack.c.bf16 %v5248_v12, %v5248_v12 }
 0x104   :  { %7136 = vst.msk [vmem:[%s12548_s3 + $0x2d0] sm:$0xf] %vm6955_vm4, %v8174_v11  ;;  %v8175_v29 = vpack.c.bf16 %v5420_v13, %v5420_v13  ;;  %v4560_v30 = vld [vmem:[#allocation2 + $0x70] sm:$0xff]  ;;  %v4043_v33 = vadd.f32 %v3233_v24, %v552_v7  ;;  %v8534_v34 = vpop.f32.mrb[18].mxu0  ;;  %v8706_v35 = vpop.f32.mrb[18].mxu1  ;;  %8640 = vmatmul.mubr.msk.bf16.gmra.mrb[124].mxu0 %vm1923_vm2, %v8993_v25  ;;  %8812 = vmatmul.mubr.msk.bf16.gmra.mrb[124].mxu1 %vm1923_vm2, %v8994_v26  ;;  %v384_v0 = vld [vmem:[#allocation2 + $0xa0] sm:$0xff] }
 0x105   :  { %v4732_v31 = vld [vmem:[#allocation2 + $0x5d0] sm:$0xff]  ;;  %6967 = vst.msk [vmem:[%s12548_s3 + $0x2c] sm:$0xf] %vm6955_vm4, %v8005_v19  ;;  %7139 = vst.msk [vmem:[%s12548_s3 + $0x2dc] sm:$0xf] %vm6955_vm4, %v8177_v20  ;;  %v4910_v37 = vadd.f32 %v10232_v18, %v4560_v30  ;;  %v4558_v39 = vld [vmem:[#allocation2 + $0x60] sm:$0xff]  ;;  %v3874_v41 = vadd.f32 %v8534_v34, %v383_v8  ;;  %v4046_v42 = vadd.f32 %v8706_v35, %v555_v9  ;;  %8643 = vmatprep.mubr.msk.bf16.mxu0 %vm1923_vm2, %v8995_v27 }
 0x106   :  { %v8996_v36 = vld [vmem:[%s12546_s0 + $0x4b0] sm:$0xff]   ;;  %v5082_v38 = vadd.f32 %v10232_v18, %v4732_v31  ;;  %v4730_v40 = vld [vmem:[#allocation2 + $0x5c0] sm:$0xff]  ;;  %4217 = vst.msk [vmem:[#allocation2 + $0x90] sm:$0xff] %vm19_vm3, %v3873_v21  ;;  %4389 = vst.msk [vmem:[#allocation2 + $0x5f0] sm:$0xff] %vm19_vm3, %v4045_v22  ;;  %v2548_v43 = vpop.f32.mrb[19].mxu0  ;;  %v3236_v44 = vpop.f32.mrb[19].mxu1  ;;  %v4908_v45 = vadd.f32 %v10232_v18, %v4558_v39 }
 0x107   :  { %6965 = vst.msk [vmem:[%s12548_s3 + $0x24] sm:$0xf] %vm6955_vm4, %v8003_v28  ;;  %7137 = vst.msk [vmem:[%s12548_s3 + $0x2d4] sm:$0xf] %vm6955_vm4, %v8175_v29  ;;  %v5080_v46 = vadd.f32 %v10232_v18, %v4730_v40  ;;  %v4561_v47 = vld [vmem:[#allocation2 + $0x78] sm:$0xff]  ;;  %v3872_v49 = vadd.f32 %v2548_v43, %v381_v16  ;;  %v4044_v50 = vadd.f32 %v3236_v44, %v553_v17  ;;  %v5253_v51 = vmax.f32 %v4910_v37, 0.0 }
 0x108   :  { %v4733_v48 = vld [vmem:[#allocation2 + $0x5d8] sm:$0xff]  ;;  %4215 = vst.msk [vmem:[#allocation2 + $0x80] sm:$0xff] %vm19_vm3, %v3871_v32  ;;  %4387 = vst.msk [vmem:[#allocation2 + $0x5e0] sm:$0xff] %vm19_vm3, %v4043_v33  ;;  %v5425_v53 = vmax.f32 %v5082_v38, 0.0  ;;  %v4911_v54 = vadd.f32 %v10232_v18, %v4561_v47  ;;  %v4559_v56 = vld [vmem:[#allocation2 + $0x68] sm:$0xff]  ;;  %v5251_v58 = vmax.f32 %v4908_v45, 0.0  ;;  %8815 = vmatprep.mubr.msk.bf16.mxu1 %vm1923_vm2, %v8996_v36 }
 0x109   :  { %v5083_v55 = vadd.f32 %v10232_v18, %v4733_v48  ;;  %v4731_v57 = vld [vmem:[#allocation2 + $0x5c8] sm:$0xff]  ;;  %4218 = vst.msk [vmem:[#allocation2 + $0x98] sm:$0xff] %vm19_vm3, %v3874_v41  ;;  %4390 = vst.msk [vmem:[#allocation2 + $0x5f8] sm:$0xff] %vm19_vm3, %v4046_v42  ;;  %v5423_v59 = vmax.f32 %v5080_v46, 0.0  ;;  %v4909_v60 = vadd.f32 %v10232_v18, %v4559_v56  ;;  %v386_v62 = vld [vmem:[#allocation2 + $0xb0] sm:$0xff]  ;;  %v8008_v1 = vpack.c.bf16 %v5253_v51, %v5253_v51  ;;  %v8537_v12 = vpop.f32.mrb[20].mxu0 }
 0x10a   :  { %v5081_v61 = vadd.f32 %v10232_v18, %v4731_v57  ;;  %4216 = vst.msk [vmem:[#allocation2 + $0x88] sm:$0xff] %vm19_vm3, %v3872_v49  ;;  %4388 = vst.msk [vmem:[#allocation2 + $0x5e8] sm:$0xff] %vm19_vm3, %v4044_v50  ;;  %v558_v63 = vld [vmem:[#allocation2 + $0x610] sm:$0xff]  ;;  %v8180_v2 = vpack.c.bf16 %v5425_v53, %v5425_v53  ;;  %v5254_v3 = vmax.f32 %v4911_v54, 0.0  ;;  %v556_v5 = vld [vmem:[#allocation2 + $0x600] sm:$0xff]  ;;  %v8006_v8 = vpack.c.bf16 %v5251_v58, %v5251_v58  ;;  %v8709_v13 = vpop.f32.mrb[20].mxu1 }
 0x10b   :  { %v5426_v4 = vmax.f32 %v5083_v55, 0.0  ;;  %v387_v6 = vld [vmem:[#allocation2 + $0xb8] sm:$0xff]  ;;  %v8178_v9 = vpack.c.bf16 %v5423_v59, %v5423_v59  ;;  %v5252_v10 = vmax.f32 %v4909_v60, 0.0  ;;  %v385_v14 = vld [vmem:[#allocation2 + $0xa8] sm:$0xff]  ;;  %6970 = vst.msk [vmem:[%s12548_s3 + $0x38] sm:$0xf] %vm6955_vm4, %v8008_v1  ;;  %v3877_v19 = vadd.f32 %v8537_v12, %v386_v62 }
 0x10c   :  { %v559_v7 = vld [vmem:[#allocation2 + $0x618] sm:$0xff]  ;;  %v5424_v11 = vmax.f32 %v5081_v61, 0.0  ;;  %v557_v15 = vld [vmem:[#allocation2 + $0x608] sm:$0xff]  ;;  %7142 = vst.msk [vmem:[%s12548_s3 + $0x2e8] sm:$0xf] %vm6955_vm4, %v8180_v2  ;;  %v8009_v16 = vpack.c.bf16 %v5254_v3, %v5254_v3  ;;  %v4049_v20 = vadd.f32 %v8709_v13, %v558_v63  ;;  %v2561_v21 = vpop.f32.mrb[21].mxu0 }
 0x10d   :  { %v8181_v17 = vpack.c.bf16 %v5426_v4, %v5426_v4  ;;  %v3249_v22 = vpop.f32.mrb[21].mxu1  ;;  %v8997_v23 = vld [vmem:[%s12546_s0 + $0x208] sm:$0xff]   ;;  %v8998_v24 = vld [vmem:[%s12546_s0 + $0x4b8] sm:$0xff]   ;;  %v8999_v25 = vld [vmem:[%s12546_s0 + $0x210] sm:$0xff]   ;;  %6968 = vst.msk [vmem:[%s12548_s3 + $0x30] sm:$0xf] %vm6955_vm4, %v8006_v8  ;;  %v8007_v26 = vpack.c.bf16 %v5252_v10, %v5252_v10  ;;  %v3875_v30 = vadd.f32 %v2561_v21, %v384_v0 }
 0x10e   :  { %7140 = vst.msk [vmem:[%s12548_s3 + $0x2e0] sm:$0xf] %vm6955_vm4, %v8178_v9  ;;  %v8179_v27 = vpack.c.bf16 %v5424_v11, %v5424_v11  ;;  %v4564_v28 = vld [vmem:[#allocation2 + $0x90] sm:$0xff]  ;;  %v4047_v31 = vadd.f32 %v3249_v22, %v556_v5  ;;  %v8538_v32 = vpop.f32.mrb[22].mxu0  ;;  %v8710_v33 = vpop.f32.mrb[22].mxu1  ;;  %v9000_v34 = vld [vmem:[%s12546_s0 + $0x4c0] sm:$0xff]   ;;  %8644 = vmatmul.mubr.msk.bf16.gmra.mrb[128].mxu0 %vm1923_vm2, %v8997_v23  ;;  %8816 = vmatmul.mubr.msk.bf16.gmra.mrb[128].mxu1 %vm1923_vm2, %v8998_v24 }
 0x10f   :  { %v4736_v29 = vld [vmem:[#allocation2 + $0x5f0] sm:$0xff]  ;;  %6971 = vst.msk [vmem:[%s12548_s3 + $0x3c] sm:$0xf] %vm6955_vm4, %v8009_v16  ;;  %7143 = vst.msk [vmem:[%s12548_s3 + $0x2ec] sm:$0xf] %vm6955_vm4, %v8181_v17  ;;  %v4914_v35 = vadd.f32 %v10232_v18, %v4564_v28  ;;  %v4562_v37 = vld [vmem:[#allocation2 + $0x80] sm:$0xff]  ;;  %v3878_v39 = vadd.f32 %v8538_v32, %v387_v6  ;;  %v4050_v40 = vadd.f32 %v8710_v33, %v559_v7  ;;  %8647 = vmatprep.mubr.msk.bf16.mxu0 %vm1923_vm2, %v8999_v25 }
 0x110   :  { %v5086_v36 = vadd.f32 %v10232_v18, %v4736_v29  ;;  %v4734_v38 = vld [vmem:[#allocation2 + $0x5e0] sm:$0xff]  ;;  %4221 = vst.msk [vmem:[#allocation2 + $0xb0] sm:$0xff] %vm19_vm3, %v3877_v19  ;;  %4393 = vst.msk [vmem:[#allocation2 + $0x610] sm:$0xff] %vm19_vm3, %v4049_v20  ;;  %v2564_v41 = vpop.f32.mrb[23].mxu0  ;;  %v3252_v42 = vpop.f32.mrb[23].mxu1  ;;  %v4912_v43 = vadd.f32 %v10232_v18, %v4562_v37  ;;  %v4565_v45 = vld [vmem:[#allocation2 + $0x98] sm:$0xff]  ;;  %8819 = vmatprep.mubr.msk.bf16.mxu1 %vm1923_vm2, %v9000_v34 }
 0x111   :  { %6969 = vst.msk [vmem:[%s12548_s3 + $0x34] sm:$0xf] %vm6955_vm4, %v8007_v26  ;;  %7141 = vst.msk [vmem:[%s12548_s3 + $0x2e4] sm:$0xf] %vm6955_vm4, %v8179_v27  ;;  %v5084_v44 = vadd.f32 %v10232_v18, %v4734_v38  ;;  %v4737_v46 = vld [vmem:[#allocation2 + $0x5f8] sm:$0xff]  ;;  %v3876_v47 = vadd.f32 %v2564_v41, %v385_v14  ;;  %v4048_v48 = vadd.f32 %v3252_v42, %v557_v15  ;;  %v5257_v49 = vmax.f32 %v4914_v35, 0.0 }
 0x112   :  { %4219 = vst.msk [vmem:[#allocation2 + $0xa0] sm:$0xff] %vm19_vm3, %v3875_v30  ;;  %4391 = vst.msk [vmem:[#allocation2 + $0x600] sm:$0xff] %vm19_vm3, %v4047_v31  ;;  %v5429_v50 = vmax.f32 %v5086_v36, 0.0  ;;  %v4915_v51 = vadd.f32 %v10232_v18, %v4565_v45  ;;  %v5087_v53 = vadd.f32 %v10232_v18, %v4737_v46  ;;  %v4563_v54 = vld [vmem:[#allocation2 + $0x88] sm:$0xff]  ;;  %v5255_v56 = vmax.f32 %v4912_v43, 0.0  ;;  %v390_v60 = vld [vmem:[#allocation2 + $0xd0] sm:$0xff] }
 0x113   :  { %v4735_v55 = vld [vmem:[#allocation2 + $0x5e8] sm:$0xff]  ;;  %4222 = vst.msk [vmem:[#allocation2 + $0xb8] sm:$0xff] %vm19_vm3, %v3878_v39  ;;  %4394 = vst.msk [vmem:[#allocation2 + $0x618] sm:$0xff] %vm19_vm3, %v4050_v40  ;;  %v5427_v57 = vmax.f32 %v5084_v44, 0.0  ;;  %v4913_v58 = vadd.f32 %v10232_v18, %v4563_v54  ;;  %v562_v61 = vld [vmem:[#allocation2 + $0x630] sm:$0xff]  ;;  %v8012_v63 = vpack.c.bf16 %v5257_v49, %v5257_v49  ;;  %v8541_v10 = vpop.f32.mrb[24].mxu0 }
 0x114   :  { %v5085_v59 = vadd.f32 %v10232_v18, %v4735_v55  ;;  %4220 = vst.msk [vmem:[#allocation2 + $0xa8] sm:$0xff] %vm19_vm3, %v3876_v47  ;;  %4392 = vst.msk [vmem:[#allocation2 + $0x608] sm:$0xff] %vm19_vm3, %v4048_v48  ;;  %v388_v62 = vld [vmem:[#allocation2 + $0xc0] sm:$0xff]  ;;  %v8184_v0 = vpack.c.bf16 %v5429_v50, %v5429_v50  ;;  %v5258_v1 = vmax.f32 %v4915_v51, 0.0  ;;  %v5430_v2 = vmax.f32 %v5087_v53, 0.0  ;;  %v391_v4 = vld [vmem:[#allocation2 + $0xd8] sm:$0xff] }
 0x115   :  { %v560_v3 = vld [vmem:[#allocation2 + $0x620] sm:$0xff]  ;;  %v563_v5 = vld [vmem:[#allocation2 + $0x638] sm:$0xff]  ;;  %v8010_v6 = vpack.c.bf16 %v5255_v56, %v5255_v56  ;;  %v8182_v7 = vpack.c.bf16 %v5427_v57, %v5427_v57  ;;  %v5256_v8 = vmax.f32 %v4913_v58, 0.0  ;;  %v8713_v11 = vpop.f32.mrb[24].mxu1  ;;  %v389_v12 = vld [vmem:[#allocation2 + $0xc8] sm:$0xff]  ;;  %v3881_v16 = vadd.f32 %v8541_v10, %v390_v60  ;;  %v2577_v19 = vpop.f32.mrb[25].mxu0 }
 0x116   :  { %v5428_v9 = vmax.f32 %v5085_v59, 0.0  ;;  %v561_v13 = vld [vmem:[#allocation2 + $0x628] sm:$0xff]  ;;  %6974 = vst.msk [vmem:[%s12548_s3 + $0x48] sm:$0xf] %vm6955_vm4, %v8012_v63  ;;  %7146 = vst.msk [vmem:[%s12548_s3 + $0x2f8] sm:$0xf] %vm6955_vm4, %v8184_v0  ;;  %v8013_v14 = vpack.c.bf16 %v5258_v1, %v5258_v1  ;;  %v8185_v15 = vpack.c.bf16 %v5430_v2, %v5430_v2  ;;  %v4053_v17 = vadd.f32 %v8713_v11, %v562_v61 }
 0x117   :  { %v3265_v20 = vpop.f32.mrb[25].mxu1  ;;  %v9001_v21 = vld [vmem:[%s12546_s0 + $0x218] sm:$0xff]   ;;  %v9002_v22 = vld [vmem:[%s12546_s0 + $0x4c8] sm:$0xff]   ;;  %v9003_v23 = vld [vmem:[%s12546_s0 + $0x220] sm:$0xff]   ;;  %6972 = vst.msk [vmem:[%s12548_s3 + $0x40] sm:$0xf] %vm6955_vm4, %v8010_v6  ;;  %v8011_v24 = vpack.c.bf16 %v5256_v8, %v5256_v8  ;;  %v3879_v28 = vadd.f32 %v2577_v19, %v388_v62 }
 0x118   :  { %7144 = vst.msk [vmem:[%s12548_s3 + $0x2f0] sm:$0xf] %vm6955_vm4, %v8182_v7  ;;  %v8183_v25 = vpack.c.bf16 %v5428_v9, %v5428_v9  ;;  %v4568_v26 = vld [vmem:[#allocation2 + $0xb0] sm:$0xff]  ;;  %v4051_v29 = vadd.f32 %v3265_v20, %v560_v3  ;;  %v8542_v30 = vpop.f32.mrb[26].mxu0  ;;  %v8714_v31 = vpop.f32.mrb[26].mxu1  ;;  %8648 = vmatmul.mubr.msk.bf16.gmra.mrb[132].mxu0 %vm1923_vm2, %v9001_v21  ;;  %8820 = vmatmul.mubr.msk.bf16.gmra.mrb[132].mxu1 %vm1923_vm2, %v9002_v22  ;;  %v392_v60 = vld [vmem:[#allocation2 + $0xe0] sm:$0xff] }
 0x119   :  { %v4740_v27 = vld [vmem:[#allocation2 + $0x610] sm:$0xff]  ;;  %6975 = vst.msk [vmem:[%s12548_s3 + $0x4c] sm:$0xf] %vm6955_vm4, %v8013_v14  ;;  %7147 = vst.msk [vmem:[%s12548_s3 + $0x2fc] sm:$0xf] %vm6955_vm4, %v8185_v15  ;;  %v4918_v33 = vadd.f32 %v10232_v18, %v4568_v26  ;;  %v4566_v35 = vld [vmem:[#allocation2 + $0xa0] sm:$0xff]  ;;  %v3882_v37 = vadd.f32 %v8542_v30, %v391_v4  ;;  %v4054_v38 = vadd.f32 %v8714_v31, %v563_v5  ;;  %8651 = vmatprep.mubr.msk.bf16.mxu0 %vm1923_vm2, %v9003_v23 }
 0x11a   :  { %v9004_v32 = vld [vmem:[%s12546_s0 + $0x4d0] sm:$0xff]   ;;  %v5090_v34 = vadd.f32 %v10232_v18, %v4740_v27  ;;  %v4738_v36 = vld [vmem:[#allocation2 + $0x600] sm:$0xff]  ;;  %4225 = vst.msk [vmem:[#allocation2 + $0xd0] sm:$0xff] %vm19_vm3, %v3881_v16  ;;  %4397 = vst.msk [vmem:[#allocation2 + $0x630] sm:$0xff] %vm19_vm3, %v4053_v17  ;;  %v2580_v39 = vpop.f32.mrb[27].mxu0  ;;  %v3268_v40 = vpop.f32.mrb[27].mxu1  ;;  %v4916_v41 = vadd.f32 %v10232_v18, %v4566_v35 }
 0x11b   :  { %6973 = vst.msk [vmem:[%s12548_s3 + $0x44] sm:$0xf] %vm6955_vm4, %v8011_v24  ;;  %7145 = vst.msk [vmem:[%s12548_s3 + $0x2f4] sm:$0xf] %vm6955_vm4, %v8183_v25  ;;  %v5088_v42 = vadd.f32 %v10232_v18, %v4738_v36  ;;  %v4569_v43 = vld [vmem:[#allocation2 + $0xb8] sm:$0xff]  ;;  %v3880_v45 = vadd.f32 %v2580_v39, %v389_v12  ;;  %v4052_v46 = vadd.f32 %v3268_v40, %v561_v13  ;;  %v5261_v47 = vmax.f32 %v4918_v33, 0.0 }
 0x11c   :  { %v4741_v44 = vld [vmem:[#allocation2 + $0x618] sm:$0xff]  ;;  %4223 = vst.msk [vmem:[#allocation2 + $0xc0] sm:$0xff] %vm19_vm3, %v3879_v28  ;;  %4395 = vst.msk [vmem:[#allocation2 + $0x620] sm:$0xff] %vm19_vm3, %v4051_v29  ;;  %v5433_v48 = vmax.f32 %v5090_v34, 0.0  ;;  %v4919_v49 = vadd.f32 %v10232_v18, %v4569_v43  ;;  %v4567_v51 = vld [vmem:[#allocation2 + $0xa8] sm:$0xff]  ;;  %v5259_v54 = vmax.f32 %v4916_v41, 0.0  ;;  %8823 = vmatprep.mubr.msk.bf16.mxu1 %vm1923_vm2, %v9004_v32 }
 0x11d   :  { %v5091_v50 = vadd.f32 %v10232_v18, %v4741_v44  ;;  %v4739_v53 = vld [vmem:[#allocation2 + $0x608] sm:$0xff]  ;;  %4226 = vst.msk [vmem:[#allocation2 + $0xd8] sm:$0xff] %vm19_vm3, %v3882_v37  ;;  %4398 = vst.msk [vmem:[#allocation2 + $0x638] sm:$0xff] %vm19_vm3, %v4054_v38  ;;  %v5431_v55 = vmax.f32 %v5088_v42, 0.0  ;;  %v4917_v56 = vadd.f32 %v10232_v18, %v4567_v51  ;;  %v394_v58 = vld [vmem:[#allocation2 + $0xf0] sm:$0xff]  ;;  %v8016_v61 = vpack.c.bf16 %v5261_v47, %v5261_v47  ;;  %v8545_v8 = vpop.f32.mrb[28].mxu0 }
 0x11e   :  { %v5089_v57 = vadd.f32 %v10232_v18, %v4739_v53  ;;  %4224 = vst.msk [vmem:[#allocation2 + $0xc8] sm:$0xff] %vm19_vm3, %v3880_v45  ;;  %4396 = vst.msk [vmem:[#allocation2 + $0x628] sm:$0xff] %vm19_vm3, %v4052_v46  ;;  %v566_v59 = vld [vmem:[#allocation2 + $0x650] sm:$0xff]  ;;  %v8188_v62 = vpack.c.bf16 %v5433_v48, %v5433_v48  ;;  %v5262_v63 = vmax.f32 %v4919_v49, 0.0  ;;  %v564_v1 = vld [vmem:[#allocation2 + $0x640] sm:$0xff]  ;;  %v8014_v4 = vpack.c.bf16 %v5259_v54, %v5259_v54  ;;  %v8717_v9 = vpop.f32.mrb[28].mxu1 }
 0x11f   :  { %v5434_v0 = vmax.f32 %v5091_v50, 0.0  ;;  %v395_v2 = vld [vmem:[#allocation2 + $0xf8] sm:$0xff]  ;;  %v8186_v5 = vpack.c.bf16 %v5431_v55, %v5431_v55  ;;  %v5260_v6 = vmax.f32 %v4917_v56, 0.0  ;;  %v393_v10 = vld [vmem:[#allocation2 + $0xe8] sm:$0xff]  ;;  %6978 = vst.msk [vmem:[%s12548_s3 + $0x58] sm:$0xf] %vm6955_vm4, %v8016_v61  ;;  %v3885_v14 = vadd.f32 %v8545_v8, %v394_v58 }
 0x120   :  { %v567_v3 = vld [vmem:[#allocation2 + $0x658] sm:$0xff]  ;;  %v5432_v7 = vmax.f32 %v5089_v57, 0.0  ;;  %v565_v11 = vld [vmem:[#allocation2 + $0x648] sm:$0xff]  ;;  %7150 = vst.msk [vmem:[%s12548_s3 + $0x308] sm:$0xf] %vm6955_vm4, %v8188_v62  ;;  %v8017_v12 = vpack.c.bf16 %v5262_v63, %v5262_v63  ;;  %v4057_v15 = vadd.f32 %v8717_v9, %v566_v59  ;;  %v2593_v16 = vpop.f32.mrb[29].mxu0 }
 0x121   :  { %v8189_v13 = vpack.c.bf16 %v5434_v0, %v5434_v0  ;;  %v3281_v17 = vpop.f32.mrb[29].mxu1  ;;  %v9005_v19 = vld [vmem:[%s12546_s0 + $0x228] sm:$0xff]   ;;  %v9006_v20 = vld [vmem:[%s12546_s0 + $0x4d8] sm:$0xff]   ;;  %v9007_v21 = vld [vmem:[%s12546_s0 + $0x230] sm:$0xff]   ;;  %6976 = vst.msk [vmem:[%s12548_s3 + $0x50] sm:$0xf] %vm6955_vm4, %v8014_v4  ;;  %v8015_v22 = vpack.c.bf16 %v5260_v6, %v5260_v6  ;;  %v3883_v26 = vadd.f32 %v2593_v16, %v392_v60 }
 0x122   :  { %7148 = vst.msk [vmem:[%s12548_s3 + $0x300] sm:$0xf] %vm6955_vm4, %v8186_v5  ;;  %v8187_v23 = vpack.c.bf16 %v5432_v7, %v5432_v7  ;;  %v4572_v24 = vld [vmem:[#allocation2 + $0xd0] sm:$0xff]  ;;  %v4055_v27 = vadd.f32 %v3281_v17, %v564_v1  ;;  %v8546_v28 = vpop.f32.mrb[30].mxu0  ;;  %v8718_v29 = vpop.f32.mrb[30].mxu1  ;;  %v9008_v30 = vld [vmem:[%s12546_s0 + $0x4e0] sm:$0xff]   ;;  %8652 = vmatmul.mubr.msk.bf16.gmra.mrb[136].mxu0 %vm1923_vm2, %v9005_v19  ;;  %8824 = vmatmul.mubr.msk.bf16.gmra.mrb[136].mxu1 %vm1923_vm2, %v9006_v20 }
 0x123   :  { %v4744_v25 = vld [vmem:[#allocation2 + $0x630] sm:$0xff]  ;;  %6979 = vst.msk [vmem:[%s12548_s3 + $0x5c] sm:$0xf] %vm6955_vm4, %v8017_v12  ;;  %7151 = vst.msk [vmem:[%s12548_s3 + $0x30c] sm:$0xf] %vm6955_vm4, %v8189_v13  ;;  %v4922_v31 = vadd.f32 %v10232_v18, %v4572_v24  ;;  %v4570_v33 = vld [vmem:[#allocation2 + $0xc0] sm:$0xff]  ;;  %v3886_v35 = vadd.f32 %v8546_v28, %v395_v2  ;;  %v4058_v36 = vadd.f32 %v8718_v29, %v567_v3  ;;  %8655 = vmatprep.mubr.msk.bf16.mxu0 %vm1923_vm2, %v9007_v21 }
 0x124   :  { %v5094_v32 = vadd.f32 %v10232_v18, %v4744_v25  ;;  %v4742_v34 = vld [vmem:[#allocation2 + $0x620] sm:$0xff]  ;;  %4229 = vst.msk [vmem:[#allocation2 + $0xf0] sm:$0xff] %vm19_vm3, %v3885_v14  ;;  %4401 = vst.msk [vmem:[#allocation2 + $0x650] sm:$0xff] %vm19_vm3, %v4057_v15  ;;  %v2596_v37 = vpop.f32.mrb[31].mxu0  ;;  %v3284_v38 = vpop.f32.mrb[31].mxu1  ;;  %v4573_v41 = vld [vmem:[#allocation2 + $0xd8] sm:$0xff]  ;;  %8827 = vmatprep.mubr.msk.bf16.mxu1 %vm1923_vm2, %v9008_v30 }
 0x125   :  { %6977 = vst.msk [vmem:[%s12548_s3 + $0x54] sm:$0xf] %vm6955_vm4, %v8015_v22  ;;  %7149 = vst.msk [vmem:[%s12548_s3 + $0x304] sm:$0xf] %vm6955_vm4, %v8187_v23  ;;  %v10641_v18 = vld [vmem:[%s12547_s2] ss:$0 sm:$0xff]  ;;  %v3884_v43 = vadd.f32 %v2596_v37, %v393_v10  ;;  %v4056_v44 = vadd.f32 %v3284_v38, %v565_v11 }
 0x126   :  { %v4920_v39 = vadd.f32 %v10641_v18, %v4570_v33  ;;  %v5092_v40 = vadd.f32 %v10641_v18, %v4742_v34  ;;  %v4745_v42 = vld [vmem:[#allocation2 + $0x638] sm:$0xff]  ;;  %4227 = vst.msk [vmem:[#allocation2 + $0xe0] sm:$0xff] %vm19_vm3, %v3883_v26  ;;  %4399 = vst.msk [vmem:[#allocation2 + $0x640] sm:$0xff] %vm19_vm3, %v4055_v27  ;;  %v5265_v45 = vmax.f32 %v4922_v31, 0.0  ;;  %v5437_v46 = vmax.f32 %v5094_v32, 0.0  ;;  %v4571_v49 = vld [vmem:[#allocation2 + $0xc8] sm:$0xff] }
 0x127   :  { %v4923_v47 = vadd.f32 %v10641_v18, %v4573_v41  ;;  %v5095_v48 = vadd.f32 %v10641_v18, %v4745_v42  ;;  %v4743_v50 = vld [vmem:[#allocation2 + $0x628] sm:$0xff]  ;;  %4230 = vst.msk [vmem:[#allocation2 + $0xf8] sm:$0xff] %vm19_vm3, %v3886_v35  ;;  %4402 = vst.msk [vmem:[#allocation2 + $0x658] sm:$0xff] %vm19_vm3, %v4058_v36  ;;  %v4921_v54 = vadd.f32 %v10641_v18, %v4571_v49  ;;  %v398_v56 = vld [vmem:[#allocation2 + $0x110] sm:$0xff]  ;;  %v8549_v6 = vpop.f32.mrb[32].mxu0  ;;  %v8721_v7 = vpop.f32.mrb[32].mxu1 }
 0x128   :  { %v5263_v51 = vmax.f32 %v4920_v39, 0.0  ;;  %v5435_v53 = vmax.f32 %v5092_v40, 0.0  ;;  %v5093_v55 = vadd.f32 %v10641_v18, %v4743_v50  ;;  %4228 = vst.msk [vmem:[#allocation2 + $0xe8] sm:$0xff] %vm19_vm3, %v3884_v43  ;;  %4400 = vst.msk [vmem:[#allocation2 + $0x648] sm:$0xff] %vm19_vm3, %v4056_v44  ;;  %v570_v57 = vld [vmem:[#allocation2 + $0x670] sm:$0xff]  ;;  %v396_v58 = vld [vmem:[#allocation2 + $0x100] sm:$0xff]  ;;  %v8020_v59 = vpack.c.bf16 %v5265_v45, %v5265_v45 }
 0x129   :  { %v8192_v60 = vpack.c.bf16 %v5437_v46, %v5437_v46  ;;  %v5266_v61 = vmax.f32 %v4923_v47, 0.0  ;;  %v5438_v62 = vmax.f32 %v5095_v48, 0.0  ;;  %v568_v63 = vld [vmem:[#allocation2 + $0x660] sm:$0xff]  ;;  %v399_v0 = vld [vmem:[#allocation2 + $0x118] sm:$0xff]  ;;  %v5264_v4 = vmax.f32 %v4921_v54, 0.0  ;;  %v397_v8 = vld [vmem:[#allocation2 + $0x108] sm:$0xff] }
 0x12a   :  { %v571_v1 = vld [vmem:[#allocation2 + $0x678] sm:$0xff]  ;;  %v8018_v2 = vpack.c.bf16 %v5263_v51, %v5263_v51  ;;  %v8190_v3 = vpack.c.bf16 %v5435_v53, %v5435_v53  ;;  %v5436_v5 = vmax.f32 %v5093_v55, 0.0  ;;  %v569_v9 = vld [vmem:[#allocation2 + $0x668] sm:$0xff]  ;;  %6982 = vst.msk [vmem:[%s12548_s3 + $0x68] sm:$0xf] %vm6955_vm4, %v8020_v59  ;;  %v3889_v12 = vadd.f32 %v8549_v6, %v398_v56  ;;  %v2609_v14 = vpop.f32.mrb[33].mxu0 }
 0x12b   :  { %7154 = vst.msk [vmem:[%s12548_s3 + $0x318] sm:$0xf] %vm6955_vm4, %v8192_v60  ;;  %v8021_v10 = vpack.c.bf16 %v5266_v61, %v5266_v61  ;;  %v8193_v11 = vpack.c.bf16 %v5438_v62, %v5438_v62  ;;  %v4061_v13 = vadd.f32 %v8721_v7, %v570_v57  ;;  %v3297_v15 = vpop.f32.mrb[33].mxu1  ;;  %v9009_v16 = vld [vmem:[%s12546_s0 + $0x238] sm:$0xff]   ;;  %v9010_v17 = vld [vmem:[%s12546_s0 + $0x4e8] sm:$0xff]   ;;  %v9011_v19 = vld [vmem:[%s12546_s0 + $0x240] sm:$0xff]   ;;  %v8019_v20 = vpack.c.bf16 %v5264_v4, %v5264_v4 }
 0x12c   :  { %6980 = vst.msk [vmem:[%s12548_s3 + $0x60] sm:$0xf] %vm6955_vm4, %v8018_v2  ;;  %7152 = vst.msk [vmem:[%s12548_s3 + $0x310] sm:$0xf] %vm6955_vm4, %v8190_v3  ;;  %v8191_v21 = vpack.c.bf16 %v5436_v5, %v5436_v5  ;;  %v4576_v22 = vld [vmem:[#allocation2 + $0xf0] sm:$0xff]  ;;  %v3887_v24 = vadd.f32 %v2609_v14, %v396_v58  ;;  %v4059_v25 = vadd.f32 %v3297_v15, %v568_v63  ;;  %v8550_v26 = vpop.f32.mrb[34].mxu0  ;;  %8656 = vmatmul.mubr.msk.bf16.gmra.mrb[140].mxu0 %vm1923_vm2, %v9009_v16 }
 0x12d   :  { %v4748_v23 = vld [vmem:[#allocation2 + $0x650] sm:$0xff]  ;;  %v8722_v27 = vpop.f32.mrb[34].mxu1  ;;  %6983 = vst.msk [vmem:[%s12548_s3 + $0x6c] sm:$0xf] %vm6955_vm4, %v8021_v10  ;;  %7155 = vst.msk [vmem:[%s12548_s3 + $0x31c] sm:$0xf] %vm6955_vm4, %v8193_v11  ;;  %v4926_v29 = vadd.f32 %v10641_v18, %v4576_v22  ;;  %v3890_v33 = vadd.f32 %v8550_v26, %v399_v0  ;;  %8828 = vmatmul.mubr.msk.bf16.gmra.mrb[140].mxu1 %vm1923_vm2, %v9010_v17  ;;  %8659 = vmatprep.mubr.msk.bf16.mxu0 %vm1923_vm2, %v9011_v19 }
 0x12e   :  { %v9012_v28 = vld [vmem:[%s12546_s0 + $0x4f0] sm:$0xff]   ;;  %v5098_v30 = vadd.f32 %v10641_v18, %v4748_v23  ;;  %v4574_v31 = vld [vmem:[#allocation2 + $0xe0] sm:$0xff]  ;;  %4233 = vst.msk [vmem:[#allocation2 + $0x110] sm:$0xff] %vm19_vm3, %v3889_v12  ;;  %4405 = vst.msk [vmem:[#allocation2 + $0x670] sm:$0xff] %vm19_vm3, %v4061_v13  ;;  %v4062_v34 = vadd.f32 %v8722_v27, %v571_v1  ;;  %v2612_v35 = vpop.f32.mrb[35].mxu0  ;;  %v3300_v36 = vpop.f32.mrb[35].mxu1 }
 0x12f   :  { %v4746_v32 = vld [vmem:[#allocation2 + $0x640] sm:$0xff]  ;;  %6981 = vst.msk [vmem:[%s12548_s3 + $0x64] sm:$0xf] %vm6955_vm4, %v8019_v20  ;;  %7153 = vst.msk [vmem:[%s12548_s3 + $0x314] sm:$0xf] %vm6955_vm4, %v8191_v21  ;;  %v4924_v37 = vadd.f32 %v10641_v18, %v4574_v31  ;;  %v4577_v39 = vld [vmem:[#allocation2 + $0xf8] sm:$0xff]  ;;  %v3888_v41 = vadd.f32 %v2612_v35, %v397_v8  ;;  %v4060_v42 = vadd.f32 %v3300_v36, %v569_v9  ;;  %8831 = vmatprep.mubr.msk.bf16.mxu1 %vm1923_vm2, %v9012_v28 }
 0x130   :  { %v5096_v38 = vadd.f32 %v10641_v18, %v4746_v32  ;;  %v4749_v40 = vld [vmem:[#allocation2 + $0x658] sm:$0xff]  ;;  %4231 = vst.msk [vmem:[#allocation2 + $0x100] sm:$0xff] %vm19_vm3, %v3887_v24  ;;  %4403 = vst.msk [vmem:[#allocation2 + $0x660] sm:$0xff] %vm19_vm3, %v4059_v25  ;;  %v5269_v43 = vmax.f32 %v4926_v29, 0.0  ;;  %v5441_v44 = vmax.f32 %v5098_v30, 0.0  ;;  %v4927_v45 = vadd.f32 %v10641_v18, %v4577_v39  ;;  %v4575_v47 = vld [vmem:[#allocation2 + $0xe8] sm:$0xff] }
 0x131   :  { %v5099_v46 = vadd.f32 %v10641_v18, %v4749_v40  ;;  %v4747_v48 = vld [vmem:[#allocation2 + $0x648] sm:$0xff]  ;;  %4234 = vst.msk [vmem:[#allocation2 + $0x118] sm:$0xff] %vm19_vm3, %v3890_v33  ;;  %4406 = vst.msk [vmem:[#allocation2 + $0x678] sm:$0xff] %vm19_vm3, %v4062_v34  ;;  %v5267_v49 = vmax.f32 %v4924_v37, 0.0  ;;  %v4925_v51 = vadd.f32 %v10641_v18, %v4575_v47  ;;  %v402_v54 = vld [vmem:[#allocation2 + $0x130] sm:$0xff]  ;;  %v8553_v4 = vpop.f32.mrb[36].mxu0 }
 0x132   :  { %v5439_v50 = vmax.f32 %v5096_v38, 0.0  ;;  %v5097_v53 = vadd.f32 %v10641_v18, %v4747_v48  ;;  %4232 = vst.msk [vmem:[#allocation2 + $0x108] sm:$0xff] %vm19_vm3, %v3888_v41  ;;  %4404 = vst.msk [vmem:[#allocation2 + $0x668] sm:$0xff] %vm19_vm3, %v4060_v42  ;;  %v574_v55 = vld [vmem:[#allocation2 + $0x690] sm:$0xff]  ;;  %v400_v56 = vld [vmem:[#allocation2 + $0x120] sm:$0xff]  ;;  %v8024_v57 = vpack.c.bf16 %v5269_v43, %v5269_v43  ;;  %v8196_v58 = vpack.c.bf16 %v5441_v44, %v5441_v44  ;;  %v8725_v5 = vpop.f32.mrb[36].mxu1 }
 0x133   :  { %v5270_v59 = vmax.f32 %v4927_v45, 0.0  ;;  %v5442_v60 = vmax.f32 %v5099_v46, 0.0  ;;  %v572_v61 = vld [vmem:[#allocation2 + $0x680] sm:$0xff]  ;;  %v403_v62 = vld [vmem:[#allocation2 + $0x138] sm:$0xff]  ;;  %v8022_v0 = vpack.c.bf16 %v5267_v49, %v5267_v49  ;;  %v5268_v2 = vmax.f32 %v4925_v51, 0.0  ;;  %v401_v6 = vld [vmem:[#allocation2 + $0x128] sm:$0xff] }
 0x134   :  { %v575_v63 = vld [vmem:[#allocation2 + $0x698] sm:$0xff]  ;;  %v8194_v1 = vpack.c.bf16 %v5439_v50, %v5439_v50  ;;  %v5440_v3 = vmax.f32 %v5097_v53, 0.0  ;;  %v573_v7 = vld [vmem:[#allocation2 + $0x688] sm:$0xff]  ;;  %6986 = vst.msk [vmem:[%s12548_s3 + $0x78] sm:$0xf] %vm6955_vm4, %v8024_v57  ;;  %v3893_v10 = vadd.f32 %v8553_v4, %v402_v54  ;;  %v4065_v11 = vadd.f32 %v8725_v5, %v574_v55  ;;  %v2625_v12 = vpop.f32.mrb[37].mxu0 }
 0x135   :  { %7158 = vst.msk [vmem:[%s12548_s3 + $0x328] sm:$0xf] %vm6955_vm4, %v8196_v58  ;;  %v8025_v8 = vpack.c.bf16 %v5270_v59, %v5270_v59  ;;  %v8197_v9 = vpack.c.bf16 %v5442_v60, %v5442_v60  ;;  %v3313_v13 = vpop.f32.mrb[37].mxu1  ;;  %v9013_v14 = vld [vmem:[%s12546_s0 + $0x248] sm:$0xff]   ;;  %v9014_v15 = vld [vmem:[%s12546_s0 + $0x4f8] sm:$0xff]   ;;  %v9015_v16 = vld [vmem:[%s12546_s0 + $0x250] sm:$0xff]   ;;  %v8023_v17 = vpack.c.bf16 %v5268_v2, %v5268_v2  ;;  %v3891_v22 = vadd.f32 %v2625_v12, %v400_v56 }
 0x136   :  { %6984 = vst.msk [vmem:[%s12548_s3 + $0x70] sm:$0xf] %vm6955_vm4, %v8022_v0  ;;  %7156 = vst.msk [vmem:[%s12548_s3 + $0x320] sm:$0xf] %vm6955_vm4, %v8194_v1  ;;  %v8195_v19 = vpack.c.bf16 %v5440_v3, %v5440_v3  ;;  %v4580_v20 = vld [vmem:[#allocation2 + $0x110] sm:$0xff]  ;;  %v4063_v23 = vadd.f32 %v3313_v13, %v572_v61  ;;  %v8554_v24 = vpop.f32.mrb[38].mxu0  ;;  %8660 = vmatmul.mubr.msk.bf16.gmra.mrb[144].mxu0 %vm1923_vm2, %v9013_v14  ;;  %8832 = vmatmul.mubr.msk.bf16.gmra.mrb[144].mxu1 %vm1923_vm2, %v9014_v15 }
 0x137   :  { %v4752_v21 = vld [vmem:[#allocation2 + $0x670] sm:$0xff]  ;;  %v8726_v25 = vpop.f32.mrb[38].mxu1  ;;  %v9016_v26 = vld [vmem:[%s12546_s0 + $0x500] sm:$0xff]   ;;  %6987 = vst.msk [vmem:[%s12548_s3 + $0x7c] sm:$0xf] %vm6955_vm4, %v8025_v8  ;;  %v4930_v27 = vadd.f32 %v10641_v18, %v4580_v20  ;;  %v3894_v31 = vadd.f32 %v8554_v24, %v403_v62  ;;  %v2628_v33 = vpop.f32.mrb[39].mxu0  ;;  %8663 = vmatprep.mubr.msk.bf16.mxu0 %vm1923_vm2, %v9015_v16 }
 0x138   :  { %7159 = vst.msk [vmem:[%s12548_s3 + $0x32c] sm:$0xf] %vm6955_vm4, %v8197_v9  ;;  %v5102_v28 = vadd.f32 %v10641_v18, %v4752_v21  ;;  %v4578_v29 = vld [vmem:[#allocation2 + $0x100] sm:$0xff]  ;;  %v4066_v32 = vadd.f32 %v8726_v25, %v575_v63  ;;  %v3316_v34 = vpop.f32.mrb[39].mxu1  ;;  %6985 = vst.msk [vmem:[%s12548_s3 + $0x74] sm:$0xf] %vm6955_vm4, %v8023_v17  ;;  %v3892_v39 = vadd.f32 %v2628_v33, %v401_v6  ;;  %8835 = vmatprep.mubr.msk.bf16.mxu1 %vm1923_vm2, %v9016_v26 }
 0x139   :  { %v4750_v30 = vld [vmem:[#allocation2 + $0x660] sm:$0xff]  ;;  %4237 = vst.msk [vmem:[#allocation2 + $0x130] sm:$0xff] %vm19_vm3, %v3893_v10  ;;  %4409 = vst.msk [vmem:[#allocation2 + $0x690] sm:$0xff] %vm19_vm3, %v4065_v11  ;;  %v4928_v35 = vadd.f32 %v10641_v18, %v4578_v29  ;;  %v4581_v37 = vld [vmem:[#allocation2 + $0x118] sm:$0xff]  ;;  %v4064_v40 = vadd.f32 %v3316_v34, %v573_v7  ;;  %v5273_v41 = vmax.f32 %v4930_v27, 0.0  ;;  %v8557_v2 = vpop.f32.mrb[40].mxu0 }
 0x13a   :  { %7157 = vst.msk [vmem:[%s12548_s3 + $0x324] sm:$0xf] %vm6955_vm4, %v8195_v19  ;;  %v5100_v36 = vadd.f32 %v10641_v18, %v4750_v30  ;;  %v4753_v38 = vld [vmem:[#allocation2 + $0x678] sm:$0xff]  ;;  %v5445_v42 = vmax.f32 %v5102_v28, 0.0  ;;  %v4931_v43 = vadd.f32 %v10641_v18, %v4581_v37  ;;  %v4579_v45 = vld [vmem:[#allocation2 + $0x108] sm:$0xff]  ;;  %v406_v51 = vld [vmem:[#allocation2 + $0x150] sm:$0xff] }
 0x13b   :  { %4235 = vst.msk [vmem:[#allocation2 + $0x120] sm:$0xff] %vm19_vm3, %v3891_v22  ;;  %4407 = vst.msk [vmem:[#allocation2 + $0x680] sm:$0xff] %vm19_vm3, %v4063_v23  ;;  %v5103_v44 = vadd.f32 %v10641_v18, %v4753_v38  ;;  %v4751_v46 = vld [vmem:[#allocation2 + $0x668] sm:$0xff]  ;;  %v5271_v47 = vmax.f32 %v4928_v35, 0.0  ;;  %v4929_v49 = vadd.f32 %v10641_v18, %v4579_v45  ;;  %v578_v53 = vld [vmem:[#allocation2 + $0x6b0] sm:$0xff]  ;;  %v8028_v55 = vpack.c.bf16 %v5273_v41, %v5273_v41  ;;  %v8729_v3 = vpop.f32.mrb[40].mxu1 }
 0x13c   :  { %4238 = vst.msk [vmem:[#allocation2 + $0x138] sm:$0xff] %vm19_vm3, %v3894_v31  ;;  %4410 = vst.msk [vmem:[#allocation2 + $0x698] sm:$0xff] %vm19_vm3, %v4066_v32  ;;  %v5443_v48 = vmax.f32 %v5100_v36, 0.0  ;;  %v5101_v50 = vadd.f32 %v10641_v18, %v4751_v46  ;;  %v404_v54 = vld [vmem:[#allocation2 + $0x140] sm:$0xff]  ;;  %v8200_v56 = vpack.c.bf16 %v5445_v42, %v5445_v42  ;;  %v5274_v57 = vmax.f32 %v4931_v43, 0.0  ;;  %v407_v60 = vld [vmem:[#allocation2 + $0x158] sm:$0xff] }
 0x13d   :  { %4236 = vst.msk [vmem:[#allocation2 + $0x128] sm:$0xff] %vm19_vm3, %v3892_v39  ;;  %4408 = vst.msk [vmem:[#allocation2 + $0x688] sm:$0xff] %vm19_vm3, %v4064_v40  ;;  %v5446_v58 = vmax.f32 %v5103_v44, 0.0  ;;  %v576_v59 = vld [vmem:[#allocation2 + $0x6a0] sm:$0xff]  ;;  %v579_v61 = vld [vmem:[#allocation2 + $0x6b8] sm:$0xff]  ;;  %v8026_v62 = vpack.c.bf16 %v5271_v47, %v5271_v47  ;;  %v5272_v0 = vmax.f32 %v4929_v49, 0.0  ;;  %v3897_v8 = vadd.f32 %v8557_v2, %v406_v51 }
 0x13e   :  { %v8198_v63 = vpack.c.bf16 %v5443_v48, %v5443_v48  ;;  %v5444_v1 = vmax.f32 %v5101_v50, 0.0  ;;  %v405_v4 = vld [vmem:[#allocation2 + $0x148] sm:$0xff]  ;;  %6990 = vst.msk [vmem:[%s12548_s3 + $0x88] sm:$0xf] %vm6955_vm4, %v8028_v55  ;;  %7162 = vst.msk [vmem:[%s12548_s3 + $0x338] sm:$0xf] %vm6955_vm4, %v8200_v56  ;;  %v8029_v6 = vpack.c.bf16 %v5274_v57, %v5274_v57  ;;  %v4069_v9 = vadd.f32 %v8729_v3, %v578_v53 }
 0x13f   :  { %v577_v5 = vld [vmem:[#allocation2 + $0x6a8] sm:$0xff]  ;;  %v8201_v7 = vpack.c.bf16 %v5446_v58, %v5446_v58  ;;  %v2641_v10 = vpop.f32.mrb[41].mxu0  ;;  %v3329_v11 = vpop.f32.mrb[41].mxu1  ;;  %v9017_v12 = vld [vmem:[%s12546_s0 + $0x258] sm:$0xff]   ;;  %v9019_v14 = vld [vmem:[%s12546_s0 + $0x260] sm:$0xff]   ;;  %v8027_v15 = vpack.c.bf16 %v5272_v0, %v5272_v0  ;;  %4241 = vst.msk [vmem:[#allocation2 + $0x150] sm:$0xff] %vm19_vm3, %v3897_v8 }
 0x140   :  { %v9018_v13 = vld [vmem:[%s12546_s0 + $0x508] sm:$0xff]   ;;  %6988 = vst.msk [vmem:[%s12548_s3 + $0x80] sm:$0xf] %vm6955_vm4, %v8026_v62  ;;  %7160 = vst.msk [vmem:[%s12548_s3 + $0x330] sm:$0xf] %vm6955_vm4, %v8198_v63  ;;  %v8199_v16 = vpack.c.bf16 %v5444_v1, %v5444_v1  ;;  %v4584_v17 = vld [vmem:[#allocation2 + $0x130] sm:$0xff]  ;;  %v3895_v20 = vadd.f32 %v2641_v10, %v404_v54  ;;  %v4067_v21 = vadd.f32 %v3329_v11, %v576_v59  ;;  %8664 = vmatmul.mubr.msk.bf16.gmra.mrb[148].mxu0 %vm1923_vm2, %v9017_v12 }
 0x141   :  { %v4756_v19 = vld [vmem:[#allocation2 + $0x690] sm:$0xff]  ;;  %v8558_v22 = vpop.f32.mrb[42].mxu0  ;;  %v8730_v23 = vpop.f32.mrb[42].mxu1  ;;  %6991 = vst.msk [vmem:[%s12548_s3 + $0x8c] sm:$0xf] %vm6955_vm4, %v8029_v6  ;;  %v4934_v25 = vadd.f32 %v10641_v18, %v4584_v17  ;;  %8836 = vmatmul.mubr.msk.bf16.gmra.mrb[148].mxu1 %vm1923_vm2, %v9018_v13  ;;  %v408_v51 = vld [vmem:[#allocation2 + $0x160] sm:$0xff]  ;;  %8667 = vmatprep.mubr.msk.bf16.mxu0 %vm1923_vm2, %v9019_v14 }
 0x142   :  { %v9020_v24 = vld [vmem:[%s12546_s0 + $0x510] sm:$0xff]   ;;  %7163 = vst.msk [vmem:[%s12548_s3 + $0x33c] sm:$0xf] %vm6955_vm4, %v8201_v7  ;;  %v5106_v26 = vadd.f32 %v10641_v18, %v4756_v19  ;;  %v4582_v27 = vld [vmem:[#allocation2 + $0x120] sm:$0xff]  ;;  %v3898_v29 = vadd.f32 %v8558_v22, %v407_v60  ;;  %v4070_v30 = vadd.f32 %v8730_v23, %v579_v61  ;;  %v2644_v31 = vpop.f32.mrb[43].mxu0  ;;  %v3332_v32 = vpop.f32.mrb[43].mxu1 }
 0x143   :  { %v4754_v28 = vld [vmem:[#allocation2 + $0x680] sm:$0xff]  ;;  %4413 = vst.msk [vmem:[#allocation2 + $0x6b0] sm:$0xff] %vm19_vm3, %v4069_v9  ;;  %v4932_v33 = vadd.f32 %v10641_v18, %v4582_v27  ;;  %v4585_v35 = vld [vmem:[#allocation2 + $0x138] sm:$0xff]  ;;  %4239 = vst.msk [vmem:[#allocation2 + $0x140] sm:$0xff] %vm19_vm3, %v3895_v20  ;;  %v3896_v37 = vadd.f32 %v2644_v31, %v405_v4  ;;  %v4068_v38 = vadd.f32 %v3332_v32, %v577_v5  ;;  %v5277_v39 = vmax.f32 %v4934_v25, 0.0  ;;  %v8561_v0 = vpop.f32.mrb[44].mxu0 }
 0x144   :  { %6989 = vst.msk [vmem:[%s12548_s3 + $0x84] sm:$0xf] %vm6955_vm4, %v8027_v15  ;;  %7161 = vst.msk [vmem:[%s12548_s3 + $0x334] sm:$0xf] %vm6955_vm4, %v8199_v16  ;;  %v5104_v34 = vadd.f32 %v10641_v18, %v4754_v28  ;;  %v4757_v36 = vld [vmem:[#allocation2 + $0x698] sm:$0xff]  ;;  %v5449_v40 = vmax.f32 %v5106_v26, 0.0  ;;  %v4935_v41 = vadd.f32 %v10641_v18, %v4585_v35  ;;  %8839 = vmatprep.mubr.msk.bf16.mxu1 %vm1923_vm2, %v9020_v24 }
 0x145   :  { %4411 = vst.msk [vmem:[#allocation2 + $0x6a0] sm:$0xff] %vm19_vm3, %v4067_v21  ;;  %v5107_v42 = vadd.f32 %v10641_v18, %v4757_v36  ;;  %v4583_v43 = vld [vmem:[#allocation2 + $0x128] sm:$0xff]  ;;  %4242 = vst.msk [vmem:[#allocation2 + $0x158] sm:$0xff] %vm19_vm3, %v3898_v29  ;;  %v5275_v45 = vmax.f32 %v4932_v33, 0.0  ;;  %v410_v49 = vld [vmem:[#allocation2 + $0x170] sm:$0xff]  ;;  %v8032_v53 = vpack.c.bf16 %v5277_v39, %v5277_v39  ;;  %v8733_v1 = vpop.f32.mrb[44].mxu1 }
 0x146   :  { %v4755_v44 = vld [vmem:[#allocation2 + $0x688] sm:$0xff]  ;;  %4414 = vst.msk [vmem:[#allocation2 + $0x6b8] sm:$0xff] %vm19_vm3, %v4070_v30  ;;  %v5447_v46 = vmax.f32 %v5104_v34, 0.0  ;;  %v4933_v47 = vadd.f32 %v10641_v18, %v4583_v43  ;;  %4240 = vst.msk [vmem:[#allocation2 + $0x148] sm:$0xff] %vm19_vm3, %v3896_v37  ;;  %v582_v50 = vld [vmem:[#allocation2 + $0x6d0] sm:$0xff]  ;;  %v8204_v54 = vpack.c.bf16 %v5449_v40, %v5449_v40  ;;  %v5278_v55 = vmax.f32 %v4935_v41, 0.0 }
 0x147   :  { %v5105_v48 = vadd.f32 %v10641_v18, %v4755_v44  ;;  %4412 = vst.msk [vmem:[#allocation2 + $0x6a8] sm:$0xff] %vm19_vm3, %v4068_v38  ;;  %v5450_v56 = vmax.f32 %v5107_v42, 0.0  ;;  %v580_v57 = vld [vmem:[#allocation2 + $0x6c0] sm:$0xff]  ;;  %v411_v58 = vld [vmem:[#allocation2 + $0x178] sm:$0xff]  ;;  %v8030_v60 = vpack.c.bf16 %v5275_v45, %v5275_v45  ;;  %v409_v2 = vld [vmem:[#allocation2 + $0x168] sm:$0xff]  ;;  %v3901_v6 = vadd.f32 %v8561_v0, %v410_v49  ;;  %v2657_v8 = vpop.f32.mrb[45].mxu0 }
 0x148   :  { %v583_v59 = vld [vmem:[#allocation2 + $0x6d8] sm:$0xff]  ;;  %v8202_v61 = vpack.c.bf16 %v5447_v46, %v5447_v46  ;;  %v5276_v62 = vmax.f32 %v4933_v47, 0.0  ;;  %v581_v3 = vld [vmem:[#allocation2 + $0x6c8] sm:$0xff]  ;;  %6994 = vst.msk [vmem:[%s12548_s3 + $0x98] sm:$0xf] %vm6955_vm4, %v8032_v53  ;;  %v8033_v4 = vpack.c.bf16 %v5278_v55, %v5278_v55  ;;  %v4073_v7 = vadd.f32 %v8733_v1, %v582_v50  ;;  %v3345_v9 = vpop.f32.mrb[45].mxu1 }
 0x149   :  { %v5448_v63 = vmax.f32 %v5105_v48, 0.0  ;;  %7166 = vst.msk [vmem:[%s12548_s3 + $0x348] sm:$0xf] %vm6955_vm4, %v8204_v54  ;;  %v8205_v5 = vpack.c.bf16 %v5450_v56, %v5450_v56  ;;  %v9021_v10 = vld [vmem:[%s12546_s0 + $0x268] sm:$0xff]   ;;  %v9022_v11 = vld [vmem:[%s12546_s0 + $0x518] sm:$0xff]   ;;  %v9023_v12 = vld [vmem:[%s12546_s0 + $0x270] sm:$0xff]   ;;  %v3899_v17 = vadd.f32 %v2657_v8, %v408_v51  ;;  %v4071_v19 = vadd.f32 %v3345_v9, %v580_v57 }
 0x14a   :  { %6992 = vst.msk [vmem:[%s12548_s3 + $0x90] sm:$0xf] %vm6955_vm4, %v8030_v60  ;;  %7164 = vst.msk [vmem:[%s12548_s3 + $0x340] sm:$0xf] %vm6955_vm4, %v8202_v61  ;;  %v8031_v13 = vpack.c.bf16 %v5276_v62, %v5276_v62  ;;  %v4588_v15 = vld [vmem:[#allocation2 + $0x150] sm:$0xff]  ;;  %v8562_v20 = vpop.f32.mrb[46].mxu0  ;;  %8668 = vmatmul.mubr.msk.bf16.gmra.mrb[152].mxu0 %vm1923_vm2, %v9021_v10  ;;  %8840 = vmatmul.mubr.msk.bf16.gmra.mrb[152].mxu1 %vm1923_vm2, %v9022_v11 }
 0x14b   :  { %v8203_v14 = vpack.c.bf16 %v5448_v63, %v5448_v63  ;;  %v4760_v16 = vld [vmem:[#allocation2 + $0x6b0] sm:$0xff]  ;;  %v8734_v21 = vpop.f32.mrb[46].mxu1  ;;  %v9024_v22 = vld [vmem:[%s12546_s0 + $0x520] sm:$0xff]   ;;  %6995 = vst.msk [vmem:[%s12548_s3 + $0x9c] sm:$0xf] %vm6955_vm4, %v8033_v4  ;;  %v4938_v23 = vadd.f32 %v10641_v18, %v4588_v15  ;;  %v3902_v27 = vadd.f32 %v8562_v20, %v411_v58  ;;  %v2660_v29 = vpop.f32.mrb[47].mxu0  ;;  %8671 = vmatprep.mubr.msk.bf16.mxu0 %vm1923_vm2, %v9023_v12 }
 0x14c   :  { %7167 = vst.msk [vmem:[%s12548_s3 + $0x34c] sm:$0xf] %vm6955_vm4, %v8205_v5  ;;  %v5110_v24 = vadd.f32 %v10641_v18, %v4760_v16  ;;  %v4586_v25 = vld [vmem:[#allocation2 + $0x140] sm:$0xff]  ;;  %v4074_v28 = vadd.f32 %v8734_v21, %v583_v59  ;;  %v3348_v30 = vpop.f32.mrb[47].mxu1  ;;  %6993 = vst.msk [vmem:[%s12548_s3 + $0x94] sm:$0xf] %vm6955_vm4, %v8031_v13  ;;  %v3900_v35 = vadd.f32 %v2660_v29, %v409_v2  ;;  %8843 = vmatprep.mubr.msk.bf16.mxu1 %vm1923_vm2, %v9024_v22 }
 0x14d   :  { %v4758_v26 = vld [vmem:[#allocation2 + $0x6a0] sm:$0xff]  ;;  %4245 = vst.msk [vmem:[#allocation2 + $0x170] sm:$0xff] %vm19_vm3, %v3901_v6  ;;  %4417 = vst.msk [vmem:[#allocation2 + $0x6d0] sm:$0xff] %vm19_vm3, %v4073_v7  ;;  %v4936_v31 = vadd.f32 %v10641_v18, %v4586_v25  ;;  %v4589_v33 = vld [vmem:[#allocation2 + $0x158] sm:$0xff]  ;;  %v4072_v36 = vadd.f32 %v3348_v30, %v581_v3  ;;  %v5281_v37 = vmax.f32 %v4938_v23, 0.0  ;;  %v8565_v62 = vpop.f32.mrb[48].mxu0 }
 0x14e   :  { %7165 = vst.msk [vmem:[%s12548_s3 + $0x344] sm:$0xf] %vm6955_vm4, %v8203_v14  ;;  %v5108_v32 = vadd.f32 %v10641_v18, %v4758_v26  ;;  %v4761_v34 = vld [vmem:[#allocation2 + $0x6b8] sm:$0xff]  ;;  %v5453_v38 = vmax.f32 %v5110_v24, 0.0  ;;  %v4939_v39 = vadd.f32 %v10641_v18, %v4589_v33  ;;  %v4587_v41 = vld [vmem:[#allocation2 + $0x148] sm:$0xff]  ;;  %v414_v47 = vld [vmem:[#allocation2 + $0x190] sm:$0xff] }
 0x14f   :  { %4243 = vst.msk [vmem:[#allocation2 + $0x160] sm:$0xff] %vm19_vm3, %v3899_v17  ;;  %4415 = vst.msk [vmem:[#allocation2 + $0x6c0] sm:$0xff] %vm19_vm3, %v4071_v19  ;;  %v5111_v40 = vadd.f32 %v10641_v18, %v4761_v34  ;;  %v4759_v42 = vld [vmem:[#allocation2 + $0x6a8] sm:$0xff]  ;;  %v5279_v43 = vmax.f32 %v4936_v31, 0.0  ;;  %v4937_v45 = vadd.f32 %v10641_v18, %v4587_v41  ;;  %v586_v48 = vld [vmem:[#allocation2 + $0x6f0] sm:$0xff]  ;;  %v8036_v50 = vpack.c.bf16 %v5281_v37, %v5281_v37  ;;  %v8737_v63 = vpop.f32.mrb[48].mxu1 }
 0x150   :  { %4246 = vst.msk [vmem:[#allocation2 + $0x178] sm:$0xff] %vm19_vm3, %v3902_v27  ;;  %4418 = vst.msk [vmem:[#allocation2 + $0x6d8] sm:$0xff] %vm19_vm3, %v4074_v28  ;;  %v5451_v44 = vmax.f32 %v5108_v32, 0.0  ;;  %v5109_v46 = vadd.f32 %v10641_v18, %v4759_v42  ;;  %v412_v49 = vld [vmem:[#allocation2 + $0x180] sm:$0xff]  ;;  %v8208_v51 = vpack.c.bf16 %v5453_v38, %v5453_v38  ;;  %v5282_v53 = vmax.f32 %v4939_v39, 0.0  ;;  %v415_v56 = vld [vmem:[#allocation2 + $0x198] sm:$0xff] }
 0x151   :  { %4244 = vst.msk [vmem:[#allocation2 + $0x168] sm:$0xff] %vm19_vm3, %v3900_v35  ;;  %4416 = vst.msk [vmem:[#allocation2 + $0x6c8] sm:$0xff] %vm19_vm3, %v4072_v36  ;;  %v5454_v54 = vmax.f32 %v5111_v40, 0.0  ;;  %v584_v55 = vld [vmem:[#allocation2 + $0x6e0] sm:$0xff]  ;;  %v587_v57 = vld [vmem:[#allocation2 + $0x6f8] sm:$0xff]  ;;  %v8034_v58 = vpack.c.bf16 %v5279_v43, %v5279_v43  ;;  %v5280_v60 = vmax.f32 %v4937_v45, 0.0  ;;  %v3905_v4 = vadd.f32 %v8565_v62, %v414_v47 }
 0x152   :  { %v8206_v59 = vpack.c.bf16 %v5451_v44, %v5451_v44  ;;  %v5452_v61 = vmax.f32 %v5109_v46, 0.0  ;;  %v413_v0 = vld [vmem:[#allocation2 + $0x188] sm:$0xff]  ;;  %6998 = vst.msk [vmem:[%s12548_s3 + $0xa8] sm:$0xf] %vm6955_vm4, %v8036_v50  ;;  %7170 = vst.msk [vmem:[%s12548_s3 + $0x358] sm:$0xf] %vm6955_vm4, %v8208_v51  ;;  %v8037_v2 = vpack.c.bf16 %v5282_v53, %v5282_v53  ;;  %v4077_v5 = vadd.f32 %v8737_v63, %v586_v48 }
 0x153   :  { %v585_v1 = vld [vmem:[#allocation2 + $0x6e8] sm:$0xff]  ;;  %v8209_v3 = vpack.c.bf16 %v5454_v54, %v5454_v54  ;;  %v2673_v6 = vpop.f32.mrb[49].mxu0  ;;  %v3361_v7 = vpop.f32.mrb[49].mxu1  ;;  %v9025_v8 = vld [vmem:[%s12546_s0 + $0x278] sm:$0xff]   ;;  %v9027_v10 = vld [vmem:[%s12546_s0 + $0x280] sm:$0xff]   ;;  %v8035_v11 = vpack.c.bf16 %v5280_v60, %v5280_v60  ;;  %4249 = vst.msk [vmem:[#allocation2 + $0x190] sm:$0xff] %vm19_vm3, %v3905_v4 }
 0x154   :  { %v9026_v9 = vld [vmem:[%s12546_s0 + $0x528] sm:$0xff]   ;;  %6996 = vst.msk [vmem:[%s12548_s3 + $0xa0] sm:$0xf] %vm6955_vm4, %v8034_v58  ;;  %7168 = vst.msk [vmem:[%s12548_s3 + $0x350] sm:$0xf] %vm6955_vm4, %v8206_v59  ;;  %v8207_v12 = vpack.c.bf16 %v5452_v61, %v5452_v61  ;;  %v4592_v13 = vld [vmem:[#allocation2 + $0x170] sm:$0xff]  ;;  %v3903_v15 = vadd.f32 %v2673_v6, %v412_v49  ;;  %v4075_v16 = vadd.f32 %v3361_v7, %v584_v55  ;;  %8672 = vmatmul.mubr.msk.bf16.gmra.mrb[156].mxu0 %vm1923_vm2, %v9025_v8 }
 0x155   :  { %v4764_v14 = vld [vmem:[#allocation2 + $0x6d0] sm:$0xff]  ;;  %v8566_v17 = vpop.f32.mrb[50].mxu0  ;;  %v8738_v19 = vpop.f32.mrb[50].mxu1  ;;  %6999 = vst.msk [vmem:[%s12548_s3 + $0xac] sm:$0xf] %vm6955_vm4, %v8037_v2  ;;  %v4942_v21 = vadd.f32 %v10641_v18, %v4592_v13  ;;  %8844 = vmatmul.mubr.msk.bf16.gmra.mrb[156].mxu1 %vm1923_vm2, %v9026_v9  ;;  %v416_v47 = vld [vmem:[#allocation2 + $0x1a0] sm:$0xff]  ;;  %8675 = vmatprep.mubr.msk.bf16.mxu0 %vm1923_vm2, %v9027_v10 }
 0x156   :  { %v9028_v20 = vld [vmem:[%s12546_s0 + $0x530] sm:$0xff]   ;;  %7171 = vst.msk [vmem:[%s12548_s3 + $0x35c] sm:$0xf] %vm6955_vm4, %v8209_v3  ;;  %v5114_v22 = vadd.f32 %v10641_v18, %v4764_v14  ;;  %v4590_v23 = vld [vmem:[#allocation2 + $0x160] sm:$0xff]  ;;  %v3906_v25 = vadd.f32 %v8566_v17, %v415_v56  ;;  %v4078_v26 = vadd.f32 %v8738_v19, %v587_v57  ;;  %v2676_v27 = vpop.f32.mrb[51].mxu0  ;;  %v3364_v28 = vpop.f32.mrb[51].mxu1 }
 0x157   :  { %v4762_v24 = vld [vmem:[#allocation2 + $0x6c0] sm:$0xff]  ;;  %4421 = vst.msk [vmem:[#allocation2 + $0x6f0] sm:$0xff] %vm19_vm3, %v4077_v5  ;;  %v4940_v29 = vadd.f32 %v10641_v18, %v4590_v23  ;;  %v4593_v31 = vld [vmem:[#allocation2 + $0x178] sm:$0xff]  ;;  %4247 = vst.msk [vmem:[#allocation2 + $0x180] sm:$0xff] %vm19_vm3, %v3903_v15  ;;  %v3904_v33 = vadd.f32 %v2676_v27, %v413_v0  ;;  %v4076_v34 = vadd.f32 %v3364_v28, %v585_v1  ;;  %v5285_v35 = vmax.f32 %v4942_v21, 0.0  ;;  %v8569_v60 = vpop.f32.mrb[52].mxu0 }
 0x158   :  { %6997 = vst.msk [vmem:[%s12548_s3 + $0xa4] sm:$0xf] %vm6955_vm4, %v8035_v11  ;;  %7169 = vst.msk [vmem:[%s12548_s3 + $0x354] sm:$0xf] %vm6955_vm4, %v8207_v12  ;;  %v5112_v30 = vadd.f32 %v10641_v18, %v4762_v24  ;;  %v4765_v32 = vld [vmem:[#allocation2 + $0x6d8] sm:$0xff]  ;;  %v5457_v36 = vmax.f32 %v5114_v22, 0.0  ;;  %v4943_v37 = vadd.f32 %v10641_v18, %v4593_v31  ;;  %8847 = vmatprep.mubr.msk.bf16.mxu1 %vm1923_vm2, %v9028_v20 }
 0x159   :  { %4419 = vst.msk [vmem:[#allocation2 + $0x6e0] sm:$0xff] %vm19_vm3, %v4075_v16  ;;  %v5115_v38 = vadd.f32 %v10641_v18, %v4765_v32  ;;  %v4591_v39 = vld [vmem:[#allocation2 + $0x168] sm:$0xff]  ;;  %4250 = vst.msk [vmem:[#allocation2 + $0x198] sm:$0xff] %vm19_vm3, %v3906_v25  ;;  %v5283_v41 = vmax.f32 %v4940_v29, 0.0  ;;  %v418_v45 = vld [vmem:[#allocation2 + $0x1b0] sm:$0xff]  ;;  %v8040_v48 = vpack.c.bf16 %v5285_v35, %v5285_v35  ;;  %v8741_v61 = vpop.f32.mrb[52].mxu1 }
 0x15a   :  { %v4763_v40 = vld [vmem:[#allocation2 + $0x6c8] sm:$0xff]  ;;  %4422 = vst.msk [vmem:[#allocation2 + $0x6f8] sm:$0xff] %vm19_vm3, %v4078_v26  ;;  %v5455_v42 = vmax.f32 %v5112_v30, 0.0  ;;  %v4941_v43 = vadd.f32 %v10641_v18, %v4591_v39  ;;  %4248 = vst.msk [vmem:[#allocation2 + $0x188] sm:$0xff] %vm19_vm3, %v3904_v33  ;;  %v590_v46 = vld [vmem:[#allocation2 + $0x710] sm:$0xff]  ;;  %v8212_v49 = vpack.c.bf16 %v5457_v36, %v5457_v36  ;;  %v5286_v50 = vmax.f32 %v4943_v37, 0.0 }
 0x15b   :  { %v5113_v44 = vadd.f32 %v10641_v18, %v4763_v40  ;;  %4420 = vst.msk [vmem:[#allocation2 + $0x6e8] sm:$0xff] %vm19_vm3, %v4076_v34  ;;  %v5458_v51 = vmax.f32 %v5115_v38, 0.0  ;;  %v588_v53 = vld [vmem:[#allocation2 + $0x700] sm:$0xff]  ;;  %v419_v54 = vld [vmem:[#allocation2 + $0x1b8] sm:$0xff]  ;;  %v8038_v56 = vpack.c.bf16 %v5283_v41, %v5283_v41  ;;  %v417_v62 = vld [vmem:[#allocation2 + $0x1a8] sm:$0xff]  ;;  %v3909_v2 = vadd.f32 %v8569_v60, %v418_v45  ;;  %v2689_v4 = vpop.f32.mrb[53].mxu0 }
 0x15c   :  { %v591_v55 = vld [vmem:[#allocation2 + $0x718] sm:$0xff]  ;;  %v8210_v57 = vpack.c.bf16 %v5455_v42, %v5455_v42  ;;  %v5284_v58 = vmax.f32 %v4941_v43, 0.0  ;;  %v589_v63 = vld [vmem:[#allocation2 + $0x708] sm:$0xff]  ;;  %7002 = vst.msk [vmem:[%s12548_s3 + $0xb8] sm:$0xf] %vm6955_vm4, %v8040_v48  ;;  %v8041_v0 = vpack.c.bf16 %v5286_v50, %v5286_v50  ;;  %v4081_v3 = vadd.f32 %v8741_v61, %v590_v46  ;;  %v3377_v5 = vpop.f32.mrb[53].mxu1 }
 0x15d   :  { %v5456_v59 = vmax.f32 %v5113_v44, 0.0  ;;  %7174 = vst.msk [vmem:[%s12548_s3 + $0x368] sm:$0xf] %vm6955_vm4, %v8212_v49  ;;  %v8213_v1 = vpack.c.bf16 %v5458_v51, %v5458_v51  ;;  %v9029_v6 = vld [vmem:[%s12546_s0 + $0x288] sm:$0xff]   ;;  %v9030_v7 = vld [vmem:[%s12546_s0 + $0x538] sm:$0xff]   ;;  %v9031_v8 = vld [vmem:[%s12546_s0 + $0x290] sm:$0xff]   ;;  %v3907_v13 = vadd.f32 %v2689_v4, %v416_v47  ;;  %v4079_v14 = vadd.f32 %v3377_v5, %v588_v53 }
 0x15e   :  { %7000 = vst.msk [vmem:[%s12548_s3 + $0xb0] sm:$0xf] %vm6955_vm4, %v8038_v56  ;;  %7172 = vst.msk [vmem:[%s12548_s3 + $0x360] sm:$0xf] %vm6955_vm4, %v8210_v57  ;;  %v8039_v9 = vpack.c.bf16 %v5284_v58, %v5284_v58  ;;  %v4596_v11 = vld [vmem:[#allocation2 + $0x190] sm:$0xff]  ;;  %v8570_v15 = vpop.f32.mrb[54].mxu0  ;;  %8676 = vmatmul.mubr.msk.bf16.gmra.mrb[160].mxu0 %vm1923_vm2, %v9029_v6  ;;  %8848 = vmatmul.mubr.msk.bf16.gmra.mrb[160].mxu1 %vm1923_vm2, %v9030_v7 }
 0x15f   :  { %v8211_v10 = vpack.c.bf16 %v5456_v59, %v5456_v59  ;;  %v4768_v12 = vld [vmem:[#allocation2 + $0x6f0] sm:$0xff]  ;;  %v8742_v16 = vpop.f32.mrb[54].mxu1  ;;  %v9032_v17 = vld [vmem:[%s12546_s0 + $0x540] sm:$0xff]   ;;  %7003 = vst.msk [vmem:[%s12548_s3 + $0xbc] sm:$0xf] %vm6955_vm4, %v8041_v0  ;;  %v4946_v19 = vadd.f32 %v10641_v18, %v4596_v11  ;;  %v3910_v23 = vadd.f32 %v8570_v15, %v419_v54  ;;  %v2692_v25 = vpop.f32.mrb[55].mxu0  ;;  %8679 = vmatprep.mubr.msk.bf16.mxu0 %vm1923_vm2, %v9031_v8 }
 0x160   :  { %7175 = vst.msk [vmem:[%s12548_s3 + $0x36c] sm:$0xf] %vm6955_vm4, %v8213_v1  ;;  %v5118_v20 = vadd.f32 %v10641_v18, %v4768_v12  ;;  %v4594_v21 = vld [vmem:[#allocation2 + $0x180] sm:$0xff]  ;;  %v4082_v24 = vadd.f32 %v8742_v16, %v591_v55  ;;  %v3380_v26 = vpop.f32.mrb[55].mxu1  ;;  %7001 = vst.msk [vmem:[%s12548_s3 + $0xb4] sm:$0xf] %vm6955_vm4, %v8039_v9  ;;  %v3908_v31 = vadd.f32 %v2692_v25, %v417_v62  ;;  %8851 = vmatprep.mubr.msk.bf16.mxu1 %vm1923_vm2, %v9032_v17 }
 0x161   :  { %v4766_v22 = vld [vmem:[#allocation2 + $0x6e0] sm:$0xff]  ;;  %4253 = vst.msk [vmem:[#allocation2 + $0x1b0] sm:$0xff] %vm19_vm3, %v3909_v2  ;;  %4425 = vst.msk [vmem:[#allocation2 + $0x710] sm:$0xff] %vm19_vm3, %v4081_v3  ;;  %v4944_v27 = vadd.f32 %v10641_v18, %v4594_v21  ;;  %v4597_v29 = vld [vmem:[#allocation2 + $0x198] sm:$0xff]  ;;  %v4080_v32 = vadd.f32 %v3380_v26, %v589_v63  ;;  %v5289_v33 = vmax.f32 %v4946_v19, 0.0  ;;  %v8573_v57 = vpop.f32.mrb[56].mxu0 }
 0x162   :  { %7173 = vst.msk [vmem:[%s12548_s3 + $0x364] sm:$0xf] %vm6955_vm4, %v8211_v10  ;;  %v5116_v28 = vadd.f32 %v10641_v18, %v4766_v22  ;;  %v4769_v30 = vld [vmem:[#allocation2 + $0x6f8] sm:$0xff]  ;;  %v5461_v34 = vmax.f32 %v5118_v20, 0.0  ;;  %v4947_v35 = vadd.f32 %v10641_v18, %v4597_v29  ;;  %v4595_v37 = vld [vmem:[#allocation2 + $0x188] sm:$0xff]  ;;  %v422_v43 = vld [vmem:[#allocation2 + $0x1d0] sm:$0xff] }
 0x163   :  { %4251 = vst.msk [vmem:[#allocation2 + $0x1a0] sm:$0xff] %vm19_vm3, %v3907_v13  ;;  %4423 = vst.msk [vmem:[#allocation2 + $0x700] sm:$0xff] %vm19_vm3, %v4079_v14  ;;  %v5119_v36 = vadd.f32 %v10641_v18, %v4769_v30  ;;  %v4767_v38 = vld [vmem:[#allocation2 + $0x6e8] sm:$0xff]  ;;  %v5287_v39 = vmax.f32 %v4944_v27, 0.0  ;;  %v4945_v41 = vadd.f32 %v10641_v18, %v4595_v37  ;;  %v594_v44 = vld [vmem:[#allocation2 + $0x730] sm:$0xff]  ;;  %v8044_v46 = vpack.c.bf16 %v5289_v33, %v5289_v33  ;;  %v8745_v58 = vpop.f32.mrb[56].mxu1 }
 0x164   :  { %4254 = vst.msk [vmem:[#allocation2 + $0x1b8] sm:$0xff] %vm19_vm3, %v3910_v23  ;;  %4426 = vst.msk [vmem:[#allocation2 + $0x718] sm:$0xff] %vm19_vm3, %v4082_v24  ;;  %v5459_v40 = vmax.f32 %v5116_v28, 0.0  ;;  %v5117_v42 = vadd.f32 %v10641_v18, %v4767_v38  ;;  %v420_v45 = vld [vmem:[#allocation2 + $0x1c0] sm:$0xff]  ;;  %v8216_v47 = vpack.c.bf16 %v5461_v34, %v5461_v34  ;;  %v5290_v48 = vmax.f32 %v4947_v35, 0.0  ;;  %v423_v51 = vld [vmem:[#allocation2 + $0x1d8] sm:$0xff] }
 0x165   :  { %4252 = vst.msk [vmem:[#allocation2 + $0x1a8] sm:$0xff] %vm19_vm3, %v3908_v31  ;;  %4424 = vst.msk [vmem:[#allocation2 + $0x708] sm:$0xff] %vm19_vm3, %v4080_v32  ;;  %v5462_v49 = vmax.f32 %v5119_v36, 0.0  ;;  %v592_v50 = vld [vmem:[#allocation2 + $0x720] sm:$0xff]  ;;  %v595_v53 = vld [vmem:[#allocation2 + $0x738] sm:$0xff]  ;;  %v8042_v54 = vpack.c.bf16 %v5287_v39, %v5287_v39  ;;  %v5288_v55 = vmax.f32 %v4945_v41, 0.0  ;;  %v3913_v63 = vadd.f32 %v8573_v57, %v422_v43 }
 0x166   :  { %v8214_v18 = vpack.c.bf16 %v5459_v40, %v5459_v40  ;;  %v5460_v56 = vmax.f32 %v5117_v42, 0.0  ;;  %v421_v59 = vld [vmem:[#allocation2 + $0x1c8] sm:$0xff]  ;;  %7006 = vst.msk [vmem:[%s12548_s3 + $0xc8] sm:$0xf] %vm6955_vm4, %v8044_v46  ;;  %7178 = vst.msk [vmem:[%s12548_s3 + $0x378] sm:$0xf] %vm6955_vm4, %v8216_v47  ;;  %v8045_v61 = vpack.c.bf16 %v5290_v48, %v5290_v48  ;;  %v4085_v0 = vadd.f32 %v8745_v58, %v594_v44 }
 0x167   :  { %v593_v60 = vld [vmem:[#allocation2 + $0x728] sm:$0xff]  ;;  %v8217_v62 = vpack.c.bf16 %v5462_v49, %v5462_v49  ;;  %v2705_v1 = vpop.f32.mrb[57].mxu0  ;;  %v3393_v2 = vpop.f32.mrb[57].mxu1  ;;  %v9033_v3 = vld [vmem:[%s12546_s0 + $0x298] sm:$0xff]   ;;  %v9035_v5 = vld [vmem:[%s12546_s0 + $0x2a0] sm:$0xff]   ;;  %v8043_v6 = vpack.c.bf16 %v5288_v55, %v5288_v55  ;;  %4257 = vst.msk [vmem:[#allocation2 + $0x1d0] sm:$0xff] %vm19_vm3, %v3913_v63 }
 0x168   :  { %v9034_v4 = vld [vmem:[%s12546_s0 + $0x548] sm:$0xff]   ;;  %7004 = vst.msk [vmem:[%s12548_s3 + $0xc0] sm:$0xf] %vm6955_vm4, %v8042_v54  ;;  %7176 = vst.msk [vmem:[%s12548_s3 + $0x370] sm:$0xf] %vm6955_vm4, %v8214_v18  ;;  %v8215_v7 = vpack.c.bf16 %v5460_v56, %v5460_v56  ;;  %v4600_v8 = vld [vmem:[#allocation2 + $0x1b0] sm:$0xff]  ;;  %v3911_v10 = vadd.f32 %v2705_v1, %v420_v45  ;;  %v4083_v11 = vadd.f32 %v3393_v2, %v592_v50  ;;  %8680 = vmatmul.mubr.msk.bf16.gmra.mrb[164].mxu0 %vm1923_vm2, %v9033_v3 }
 0x169   :  { %v4772_v9 = vld [vmem:[#allocation2 + $0x710] sm:$0xff]  ;;  %v8574_v12 = vpop.f32.mrb[58].mxu0  ;;  %v8746_v13 = vpop.f32.mrb[58].mxu1  ;;  %7007 = vst.msk [vmem:[%s12548_s3 + $0xcc] sm:$0xf] %vm6955_vm4, %v8045_v61  ;;  %8852 = vmatmul.mubr.msk.bf16.gmra.mrb[164].mxu1 %vm1923_vm2, %v9034_v4  ;;  %v424_v43 = vld [vmem:[#allocation2 + $0x1e0] sm:$0xff]  ;;  %8683 = vmatprep.mubr.msk.bf16.mxu0 %vm1923_vm2, %v9035_v5 }
 0x16a   :  { %v9036_v14 = vld [vmem:[%s12546_s0 + $0x550] sm:$0xff]   ;;  %7179 = vst.msk [vmem:[%s12548_s3 + $0x37c] sm:$0xf] %vm6955_vm4, %v8217_v62  ;;  %v11082_v15 = vld [vmem:[%s12547_s2] ss:$0 sm:$0xff]  ;;  %v3914_v21 = vadd.f32 %v8574_v12, %v423_v51  ;;  %v4086_v22 = vadd.f32 %v8746_v13, %v595_v53  ;;  %v2708_v23 = vpop.f32.mrb[59].mxu0 }
 0x16b   :  { %v4950_v16 = vadd.f32 %v11082_v15, %v4600_v8  ;;  %v5122_v17 = vadd.f32 %v11082_v15, %v4772_v9  ;;  %v4598_v19 = vld [vmem:[#allocation2 + $0x1a0] sm:$0xff]  ;;  %4429 = vst.msk [vmem:[#allocation2 + $0x730] sm:$0xff] %vm19_vm3, %v4085_v0  ;;  %v3396_v24 = vpop.f32.mrb[59].mxu1  ;;  %v4601_v27 = vld [vmem:[#allocation2 + $0x1b8] sm:$0xff]  ;;  %4255 = vst.msk [vmem:[#allocation2 + $0x1c0] sm:$0xff] %vm19_vm3, %v3911_v10  ;;  %v3912_v29 = vadd.f32 %v2708_v23, %v421_v59  ;;  %8855 = vmatprep.mubr.msk.bf16.mxu1 %vm1923_vm2, %v9036_v14  ;;  %v8577_v55 = vpop.f32.mrb[60].mxu0 }
 0x16c   :  { %v4770_v20 = vld [vmem:[#allocation2 + $0x700] sm:$0xff]  ;;  %7005 = vst.msk [vmem:[%s12548_s3 + $0xc4] sm:$0xf] %vm6955_vm4, %v8043_v6  ;;  %7177 = vst.msk [vmem:[%s12548_s3 + $0x374] sm:$0xf] %vm6955_vm4, %v8215_v7  ;;  %v4948_v25 = vadd.f32 %v11082_v15, %v4598_v19  ;;  %v4773_v28 = vld [vmem:[#allocation2 + $0x718] sm:$0xff]  ;;  %v4084_v30 = vadd.f32 %v3396_v24, %v593_v60  ;;  %v4951_v33 = vadd.f32 %v11082_v15, %v4601_v27 }
 0x16d   :  { %v5120_v26 = vadd.f32 %v11082_v15, %v4770_v20  ;;  %4427 = vst.msk [vmem:[#allocation2 + $0x720] sm:$0xff] %vm19_vm3, %v4083_v11  ;;  %v5293_v31 = vmax.f32 %v4950_v16, 0.0  ;;  %v5465_v32 = vmax.f32 %v5122_v17, 0.0  ;;  %v5123_v34 = vadd.f32 %v11082_v15, %v4773_v28  ;;  %v4599_v35 = vld [vmem:[#allocation2 + $0x1a8] sm:$0xff]  ;;  %4258 = vst.msk [vmem:[#allocation2 + $0x1d8] sm:$0xff] %vm19_vm3, %v3914_v21  ;;  %v426_v41 = vld [vmem:[#allocation2 + $0x1f0] sm:$0xff] }
 0x16e   :  { %v4771_v36 = vld [vmem:[#allocation2 + $0x708] sm:$0xff]  ;;  %4430 = vst.msk [vmem:[#allocation2 + $0x738] sm:$0xff] %vm19_vm3, %v4086_v22  ;;  %v5291_v37 = vmax.f32 %v4948_v25, 0.0  ;;  %v4949_v39 = vadd.f32 %v11082_v15, %v4599_v35  ;;  %4256 = vst.msk [vmem:[#allocation2 + $0x1c8] sm:$0xff] %vm19_vm3, %v3912_v29  ;;  %v598_v42 = vld [vmem:[#allocation2 + $0x750] sm:$0xff]  ;;  %v5294_v46 = vmax.f32 %v4951_v33, 0.0  ;;  %v3917_v61 = vadd.f32 %v8577_v55, %v426_v41 }
 0x16f   :  { %v5463_v38 = vmax.f32 %v5120_v26, 0.0  ;;  %v5121_v40 = vadd.f32 %v11082_v15, %v4771_v36  ;;  %4428 = vst.msk [vmem:[#allocation2 + $0x728] sm:$0xff] %vm19_vm3, %v4084_v30  ;;  %v8048_v44 = vpack.c.bf16 %v5293_v31, %v5293_v31  ;;  %v8220_v45 = vpack.c.bf16 %v5465_v32, %v5465_v32  ;;  %v596_v48 = vld [vmem:[#allocation2 + $0x740] sm:$0xff]  ;;  %v427_v49 = vld [vmem:[#allocation2 + $0x1f8] sm:$0xff]  ;;  %v8749_v56 = vpop.f32.mrb[60].mxu1  ;;  %v425_v57 = vld [vmem:[#allocation2 + $0x1e8] sm:$0xff] }
 0x170   :  { %v5466_v47 = vmax.f32 %v5123_v34, 0.0  ;;  %v599_v50 = vld [vmem:[#allocation2 + $0x758] sm:$0xff]  ;;  %v8046_v51 = vpack.c.bf16 %v5291_v37, %v5291_v37  ;;  %v5292_v54 = vmax.f32 %v4949_v39, 0.0  ;;  %v597_v58 = vld [vmem:[#allocation2 + $0x748] sm:$0xff]  ;;  %v8049_v59 = vpack.c.bf16 %v5294_v46, %v5294_v46  ;;  %v2721_v63 = vpop.f32.mrb[61].mxu0  ;;  %v3409_v0 = vpop.f32.mrb[61].mxu1 }
 0x171   :  { %v8218_v53 = vpack.c.bf16 %v5463_v38, %v5463_v38  ;;  %v5464_v18 = vmax.f32 %v5121_v40, 0.0  ;;  %7010 = vst.msk [vmem:[%s12548_s3 + $0xd8] sm:$0xf] %vm6955_vm4, %v8048_v44  ;;  %7182 = vst.msk [vmem:[%s12548_s3 + $0x388] sm:$0xf] %vm6955_vm4, %v8220_v45  ;;  %v4089_v62 = vadd.f32 %v8749_v56, %v598_v42  ;;  %v9037_v1 = vld [vmem:[%s12546_s0 + $0x2a8] sm:$0xff]   ;;  %v3915_v7 = vadd.f32 %v2721_v63, %v424_v43 }
 0x172   :  { %v8221_v60 = vpack.c.bf16 %v5466_v47, %v5466_v47  ;;  %v9038_v2 = vld [vmem:[%s12546_s0 + $0x558] ss:$0 sps:$4 sm:$0x11]   ;;  %7008 = vst.msk [vmem:[%s12548_s3 + $0xd0] sm:$0xf] %vm6955_vm4, %v8046_v51  ;;  %v8047_v3 = vpack.c.bf16 %v5292_v54, %v5292_v54  ;;  %v4604_v5 = vld [vmem:[#allocation2 + $0x1d0] sm:$0xff]  ;;  %v4087_v8 = vadd.f32 %v3409_v0, %v596_v48  ;;  %8684 = vmatmul.mubr.msk.bf16.gmra.mrb[168].mxu0 %vm1923_vm2, %v9037_v1 }
 0x173   :  { %7180 = vst.msk [vmem:[%s12548_s3 + $0x380] sm:$0xf] %vm6955_vm4, %v8218_v53  ;;  %v8219_v4 = vpack.c.bf16 %v5464_v18, %v5464_v18  ;;  %v4776_v6 = vld [vmem:[#allocation2 + $0x730] sm:$0xff]  ;;  %v8578_v9 = vpop.f32.mrb[62].mxu0  ;;  %v8750_v10 = vpop.f32.mrb[62].mxu1  ;;  %v4954_v11 = vadd.f32 %v11082_v15, %v4604_v5  ;;  %v4602_v13 = vld [vmem:[#allocation2 + $0x1c0] sm:$0xff]  ;;  %8856 = vmatmul.mubr.msk.bf16.gmra.mrb[168].mxu1 %vm1923_vm2, %v9038_v2 }
 0x174   :  { %7011 = vst.msk [vmem:[%s12548_s3 + $0xdc] sm:$0xf] %vm6955_vm4, %v8049_v59  ;;  %7183 = vst.msk [vmem:[%s12548_s3 + $0x38c] sm:$0xf] %vm6955_vm4, %v8221_v60  ;;  %v5126_v12 = vadd.f32 %v11082_v15, %v4776_v6  ;;  %v4774_v14 = vld [vmem:[#allocation2 + $0x720] sm:$0xff]  ;;  %v3918_v16 = vadd.f32 %v8578_v9, %v427_v49  ;;  %v4090_v17 = vadd.f32 %v8750_v10, %v599_v50  ;;  %v2724_v19 = vpop.f32.mrb[63].mxu0 }
 0x175   :  { %4261 = vst.msk [vmem:[#allocation2 + $0x1f0] sm:$0xff] %vm19_vm3, %v3917_v61  ;;  %4433 = vst.msk [vmem:[#allocation2 + $0x750] sm:$0xff] %vm19_vm3, %v4089_v62  ;;  %v3412_v20 = vpop.f32.mrb[63].mxu1  ;;  %v4952_v21 = vadd.f32 %v11082_v15, %v4602_v13  ;;  %v5124_v22 = vadd.f32 %v11082_v15, %v4774_v14  ;;  %v4605_v23 = vld [vmem:[#allocation2 + $0x1d8] sm:$0xff]  ;;  %v3916_v25 = vadd.f32 %v2724_v19, %v425_v57  ;;  %v5297_v27 = vmax.f32 %v4954_v11, 0.0  ;;  %v4603_v31 = vld [vmem:[#allocation2 + $0x1c8] sm:$0xff] }
 0x176   :  { %7009 = vst.msk [vmem:[%s12548_s3 + $0xd4] sm:$0xf] %vm6955_vm4, %v8047_v3  ;;  %7181 = vst.msk [vmem:[%s12548_s3 + $0x384] sm:$0xf] %vm6955_vm4, %v8219_v4  ;;  %v4777_v24 = vld [vmem:[#allocation2 + $0x738] sm:$0xff]  ;;  %v4088_v26 = vadd.f32 %v3412_v20, %v597_v58  ;;  %v5469_v28 = vmax.f32 %v5126_v12, 0.0  ;;  %v4955_v29 = vadd.f32 %v11082_v15, %v4605_v23  ;;  %v4953_v35 = vadd.f32 %v11082_v15, %v4603_v31 }
 0x177   :  { %4259 = vst.msk [vmem:[#allocation2 + $0x1e0] sm:$0xff] %vm19_vm3, %v3915_v7  ;;  %4431 = vst.msk [vmem:[#allocation2 + $0x740] sm:$0xff] %vm19_vm3, %v4087_v8  ;;  %v5127_v30 = vadd.f32 %v11082_v15, %v4777_v24  ;;  %v4775_v32 = vld [vmem:[#allocation2 + $0x728] sm:$0xff]  ;;  %v5295_v33 = vmax.f32 %v4952_v21, 0.0  ;;  %v5467_v34 = vmax.f32 %v5124_v22, 0.0  ;;  %v430_v37 = vld [vmem:[#allocation2 + $0x210] sm:$0xff]  ;;  %v8052_v39 = vpack.c.bf16 %v5297_v27, %v5297_v27 }
 0x178   :  { %4262 = vst.msk [vmem:[#allocation2 + $0x1f8] sm:$0xff] %vm19_vm3, %v3918_v16  ;;  %4434 = vst.msk [vmem:[#allocation2 + $0x758] sm:$0xff] %vm19_vm3, %v4090_v17  ;;  %v5125_v36 = vadd.f32 %v11082_v15, %v4775_v32  ;;  %v602_v38 = vld [vmem:[#allocation2 + $0x770] sm:$0xff]  ;;  %v8224_v40 = vpack.c.bf16 %v5469_v28, %v5469_v28  ;;  %v5298_v41 = vmax.f32 %v4955_v29, 0.0  ;;  %v428_v43 = vld [vmem:[#allocation2 + $0x200] sm:$0xff]  ;;  %v5296_v47 = vmax.f32 %v4953_v35, 0.0 }
 0x179   :  { %4260 = vst.msk [vmem:[#allocation2 + $0x1e8] sm:$0xff] %vm19_vm3, %v3916_v25  ;;  %4432 = vst.msk [vmem:[#allocation2 + $0x748] sm:$0xff] %vm19_vm3, %v4088_v26  ;;  %v5470_v42 = vmax.f32 %v5127_v30, 0.0  ;;  %v600_v44 = vld [vmem:[#allocation2 + $0x760] sm:$0xff]  ;;  %v8050_v45 = vpack.c.bf16 %v5295_v33, %v5295_v33  ;;  %v8222_v46 = vpack.c.bf16 %v5467_v34, %v5467_v34  ;;  %v8581_v49 = vpop.f32.mrb[64].mxu0  ;;  %v8753_v50 = vpop.f32.mrb[64].mxu1 }
 0x17a   :  { %v5468_v48 = vmax.f32 %v5125_v36, 0.0  ;;  %v431_v51 = vld [vmem:[#allocation2 + $0x218] sm:$0xff]  ;;  %7014 = vst.msk [vmem:[%s12548_s3 + $0xe8] sm:$0xf] %vm6955_vm4, %v8052_v39  ;;  %7186 = vst.msk [vmem:[%s12548_s3 + $0x398] sm:$0xf] %vm6955_vm4, %v8224_v40  ;;  %v8053_v54 = vpack.c.bf16 %v5298_v41, %v5298_v41  ;;  %v3921_v55 = vadd.f32 %v8581_v49, %v430_v37  ;;  %v4093_v56 = vadd.f32 %v8753_v50, %v602_v38 }
 0x17b   :  { %v603_v53 = vld [vmem:[#allocation2 + $0x778] sm:$0xff]  ;;  %v8225_v18 = vpack.c.bf16 %v5470_v42, %v5470_v42  ;;  %v2737_v57 = vpop.f32.mrb[65].mxu0  ;;  %v3425_v58 = vpop.f32.mrb[65].mxu1  ;;  %v429_v59 = vld [vmem:[#allocation2 + $0x208] sm:$0xff]  ;;  %7012 = vst.msk [vmem:[%s12548_s3 + $0xe0] sm:$0xf] %vm6955_vm4, %v8050_v45  ;;  %v8051_v61 = vpack.c.bf16 %v5296_v47, %v5296_v47 }
 0x17c   :  { %v601_v60 = vld [vmem:[#allocation2 + $0x768] sm:$0xff]  ;;  %7184 = vst.msk [vmem:[%s12548_s3 + $0x390] sm:$0xf] %vm6955_vm4, %v8222_v46  ;;  %v8223_v62 = vpack.c.bf16 %v5468_v48, %v5468_v48  ;;  %v4608_v63 = vld [vmem:[#allocation2 + $0x1f0] sm:$0xff]  ;;  %v3919_v1 = vadd.f32 %v2737_v57, %v428_v43  ;;  %v4091_v2 = vadd.f32 %v3425_v58, %v600_v44  ;;  %v8582_v3 = vpop.f32.mrb[66].mxu0  ;;  %v8754_v4 = vpop.f32.mrb[66].mxu1 }
 0x17d   :  { %v4780_v0 = vld [vmem:[#allocation2 + $0x750] sm:$0xff]  ;;  %7015 = vst.msk [vmem:[%s12548_s3 + $0xec] sm:$0xf] %vm6955_vm4, %v8053_v54  ;;  %7187 = vst.msk [vmem:[%s12548_s3 + $0x39c] sm:$0xf] %vm6955_vm4, %v8225_v18  ;;  %v4958_v5 = vadd.f32 %v11082_v15, %v4608_v63  ;;  %v3922_v9 = vadd.f32 %v8582_v3, %v431_v51  ;;  %v4094_v10 = vadd.f32 %v8754_v4, %v603_v53  ;;  %v2740_v11 = vpop.f32.mrb[67].mxu0 }
 0x17e   :  { %v5130_v6 = vadd.f32 %v11082_v15, %v4780_v0  ;;  %v4606_v7 = vld [vmem:[#allocation2 + $0x1e0] sm:$0xff]  ;;  %4265 = vst.msk [vmem:[#allocation2 + $0x210] sm:$0xff] %vm19_vm3, %v3921_v55  ;;  %4437 = vst.msk [vmem:[#allocation2 + $0x770] sm:$0xff] %vm19_vm3, %v4093_v56  ;;  %v3428_v12 = vpop.f32.mrb[67].mxu1  ;;  %v3920_v19 = vadd.f32 %v2740_v11, %v429_v59  ;;  %v434_v31 = vld [vmem:[#allocation2 + $0x230] sm:$0xff]  ;;  %v8585_v43 = vpop.f32.mrb[68].mxu0 }
 0x17f   :  { %v4778_v8 = vld [vmem:[#allocation2 + $0x740] sm:$0xff]  ;;  %7013 = vst.msk [vmem:[%s12548_s3 + $0xe4] sm:$0xf] %vm6955_vm4, %v8051_v61  ;;  %7185 = vst.msk [vmem:[%s12548_s3 + $0x394] sm:$0xf] %vm6955_vm4, %v8223_v62  ;;  %v4956_v13 = vadd.f32 %v11082_v15, %v4606_v7  ;;  %v4609_v16 = vld [vmem:[#allocation2 + $0x1f8] sm:$0xff]  ;;  %v4092_v20 = vadd.f32 %v3428_v12, %v601_v60  ;;  %v3925_v49 = vadd.f32 %v8585_v43, %v434_v31 }
 0x180   :  { %v5128_v14 = vadd.f32 %v11082_v15, %v4778_v8  ;;  %v4781_v17 = vld [vmem:[#allocation2 + $0x758] sm:$0xff]  ;;  %4263 = vst.msk [vmem:[#allocation2 + $0x200] sm:$0xff] %vm19_vm3, %v3919_v1  ;;  %4435 = vst.msk [vmem:[#allocation2 + $0x760] sm:$0xff] %vm19_vm3, %v4091_v2  ;;  %v5301_v21 = vmax.f32 %v4958_v5, 0.0  ;;  %v5473_v22 = vmax.f32 %v5130_v6, 0.0  ;;  %v4959_v23 = vadd.f32 %v11082_v15, %v4609_v16  ;;  %v4607_v25 = vld [vmem:[#allocation2 + $0x1e8] sm:$0xff] }
 0x181   :  { %v5131_v24 = vadd.f32 %v11082_v15, %v4781_v17  ;;  %v4779_v26 = vld [vmem:[#allocation2 + $0x748] sm:$0xff]  ;;  %4266 = vst.msk [vmem:[#allocation2 + $0x218] sm:$0xff] %vm19_vm3, %v3922_v9  ;;  %4438 = vst.msk [vmem:[#allocation2 + $0x778] sm:$0xff] %vm19_vm3, %v4094_v10  ;;  %v5299_v27 = vmax.f32 %v4956_v13, 0.0  ;;  %v4957_v29 = vadd.f32 %v11082_v15, %v4607_v25  ;;  %v606_v32 = vld [vmem:[#allocation2 + $0x790] sm:$0xff]  ;;  %v8757_v44 = vpop.f32.mrb[68].mxu1 }
 0x182   :  { %v5471_v28 = vmax.f32 %v5128_v14, 0.0  ;;  %v5129_v30 = vadd.f32 %v11082_v15, %v4779_v26  ;;  %4264 = vst.msk [vmem:[#allocation2 + $0x208] sm:$0xff] %vm19_vm3, %v3920_v19  ;;  %4436 = vst.msk [vmem:[#allocation2 + $0x768] sm:$0xff] %vm19_vm3, %v4092_v20  ;;  %v8056_v33 = vpack.c.bf16 %v5301_v21, %v5301_v21  ;;  %v8228_v34 = vpack.c.bf16 %v5473_v22, %v5473_v22  ;;  %v432_v37 = vld [vmem:[#allocation2 + $0x220] sm:$0xff]  ;;  %v435_v45 = vld [vmem:[#allocation2 + $0x238] sm:$0xff]  ;;  %v2753_v51 = vpop.f32.mrb[69].mxu0 }
 0x183   :  { %v5302_v35 = vmax.f32 %v4959_v23, 0.0  ;;  %v5474_v36 = vmax.f32 %v5131_v24, 0.0  ;;  %v604_v38 = vld [vmem:[#allocation2 + $0x780] sm:$0xff]  ;;  %v8054_v39 = vpack.c.bf16 %v5299_v27, %v5299_v27  ;;  %v5300_v41 = vmax.f32 %v4957_v29, 0.0  ;;  %v607_v46 = vld [vmem:[#allocation2 + $0x798] sm:$0xff]  ;;  %v3441_v53 = vpop.f32.mrb[69].mxu1 }
 0x184   :  { %v8226_v40 = vpack.c.bf16 %v5471_v28, %v5471_v28  ;;  %v5472_v42 = vmax.f32 %v5129_v30, 0.0  ;;  %7018 = vst.msk [vmem:[%s12548_s3 + $0xf8] sm:$0xf] %vm6955_vm4, %v8056_v33  ;;  %7190 = vst.msk [vmem:[%s12548_s3 + $0x3a8] sm:$0xf] %vm6955_vm4, %v8228_v34  ;;  %v4097_v50 = vadd.f32 %v8757_v44, %v606_v32  ;;  %v433_v54 = vld [vmem:[#allocation2 + $0x228] sm:$0xff]  ;;  %v3923_v59 = vadd.f32 %v2753_v51, %v432_v37 }
 0x185   :  { %v8057_v47 = vpack.c.bf16 %v5302_v35, %v5302_v35  ;;  %v8229_v48 = vpack.c.bf16 %v5474_v36, %v5474_v36  ;;  %v605_v18 = vld [vmem:[#allocation2 + $0x788] sm:$0xff]  ;;  %7016 = vst.msk [vmem:[%s12548_s3 + $0xf0] sm:$0xf] %vm6955_vm4, %v8054_v39  ;;  %v8055_v55 = vpack.c.bf16 %v5300_v41, %v5300_v41  ;;  %v4612_v57 = vld [vmem:[#allocation2 + $0x210] sm:$0xff]  ;;  %v4095_v60 = vadd.f32 %v3441_v53, %v604_v38  ;;  %v8586_v61 = vpop.f32.mrb[70].mxu0  ;;  %v8758_v62 = vpop.f32.mrb[70].mxu1 }
 0x186   :  { %7188 = vst.msk [vmem:[%s12548_s3 + $0x3a0] sm:$0xf] %vm6955_vm4, %v8226_v40  ;;  %v8227_v56 = vpack.c.bf16 %v5472_v42, %v5472_v42  ;;  %v4784_v58 = vld [vmem:[#allocation2 + $0x770] sm:$0xff]  ;;  %v4962_v63 = vadd.f32 %v11082_v15, %v4612_v57  ;;  %v3926_v3 = vadd.f32 %v8586_v61, %v435_v45  ;;  %v4098_v4 = vadd.f32 %v8758_v62, %v607_v46  ;;  %v2756_v5 = vpop.f32.mrb[71].mxu0  ;;  %v3444_v6 = vpop.f32.mrb[71].mxu1  ;;  %v436_v31 = vld [vmem:[#allocation2 + $0x240] sm:$0xff] }
 0x187   :  { %7019 = vst.msk [vmem:[%s12548_s3 + $0xfc] sm:$0xf] %vm6955_vm4, %v8057_v47  ;;  %7191 = vst.msk [vmem:[%s12548_s3 + $0x3ac] sm:$0xf] %vm6955_vm4, %v8229_v48  ;;  %v5134_v0 = vadd.f32 %v11082_v15, %v4784_v58  ;;  %v4610_v1 = vld [vmem:[#allocation2 + $0x200] sm:$0xff]  ;;  %v3924_v11 = vadd.f32 %v2756_v5, %v433_v54  ;;  %v4096_v12 = vadd.f32 %v3444_v6, %v605_v18  ;;  %v438_v25 = vld [vmem:[#allocation2 + $0x250] sm:$0xff] }
 0x188   :  { %v4782_v2 = vld [vmem:[#allocation2 + $0x760] sm:$0xff]  ;;  %4269 = vst.msk [vmem:[#allocation2 + $0x230] sm:$0xff] %vm19_vm3, %v3925_v49  ;;  %4441 = vst.msk [vmem:[#allocation2 + $0x790] sm:$0xff] %vm19_vm3, %v4097_v50  ;;  %v4960_v7 = vadd.f32 %v11082_v15, %v4610_v1  ;;  %v4613_v9 = vld [vmem:[#allocation2 + $0x218] sm:$0xff]  ;;  %v5305_v13 = vmax.f32 %v4962_v63, 0.0  ;;  %v8589_v37 = vpop.f32.mrb[72].mxu0 }
 0x189   :  { %7017 = vst.msk [vmem:[%s12548_s3 + $0xf4] sm:$0xf] %vm6955_vm4, %v8055_v55  ;;  %7189 = vst.msk [vmem:[%s12548_s3 + $0x3a4] sm:$0xf] %vm6955_vm4, %v8227_v56  ;;  %v5132_v8 = vadd.f32 %v11082_v15, %v4782_v2  ;;  %v4785_v10 = vld [vmem:[#allocation2 + $0x778] sm:$0xff]  ;;  %v5477_v14 = vmax.f32 %v5134_v0, 0.0  ;;  %v4963_v16 = vadd.f32 %v11082_v15, %v4613_v9  ;;  %v3929_v43 = vadd.f32 %v8589_v37, %v438_v25 }
 0x18a   :  { %4267 = vst.msk [vmem:[#allocation2 + $0x220] sm:$0xff] %vm19_vm3, %v3923_v59  ;;  %4439 = vst.msk [vmem:[#allocation2 + $0x780] sm:$0xff] %vm19_vm3, %v4095_v60  ;;  %v5135_v17 = vadd.f32 %v11082_v15, %v4785_v10  ;;  %v4611_v19 = vld [vmem:[#allocation2 + $0x208] sm:$0xff]  ;;  %v5303_v21 = vmax.f32 %v4960_v7, 0.0  ;;  %v610_v26 = vld [vmem:[#allocation2 + $0x7b0] sm:$0xff]  ;;  %v8060_v27 = vpack.c.bf16 %v5305_v13, %v5305_v13  ;;  %v8761_v38 = vpop.f32.mrb[72].mxu1 }
 0x18b   :  { %v4783_v20 = vld [vmem:[#allocation2 + $0x768] sm:$0xff]  ;;  %4270 = vst.msk [vmem:[#allocation2 + $0x238] sm:$0xff] %vm19_vm3, %v3926_v3  ;;  %4442 = vst.msk [vmem:[#allocation2 + $0x798] sm:$0xff] %vm19_vm3, %v4098_v4  ;;  %v5475_v22 = vmax.f32 %v5132_v8, 0.0  ;;  %v4961_v23 = vadd.f32 %v11082_v15, %v4611_v19  ;;  %v8232_v28 = vpack.c.bf16 %v5477_v14, %v5477_v14  ;;  %v5306_v29 = vmax.f32 %v4963_v16, 0.0  ;;  %v608_v32 = vld [vmem:[#allocation2 + $0x7a0] sm:$0xff] }
 0x18c   :  { %v5133_v24 = vadd.f32 %v11082_v15, %v4783_v20  ;;  %4268 = vst.msk [vmem:[#allocation2 + $0x228] sm:$0xff] %vm19_vm3, %v3924_v11  ;;  %4440 = vst.msk [vmem:[#allocation2 + $0x788] sm:$0xff] %vm19_vm3, %v4096_v12  ;;  %v5478_v30 = vmax.f32 %v5135_v17, 0.0  ;;  %v8058_v33 = vpack.c.bf16 %v5303_v21, %v5303_v21  ;;  %v439_v39 = vld [vmem:[#allocation2 + $0x258] sm:$0xff]  ;;  %v4101_v44 = vadd.f32 %v8761_v38, %v610_v26  ;;  %v2769_v45 = vpop.f32.mrb[73].mxu0  ;;  %v3457_v46 = vpop.f32.mrb[73].mxu1 }
 0x18d   :  { %v8230_v34 = vpack.c.bf16 %v5475_v22, %v5475_v22  ;;  %v5304_v35 = vmax.f32 %v4961_v23, 0.0  ;;  %v611_v40 = vld [vmem:[#allocation2 + $0x7b8] sm:$0xff]  ;;  %7022 = vst.msk [vmem:[%s12548_s3 + $0x108] sm:$0xf] %vm6955_vm4, %v8060_v27  ;;  %7194 = vst.msk [vmem:[%s12548_s3 + $0x3b8] sm:$0xf] %vm6955_vm4, %v8232_v28  ;;  %v8061_v41 = vpack.c.bf16 %v5306_v29, %v5306_v29  ;;  %v3927_v54 = vadd.f32 %v2769_v45, %v436_v31 }
 0x18e   :  { %v5476_v36 = vmax.f32 %v5133_v24, 0.0  ;;  %v8233_v42 = vpack.c.bf16 %v5478_v30, %v5478_v30  ;;  %v437_v47 = vld [vmem:[#allocation2 + $0x248] sm:$0xff]  ;;  %7020 = vst.msk [vmem:[%s12548_s3 + $0x100] sm:$0xf] %vm6955_vm4, %v8058_v33  ;;  %v4099_v18 = vadd.f32 %v3457_v46, %v608_v32  ;;  %v8590_v55 = vpop.f32.mrb[74].mxu0  ;;  %v8762_v56 = vpop.f32.mrb[74].mxu1 }
 0x18f   :  { %v609_v48 = vld [vmem:[#allocation2 + $0x7a8] sm:$0xff]  ;;  %7192 = vst.msk [vmem:[%s12548_s3 + $0x3b0] sm:$0xf] %vm6955_vm4, %v8230_v34  ;;  %v8059_v49 = vpack.c.bf16 %v5304_v35, %v5304_v35  ;;  %v4616_v51 = vld [vmem:[#allocation2 + $0x230] sm:$0xff]  ;;  %7023 = vst.msk [vmem:[%s12548_s3 + $0x10c] sm:$0xf] %vm6955_vm4, %v8061_v41  ;;  %v3930_v61 = vadd.f32 %v8590_v55, %v439_v39  ;;  %v4102_v62 = vadd.f32 %v8762_v56, %v611_v40 }
 0x190   :  { %v8231_v50 = vpack.c.bf16 %v5476_v36, %v5476_v36  ;;  %v4788_v53 = vld [vmem:[#allocation2 + $0x790] sm:$0xff]  ;;  %7195 = vst.msk [vmem:[%s12548_s3 + $0x3bc] sm:$0xf] %vm6955_vm4, %v8233_v42  ;;  %v4966_v57 = vadd.f32 %v11082_v15, %v4616_v51  ;;  %v2772_v63 = vpop.f32.mrb[75].mxu0  ;;  %v3460_v0 = vpop.f32.mrb[75].mxu1  ;;  %v440_v25 = vld [vmem:[#allocation2 + $0x260] sm:$0xff] }
 0x191   :  { %v5138_v58 = vadd.f32 %v11082_v15, %v4788_v53  ;;  %v4614_v59 = vld [vmem:[#allocation2 + $0x220] sm:$0xff]  ;;  %4273 = vst.msk [vmem:[#allocation2 + $0x250] sm:$0xff] %vm19_vm3, %v3929_v43  ;;  %4445 = vst.msk [vmem:[#allocation2 + $0x7b0] sm:$0xff] %vm19_vm3, %v4101_v44  ;;  %v3928_v5 = vadd.f32 %v2772_v63, %v437_v47  ;;  %v4100_v6 = vadd.f32 %v3460_v0, %v609_v48  ;;  %v442_v19 = vld [vmem:[#allocation2 + $0x270] sm:$0xff]  ;;  %v8593_v31 = vpop.f32.mrb[76].mxu0  ;;  %v8765_v32 = vpop.f32.mrb[76].mxu1 }
 0x192   :  { %v4786_v60 = vld [vmem:[#allocation2 + $0x780] sm:$0xff]  ;;  %7021 = vst.msk [vmem:[%s12548_s3 + $0x104] sm:$0xf] %vm6955_vm4, %v8059_v49  ;;  %7193 = vst.msk [vmem:[%s12548_s3 + $0x3b4] sm:$0xf] %vm6955_vm4, %v8231_v50  ;;  %v4964_v1 = vadd.f32 %v11082_v15, %v4614_v59  ;;  %v4617_v3 = vld [vmem:[#allocation2 + $0x238] sm:$0xff]  ;;  %v3933_v37 = vadd.f32 %v8593_v31, %v442_v19 }
 0x193   :  { %v5136_v2 = vadd.f32 %v11082_v15, %v4786_v60  ;;  %v4789_v4 = vld [vmem:[#allocation2 + $0x798] sm:$0xff]  ;;  %4271 = vst.msk [vmem:[#allocation2 + $0x240] sm:$0xff] %vm19_vm3, %v3927_v54  ;;  %4443 = vst.msk [vmem:[#allocation2 + $0x7a0] sm:$0xff] %vm19_vm3, %v4099_v18  ;;  %v5309_v7 = vmax.f32 %v4966_v57, 0.0  ;;  %v5481_v8 = vmax.f32 %v5138_v58, 0.0  ;;  %v4967_v9 = vadd.f32 %v11082_v15, %v4617_v3  ;;  %v4615_v11 = vld [vmem:[#allocation2 + $0x228] sm:$0xff] }
 0x194   :  { %v5139_v10 = vadd.f32 %v11082_v15, %v4789_v4  ;;  %v4787_v12 = vld [vmem:[#allocation2 + $0x788] sm:$0xff]  ;;  %4274 = vst.msk [vmem:[#allocation2 + $0x258] sm:$0xff] %vm19_vm3, %v3930_v61  ;;  %4446 = vst.msk [vmem:[#allocation2 + $0x7b8] sm:$0xff] %vm19_vm3, %v4102_v62  ;;  %v5307_v13 = vmax.f32 %v4964_v1, 0.0  ;;  %v4965_v16 = vadd.f32 %v11082_v15, %v4615_v11  ;;  %v614_v20 = vld [vmem:[#allocation2 + $0x7d0] sm:$0xff]  ;;  %v2785_v39 = vpop.f32.mrb[77].mxu0 }
 0x195   :  { %v5479_v14 = vmax.f32 %v5136_v2, 0.0  ;;  %v5137_v17 = vadd.f32 %v11082_v15, %v4787_v12  ;;  %4272 = vst.msk [vmem:[#allocation2 + $0x248] sm:$0xff] %vm19_vm3, %v3928_v5  ;;  %4444 = vst.msk [vmem:[#allocation2 + $0x7a8] sm:$0xff] %vm19_vm3, %v4100_v6  ;;  %v8064_v21 = vpack.c.bf16 %v5309_v7, %v5309_v7  ;;  %v8236_v22 = vpack.c.bf16 %v5481_v8, %v5481_v8  ;;  %v612_v26 = vld [vmem:[#allocation2 + $0x7c0] sm:$0xff]  ;;  %v443_v33 = vld [vmem:[#allocation2 + $0x278] sm:$0xff]  ;;  %v3473_v40 = vpop.f32.mrb[77].mxu1 }
 0x196   :  { %v5310_v23 = vmax.f32 %v4967_v9, 0.0  ;;  %v5482_v24 = vmax.f32 %v5139_v10, 0.0  ;;  %v8062_v27 = vpack.c.bf16 %v5307_v13, %v5307_v13  ;;  %v5308_v29 = vmax.f32 %v4965_v16, 0.0  ;;  %v615_v34 = vld [vmem:[#allocation2 + $0x7d8] sm:$0xff]  ;;  %v441_v41 = vld [vmem:[#allocation2 + $0x268] sm:$0xff]  ;;  %v8594_v49 = vpop.f32.mrb[78].mxu0 }
 0x197   :  { %v8234_v28 = vpack.c.bf16 %v5479_v14, %v5479_v14  ;;  %v5480_v30 = vmax.f32 %v5137_v17, 0.0  ;;  %7026 = vst.msk [vmem:[%s12548_s3 + $0x118] sm:$0xf] %vm6955_vm4, %v8064_v21  ;;  %7198 = vst.msk [vmem:[%s12548_s3 + $0x3c8] sm:$0xf] %vm6955_vm4, %v8236_v22  ;;  %v4105_v38 = vadd.f32 %v8765_v32, %v614_v20  ;;  %v613_v42 = vld [vmem:[#allocation2 + $0x7c8] sm:$0xff]  ;;  %v3931_v47 = vadd.f32 %v2785_v39, %v440_v25 }
 0x198   :  { %v8065_v35 = vpack.c.bf16 %v5310_v23, %v5310_v23  ;;  %v8237_v36 = vpack.c.bf16 %v5482_v24, %v5482_v24  ;;  %7024 = vst.msk [vmem:[%s12548_s3 + $0x110] sm:$0xf] %vm6955_vm4, %v8062_v27  ;;  %v8063_v43 = vpack.c.bf16 %v5308_v29, %v5308_v29  ;;  %v4620_v45 = vld [vmem:[#allocation2 + $0x250] sm:$0xff]  ;;  %v4103_v48 = vadd.f32 %v3473_v40, %v612_v26  ;;  %v8766_v50 = vpop.f32.mrb[78].mxu1  ;;  %v2788_v57 = vpop.f32.mrb[79].mxu0  ;;  %v444_v19 = vld [vmem:[#allocation2 + $0x280] sm:$0xff] }
 0x199   :  { %7196 = vst.msk [vmem:[%s12548_s3 + $0x3c0] sm:$0xf] %vm6955_vm4, %v8234_v28  ;;  %v8235_v44 = vpack.c.bf16 %v5480_v30, %v5480_v30  ;;  %v4792_v46 = vld [vmem:[#allocation2 + $0x7b0] sm:$0xff]  ;;  %v4970_v51 = vadd.f32 %v11082_v15, %v4620_v45  ;;  %v3934_v55 = vadd.f32 %v8594_v49, %v443_v33  ;;  %v4106_v56 = vadd.f32 %v8766_v50, %v615_v34  ;;  %v3476_v58 = vpop.f32.mrb[79].mxu1  ;;  %v616_v20 = vld [vmem:[#allocation2 + $0x7e0] sm:$0xff]  ;;  %v8597_v25 = vpop.f32.mrb[80].mxu0 }
 0x19a   :  { %7027 = vst.msk [vmem:[%s12548_s3 + $0x11c] sm:$0xf] %vm6955_vm4, %v8065_v35  ;;  %7199 = vst.msk [vmem:[%s12548_s3 + $0x3cc] sm:$0xf] %vm6955_vm4, %v8237_v36  ;;  %v5142_v53 = vadd.f32 %v11082_v15, %v4792_v46  ;;  %v4618_v54 = vld [vmem:[#allocation2 + $0x240] sm:$0xff]  ;;  %v3932_v63 = vadd.f32 %v2788_v57, %v441_v41  ;;  %v4104_v0 = vadd.f32 %v3476_v58, %v613_v42  ;;  %v446_v11 = vld [vmem:[#allocation2 + $0x290] sm:$0xff] }
 0x19b   :  { %v4790_v18 = vld [vmem:[#allocation2 + $0x7a0] sm:$0xff]  ;;  %4277 = vst.msk [vmem:[#allocation2 + $0x270] sm:$0xff] %vm19_vm3, %v3933_v37  ;;  %4449 = vst.msk [vmem:[#allocation2 + $0x7d0] sm:$0xff] %vm19_vm3, %v4105_v38  ;;  %v4968_v59 = vadd.f32 %v11082_v15, %v4618_v54  ;;  %v4621_v61 = vld [vmem:[#allocation2 + $0x258] sm:$0xff]  ;;  %v5313_v1 = vmax.f32 %v4970_v51, 0.0  ;;  %v8769_v26 = vpop.f32.mrb[80].mxu1  ;;  %v3937_v31 = vadd.f32 %v8597_v25, %v446_v11 }
 0x19c   :  { %7025 = vst.msk [vmem:[%s12548_s3 + $0x114] sm:$0xf] %vm6955_vm4, %v8063_v43  ;;  %7197 = vst.msk [vmem:[%s12548_s3 + $0x3c4] sm:$0xf] %vm6955_vm4, %v8235_v44  ;;  %v5140_v60 = vadd.f32 %v11082_v15, %v4790_v18  ;;  %v4793_v62 = vld [vmem:[#allocation2 + $0x7b8] sm:$0xff]  ;;  %v5485_v2 = vmax.f32 %v5142_v53, 0.0  ;;  %v4971_v3 = vadd.f32 %v11082_v15, %v4621_v61 }
 0x19d   :  { %4275 = vst.msk [vmem:[#allocation2 + $0x260] sm:$0xff] %vm19_vm3, %v3931_v47  ;;  %4447 = vst.msk [vmem:[#allocation2 + $0x7c0] sm:$0xff] %vm19_vm3, %v4103_v48  ;;  %v5143_v4 = vadd.f32 %v11082_v15, %v4793_v62  ;;  %v4619_v5 = vld [vmem:[#allocation2 + $0x248] sm:$0xff]  ;;  %v5311_v7 = vmax.f32 %v4968_v59, 0.0  ;;  %v618_v12 = vld [vmem:[#allocation2 + $0x7f0] sm:$0xff]  ;;  %v8068_v13 = vpack.c.bf16 %v5313_v1, %v5313_v1  ;;  %v2801_v33 = vpop.f32.mrb[81].mxu0 }
 0x19e   :  { %v4791_v6 = vld [vmem:[#allocation2 + $0x7a8] sm:$0xff]  ;;  %4278 = vst.msk [vmem:[#allocation2 + $0x278] sm:$0xff] %vm19_vm3, %v3934_v55  ;;  %4450 = vst.msk [vmem:[#allocation2 + $0x7d8] sm:$0xff] %vm19_vm3, %v4106_v56  ;;  %v5483_v8 = vmax.f32 %v5140_v60, 0.0  ;;  %v4969_v9 = vadd.f32 %v11082_v15, %v4619_v5  ;;  %v8240_v14 = vpack.c.bf16 %v5485_v2, %v5485_v2  ;;  %v5314_v16 = vmax.f32 %v4971_v3, 0.0  ;;  %v447_v27 = vld [vmem:[#allocation2 + $0x298] sm:$0xff] }
 0x19f   :  { %v5141_v10 = vadd.f32 %v11082_v15, %v4791_v6  ;;  %4276 = vst.msk [vmem:[#allocation2 + $0x268] sm:$0xff] %vm19_vm3, %v3932_v63  ;;  %4448 = vst.msk [vmem:[#allocation2 + $0x7c8] sm:$0xff] %vm19_vm3, %v4104_v0  ;;  %v5486_v17 = vmax.f32 %v5143_v4, 0.0  ;;  %v8066_v21 = vpack.c.bf16 %v5311_v7, %v5311_v7  ;;  %v619_v28 = vld [vmem:[#allocation2 + $0x7f8] sm:$0xff]  ;;  %v4109_v32 = vadd.f32 %v8769_v26, %v618_v12  ;;  %v3489_v34 = vpop.f32.mrb[81].mxu1  ;;  %v445_v35 = vld [vmem:[#allocation2 + $0x288] sm:$0xff] }
 0x1a0   :  { %v8238_v22 = vpack.c.bf16 %v5483_v8, %v5483_v8  ;;  %v5312_v23 = vmax.f32 %v4969_v9, 0.0  ;;  %7030 = vst.msk [vmem:[%s12548_s3 + $0x128] sm:$0xf] %vm6955_vm4, %v8068_v13  ;;  %7202 = vst.msk [vmem:[%s12548_s3 + $0x3d8] sm:$0xf] %vm6955_vm4, %v8240_v14  ;;  %v8069_v29 = vpack.c.bf16 %v5314_v16, %v5314_v16  ;;  %v617_v36 = vld [vmem:[#allocation2 + $0x7e8] sm:$0xff]  ;;  %v3935_v41 = vadd.f32 %v2801_v33, %v444_v19 }
 0x1a1   :  { %v5484_v24 = vmax.f32 %v5141_v10, 0.0  ;;  %v8241_v30 = vpack.c.bf16 %v5486_v17, %v5486_v17  ;;  %7028 = vst.msk [vmem:[%s12548_s3 + $0x120] sm:$0xf] %vm6955_vm4, %v8066_v21  ;;  %v4107_v42 = vadd.f32 %v3489_v34, %v616_v20  ;;  %v8598_v43 = vpop.f32.mrb[82].mxu0  ;;  %v8770_v44 = vpop.f32.mrb[82].mxu1  ;;  %v450_v5 = vld [vmem:[#allocation2 + $0x2b0] sm:$0xff] }
 0x1a2   :  { %7200 = vst.msk [vmem:[%s12548_s3 + $0x3d0] sm:$0xf] %vm6955_vm4, %v8238_v22  ;;  %v8067_v37 = vpack.c.bf16 %v5312_v23, %v5312_v23  ;;  %v4624_v39 = vld [vmem:[#allocation2 + $0x270] sm:$0xff]  ;;  %7031 = vst.msk [vmem:[%s12548_s3 + $0x12c] sm:$0xf] %vm6955_vm4, %v8069_v29  ;;  %v3938_v49 = vadd.f32 %v8598_v43, %v447_v27  ;;  %v4110_v50 = vadd.f32 %v8770_v44, %v619_v28  ;;  %v2804_v51 = vpop.f32.mrb[83].mxu0 }
 0x1a3   :  { %v8239_v38 = vpack.c.bf16 %v5484_v24, %v5484_v24  ;;  %v4796_v40 = vld [vmem:[#allocation2 + $0x7d0] sm:$0xff]  ;;  %7203 = vst.msk [vmem:[%s12548_s3 + $0x3dc] sm:$0xf] %vm6955_vm4, %v8241_v30  ;;  %v4974_v45 = vadd.f32 %v11082_v15, %v4624_v39  ;;  %v3492_v53 = vpop.f32.mrb[83].mxu1  ;;  %v3936_v57 = vadd.f32 %v2804_v51, %v445_v35  ;;  %v448_v11 = vld [vmem:[#allocation2 + $0x2a0] sm:$0xff]  ;;  %v8601_v19 = vpop.f32.mrb[84].mxu0 }
 0x1a4   :  { %v5146_v46 = vadd.f32 %v11082_v15, %v4796_v40  ;;  %v4622_v47 = vld [vmem:[#allocation2 + $0x260] sm:$0xff]  ;;  %4281 = vst.msk [vmem:[#allocation2 + $0x290] sm:$0xff] %vm19_vm3, %v3937_v31  ;;  %4453 = vst.msk [vmem:[#allocation2 + $0x7f0] sm:$0xff] %vm19_vm3, %v4109_v32  ;;  %v4108_v58 = vadd.f32 %v3492_v53, %v617_v36  ;;  %v622_v6 = vld [vmem:[#allocation2 + $0x810] sm:$0xff]  ;;  %v8773_v20 = vpop.f32.mrb[84].mxu1  ;;  %v3941_v24 = vadd.f32 %v8601_v19, %v450_v5  ;;  %v2817_v26 = vpop.f32.mrb[85].mxu0 }
 0x1a5   :  { %v4794_v48 = vld [vmem:[#allocation2 + $0x7c0] sm:$0xff]  ;;  %7029 = vst.msk [vmem:[%s12548_s3 + $0x124] sm:$0xf] %vm6955_vm4, %v8067_v37  ;;  %7201 = vst.msk [vmem:[%s12548_s3 + $0x3d4] sm:$0xf] %vm6955_vm4, %v8239_v38  ;;  %v4972_v54 = vadd.f32 %v11082_v15, %v4622_v47  ;;  %v4625_v55 = vld [vmem:[#allocation2 + $0x278] sm:$0xff]  ;;  %v4113_v25 = vadd.f32 %v8773_v20, %v622_v6  ;;  %v3939_v34 = vadd.f32 %v2817_v26, %v448_v11 }
 0x1a6   :  { %v5144_v18 = vadd.f32 %v11082_v15, %v4794_v48  ;;  %v4797_v56 = vld [vmem:[#allocation2 + $0x7d8] sm:$0xff]  ;;  %4279 = vst.msk [vmem:[#allocation2 + $0x280] sm:$0xff] %vm19_vm3, %v3935_v41  ;;  %4451 = vst.msk [vmem:[#allocation2 + $0x7e0] sm:$0xff] %vm19_vm3, %v4107_v42  ;;  %v5317_v59 = vmax.f32 %v4974_v45, 0.0  ;;  %v5489_v60 = vmax.f32 %v5146_v46, 0.0  ;;  %v4975_v61 = vadd.f32 %v11082_v15, %v4625_v55  ;;  %v4623_v63 = vld [vmem:[#allocation2 + $0x268] sm:$0xff] }
 0x1a7   :  { %v5147_v62 = vadd.f32 %v11082_v15, %v4797_v56  ;;  %v4795_v0 = vld [vmem:[#allocation2 + $0x7c8] sm:$0xff]  ;;  %4282 = vst.msk [vmem:[#allocation2 + $0x298] sm:$0xff] %vm19_vm3, %v3938_v49  ;;  %4454 = vst.msk [vmem:[#allocation2 + $0x7f8] sm:$0xff] %vm19_vm3, %v4110_v50  ;;  %v5315_v1 = vmax.f32 %v4972_v54, 0.0  ;;  %v4973_v3 = vadd.f32 %v11082_v15, %v4623_v63  ;;  %v620_v12 = vld [vmem:[#allocation2 + $0x800] sm:$0xff]  ;;  %v3505_v27 = vpop.f32.mrb[85].mxu1 }
 0x1a8   :  { %v5487_v2 = vmax.f32 %v5144_v18, 0.0  ;;  %v5145_v4 = vadd.f32 %v11082_v15, %v4795_v0  ;;  %4280 = vst.msk [vmem:[#allocation2 + $0x288] sm:$0xff] %vm19_vm3, %v3936_v57  ;;  %4452 = vst.msk [vmem:[#allocation2 + $0x7e8] sm:$0xff] %vm19_vm3, %v4108_v58  ;;  %v8072_v7 = vpack.c.bf16 %v5317_v59, %v5317_v59  ;;  %v8244_v8 = vpack.c.bf16 %v5489_v60, %v5489_v60  ;;  %v451_v21 = vld [vmem:[#allocation2 + $0x2b8] sm:$0xff]  ;;  %v449_v28 = vld [vmem:[#allocation2 + $0x2a8] sm:$0xff]  ;;  %v8602_v36 = vpop.f32.mrb[86].mxu0 }
 0x1a9   :  { %v5318_v9 = vmax.f32 %v4975_v61, 0.0  ;;  %v5490_v10 = vmax.f32 %v5147_v62, 0.0  ;;  %v8070_v13 = vpack.c.bf16 %v5315_v1, %v5315_v1  ;;  %v5316_v16 = vmax.f32 %v4973_v3, 0.0  ;;  %v623_v15 = vld [vmem:[#allocation2 + $0x818] sm:$0xff]  ;;  %v621_v29 = vld [vmem:[#allocation2 + $0x808] sm:$0xff]  ;;  %v8774_v37 = vpop.f32.mrb[86].mxu1 }
 0x1aa   :  { %v8242_v14 = vpack.c.bf16 %v5487_v2, %v5487_v2  ;;  %v5488_v17 = vmax.f32 %v5145_v4, 0.0  ;;  %7034 = vst.msk [vmem:[%s12548_s3 + $0x138] sm:$0xf] %vm6955_vm4, %v8072_v7  ;;  %7206 = vst.msk [vmem:[%s12548_s3 + $0x3e8] sm:$0xf] %vm6955_vm4, %v8244_v8  ;;  %v4111_v35 = vadd.f32 %v3505_v27, %v620_v12  ;;  %v3942_v43 = vadd.f32 %v8602_v36, %v451_v21  ;;  %v2820_v45 = vpop.f32.mrb[87].mxu0 }
 0x1ab   :  { %v8073_v22 = vpack.c.bf16 %v5318_v9, %v5318_v9  ;;  %v8245_v23 = vpack.c.bf16 %v5490_v10, %v5490_v10  ;;  %7032 = vst.msk [vmem:[%s12548_s3 + $0x130] sm:$0xf] %vm6955_vm4, %v8070_v13  ;;  %v8071_v30 = vpack.c.bf16 %v5316_v16, %v5316_v16  ;;  %v4628_v32 = vld [vmem:[#allocation2 + $0x290] sm:$0xff]  ;;  %v11435_v38 = vld [vmem:[%s12547_s2] ss:$0 sm:$0xff]  ;;  %v4114_v44 = vadd.f32 %v8774_v37, %v623_v15  ;;  %v3508_v46 = vpop.f32.mrb[87].mxu1 }
 0x1ac   :  { %7204 = vst.msk [vmem:[%s12548_s3 + $0x3e0] sm:$0xf] %vm6955_vm4, %v8242_v14  ;;  %v8243_v31 = vpack.c.bf16 %v5488_v17, %v5488_v17  ;;  %v4800_v33 = vld [vmem:[#allocation2 + $0x7f0] sm:$0xff]  ;;  %v4978_v39 = vadd.f32 %v11435_v38, %v4628_v32  ;;  %v3940_v51 = vadd.f32 %v2820_v45, %v449_v28  ;;  %v4112_v53 = vadd.f32 %v3508_v46, %v621_v29  ;;  %v452_v5 = vld [vmem:[#allocation2 + $0x2c0] sm:$0xff]  ;;  %v8605_v11 = vpop.f32.mrb[88].mxu0  ;;  %v8777_v12 = vpop.f32.mrb[88].mxu1 }
 0x1ad   :  { %7035 = vst.msk [vmem:[%s12548_s3 + $0x13c] sm:$0xf] %vm6955_vm4, %v8073_v22  ;;  %7207 = vst.msk [vmem:[%s12548_s3 + $0x3ec] sm:$0xf] %vm6955_vm4, %v8245_v23  ;;  %v5150_v40 = vadd.f32 %v11435_v38, %v4800_v33  ;;  %v4626_v41 = vld [vmem:[#allocation2 + $0x280] sm:$0xff]  ;;  %v454_v63 = vld [vmem:[#allocation2 + $0x2d0] sm:$0xff] }
 0x1ae   :  { %v4798_v42 = vld [vmem:[#allocation2 + $0x7e0] sm:$0xff]  ;;  %4285 = vst.msk [vmem:[#allocation2 + $0x2b0] sm:$0xff] %vm19_vm3, %v3941_v24  ;;  %4457 = vst.msk [vmem:[#allocation2 + $0x810] sm:$0xff] %vm19_vm3, %v4113_v25  ;;  %v4976_v47 = vadd.f32 %v11435_v38, %v4626_v41  ;;  %v4629_v49 = vld [vmem:[#allocation2 + $0x298] sm:$0xff]  ;;  %v5321_v54 = vmax.f32 %v4978_v39, 0.0  ;;  %v3945_v19 = vadd.f32 %v8605_v11, %v454_v63  ;;  %v2833_v21 = vpop.f32.mrb[89].mxu0 }
 0x1af   :  { %7033 = vst.msk [vmem:[%s12548_s3 + $0x134] sm:$0xf] %vm6955_vm4, %v8071_v30  ;;  %7205 = vst.msk [vmem:[%s12548_s3 + $0x3e4] sm:$0xf] %vm6955_vm4, %v8243_v31  ;;  %v5148_v48 = vadd.f32 %v11435_v38, %v4798_v42  ;;  %v4801_v50 = vld [vmem:[#allocation2 + $0x7f8] sm:$0xff]  ;;  %v5493_v18 = vmax.f32 %v5150_v40, 0.0  ;;  %v4979_v55 = vadd.f32 %v11435_v38, %v4629_v49  ;;  %v3943_v28 = vadd.f32 %v2833_v21, %v452_v5 }
 0x1b0   :  { %4283 = vst.msk [vmem:[#allocation2 + $0x2a0] sm:$0xff] %vm19_vm3, %v3939_v34  ;;  %4455 = vst.msk [vmem:[#allocation2 + $0x800] sm:$0xff] %vm19_vm3, %v4111_v35  ;;  %v5151_v56 = vadd.f32 %v11435_v38, %v4801_v50  ;;  %v4627_v57 = vld [vmem:[#allocation2 + $0x288] sm:$0xff]  ;;  %v5319_v59 = vmax.f32 %v4976_v47, 0.0  ;;  %v626_v0 = vld [vmem:[#allocation2 + $0x830] sm:$0xff]  ;;  %v8076_v1 = vpack.c.bf16 %v5321_v54, %v5321_v54  ;;  %v3521_v15 = vpop.f32.mrb[89].mxu1 }
 0x1b1   :  { %v4799_v58 = vld [vmem:[#allocation2 + $0x7e8] sm:$0xff]  ;;  %4286 = vst.msk [vmem:[#allocation2 + $0x2b8] sm:$0xff] %vm19_vm3, %v3942_v43  ;;  %4458 = vst.msk [vmem:[#allocation2 + $0x818] sm:$0xff] %vm19_vm3, %v4114_v44  ;;  %v5491_v60 = vmax.f32 %v5148_v48, 0.0  ;;  %v4977_v61 = vadd.f32 %v11435_v38, %v4627_v57  ;;  %v8248_v2 = vpack.c.bf16 %v5493_v18, %v5493_v18  ;;  %v5322_v3 = vmax.f32 %v4979_v55, 0.0  ;;  %v624_v6 = vld [vmem:[#allocation2 + $0x820] sm:$0xff] }
 0x1b2   :  { %v5149_v62 = vadd.f32 %v11435_v38, %v4799_v58  ;;  %4284 = vst.msk [vmem:[#allocation2 + $0x2a8] sm:$0xff] %vm19_vm3, %v3940_v51  ;;  %4456 = vst.msk [vmem:[#allocation2 + $0x808] sm:$0xff] %vm19_vm3, %v4112_v53  ;;  %v5494_v4 = vmax.f32 %v5151_v56, 0.0  ;;  %v8074_v7 = vpack.c.bf16 %v5319_v59, %v5319_v59  ;;  %v455_v13 = vld [vmem:[#allocation2 + $0x2d8] sm:$0xff]  ;;  %v4117_v20 = vadd.f32 %v8777_v12, %v626_v0  ;;  %v453_v22 = vld [vmem:[#allocation2 + $0x2c8] sm:$0xff]  ;;  %v8606_v30 = vpop.f32.mrb[90].mxu0 }
 0x1b3   :  { %v8246_v8 = vpack.c.bf16 %v5491_v60, %v5491_v60  ;;  %v5320_v9 = vmax.f32 %v4977_v61, 0.0  ;;  %v627_v14 = vld [vmem:[#allocation2 + $0x838] sm:$0xff]  ;;  %7038 = vst.msk [vmem:[%s12548_s3 + $0x148] sm:$0xf] %vm6955_vm4, %v8076_v1  ;;  %7210 = vst.msk [vmem:[%s12548_s3 + $0x3f8] sm:$0xf] %vm6955_vm4, %v8248_v2  ;;  %v8077_v16 = vpack.c.bf16 %v5322_v3, %v5322_v3  ;;  %v4115_v29 = vadd.f32 %v3521_v15, %v624_v6 }
 0x1b4   :  { %v5492_v10 = vmax.f32 %v5149_v62, 0.0  ;;  %v8249_v17 = vpack.c.bf16 %v5494_v4, %v5494_v4  ;;  %v625_v23 = vld [vmem:[#allocation2 + $0x828] sm:$0xff]  ;;  %7036 = vst.msk [vmem:[%s12548_s3 + $0x140] sm:$0xf] %vm6955_vm4, %v8074_v7  ;;  %v8778_v31 = vpop.f32.mrb[90].mxu1  ;;  %v3946_v36 = vadd.f32 %v8606_v30, %v455_v13  ;;  %v2836_v39 = vpop.f32.mrb[91].mxu0 }
 0x1b5   :  { %7208 = vst.msk [vmem:[%s12548_s3 + $0x3f0] sm:$0xf] %vm6955_vm4, %v8246_v8  ;;  %v8075_v24 = vpack.c.bf16 %v5320_v9, %v5320_v9  ;;  %v4632_v26 = vld [vmem:[#allocation2 + $0x2b0] sm:$0xff]  ;;  %7039 = vst.msk [vmem:[%s12548_s3 + $0x14c] sm:$0xf] %vm6955_vm4, %v8077_v16  ;;  %v4118_v37 = vadd.f32 %v8778_v31, %v627_v14  ;;  %v3524_v40 = vpop.f32.mrb[91].mxu1  ;;  %v3944_v45 = vadd.f32 %v2836_v39, %v453_v22 }
 0x1b6   :  { %v8247_v25 = vpack.c.bf16 %v5492_v10, %v5492_v10  ;;  %v4804_v27 = vld [vmem:[#allocation2 + $0x810] sm:$0xff]  ;;  %7211 = vst.msk [vmem:[%s12548_s3 + $0x3fc] sm:$0xf] %vm6955_vm4, %v8249_v17  ;;  %v4982_v32 = vadd.f32 %v11435_v38, %v4632_v26  ;;  %v4116_v46 = vadd.f32 %v3524_v40, %v625_v23  ;;  %v456_v63 = vld [vmem:[#allocation2 + $0x2e0] sm:$0xff]  ;;  %v8609_v5 = vpop.f32.mrb[92].mxu0  ;;  %v8781_v6 = vpop.f32.mrb[92].mxu1 }
 0x1b7   :  { %v5154_v33 = vadd.f32 %v11435_v38, %v4804_v27  ;;  %v4630_v34 = vld [vmem:[#allocation2 + $0x2a0] sm:$0xff]  ;;  %4289 = vst.msk [vmem:[#allocation2 + $0x2d0] sm:$0xff] %vm19_vm3, %v3945_v19  ;;  %4461 = vst.msk [vmem:[#allocation2 + $0x830] sm:$0xff] %vm19_vm3, %v4117_v20  ;;  %v458_v57 = vld [vmem:[#allocation2 + $0x2f0] sm:$0xff]  ;;  %v2849_v13 = vpop.f32.mrb[93].mxu0  ;;  %v3537_v14 = vpop.f32.mrb[93].mxu1 }
 0x1b8   :  { %v4802_v35 = vld [vmem:[#allocation2 + $0x800] sm:$0xff]  ;;  %7037 = vst.msk [vmem:[%s12548_s3 + $0x144] sm:$0xf] %vm6955_vm4, %v8075_v24  ;;  %7209 = vst.msk [vmem:[%s12548_s3 + $0x3f4] sm:$0xf] %vm6955_vm4, %v8247_v25  ;;  %v4980_v41 = vadd.f32 %v11435_v38, %v4630_v34  ;;  %v4633_v43 = vld [vmem:[#allocation2 + $0x2b8] sm:$0xff]  ;;  %v3949_v11 = vadd.f32 %v8609_v5, %v458_v57  ;;  %v3947_v22 = vadd.f32 %v2849_v13, %v456_v63 }
 0x1b9   :  { %v5152_v42 = vadd.f32 %v11435_v38, %v4802_v35  ;;  %v4805_v44 = vld [vmem:[#allocation2 + $0x818] sm:$0xff]  ;;  %4287 = vst.msk [vmem:[#allocation2 + $0x2c0] sm:$0xff] %vm19_vm3, %v3943_v28  ;;  %4459 = vst.msk [vmem:[#allocation2 + $0x820] sm:$0xff] %vm19_vm3, %v4115_v29  ;;  %v5325_v47 = vmax.f32 %v4982_v32, 0.0  ;;  %v5497_v48 = vmax.f32 %v5154_v33, 0.0  ;;  %v4983_v49 = vadd.f32 %v11435_v38, %v4633_v43  ;;  %v4631_v51 = vld [vmem:[#allocation2 + $0x2a8] sm:$0xff] }
 0x1ba   :  { %v5155_v50 = vadd.f32 %v11435_v38, %v4805_v44  ;;  %v4803_v53 = vld [vmem:[#allocation2 + $0x808] sm:$0xff]  ;;  %4290 = vst.msk [vmem:[#allocation2 + $0x2d8] sm:$0xff] %vm19_vm3, %v3946_v36  ;;  %4462 = vst.msk [vmem:[#allocation2 + $0x838] sm:$0xff] %vm19_vm3, %v4118_v37  ;;  %v5323_v54 = vmax.f32 %v4980_v41, 0.0  ;;  %v4981_v55 = vadd.f32 %v11435_v38, %v4631_v51  ;;  %v630_v58 = vld [vmem:[#allocation2 + $0x850] sm:$0xff]  ;;  %v8610_v24 = vpop.f32.mrb[94].mxu0 }
 0x1bb   :  { %v5495_v18 = vmax.f32 %v5152_v42, 0.0  ;;  %v5153_v56 = vadd.f32 %v11435_v38, %v4803_v53  ;;  %4288 = vst.msk [vmem:[#allocation2 + $0x2c8] sm:$0xff] %vm19_vm3, %v3944_v45  ;;  %4460 = vst.msk [vmem:[#allocation2 + $0x828] sm:$0xff] %vm19_vm3, %v4116_v46  ;;  %v8080_v59 = vpack.c.bf16 %v5325_v47, %v5325_v47  ;;  %v8252_v60 = vpack.c.bf16 %v5497_v48, %v5497_v48  ;;  %v628_v0 = vld [vmem:[#allocation2 + $0x840] sm:$0xff]  ;;  %v459_v7 = vld [vmem:[#allocation2 + $0x2f8] sm:$0xff]  ;;  %v8782_v25 = vpop.f32.mrb[94].mxu1 }
 0x1bc   :  { %v5326_v61 = vmax.f32 %v4983_v49, 0.0  ;;  %v5498_v62 = vmax.f32 %v5155_v50, 0.0  ;;  %v8078_v1 = vpack.c.bf16 %v5323_v54, %v5323_v54  ;;  %v5324_v3 = vmax.f32 %v4981_v55, 0.0  ;;  %v631_v8 = vld [vmem:[#allocation2 + $0x858] sm:$0xff]  ;;  %v457_v16 = vld [vmem:[#allocation2 + $0x2e8] sm:$0xff]  ;;  %4293 = vst.msk [vmem:[#allocation2 + $0x2f0] sm:$0xff] %vm19_vm3, %v3949_v11 }
 0x1bd   :  { %v8250_v2 = vpack.c.bf16 %v5495_v18, %v5495_v18  ;;  %v5496_v4 = vmax.f32 %v5153_v56, 0.0  ;;  %7042 = vst.msk [vmem:[%s12548_s3 + $0x158] sm:$0xf] %vm6955_vm4, %v8080_v59  ;;  %7214 = vst.msk [vmem:[%s12548_s3 + $0x408] sm:$0xf] %vm6955_vm4, %v8252_v60  ;;  %v4121_v12 = vadd.f32 %v8781_v6, %v630_v58  ;;  %v629_v17 = vld [vmem:[#allocation2 + $0x848] sm:$0xff]  ;;  %v4119_v23 = vadd.f32 %v3537_v14, %v628_v0 }
 0x1be   :  { %v8081_v9 = vpack.c.bf16 %v5326_v61, %v5326_v61  ;;  %v8253_v10 = vpack.c.bf16 %v5498_v62, %v5498_v62  ;;  %7040 = vst.msk [vmem:[%s12548_s3 + $0x150] sm:$0xf] %vm6955_vm4, %v8078_v1  ;;  %v8079_v19 = vpack.c.bf16 %v5324_v3, %v5324_v3  ;;  %v4636_v21 = vld [vmem:[#allocation2 + $0x2d0] sm:$0xff]  ;;  %v3950_v30 = vadd.f32 %v8610_v24, %v459_v7  ;;  %v2852_v32 = vpop.f32.mrb[95].mxu0  ;;  %v3540_v33 = vpop.f32.mrb[95].mxu1  ;;  %v460_v57 = vld [vmem:[#allocation2 + $0x300] sm:$0xff] }
 0x1bf   :  { %7212 = vst.msk [vmem:[%s12548_s3 + $0x400] sm:$0xf] %vm6955_vm4, %v8250_v2  ;;  %v8251_v20 = vpack.c.bf16 %v5496_v4, %v5496_v4  ;;  %v4808_v15 = vld [vmem:[#allocation2 + $0x830] sm:$0xff]  ;;  %v4986_v26 = vadd.f32 %v11435_v38, %v4636_v21  ;;  %v4122_v31 = vadd.f32 %v8782_v25, %v631_v8  ;;  %v3948_v39 = vadd.f32 %v2852_v32, %v457_v16  ;;  %v632_v58 = vld [vmem:[#allocation2 + $0x860] sm:$0xff]  ;;  %v8613_v63 = vpop.f32.mrb[96].mxu0  ;;  %v8785_v0 = vpop.f32.mrb[96].mxu1 }
 0x1c0   :  { %7043 = vst.msk [vmem:[%s12548_s3 + $0x15c] sm:$0xf] %vm6955_vm4, %v8081_v9  ;;  %7215 = vst.msk [vmem:[%s12548_s3 + $0x40c] sm:$0xf] %vm6955_vm4, %v8253_v10  ;;  %v5158_v27 = vadd.f32 %v11435_v38, %v4808_v15  ;;  %v4634_v28 = vld [vmem:[#allocation2 + $0x2c0] sm:$0xff]  ;;  %v4120_v40 = vadd.f32 %v3540_v33, %v629_v17  ;;  %v462_v51 = vld [vmem:[#allocation2 + $0x310] sm:$0xff] }
 0x1c1   :  { %v4806_v29 = vld [vmem:[#allocation2 + $0x820] sm:$0xff]  ;;  %4465 = vst.msk [vmem:[#allocation2 + $0x850] sm:$0xff] %vm19_vm3, %v4121_v12  ;;  %v4984_v34 = vadd.f32 %v11435_v38, %v4634_v28  ;;  %v4637_v36 = vld [vmem:[#allocation2 + $0x2d8] sm:$0xff]  ;;  %4291 = vst.msk [vmem:[#allocation2 + $0x2e0] sm:$0xff] %vm19_vm3, %v3947_v22  ;;  %v5329_v41 = vmax.f32 %v4986_v26, 0.0  ;;  %v3953_v5 = vadd.f32 %v8613_v63, %v462_v51  ;;  %v2865_v7 = vpop.f32.mrb[97].mxu0 }
 0x1c2   :  { %7041 = vst.msk [vmem:[%s12548_s3 + $0x154] sm:$0xf] %vm6955_vm4, %v8079_v19  ;;  %7213 = vst.msk [vmem:[%s12548_s3 + $0x404] sm:$0xf] %vm6955_vm4, %v8251_v20  ;;  %v5156_v35 = vadd.f32 %v11435_v38, %v4806_v29  ;;  %v4809_v37 = vld [vmem:[#allocation2 + $0x838] sm:$0xff]  ;;  %v5501_v42 = vmax.f32 %v5158_v27, 0.0  ;;  %v4987_v43 = vadd.f32 %v11435_v38, %v4637_v36  ;;  %v3951_v16 = vadd.f32 %v2865_v7, %v460_v57 }
 0x1c3   :  { %4463 = vst.msk [vmem:[#allocation2 + $0x840] sm:$0xff] %vm19_vm3, %v4119_v23  ;;  %v5159_v44 = vadd.f32 %v11435_v38, %v4809_v37  ;;  %v4635_v45 = vld [vmem:[#allocation2 + $0x2c8] sm:$0xff]  ;;  %4294 = vst.msk [vmem:[#allocation2 + $0x2f8] sm:$0xff] %vm19_vm3, %v3950_v30  ;;  %v5327_v47 = vmax.f32 %v4984_v34, 0.0  ;;  %v634_v53 = vld [vmem:[#allocation2 + $0x870] sm:$0xff]  ;;  %v8084_v54 = vpack.c.bf16 %v5329_v41, %v5329_v41  ;;  %v3553_v8 = vpop.f32.mrb[97].mxu1 }
 0x1c4   :  { %v4807_v46 = vld [vmem:[#allocation2 + $0x828] sm:$0xff]  ;;  %4466 = vst.msk [vmem:[#allocation2 + $0x858] sm:$0xff] %vm19_vm3, %v4122_v31  ;;  %v5499_v48 = vmax.f32 %v5156_v35, 0.0  ;;  %v4985_v49 = vadd.f32 %v11435_v38, %v4635_v45  ;;  %4292 = vst.msk [vmem:[#allocation2 + $0x2e8] sm:$0xff] %vm19_vm3, %v3948_v39  ;;  %v8256_v18 = vpack.c.bf16 %v5501_v42, %v5501_v42  ;;  %v5330_v55 = vmax.f32 %v4987_v43, 0.0  ;;  %v463_v1 = vld [vmem:[#allocation2 + $0x318] sm:$0xff] }
 0x1c5   :  { %v5157_v50 = vadd.f32 %v11435_v38, %v4807_v46  ;;  %4464 = vst.msk [vmem:[#allocation2 + $0x848] sm:$0xff] %vm19_vm3, %v4120_v40  ;;  %v5502_v56 = vmax.f32 %v5159_v44, 0.0  ;;  %v8082_v59 = vpack.c.bf16 %v5327_v47, %v5327_v47  ;;  %v635_v2 = vld [vmem:[#allocation2 + $0x878] sm:$0xff]  ;;  %v4125_v6 = vadd.f32 %v8785_v0, %v634_v53  ;;  %v461_v9 = vld [vmem:[#allocation2 + $0x308] sm:$0xff]  ;;  %v4640_v13 = vld [vmem:[#allocation2 + $0x2f0] sm:$0xff]  ;;  %v8614_v19 = vpop.f32.mrb[98].mxu0 }
 0x1c6   :  { %v8254_v60 = vpack.c.bf16 %v5499_v48, %v5499_v48  ;;  %v5328_v61 = vmax.f32 %v4985_v49, 0.0  ;;  %7046 = vst.msk [vmem:[%s12548_s3 + $0x168] sm:$0xf] %vm6955_vm4, %v8084_v54  ;;  %7218 = vst.msk [vmem:[%s12548_s3 + $0x418] sm:$0xf] %vm6955_vm4, %v8256_v18  ;;  %v8085_v3 = vpack.c.bf16 %v5330_v55, %v5330_v55  ;;  %v633_v10 = vld [vmem:[#allocation2 + $0x868] sm:$0xff]  ;;  %v4123_v17 = vadd.f32 %v3553_v8, %v632_v58 }
 0x1c7   :  { %v5500_v62 = vmax.f32 %v5157_v50, 0.0  ;;  %v8257_v4 = vpack.c.bf16 %v5502_v56, %v5502_v56  ;;  %7044 = vst.msk [vmem:[%s12548_s3 + $0x160] sm:$0xf] %vm6955_vm4, %v8082_v59  ;;  %v8786_v20 = vpop.f32.mrb[98].mxu1  ;;  %v4990_v21 = vadd.f32 %v11435_v38, %v4640_v13  ;;  %v3954_v24 = vadd.f32 %v8614_v19, %v463_v1  ;;  %v2868_v26 = vpop.f32.mrb[99].mxu0  ;;  %v466_v45 = vld [vmem:[#allocation2 + $0x330] sm:$0xff] }
 0x1c8   :  { %7216 = vst.msk [vmem:[%s12548_s3 + $0x410] sm:$0xf] %vm6955_vm4, %v8254_v60  ;;  %v8083_v11 = vpack.c.bf16 %v5328_v61, %v5328_v61  ;;  %v4812_v14 = vld [vmem:[#allocation2 + $0x850] sm:$0xff]  ;;  %7047 = vst.msk [vmem:[%s12548_s3 + $0x16c] sm:$0xf] %vm6955_vm4, %v8085_v3  ;;  %v4638_v22 = vld [vmem:[#allocation2 + $0x2e0] sm:$0xff]  ;;  %v4126_v25 = vadd.f32 %v8786_v20, %v635_v2  ;;  %v3952_v32 = vadd.f32 %v2868_v26, %v461_v9 }
 0x1c9   :  { %v8255_v12 = vpack.c.bf16 %v5500_v62, %v5500_v62  ;;  %7219 = vst.msk [vmem:[%s12548_s3 + $0x41c] sm:$0xf] %vm6955_vm4, %v8257_v4  ;;  %v5162_v15 = vadd.f32 %v11435_v38, %v4812_v14  ;;  %v3556_v27 = vpop.f32.mrb[99].mxu1  ;;  %v4988_v28 = vadd.f32 %v11435_v38, %v4638_v22  ;;  %v5333_v34 = vmax.f32 %v4990_v21, 0.0  ;;  %v638_v46 = vld [vmem:[#allocation2 + $0x890] sm:$0xff]  ;;  %v464_v51 = vld [vmem:[#allocation2 + $0x320] sm:$0xff] }
 0x1ca   :  { %v4810_v23 = vld [vmem:[#allocation2 + $0x840] sm:$0xff]  ;;  %4297 = vst.msk [vmem:[#allocation2 + $0x310] sm:$0xff] %vm19_vm3, %v3953_v5  ;;  %4469 = vst.msk [vmem:[#allocation2 + $0x870] sm:$0xff] %vm19_vm3, %v4125_v6  ;;  %v4641_v30 = vld [vmem:[#allocation2 + $0x2f8] sm:$0xff]  ;;  %v4124_v33 = vadd.f32 %v3556_v27, %v633_v10  ;;  %v8617_v57 = vpop.f32.mrb[100].mxu0  ;;  %v8789_v58 = vpop.f32.mrb[100].mxu1 }
 0x1cb   :  { %7045 = vst.msk [vmem:[%s12548_s3 + $0x164] sm:$0xf] %vm6955_vm4, %v8083_v11  ;;  %7217 = vst.msk [vmem:[%s12548_s3 + $0x414] sm:$0xf] %vm6955_vm4, %v8255_v12  ;;  %v5160_v29 = vadd.f32 %v11435_v38, %v4810_v23  ;;  %v4813_v31 = vld [vmem:[#allocation2 + $0x858] sm:$0xff]  ;;  %v5505_v35 = vmax.f32 %v5162_v15, 0.0  ;;  %v4991_v36 = vadd.f32 %v11435_v38, %v4641_v30  ;;  %v8088_v47 = vpack.c.bf16 %v5333_v34, %v5333_v34 }
 0x1cc   :  { %4295 = vst.msk [vmem:[#allocation2 + $0x300] sm:$0xff] %vm19_vm3, %v3951_v16  ;;  %4467 = vst.msk [vmem:[#allocation2 + $0x860] sm:$0xff] %vm19_vm3, %v4123_v17  ;;  %v5163_v37 = vadd.f32 %v11435_v38, %v4813_v31  ;;  %v4639_v39 = vld [vmem:[#allocation2 + $0x2e8] sm:$0xff]  ;;  %v5331_v41 = vmax.f32 %v4988_v28, 0.0  ;;  %v636_v53 = vld [vmem:[#allocation2 + $0x880] sm:$0xff]  ;;  %v3957_v63 = vadd.f32 %v8617_v57, %v466_v45  ;;  %v4129_v0 = vadd.f32 %v8789_v58, %v638_v46  ;;  %v2881_v1 = vpop.f32.mrb[101].mxu0 }
 0x1cd   :  { %v4811_v40 = vld [vmem:[#allocation2 + $0x848] sm:$0xff]  ;;  %4298 = vst.msk [vmem:[#allocation2 + $0x318] sm:$0xff] %vm19_vm3, %v3954_v24  ;;  %4470 = vst.msk [vmem:[#allocation2 + $0x878] sm:$0xff] %vm19_vm3, %v4126_v25  ;;  %v5503_v42 = vmax.f32 %v5160_v29, 0.0  ;;  %v4989_v43 = vadd.f32 %v11435_v38, %v4639_v39  ;;  %v8260_v48 = vpack.c.bf16 %v5505_v35, %v5505_v35  ;;  %v5334_v49 = vmax.f32 %v4991_v36, 0.0  ;;  %v467_v59 = vld [vmem:[#allocation2 + $0x338] sm:$0xff] }
 0x1ce   :  { %v5161_v44 = vadd.f32 %v11435_v38, %v4811_v40  ;;  %4296 = vst.msk [vmem:[#allocation2 + $0x308] sm:$0xff] %vm19_vm3, %v3952_v32  ;;  %4468 = vst.msk [vmem:[#allocation2 + $0x868] sm:$0xff] %vm19_vm3, %v4124_v33  ;;  %v5506_v50 = vmax.f32 %v5163_v37, 0.0  ;;  %v8086_v54 = vpack.c.bf16 %v5331_v41, %v5331_v41  ;;  %v639_v60 = vld [vmem:[#allocation2 + $0x898] sm:$0xff]  ;;  %v3569_v2 = vpop.f32.mrb[101].mxu1  ;;  %v465_v3 = vld [vmem:[#allocation2 + $0x328] sm:$0xff]  ;;  %v3955_v9 = vadd.f32 %v2881_v1, %v464_v51 }
 0x1cf   :  { %v8258_v18 = vpack.c.bf16 %v5503_v42, %v5503_v42  ;;  %v5332_v55 = vmax.f32 %v4989_v43, 0.0  ;;  %7050 = vst.msk [vmem:[%s12548_s3 + $0x178] sm:$0xf] %vm6955_vm4, %v8088_v47  ;;  %7222 = vst.msk [vmem:[%s12548_s3 + $0x428] sm:$0xf] %vm6955_vm4, %v8260_v48  ;;  %v8089_v61 = vpack.c.bf16 %v5334_v49, %v5334_v49  ;;  %v637_v4 = vld [vmem:[#allocation2 + $0x888] sm:$0xff]  ;;  %v4127_v10 = vadd.f32 %v3569_v2, %v636_v53 }
 0x1d0   :  { %v5504_v56 = vmax.f32 %v5161_v44, 0.0  ;;  %v8261_v62 = vpack.c.bf16 %v5506_v50, %v5506_v50  ;;  %7048 = vst.msk [vmem:[%s12548_s3 + $0x170] sm:$0xf] %vm6955_vm4, %v8086_v54  ;;  %v8618_v11 = vpop.f32.mrb[102].mxu0  ;;  %v8790_v12 = vpop.f32.mrb[102].mxu1  ;;  %v470_v39 = vld [vmem:[#allocation2 + $0x350] sm:$0xff] }
 0x1d1   :  { %7220 = vst.msk [vmem:[%s12548_s3 + $0x420] sm:$0xf] %vm6955_vm4, %v8258_v18  ;;  %v8087_v5 = vpack.c.bf16 %v5332_v55, %v5332_v55  ;;  %v4644_v7 = vld [vmem:[#allocation2 + $0x310] sm:$0xff]  ;;  %7051 = vst.msk [vmem:[%s12548_s3 + $0x17c] sm:$0xf] %vm6955_vm4, %v8089_v61  ;;  %v3958_v19 = vadd.f32 %v8618_v11, %v467_v59  ;;  %v4130_v20 = vadd.f32 %v8790_v12, %v639_v60  ;;  %v2884_v21 = vpop.f32.mrb[103].mxu0 }
 0x1d2   :  { %v8259_v6 = vpack.c.bf16 %v5504_v56, %v5504_v56  ;;  %v4816_v8 = vld [vmem:[#allocation2 + $0x870] sm:$0xff]  ;;  %7223 = vst.msk [vmem:[%s12548_s3 + $0x42c] sm:$0xf] %vm6955_vm4, %v8261_v62  ;;  %v4994_v13 = vadd.f32 %v11435_v38, %v4644_v7  ;;  %v3572_v15 = vpop.f32.mrb[103].mxu1  ;;  %v3956_v26 = vadd.f32 %v2884_v21, %v465_v3  ;;  %v468_v45 = vld [vmem:[#allocation2 + $0x340] sm:$0xff]  ;;  %v8621_v51 = vpop.f32.mrb[104].mxu0 }
 0x1d3   :  { %v5166_v14 = vadd.f32 %v11435_v38, %v4816_v8  ;;  %v4642_v16 = vld [vmem:[#allocation2 + $0x300] sm:$0xff]  ;;  %4301 = vst.msk [vmem:[#allocation2 + $0x330] sm:$0xff] %vm19_vm3, %v3957_v63  ;;  %4473 = vst.msk [vmem:[#allocation2 + $0x890] sm:$0xff] %vm19_vm3, %v4129_v0  ;;  %v4128_v27 = vadd.f32 %v3572_v15, %v637_v4  ;;  %v642_v40 = vld [vmem:[#allocation2 + $0x8b0] sm:$0xff]  ;;  %v8793_v53 = vpop.f32.mrb[104].mxu1  ;;  %v3961_v57 = vadd.f32 %v8621_v51, %v470_v39  ;;  %v2897_v59 = vpop.f32.mrb[105].mxu0 }
 0x1d4   :  { %v4814_v17 = vld [vmem:[#allocation2 + $0x860] sm:$0xff]  ;;  %7049 = vst.msk [vmem:[%s12548_s3 + $0x174] sm:$0xf] %vm6955_vm4, %v8087_v5  ;;  %7221 = vst.msk [vmem:[%s12548_s3 + $0x424] sm:$0xf] %vm6955_vm4, %v8259_v6  ;;  %v4992_v22 = vadd.f32 %v11435_v38, %v4642_v16  ;;  %v4645_v24 = vld [vmem:[#allocation2 + $0x318] sm:$0xff]  ;;  %v4133_v58 = vadd.f32 %v8793_v53, %v642_v40  ;;  %v3959_v3 = vadd.f32 %v2897_v59, %v468_v45 }
 0x1d5   :  { %v5164_v23 = vadd.f32 %v11435_v38, %v4814_v17  ;;  %v4817_v25 = vld [vmem:[#allocation2 + $0x878] sm:$0xff]  ;;  %4299 = vst.msk [vmem:[#allocation2 + $0x320] sm:$0xff] %vm19_vm3, %v3955_v9  ;;  %4471 = vst.msk [vmem:[#allocation2 + $0x880] sm:$0xff] %vm19_vm3, %v4127_v10  ;;  %v5337_v28 = vmax.f32 %v4994_v13, 0.0  ;;  %v5509_v29 = vmax.f32 %v5166_v14, 0.0  ;;  %v4995_v30 = vadd.f32 %v11435_v38, %v4645_v24  ;;  %v4643_v32 = vld [vmem:[#allocation2 + $0x308] sm:$0xff] }
 0x1d6   :  { %v5167_v31 = vadd.f32 %v11435_v38, %v4817_v25  ;;  %v4815_v33 = vld [vmem:[#allocation2 + $0x868] sm:$0xff]  ;;  %4302 = vst.msk [vmem:[#allocation2 + $0x338] sm:$0xff] %vm19_vm3, %v3958_v19  ;;  %4474 = vst.msk [vmem:[#allocation2 + $0x898] sm:$0xff] %vm19_vm3, %v4130_v20  ;;  %v5335_v34 = vmax.f32 %v4992_v22, 0.0  ;;  %v4993_v36 = vadd.f32 %v11435_v38, %v4643_v32  ;;  %v640_v46 = vld [vmem:[#allocation2 + $0x8a0] sm:$0xff]  ;;  %v3585_v60 = vpop.f32.mrb[105].mxu1 }
 0x1d7   :  { %v5507_v35 = vmax.f32 %v5164_v23, 0.0  ;;  %v5165_v37 = vadd.f32 %v11435_v38, %v4815_v33  ;;  %4300 = vst.msk [vmem:[#allocation2 + $0x328] sm:$0xff] %vm19_vm3, %v3956_v26  ;;  %4472 = vst.msk [vmem:[#allocation2 + $0x888] sm:$0xff] %vm19_vm3, %v4128_v27  ;;  %v8092_v41 = vpack.c.bf16 %v5337_v28, %v5337_v28  ;;  %v8264_v42 = vpack.c.bf16 %v5509_v29, %v5509_v29  ;;  %v471_v54 = vld [vmem:[#allocation2 + $0x358] sm:$0xff]  ;;  %v469_v61 = vld [vmem:[#allocation2 + $0x348] sm:$0xff]  ;;  %v8622_v5 = vpop.f32.mrb[106].mxu0 }
 0x1d8   :  { %v5338_v43 = vmax.f32 %v4995_v30, 0.0  ;;  %v5510_v44 = vmax.f32 %v5167_v31, 0.0  ;;  %v8090_v47 = vpack.c.bf16 %v5335_v34, %v5335_v34  ;;  %v5336_v49 = vmax.f32 %v4993_v36, 0.0  ;;  %v643_v18 = vld [vmem:[#allocation2 + $0x8b8] sm:$0xff]  ;;  %v641_v62 = vld [vmem:[#allocation2 + $0x8a8] sm:$0xff]  ;;  %v8794_v6 = vpop.f32.mrb[106].mxu1 }
 0x1d9   :  { %v8262_v48 = vpack.c.bf16 %v5507_v35, %v5507_v35  ;;  %v5508_v50 = vmax.f32 %v5165_v37, 0.0  ;;  %7054 = vst.msk [vmem:[%s12548_s3 + $0x188] sm:$0xf] %vm6955_vm4, %v8092_v41  ;;  %7226 = vst.msk [vmem:[%s12548_s3 + $0x438] sm:$0xf] %vm6955_vm4, %v8264_v42  ;;  %v4131_v4 = vadd.f32 %v3585_v60, %v640_v46  ;;  %v3962_v11 = vadd.f32 %v8622_v5, %v471_v54  ;;  %v2900_v13 = vpop.f32.mrb[107].mxu0 }
 0x1da   :  { %v8093_v55 = vpack.c.bf16 %v5338_v43, %v5338_v43  ;;  %v8265_v56 = vpack.c.bf16 %v5510_v44, %v5510_v44  ;;  %7052 = vst.msk [vmem:[%s12548_s3 + $0x180] sm:$0xf] %vm6955_vm4, %v8090_v47  ;;  %v8091_v63 = vpack.c.bf16 %v5336_v49, %v5336_v49  ;;  %v4648_v1 = vld [vmem:[#allocation2 + $0x330] sm:$0xff]  ;;  %v4134_v12 = vadd.f32 %v8794_v6, %v643_v18  ;;  %v3588_v14 = vpop.f32.mrb[107].mxu1  ;;  %v472_v39 = vld [vmem:[#allocation2 + $0x360] sm:$0xff]  ;;  %v8625_v45 = vpop.f32.mrb[108].mxu0 }
 0x1db   :  { %7224 = vst.msk [vmem:[%s12548_s3 + $0x430] sm:$0xf] %vm6955_vm4, %v8262_v48  ;;  %v8263_v0 = vpack.c.bf16 %v5508_v50, %v5508_v50  ;;  %v4820_v2 = vld [vmem:[#allocation2 + $0x890] sm:$0xff]  ;;  %v4998_v7 = vadd.f32 %v11435_v38, %v4648_v1  ;;  %v3960_v21 = vadd.f32 %v2900_v13, %v469_v61  ;;  %v4132_v15 = vadd.f32 %v3588_v14, %v641_v62  ;;  %v644_v40 = vld [vmem:[#allocation2 + $0x8c0] sm:$0xff]  ;;  %v8797_v46 = vpop.f32.mrb[108].mxu1  ;;  %v475_v47 = vld [vmem:[#allocation2 + $0x378] sm:$0xff] }
 0x1dc   :  { %7055 = vst.msk [vmem:[%s12548_s3 + $0x18c] sm:$0xf] %vm6955_vm4, %v8093_v55  ;;  %7227 = vst.msk [vmem:[%s12548_s3 + $0x43c] sm:$0xf] %vm6955_vm4, %v8265_v56  ;;  %v5170_v8 = vadd.f32 %v11435_v38, %v4820_v2  ;;  %v4646_v9 = vld [vmem:[#allocation2 + $0x320] sm:$0xff]  ;;  %v474_v32 = vld [vmem:[#allocation2 + $0x370] sm:$0xff] }
 0x1dd   :  { %v4818_v10 = vld [vmem:[#allocation2 + $0x880] sm:$0xff]  ;;  %4305 = vst.msk [vmem:[#allocation2 + $0x350] sm:$0xff] %vm19_vm3, %v3961_v57  ;;  %4477 = vst.msk [vmem:[#allocation2 + $0x8b0] sm:$0xff] %vm19_vm3, %v4133_v58  ;;  %v4996_v16 = vadd.f32 %v11435_v38, %v4646_v9  ;;  %v4649_v19 = vld [vmem:[#allocation2 + $0x338] sm:$0xff]  ;;  %v5341_v22 = vmax.f32 %v4998_v7, 0.0  ;;  %v3965_v51 = vadd.f32 %v8625_v45, %v474_v32  ;;  %v2913_v54 = vpop.f32.mrb[109].mxu0 }
 0x1de   :  { %7053 = vst.msk [vmem:[%s12548_s3 + $0x184] sm:$0xf] %vm6955_vm4, %v8091_v63  ;;  %7225 = vst.msk [vmem:[%s12548_s3 + $0x434] sm:$0xf] %vm6955_vm4, %v8263_v0  ;;  %v5168_v17 = vadd.f32 %v11435_v38, %v4818_v10  ;;  %v4821_v20 = vld [vmem:[#allocation2 + $0x898] sm:$0xff]  ;;  %v5513_v23 = vmax.f32 %v5170_v8, 0.0  ;;  %v4999_v24 = vadd.f32 %v11435_v38, %v4649_v19  ;;  %v3963_v61 = vadd.f32 %v2913_v54, %v472_v39 }
 0x1df   :  { %4303 = vst.msk [vmem:[#allocation2 + $0x340] sm:$0xff] %vm19_vm3, %v3959_v3  ;;  %4475 = vst.msk [vmem:[#allocation2 + $0x8a0] sm:$0xff] %vm19_vm3, %v4131_v4  ;;  %v5171_v25 = vadd.f32 %v11435_v38, %v4821_v20  ;;  %v4647_v26 = vld [vmem:[#allocation2 + $0x328] sm:$0xff]  ;;  %v5339_v28 = vmax.f32 %v4996_v16, 0.0  ;;  %v646_v33 = vld [vmem:[#allocation2 + $0x8d0] sm:$0xff]  ;;  %v8096_v34 = vpack.c.bf16 %v5341_v22, %v5341_v22  ;;  %v3601_v18 = vpop.f32.mrb[109].mxu1 }
 0x1e0   :  { %v4819_v27 = vld [vmem:[#allocation2 + $0x888] sm:$0xff]  ;;  %4306 = vst.msk [vmem:[#allocation2 + $0x358] sm:$0xff] %vm19_vm3, %v3962_v11  ;;  %4478 = vst.msk [vmem:[#allocation2 + $0x8b8] sm:$0xff] %vm19_vm3, %v4134_v12  ;;  %v5511_v29 = vmax.f32 %v5168_v17, 0.0  ;;  %v4997_v30 = vadd.f32 %v11435_v38, %v4647_v26  ;;  %v8268_v35 = vpack.c.bf16 %v5513_v23, %v5513_v23  ;;  %v5342_v36 = vmax.f32 %v4999_v24, 0.0  ;;  %v647_v48 = vld [vmem:[#allocation2 + $0x8d8] sm:$0xff] }
 0x1e1   :  { %v5169_v31 = vadd.f32 %v11435_v38, %v4819_v27  ;;  %4304 = vst.msk [vmem:[#allocation2 + $0x348] sm:$0xff] %vm19_vm3, %v3960_v21  ;;  %4476 = vst.msk [vmem:[#allocation2 + $0x8a8] sm:$0xff] %vm19_vm3, %v4132_v15  ;;  %v5514_v37 = vmax.f32 %v5171_v25, 0.0  ;;  %v8094_v41 = vpack.c.bf16 %v5339_v28, %v5339_v28  ;;  %v4137_v53 = vadd.f32 %v8797_v46, %v646_v33  ;;  %v473_v55 = vld [vmem:[#allocation2 + $0x368] sm:$0xff]  ;;  %v8626_v63 = vpop.f32.mrb[110].mxu0  ;;  %v8798_v0 = vpop.f32.mrb[110].mxu1 }
 0x1e2   :  { %v8266_v42 = vpack.c.bf16 %v5511_v29, %v5511_v29  ;;  %v5340_v43 = vmax.f32 %v4997_v30, 0.0  ;;  %7058 = vst.msk [vmem:[%s12548_s3 + $0x198] sm:$0xf] %vm6955_vm4, %v8096_v34  ;;  %7230 = vst.msk [vmem:[%s12548_s3 + $0x448] sm:$0xf] %vm6955_vm4, %v8268_v35  ;;  %v8097_v49 = vpack.c.bf16 %v5342_v36, %v5342_v36  ;;  %v645_v56 = vld [vmem:[#allocation2 + $0x8c8] sm:$0xff]  ;;  %v4135_v62 = vadd.f32 %v3601_v18, %v644_v40 }
 0x1e3   :  { %v5512_v44 = vmax.f32 %v5169_v31, 0.0  ;;  %v8269_v50 = vpack.c.bf16 %v5514_v37, %v5514_v37  ;;  %7056 = vst.msk [vmem:[%s12548_s3 + $0x190] sm:$0xf] %vm6955_vm4, %v8094_v41  ;;  %v3966_v5 = vadd.f32 %v8626_v63, %v475_v47  ;;  %v4138_v6 = vadd.f32 %v8798_v0, %v647_v48  ;;  %v2916_v7 = vpop.f32.mrb[111].mxu0  ;;  %v3604_v8 = vpop.f32.mrb[111].mxu1  ;;  %v478_v26 = vld [vmem:[#allocation2 + $0x390] sm:$0xff] }
 0x1e4   :  { %7228 = vst.msk [vmem:[%s12548_s3 + $0x440] sm:$0xf] %vm6955_vm4, %v8266_v42  ;;  %v8095_v57 = vpack.c.bf16 %v5340_v43, %v5340_v43  ;;  %v4652_v59 = vld [vmem:[#allocation2 + $0x350] sm:$0xff]  ;;  %7059 = vst.msk [vmem:[%s12548_s3 + $0x19c] sm:$0xf] %vm6955_vm4, %v8097_v49  ;;  %v3964_v13 = vadd.f32 %v2916_v7, %v473_v55  ;;  %v4136_v14 = vadd.f32 %v3604_v8, %v645_v56  ;;  %v476_v32 = vld [vmem:[#allocation2 + $0x380] sm:$0xff] }
 0x1e5   :  { %v8267_v58 = vpack.c.bf16 %v5512_v44, %v5512_v44  ;;  %v4824_v60 = vld [vmem:[#allocation2 + $0x8b0] sm:$0xff]  ;;  %7231 = vst.msk [vmem:[%s12548_s3 + $0x44c] sm:$0xf] %vm6955_vm4, %v8269_v50  ;;  %v5002_v1 = vadd.f32 %v11435_v38, %v4652_v59  ;;  %v648_v33 = vld [vmem:[#allocation2 + $0x8e0] sm:$0xff]  ;;  %v8629_v39 = vpop.f32.mrb[112].mxu0  ;;  %v8801_v40 = vpop.f32.mrb[112].mxu1 }
 0x1e6   :  { %v5174_v2 = vadd.f32 %v11435_v38, %v4824_v60  ;;  %v4650_v3 = vld [vmem:[#allocation2 + $0x340] sm:$0xff]  ;;  %4309 = vst.msk [vmem:[#allocation2 + $0x370] sm:$0xff] %vm19_vm3, %v3965_v51  ;;  %4481 = vst.msk [vmem:[#allocation2 + $0x8d0] sm:$0xff] %vm19_vm3, %v4137_v53  ;;  %v650_v27 = vld [vmem:[#allocation2 + $0x8f0] sm:$0xff]  ;;  %v3969_v45 = vadd.f32 %v8629_v39, %v478_v26  ;;  %v2929_v47 = vpop.f32.mrb[113].mxu0  ;;  %v3617_v48 = vpop.f32.mrb[113].mxu1 }
 0x1e7   :  { %v4822_v4 = vld [vmem:[#allocation2 + $0x8a0] sm:$0xff]  ;;  %7057 = vst.msk [vmem:[%s12548_s3 + $0x194] sm:$0xf] %vm6955_vm4, %v8095_v57  ;;  %7229 = vst.msk [vmem:[%s12548_s3 + $0x444] sm:$0xf] %vm6955_vm4, %v8267_v58  ;;  %v5000_v9 = vadd.f32 %v11435_v38, %v4650_v3  ;;  %v4653_v11 = vld [vmem:[#allocation2 + $0x358] sm:$0xff]  ;;  %v4141_v46 = vadd.f32 %v8801_v40, %v650_v27  ;;  %v3967_v55 = vadd.f32 %v2929_v47, %v476_v32 }
 0x1e8   :  { %v5172_v10 = vadd.f32 %v11435_v38, %v4822_v4  ;;  %v4825_v12 = vld [vmem:[#allocation2 + $0x8b8] sm:$0xff]  ;;  %4307 = vst.msk [vmem:[#allocation2 + $0x360] sm:$0xff] %vm19_vm3, %v3963_v61  ;;  %4479 = vst.msk [vmem:[#allocation2 + $0x8c0] sm:$0xff] %vm19_vm3, %v4135_v62  ;;  %v5345_v16 = vmax.f32 %v5002_v1, 0.0  ;;  %v5517_v17 = vmax.f32 %v5174_v2, 0.0  ;;  %v5003_v19 = vadd.f32 %v11435_v38, %v4653_v11  ;;  %v4651_v21 = vld [vmem:[#allocation2 + $0x348] sm:$0xff] }
 0x1e9   :  { %v5175_v20 = vadd.f32 %v11435_v38, %v4825_v12  ;;  %v4823_v15 = vld [vmem:[#allocation2 + $0x8a8] sm:$0xff]  ;;  %4310 = vst.msk [vmem:[#allocation2 + $0x378] sm:$0xff] %vm19_vm3, %v3966_v5  ;;  %4482 = vst.msk [vmem:[#allocation2 + $0x8d8] sm:$0xff] %vm19_vm3, %v4138_v6  ;;  %v5343_v22 = vmax.f32 %v5000_v9, 0.0  ;;  %v5001_v24 = vadd.f32 %v11435_v38, %v4651_v21  ;;  %v479_v41 = vld [vmem:[#allocation2 + $0x398] sm:$0xff]  ;;  %v4139_v56 = vadd.f32 %v3617_v48, %v648_v33  ;;  %v8630_v57 = vpop.f32.mrb[114].mxu0 }
 0x1ea   :  { %v5515_v23 = vmax.f32 %v5172_v10, 0.0  ;;  %v5173_v25 = vadd.f32 %v11435_v38, %v4823_v15  ;;  %4308 = vst.msk [vmem:[#allocation2 + $0x368] sm:$0xff] %vm19_vm3, %v3964_v13  ;;  %4480 = vst.msk [vmem:[#allocation2 + $0x8c8] sm:$0xff] %vm19_vm3, %v4136_v14  ;;  %v8100_v28 = vpack.c.bf16 %v5345_v16, %v5345_v16  ;;  %v8272_v29 = vpack.c.bf16 %v5517_v17, %v5517_v17  ;;  %v651_v42 = vld [vmem:[#allocation2 + $0x8f8] sm:$0xff]  ;;  %v477_v49 = vld [vmem:[#allocation2 + $0x388] sm:$0xff]  ;;  %v8802_v58 = vpop.f32.mrb[114].mxu1 }
 0x1eb   :  { %v5346_v30 = vmax.f32 %v5003_v19, 0.0  ;;  %v5518_v31 = vmax.f32 %v5175_v20, 0.0  ;;  %v8098_v34 = vpack.c.bf16 %v5343_v22, %v5343_v22  ;;  %v5344_v36 = vmax.f32 %v5001_v24, 0.0  ;;  %v649_v50 = vld [vmem:[#allocation2 + $0x8e8] sm:$0xff]  ;;  %4313 = vst.msk [vmem:[#allocation2 + $0x390] sm:$0xff] %vm19_vm3, %v3969_v45  ;;  %4485 = vst.msk [vmem:[#allocation2 + $0x8f0] sm:$0xff] %vm19_vm3, %v4141_v46 }
 0x1ec   :  { %v8270_v35 = vpack.c.bf16 %v5515_v23, %v5515_v23  ;;  %v5516_v37 = vmax.f32 %v5173_v25, 0.0  ;;  %7062 = vst.msk [vmem:[%s12548_s3 + $0x1a8] sm:$0xf] %vm6955_vm4, %v8100_v28  ;;  %7234 = vst.msk [vmem:[%s12548_s3 + $0x458] sm:$0xf] %vm6955_vm4, %v8272_v29  ;;  %v3970_v63 = vadd.f32 %v8630_v57, %v479_v41  ;;  %v4142_v0 = vadd.f32 %v8802_v58, %v651_v42  ;;  %v2932_v1 = vpop.f32.mrb[115].mxu0 }
 0x1ed   :  { %v8101_v43 = vpack.c.bf16 %v5346_v30, %v5346_v30  ;;  %v8273_v44 = vpack.c.bf16 %v5518_v31, %v5518_v31  ;;  %7060 = vst.msk [vmem:[%s12548_s3 + $0x1a0] sm:$0xf] %vm6955_vm4, %v8098_v34  ;;  %v8099_v51 = vpack.c.bf16 %v5344_v36, %v5344_v36  ;;  %v4656_v54 = vld [vmem:[#allocation2 + $0x370] sm:$0xff]  ;;  %v3620_v2 = vpop.f32.mrb[115].mxu1  ;;  %v3968_v7 = vadd.f32 %v2932_v1, %v477_v49  ;;  %v480_v26 = vld [vmem:[#allocation2 + $0x3a0] sm:$0xff]  ;;  %v8633_v32 = vpop.f32.mrb[116].mxu0 }
 0x1ee   :  { %7232 = vst.msk [vmem:[%s12548_s3 + $0x450] sm:$0xf] %vm6955_vm4, %v8270_v35  ;;  %v8271_v53 = vpack.c.bf16 %v5516_v37, %v5516_v37  ;;  %v4828_v18 = vld [vmem:[#allocation2 + $0x8d0] sm:$0xff]  ;;  %v5006_v59 = vadd.f32 %v11435_v38, %v4656_v54  ;;  %v4140_v8 = vadd.f32 %v3620_v2, %v649_v50  ;;  %v652_v27 = vld [vmem:[#allocation2 + $0x900] sm:$0xff]  ;;  %v8805_v33 = vpop.f32.mrb[116].mxu1  ;;  %v483_v34 = vld [vmem:[#allocation2 + $0x3b8] sm:$0xff] }
 0x1ef   :  { %7063 = vst.msk [vmem:[%s12548_s3 + $0x1ac] sm:$0xf] %vm6955_vm4, %v8101_v43  ;;  %7235 = vst.msk [vmem:[%s12548_s3 + $0x45c] sm:$0xf] %vm6955_vm4, %v8273_v44  ;;  %v5178_v60 = vadd.f32 %v11435_v38, %v4828_v18  ;;  %v4654_v61 = vld [vmem:[#allocation2 + $0x360] sm:$0xff]  ;;  %v482_v21 = vld [vmem:[#allocation2 + $0x3b0] sm:$0xff] }
 0x1f0   :  { %v4826_v62 = vld [vmem:[#allocation2 + $0x8c0] sm:$0xff]  ;;  %7061 = vst.msk [vmem:[%s12548_s3 + $0x1a4] sm:$0xf] %vm6955_vm4, %v8099_v51  ;;  %7233 = vst.msk [vmem:[%s12548_s3 + $0x454] sm:$0xf] %vm6955_vm4, %v8271_v53  ;;  %v4657_v5 = vld [vmem:[#allocation2 + $0x378] sm:$0xff]  ;;  %v3973_v39 = vadd.f32 %v8633_v32, %v482_v21 }
 0x1f1   :  { %v11788_v38 = vld [vmem:[%s12547_s2] ss:$0 sm:$0xff]  ;;  %v4829_v6 = vld [vmem:[#allocation2 + $0x8d8] sm:$0xff]  ;;  %4311 = vst.msk [vmem:[#allocation2 + $0x380] sm:$0xff] %vm19_vm3, %v3967_v55  ;;  %4483 = vst.msk [vmem:[#allocation2 + $0x8e0] sm:$0xff] %vm19_vm3, %v4139_v56  ;;  %v5349_v9 = vmax.f32 %v5006_v59, 0.0 }
 0x1f2   :  { %v5004_v3 = vadd.f32 %v11788_v38, %v4654_v61  ;;  %v5176_v4 = vadd.f32 %v11788_v38, %v4826_v62  ;;  %v5521_v10 = vmax.f32 %v5178_v60, 0.0  ;;  %v5007_v11 = vadd.f32 %v11788_v38, %v4657_v5  ;;  %v4655_v13 = vld [vmem:[#allocation2 + $0x368] sm:$0xff]  ;;  %4314 = vst.msk [vmem:[#allocation2 + $0x398] sm:$0xff] %vm19_vm3, %v3970_v63  ;;  %4486 = vst.msk [vmem:[#allocation2 + $0x8f8] sm:$0xff] %vm19_vm3, %v4142_v0  ;;  %v654_v15 = vld [vmem:[#allocation2 + $0x910] sm:$0xff]  ;;  %v2945_v41 = vpop.f32.mrb[117].mxu0 }
 0x1f3   :  { %v5179_v12 = vadd.f32 %v11788_v38, %v4829_v6  ;;  %v4827_v14 = vld [vmem:[#allocation2 + $0x8c8] sm:$0xff]  ;;  %v5005_v19 = vadd.f32 %v11788_v38, %v4655_v13  ;;  %4312 = vst.msk [vmem:[#allocation2 + $0x388] sm:$0xff] %vm19_vm3, %v3968_v7  ;;  %4484 = vst.msk [vmem:[#allocation2 + $0x8e8] sm:$0xff] %vm19_vm3, %v4140_v8  ;;  %v8104_v22 = vpack.c.bf16 %v5349_v9, %v5349_v9  ;;  %v655_v35 = vld [vmem:[#allocation2 + $0x918] sm:$0xff]  ;;  %v3633_v42 = vpop.f32.mrb[117].mxu1  ;;  %v8634_v51 = vpop.f32.mrb[118].mxu0 }
 0x1f4   :  { %v5347_v16 = vmax.f32 %v5004_v3, 0.0  ;;  %v5519_v17 = vmax.f32 %v5176_v4, 0.0  ;;  %v5177_v20 = vadd.f32 %v11788_v38, %v4827_v14  ;;  %v8276_v23 = vpack.c.bf16 %v5521_v10, %v5521_v10  ;;  %v481_v43 = vld [vmem:[#allocation2 + $0x3a8] sm:$0xff]  ;;  %v4660_v47 = vld [vmem:[#allocation2 + $0x390] sm:$0xff]  ;;  %v8806_v53 = vpop.f32.mrb[118].mxu1  ;;  %4317 = vst.msk [vmem:[#allocation2 + $0x3b0] sm:$0xff] %vm19_vm3, %v3973_v39 }
 0x1f5   :  { %v5350_v24 = vmax.f32 %v5007_v11, 0.0  ;;  %v5522_v25 = vmax.f32 %v5179_v12, 0.0  ;;  %v5348_v30 = vmax.f32 %v5005_v19, 0.0  ;;  %7066 = vst.msk [vmem:[%s12548_s3 + $0x1b8] sm:$0xf] %vm6955_vm4, %v8104_v22  ;;  %v4145_v40 = vadd.f32 %v8805_v33, %v654_v15  ;;  %v653_v44 = vld [vmem:[#allocation2 + $0x908] sm:$0xff] }
 0x1f6   :  { %v8102_v28 = vpack.c.bf16 %v5347_v16, %v5347_v16  ;;  %v8274_v29 = vpack.c.bf16 %v5519_v17, %v5519_v17  ;;  %v5520_v31 = vmax.f32 %v5177_v20, 0.0  ;;  %7238 = vst.msk [vmem:[%s12548_s3 + $0x468] sm:$0xf] %vm6955_vm4, %v8276_v23  ;;  %v4832_v48 = vld [vmem:[#allocation2 + $0x8f0] sm:$0xff]  ;;  %v3971_v49 = vadd.f32 %v2945_v41, %v480_v26  ;;  %v2948_v59 = vpop.f32.mrb[119].mxu0  ;;  %v3636_v60 = vpop.f32.mrb[119].mxu1 }
 0x1f7   :  { %v8105_v36 = vpack.c.bf16 %v5350_v24, %v5350_v24  ;;  %v8277_v37 = vpack.c.bf16 %v5522_v25, %v5522_v25  ;;  %v8103_v45 = vpack.c.bf16 %v5348_v30, %v5348_v30  ;;  %v4143_v50 = vadd.f32 %v3633_v42, %v652_v27  ;;  %4489 = vst.msk [vmem:[#allocation2 + $0x910] sm:$0xff] %vm19_vm3, %v4145_v40  ;;  %v486_v13 = vld [vmem:[#allocation2 + $0x3d0] sm:$0xff]  ;;  %v484_v21 = vld [vmem:[#allocation2 + $0x3c0] sm:$0xff]  ;;  %v8637_v26 = vpop.f32.mrb[120].mxu0  ;;  %v8809_v27 = vpop.f32.mrb[120].mxu1 }
 0x1f8   :  { %7064 = vst.msk [vmem:[%s12548_s3 + $0x1b0] sm:$0xf] %vm6955_vm4, %v8102_v28  ;;  %7236 = vst.msk [vmem:[%s12548_s3 + $0x460] sm:$0xf] %vm6955_vm4, %v8274_v29  ;;  %v8275_v46 = vpack.c.bf16 %v5520_v31, %v5520_v31  ;;  %v5010_v54 = vadd.f32 %v11788_v38, %v4660_v47  ;;  %v5182_v18 = vadd.f32 %v11788_v38, %v4832_v48  ;;  %v4658_v55 = vld [vmem:[#allocation2 + $0x380] sm:$0xff]  ;;  %v658_v14 = vld [vmem:[#allocation2 + $0x930] sm:$0xff] }
 0x1f9   :  { %7067 = vst.msk [vmem:[%s12548_s3 + $0x1bc] sm:$0xf] %vm6955_vm4, %v8105_v36  ;;  %7239 = vst.msk [vmem:[%s12548_s3 + $0x46c] sm:$0xf] %vm6955_vm4, %v8277_v37  ;;  %v4830_v56 = vld [vmem:[#allocation2 + $0x8e0] sm:$0xff]  ;;  %v3974_v57 = vadd.f32 %v8634_v51, %v483_v34  ;;  %v4146_v58 = vadd.f32 %v8806_v53, %v655_v35  ;;  %v5008_v61 = vadd.f32 %v11788_v38, %v4658_v55  ;;  %v4661_v63 = vld [vmem:[#allocation2 + $0x398] sm:$0xff] }
 0x1fa   :  { %7065 = vst.msk [vmem:[%s12548_s3 + $0x1b4] sm:$0xf] %vm6955_vm4, %v8103_v45  ;;  %7237 = vst.msk [vmem:[%s12548_s3 + $0x464] sm:$0xf] %vm6955_vm4, %v8275_v46  ;;  %v5180_v62 = vadd.f32 %v11788_v38, %v4830_v56  ;;  %v4833_v0 = vld [vmem:[#allocation2 + $0x8f8] sm:$0xff]  ;;  %v3972_v1 = vadd.f32 %v2948_v59, %v481_v43  ;;  %v4144_v2 = vadd.f32 %v3636_v60, %v653_v44  ;;  %v5353_v3 = vmax.f32 %v5010_v54, 0.0 }
 0x1fb   :  { %4315 = vst.msk [vmem:[#allocation2 + $0x3a0] sm:$0xff] %vm19_vm3, %v3971_v49  ;;  %4487 = vst.msk [vmem:[#allocation2 + $0x900] sm:$0xff] %vm19_vm3, %v4143_v50  ;;  %v5525_v4 = vmax.f32 %v5182_v18, 0.0  ;;  %v5011_v5 = vadd.f32 %v11788_v38, %v4661_v63  ;;  %v5183_v6 = vadd.f32 %v11788_v38, %v4833_v0  ;;  %v4659_v7 = vld [vmem:[#allocation2 + $0x388] sm:$0xff]  ;;  %v5351_v9 = vmax.f32 %v5008_v61, 0.0  ;;  %v656_v15 = vld [vmem:[#allocation2 + $0x920] sm:$0xff] }
 0x1fc   :  { %v4831_v8 = vld [vmem:[#allocation2 + $0x8e8] sm:$0xff]  ;;  %4318 = vst.msk [vmem:[#allocation2 + $0x3b8] sm:$0xff] %vm19_vm3, %v3974_v57  ;;  %4490 = vst.msk [vmem:[#allocation2 + $0x918] sm:$0xff] %vm19_vm3, %v4146_v58  ;;  %v5523_v10 = vmax.f32 %v5180_v62, 0.0  ;;  %v5009_v11 = vadd.f32 %v11788_v38, %v4659_v7  ;;  %v8108_v16 = vpack.c.bf16 %v5353_v3, %v5353_v3  ;;  %v487_v28 = vld [vmem:[#allocation2 + $0x3d8] sm:$0xff]  ;;  %v3977_v32 = vadd.f32 %v8637_v26, %v486_v13  ;;  %v2961_v34 = vpop.f32.mrb[121].mxu0 }
 0x1fd   :  { %v5181_v12 = vadd.f32 %v11788_v38, %v4831_v8  ;;  %4316 = vst.msk [vmem:[#allocation2 + $0x3a8] sm:$0xff] %vm19_vm3, %v3972_v1  ;;  %4488 = vst.msk [vmem:[#allocation2 + $0x908] sm:$0xff] %vm19_vm3, %v4144_v2  ;;  %v8280_v17 = vpack.c.bf16 %v5525_v4, %v5525_v4  ;;  %v5354_v19 = vmax.f32 %v5011_v5, 0.0  ;;  %v5526_v20 = vmax.f32 %v5183_v6, 0.0  ;;  %v659_v29 = vld [vmem:[#allocation2 + $0x938] sm:$0xff]  ;;  %v3649_v35 = vpop.f32.mrb[121].mxu1 }
 0x1fe   :  { %v8106_v22 = vpack.c.bf16 %v5351_v9, %v5351_v9  ;;  %v8278_v23 = vpack.c.bf16 %v5523_v10, %v5523_v10  ;;  %v5352_v24 = vmax.f32 %v5009_v11, 0.0  ;;  %7070 = vst.msk [vmem:[%s12548_s3 + $0x1c8] sm:$0xf] %vm6955_vm4, %v8108_v16  ;;  %v4149_v33 = vadd.f32 %v8809_v27, %v658_v14  ;;  %v485_v36 = vld [vmem:[#allocation2 + $0x3c8] sm:$0xff]  ;;  %v4664_v41 = vld [vmem:[#allocation2 + $0x3b0] sm:$0xff]  ;;  %v8638_v45 = vpop.f32.mrb[122].mxu0 }
 0x1ff   :  { %v5524_v25 = vmax.f32 %v5181_v12, 0.0  ;;  %7242 = vst.msk [vmem:[%s12548_s3 + $0x478] sm:$0xf] %vm6955_vm4, %v8280_v17  ;;  %v8109_v30 = vpack.c.bf16 %v5354_v19, %v5354_v19  ;;  %v8281_v31 = vpack.c.bf16 %v5526_v20, %v5526_v20  ;;  %v657_v37 = vld [vmem:[#allocation2 + $0x928] sm:$0xff]  ;;  %v4836_v42 = vld [vmem:[#allocation2 + $0x910] sm:$0xff]  ;;  %v3975_v43 = vadd.f32 %v2961_v34, %v484_v21  ;;  %v8810_v46 = vpop.f32.mrb[122].mxu1 }
 0x200   :  { %7068 = vst.msk [vmem:[%s12548_s3 + $0x1c0] sm:$0xf] %vm6955_vm4, %v8106_v22  ;;  %7240 = vst.msk [vmem:[%s12548_s3 + $0x470] sm:$0xf] %vm6955_vm4, %v8278_v23  ;;  %v8107_v39 = vpack.c.bf16 %v5352_v24, %v5352_v24  ;;  %v4147_v44 = vadd.f32 %v3649_v35, %v656_v15  ;;  %v5014_v47 = vadd.f32 %v11788_v38, %v4664_v41  ;;  %v2964_v54 = vpop.f32.mrb[123].mxu0  ;;  %v3652_v18 = vpop.f32.mrb[123].mxu1 }
 0x201   :  { %v8279_v40 = vpack.c.bf16 %v5524_v25, %v5524_v25  ;;  %7071 = vst.msk [vmem:[%s12548_s3 + $0x1cc] sm:$0xf] %vm6955_vm4, %v8109_v30  ;;  %7243 = vst.msk [vmem:[%s12548_s3 + $0x47c] sm:$0xf] %vm6955_vm4, %v8281_v31  ;;  %v5186_v48 = vadd.f32 %v11788_v38, %v4836_v42  ;;  %v3978_v51 = vadd.f32 %v8638_v45, %v487_v28  ;;  %v490_v7 = vld [vmem:[#allocation2 + $0x3f0] sm:$0xff]  ;;  %v488_v13 = vld [vmem:[#allocation2 + $0x3e0] sm:$0xff] }
 0x202   :  { %v4662_v49 = vld [vmem:[#allocation2 + $0x3a0] sm:$0xff]  ;;  %4321 = vst.msk [vmem:[#allocation2 + $0x3d0] sm:$0xff] %vm19_vm3, %v3977_v32  ;;  %4493 = vst.msk [vmem:[#allocation2 + $0x930] sm:$0xff] %vm19_vm3, %v4149_v33  ;;  %v4150_v53 = vadd.f32 %v8810_v46, %v659_v29  ;;  %v3976_v59 = vadd.f32 %v2964_v54, %v485_v36  ;;  %v4148_v60 = vadd.f32 %v3652_v18, %v657_v37  ;;  %v5357_v61 = vmax.f32 %v5014_v47, 0.0  ;;  %v662_v8 = vld [vmem:[#allocation2 + $0x950] sm:$0xff]  ;;  %v8641_v21 = vpop.f32.mrb[124].mxu0 }
 0x203   :  { %v4834_v50 = vld [vmem:[#allocation2 + $0x900] sm:$0xff]  ;;  %7069 = vst.msk [vmem:[%s12548_s3 + $0x1c4] sm:$0xf] %vm6955_vm4, %v8107_v39  ;;  %7241 = vst.msk [vmem:[%s12548_s3 + $0x474] sm:$0xf] %vm6955_vm4, %v8279_v40  ;;  %v5012_v55 = vadd.f32 %v11788_v38, %v4662_v49  ;;  %v4665_v57 = vld [vmem:[#allocation2 + $0x3b8] sm:$0xff]  ;;  %v3981_v26 = vadd.f32 %v8641_v21, %v490_v7 }
 0x204   :  { %v5184_v56 = vadd.f32 %v11788_v38, %v4834_v50  ;;  %v4837_v58 = vld [vmem:[#allocation2 + $0x918] sm:$0xff]  ;;  %4319 = vst.msk [vmem:[#allocation2 + $0x3c0] sm:$0xff] %vm19_vm3, %v3975_v43  ;;  %4491 = vst.msk [vmem:[#allocation2 + $0x920] sm:$0xff] %vm19_vm3, %v4147_v44  ;;  %v5529_v62 = vmax.f32 %v5186_v48, 0.0  ;;  %v5015_v63 = vadd.f32 %v11788_v38, %v4665_v57  ;;  %v4663_v1 = vld [vmem:[#allocation2 + $0x3a8] sm:$0xff]  ;;  %v8112_v9 = vpack.c.bf16 %v5357_v61, %v5357_v61  ;;  %v8813_v15 = vpop.f32.mrb[124].mxu1 }
 0x205   :  { %v5187_v0 = vadd.f32 %v11788_v38, %v4837_v58  ;;  %v4835_v2 = vld [vmem:[#allocation2 + $0x908] sm:$0xff]  ;;  %4322 = vst.msk [vmem:[#allocation2 + $0x3d8] sm:$0xff] %vm19_vm3, %v3978_v51  ;;  %4494 = vst.msk [vmem:[#allocation2 + $0x938] sm:$0xff] %vm19_vm3, %v4150_v53  ;;  %v5355_v3 = vmax.f32 %v5012_v55, 0.0  ;;  %v5013_v5 = vadd.f32 %v11788_v38, %v4663_v1  ;;  %v660_v14 = vld [vmem:[#allocation2 + $0x940] sm:$0xff]  ;;  %v4153_v27 = vadd.f32 %v8813_v15, %v662_v8  ;;  %v2977_v28 = vpop.f32.mrb[125].mxu0 }
 0x206   :  { %v5527_v4 = vmax.f32 %v5184_v56, 0.0  ;;  %v5185_v6 = vadd.f32 %v11788_v38, %v4835_v2  ;;  %4320 = vst.msk [vmem:[#allocation2 + $0x3c8] sm:$0xff] %vm19_vm3, %v3976_v59  ;;  %4492 = vst.msk [vmem:[#allocation2 + $0x928] sm:$0xff] %vm19_vm3, %v4148_v60  ;;  %v8284_v10 = vpack.c.bf16 %v5529_v62, %v5529_v62  ;;  %v5358_v11 = vmax.f32 %v5015_v63, 0.0  ;;  %v491_v22 = vld [vmem:[#allocation2 + $0x3f8] sm:$0xff]  ;;  %v3665_v29 = vpop.f32.mrb[125].mxu1 }
 0x207   :  { %v5530_v12 = vmax.f32 %v5187_v0, 0.0  ;;  %v8110_v16 = vpack.c.bf16 %v5355_v3, %v5355_v3  ;;  %v5356_v19 = vmax.f32 %v5013_v5, 0.0  ;;  %v663_v23 = vld [vmem:[#allocation2 + $0x958] sm:$0xff]  ;;  %7074 = vst.msk [vmem:[%s12548_s3 + $0x1d8] sm:$0xf] %vm6955_vm4, %v8112_v9  ;;  %v489_v30 = vld [vmem:[#allocation2 + $0x3e8] sm:$0xff]  ;;  %v3979_v36 = vadd.f32 %v2977_v28, %v488_v13 }
 0x208   :  { %v8282_v17 = vpack.c.bf16 %v5527_v4, %v5527_v4  ;;  %v5528_v20 = vmax.f32 %v5185_v6, 0.0  ;;  %7246 = vst.msk [vmem:[%s12548_s3 + $0x488] sm:$0xf] %vm6955_vm4, %v8284_v10  ;;  %v8113_v24 = vpack.c.bf16 %v5358_v11, %v5358_v11  ;;  %v661_v31 = vld [vmem:[#allocation2 + $0x948] sm:$0xff]  ;;  %v4151_v37 = vadd.f32 %v3665_v29, %v660_v14  ;;  %v8642_v39 = vpop.f32.mrb[126].mxu0  ;;  %v8814_v40 = vpop.f32.mrb[126].mxu1 }
 0x209   :  { %v8285_v25 = vpack.c.bf16 %v5530_v12, %v5530_v12  ;;  %7072 = vst.msk [vmem:[%s12548_s3 + $0x1d0] sm:$0xf] %vm6955_vm4, %v8110_v16  ;;  %v8111_v32 = vpack.c.bf16 %v5356_v19, %v5356_v19  ;;  %v4668_v34 = vld [vmem:[#allocation2 + $0x3d0] sm:$0xff]  ;;  %v3982_v45 = vadd.f32 %v8642_v39, %v491_v22  ;;  %v4154_v46 = vadd.f32 %v8814_v40, %v663_v23  ;;  %v2980_v47 = vpop.f32.mrb[127].mxu0  ;;  %v3668_v48 = vpop.f32.mrb[127].mxu1  ;;  %v492_v7 = vld [vmem:[#allocation2 + $0x400] sm:$0xff] }
 0x20a   :  { %7244 = vst.msk [vmem:[%s12548_s3 + $0x480] sm:$0xf] %vm6955_vm4, %v8282_v17  ;;  %v8283_v33 = vpack.c.bf16 %v5528_v20, %v5528_v20  ;;  %v4840_v35 = vld [vmem:[#allocation2 + $0x930] sm:$0xff]  ;;  %7075 = vst.msk [vmem:[%s12548_s3 + $0x1dc] sm:$0xf] %vm6955_vm4, %v8113_v24  ;;  %v5018_v41 = vadd.f32 %v11788_v38, %v4668_v34  ;;  %v3980_v54 = vadd.f32 %v2980_v47, %v489_v30  ;;  %v664_v8 = vld [vmem:[#allocation2 + $0x960] sm:$0xff] }
 0x20b   :  { %7247 = vst.msk [vmem:[%s12548_s3 + $0x48c] sm:$0xf] %vm6955_vm4, %v8285_v25  ;;  %v5190_v42 = vadd.f32 %v11788_v38, %v4840_v35  ;;  %v4666_v43 = vld [vmem:[#allocation2 + $0x3c0] sm:$0xff]  ;;  %7073 = vst.msk [vmem:[%s12548_s3 + $0x1d4] sm:$0xf] %vm6955_vm4, %v8111_v32  ;;  %v4152_v18 = vadd.f32 %v3668_v48, %v661_v31  ;;  %v494_v1 = vld [vmem:[#allocation2 + $0x410] sm:$0xff] }
 0x20c   :  { %v4838_v44 = vld [vmem:[#allocation2 + $0x920] sm:$0xff]  ;;  %4325 = vst.msk [vmem:[#allocation2 + $0x3f0] sm:$0xff] %vm19_vm3, %v3981_v26  ;;  %4497 = vst.msk [vmem:[#allocation2 + $0x950] sm:$0xff] %vm19_vm3, %v4153_v27  ;;  %v5016_v49 = vadd.f32 %v11788_v38, %v4666_v43  ;;  %v4669_v51 = vld [vmem:[#allocation2 + $0x3d8] sm:$0xff]  ;;  %v5361_v55 = vmax.f32 %v5018_v41, 0.0  ;;  %v8645_v13 = vpop.f32.mrb[128].mxu0 }
 0x20d   :  { %7245 = vst.msk [vmem:[%s12548_s3 + $0x484] sm:$0xf] %vm6955_vm4, %v8283_v33  ;;  %v5188_v50 = vadd.f32 %v11788_v38, %v4838_v44  ;;  %v4841_v53 = vld [vmem:[#allocation2 + $0x938] sm:$0xff]  ;;  %v5533_v56 = vmax.f32 %v5190_v42, 0.0  ;;  %v5019_v57 = vadd.f32 %v11788_v38, %v4669_v51  ;;  %v4667_v59 = vld [vmem:[#allocation2 + $0x3c8] sm:$0xff]  ;;  %v666_v2 = vld [vmem:[#allocation2 + $0x970] sm:$0xff]  ;;  %v3985_v21 = vadd.f32 %v8645_v13, %v494_v1 }
 0x20e   :  { %4323 = vst.msk [vmem:[#allocation2 + $0x3e0] sm:$0xff] %vm19_vm3, %v3979_v36  ;;  %4495 = vst.msk [vmem:[#allocation2 + $0x940] sm:$0xff] %vm19_vm3, %v4151_v37  ;;  %v5191_v58 = vadd.f32 %v11788_v38, %v4841_v53  ;;  %v4839_v60 = vld [vmem:[#allocation2 + $0x928] sm:$0xff]  ;;  %v5359_v61 = vmax.f32 %v5016_v49, 0.0  ;;  %v5017_v63 = vadd.f32 %v11788_v38, %v4667_v59  ;;  %v8116_v3 = vpack.c.bf16 %v5361_v55, %v5361_v55  ;;  %v8817_v14 = vpop.f32.mrb[128].mxu1  ;;  %v495_v16 = vld [vmem:[#allocation2 + $0x418] sm:$0xff] }
 0x20f   :  { %4326 = vst.msk [vmem:[#allocation2 + $0x3f8] sm:$0xff] %vm19_vm3, %v3982_v45  ;;  %4498 = vst.msk [vmem:[#allocation2 + $0x958] sm:$0xff] %vm19_vm3, %v4154_v46  ;;  %v5531_v62 = vmax.f32 %v5188_v50, 0.0  ;;  %v5189_v0 = vadd.f32 %v11788_v38, %v4839_v60  ;;  %v8288_v4 = vpack.c.bf16 %v5533_v56, %v5533_v56  ;;  %v5362_v5 = vmax.f32 %v5019_v57, 0.0  ;;  %v667_v17 = vld [vmem:[#allocation2 + $0x978] sm:$0xff]  ;;  %v2993_v22 = vpop.f32.mrb[129].mxu0 }
 0x210   :  { %4324 = vst.msk [vmem:[#allocation2 + $0x3e8] sm:$0xff] %vm19_vm3, %v3980_v54  ;;  %4496 = vst.msk [vmem:[#allocation2 + $0x948] sm:$0xff] %vm19_vm3, %v4152_v18  ;;  %v5534_v6 = vmax.f32 %v5191_v58, 0.0  ;;  %v8114_v9 = vpack.c.bf16 %v5359_v61, %v5359_v61  ;;  %v5360_v11 = vmax.f32 %v5017_v63, 0.0  ;;  %v4157_v15 = vadd.f32 %v8817_v14, %v666_v2  ;;  %v3681_v23 = vpop.f32.mrb[129].mxu1  ;;  %v493_v24 = vld [vmem:[#allocation2 + $0x408] sm:$0xff] }
 0x211   :  { %v8286_v10 = vpack.c.bf16 %v5531_v62, %v5531_v62  ;;  %v5532_v12 = vmax.f32 %v5189_v0, 0.0  ;;  %7078 = vst.msk [vmem:[%s12548_s3 + $0x1e8] sm:$0xf] %vm6955_vm4, %v8116_v3  ;;  %7250 = vst.msk [vmem:[%s12548_s3 + $0x498] sm:$0xf] %vm6955_vm4, %v8288_v4  ;;  %v8117_v19 = vpack.c.bf16 %v5362_v5, %v5362_v5  ;;  %v665_v25 = vld [vmem:[#allocation2 + $0x968] sm:$0xff]  ;;  %v3983_v30 = vadd.f32 %v2993_v22, %v492_v7 }
 0x212   :  { %v8289_v20 = vpack.c.bf16 %v5534_v6, %v5534_v6  ;;  %7076 = vst.msk [vmem:[%s12548_s3 + $0x1e0] sm:$0xf] %vm6955_vm4, %v8114_v9  ;;  %v8115_v26 = vpack.c.bf16 %v5360_v11, %v5360_v11  ;;  %v4155_v31 = vadd.f32 %v3681_v23, %v664_v8  ;;  %v8646_v32 = vpop.f32.mrb[130].mxu0  ;;  %v8818_v33 = vpop.f32.mrb[130].mxu1  ;;  %v498_v59 = vld [vmem:[#allocation2 + $0x430] sm:$0xff]  ;;  %v496_v1 = vld [vmem:[#allocation2 + $0x420] sm:$0xff] }
 0x213   :  { %7248 = vst.msk [vmem:[%s12548_s3 + $0x490] sm:$0xf] %vm6955_vm4, %v8286_v10  ;;  %v8287_v27 = vpack.c.bf16 %v5532_v12, %v5532_v12  ;;  %v4672_v28 = vld [vmem:[#allocation2 + $0x3f0] sm:$0xff]  ;;  %7079 = vst.msk [vmem:[%s12548_s3 + $0x1ec] sm:$0xf] %vm6955_vm4, %v8117_v19  ;;  %v3986_v39 = vadd.f32 %v8646_v32, %v495_v16  ;;  %v4158_v40 = vadd.f32 %v8818_v33, %v667_v17  ;;  %v2996_v41 = vpop.f32.mrb[131].mxu0 }
 0x214   :  { %v4844_v29 = vld [vmem:[#allocation2 + $0x950] sm:$0xff]  ;;  %7251 = vst.msk [vmem:[%s12548_s3 + $0x49c] sm:$0xf] %vm6955_vm4, %v8289_v20  ;;  %v5022_v34 = vadd.f32 %v11788_v38, %v4672_v28  ;;  %v3684_v42 = vpop.f32.mrb[131].mxu1  ;;  %7077 = vst.msk [vmem:[%s12548_s3 + $0x1e4] sm:$0xf] %vm6955_vm4, %v8115_v26  ;;  %v3984_v47 = vadd.f32 %v2996_v41, %v493_v24 }
 0x215   :  { %v5194_v35 = vadd.f32 %v11788_v38, %v4844_v29  ;;  %v4670_v36 = vld [vmem:[#allocation2 + $0x3e0] sm:$0xff]  ;;  %4329 = vst.msk [vmem:[#allocation2 + $0x410] sm:$0xff] %vm19_vm3, %v3985_v21  ;;  %4501 = vst.msk [vmem:[#allocation2 + $0x970] sm:$0xff] %vm19_vm3, %v4157_v15  ;;  %v4156_v48 = vadd.f32 %v3684_v42, %v665_v25  ;;  %v670_v60 = vld [vmem:[#allocation2 + $0x990] sm:$0xff]  ;;  %v8649_v7 = vpop.f32.mrb[132].mxu0  ;;  %v8821_v8 = vpop.f32.mrb[132].mxu1 }
 0x216   :  { %v4842_v37 = vld [vmem:[#allocation2 + $0x940] sm:$0xff]  ;;  %7249 = vst.msk [vmem:[%s12548_s3 + $0x494] sm:$0xf] %vm6955_vm4, %v8287_v27  ;;  %v5020_v43 = vadd.f32 %v11788_v38, %v4670_v36  ;;  %v4673_v45 = vld [vmem:[#allocation2 + $0x3f8] sm:$0xff]  ;;  %v5365_v49 = vmax.f32 %v5022_v34, 0.0  ;;  %v3989_v13 = vadd.f32 %v8649_v7, %v498_v59  ;;  %v4161_v14 = vadd.f32 %v8821_v8, %v670_v60  ;;  %v3009_v16 = vpop.f32.mrb[133].mxu0 }
 0x217   :  { %v5192_v44 = vadd.f32 %v11788_v38, %v4842_v37  ;;  %v4845_v46 = vld [vmem:[#allocation2 + $0x958] sm:$0xff]  ;;  %4327 = vst.msk [vmem:[#allocation2 + $0x400] sm:$0xff] %vm19_vm3, %v3983_v30  ;;  %4499 = vst.msk [vmem:[#allocation2 + $0x960] sm:$0xff] %vm19_vm3, %v4155_v31  ;;  %v5537_v50 = vmax.f32 %v5194_v35, 0.0  ;;  %v5023_v51 = vadd.f32 %v11788_v38, %v4673_v45  ;;  %v4671_v54 = vld [vmem:[#allocation2 + $0x3e8] sm:$0xff]  ;;  %v3697_v17 = vpop.f32.mrb[133].mxu1  ;;  %v3987_v24 = vadd.f32 %v3009_v16, %v496_v1 }
 0x218   :  { %v5195_v53 = vadd.f32 %v11788_v38, %v4845_v46  ;;  %v4843_v18 = vld [vmem:[#allocation2 + $0x948] sm:$0xff]  ;;  %4330 = vst.msk [vmem:[#allocation2 + $0x418] sm:$0xff] %vm19_vm3, %v3986_v39  ;;  %4502 = vst.msk [vmem:[#allocation2 + $0x978] sm:$0xff] %vm19_vm3, %v4158_v40  ;;  %v5363_v55 = vmax.f32 %v5020_v43, 0.0  ;;  %v5021_v57 = vadd.f32 %v11788_v38, %v4671_v54  ;;  %v8120_v61 = vpack.c.bf16 %v5365_v49, %v5365_v49  ;;  %v668_v2 = vld [vmem:[#allocation2 + $0x980] sm:$0xff]  ;;  %v8650_v26 = vpop.f32.mrb[134].mxu0 }
 0x219   :  { %v5535_v56 = vmax.f32 %v5192_v44, 0.0  ;;  %v5193_v58 = vadd.f32 %v11788_v38, %v4843_v18  ;;  %4328 = vst.msk [vmem:[#allocation2 + $0x408] sm:$0xff] %vm19_vm3, %v3984_v47  ;;  %4500 = vst.msk [vmem:[#allocation2 + $0x968] sm:$0xff] %vm19_vm3, %v4156_v48  ;;  %v8292_v62 = vpack.c.bf16 %v5537_v50, %v5537_v50  ;;  %v5366_v63 = vmax.f32 %v5023_v51, 0.0  ;;  %v499_v9 = vld [vmem:[#allocation2 + $0x438] sm:$0xff]  ;;  %v497_v19 = vld [vmem:[#allocation2 + $0x428] sm:$0xff] }
 0x21a   :  { %v5538_v0 = vmax.f32 %v5195_v53, 0.0  ;;  %v8118_v3 = vpack.c.bf16 %v5363_v55, %v5363_v55  ;;  %v5364_v5 = vmax.f32 %v5021_v57, 0.0  ;;  %v671_v10 = vld [vmem:[#allocation2 + $0x998] sm:$0xff]  ;;  %7082 = vst.msk [vmem:[%s12548_s3 + $0x1f8] sm:$0xf] %vm6955_vm4, %v8120_v61  ;;  %v669_v20 = vld [vmem:[#allocation2 + $0x988] sm:$0xff]  ;;  %v4159_v25 = vadd.f32 %v3697_v17, %v668_v2 }
 0x21b   :  { %v8290_v4 = vpack.c.bf16 %v5535_v56, %v5535_v56  ;;  %v5536_v6 = vmax.f32 %v5193_v58, 0.0  ;;  %7254 = vst.msk [vmem:[%s12548_s3 + $0x4a8] sm:$0xf] %vm6955_vm4, %v8292_v62  ;;  %v8121_v11 = vpack.c.bf16 %v5366_v63, %v5366_v63  ;;  %v8822_v27 = vpop.f32.mrb[134].mxu1  ;;  %v3990_v32 = vadd.f32 %v8650_v26, %v499_v9  ;;  %v3012_v34 = vpop.f32.mrb[135].mxu0  ;;  %v502_v54 = vld [vmem:[#allocation2 + $0x450] sm:$0xff] }
 0x21c   :  { %v8293_v12 = vpack.c.bf16 %v5538_v0, %v5538_v0  ;;  %7080 = vst.msk [vmem:[%s12548_s3 + $0x1f0] sm:$0xf] %vm6955_vm4, %v8118_v3  ;;  %v8119_v21 = vpack.c.bf16 %v5364_v5, %v5364_v5  ;;  %v4676_v22 = vld [vmem:[#allocation2 + $0x410] sm:$0xff]  ;;  %v4162_v33 = vadd.f32 %v8822_v27, %v671_v10  ;;  %v3700_v35 = vpop.f32.mrb[135].mxu1  ;;  %v3988_v41 = vadd.f32 %v3012_v34, %v497_v19  ;;  %v500_v59 = vld [vmem:[#allocation2 + $0x440] sm:$0xff]  ;;  %v8653_v1 = vpop.f32.mrb[136].mxu0 }
 0x21d   :  { %7252 = vst.msk [vmem:[%s12548_s3 + $0x4a0] sm:$0xf] %vm6955_vm4, %v8290_v4  ;;  %v8291_v15 = vpack.c.bf16 %v5536_v6, %v5536_v6  ;;  %v4848_v23 = vld [vmem:[#allocation2 + $0x970] sm:$0xff]  ;;  %7083 = vst.msk [vmem:[%s12548_s3 + $0x1fc] sm:$0xf] %vm6955_vm4, %v8121_v11  ;;  %v5026_v28 = vadd.f32 %v11788_v38, %v4676_v22  ;;  %v4160_v42 = vadd.f32 %v3700_v35, %v669_v20  ;;  %v672_v60 = vld [vmem:[#allocation2 + $0x9a0] sm:$0xff] }
 0x21e   :  { %7255 = vst.msk [vmem:[%s12548_s3 + $0x4ac] sm:$0xf] %vm6955_vm4, %v8293_v12  ;;  %v5198_v29 = vadd.f32 %v11788_v38, %v4848_v23  ;;  %v4674_v30 = vld [vmem:[#allocation2 + $0x400] sm:$0xff]  ;;  %7081 = vst.msk [vmem:[%s12548_s3 + $0x1f4] sm:$0xf] %vm6955_vm4, %v8119_v21  ;;  %v674_v18 = vld [vmem:[#allocation2 + $0x9b0] sm:$0xff]  ;;  %v3993_v7 = vadd.f32 %v8653_v1, %v502_v54 }
 0x21f   :  { %v4846_v31 = vld [vmem:[#allocation2 + $0x960] sm:$0xff]  ;;  %4333 = vst.msk [vmem:[#allocation2 + $0x430] sm:$0xff] %vm19_vm3, %v3989_v13  ;;  %4505 = vst.msk [vmem:[#allocation2 + $0x990] sm:$0xff] %vm19_vm3, %v4161_v14  ;;  %v5024_v36 = vadd.f32 %v11788_v38, %v4674_v30  ;;  %v4677_v39 = vld [vmem:[#allocation2 + $0x418] sm:$0xff]  ;;  %v5369_v43 = vmax.f32 %v5026_v28, 0.0  ;;  %v8825_v2 = vpop.f32.mrb[136].mxu1 }
 0x220   :  { %7253 = vst.msk [vmem:[%s12548_s3 + $0x4a4] sm:$0xf] %vm6955_vm4, %v8291_v15  ;;  %v5196_v37 = vadd.f32 %v11788_v38, %v4846_v31  ;;  %v4849_v40 = vld [vmem:[#allocation2 + $0x978] sm:$0xff]  ;;  %v5541_v44 = vmax.f32 %v5198_v29, 0.0  ;;  %v5027_v45 = vadd.f32 %v11788_v38, %v4677_v39  ;;  %v4675_v47 = vld [vmem:[#allocation2 + $0x408] sm:$0xff]  ;;  %v4165_v8 = vadd.f32 %v8825_v2, %v674_v18  ;;  %v3025_v9 = vpop.f32.mrb[137].mxu0 }
 0x221   :  { %4331 = vst.msk [vmem:[#allocation2 + $0x420] sm:$0xff] %vm19_vm3, %v3987_v24  ;;  %4503 = vst.msk [vmem:[#allocation2 + $0x980] sm:$0xff] %vm19_vm3, %v4159_v25  ;;  %v5199_v46 = vadd.f32 %v11788_v38, %v4849_v40  ;;  %v4847_v48 = vld [vmem:[#allocation2 + $0x968] sm:$0xff]  ;;  %v5367_v49 = vmax.f32 %v5024_v36, 0.0  ;;  %v5025_v51 = vadd.f32 %v11788_v38, %v4675_v47  ;;  %v8124_v55 = vpack.c.bf16 %v5369_v43, %v5369_v43  ;;  %v503_v3 = vld [vmem:[#allocation2 + $0x458] sm:$0xff]  ;;  %v3713_v10 = vpop.f32.mrb[137].mxu1 }
 0x222   :  { %4334 = vst.msk [vmem:[#allocation2 + $0x438] sm:$0xff] %vm19_vm3, %v3990_v32  ;;  %4506 = vst.msk [vmem:[#allocation2 + $0x998] sm:$0xff] %vm19_vm3, %v4162_v33  ;;  %v5539_v50 = vmax.f32 %v5196_v37, 0.0  ;;  %v5197_v53 = vadd.f32 %v11788_v38, %v4847_v48  ;;  %v8296_v56 = vpack.c.bf16 %v5541_v44, %v5541_v44  ;;  %v5370_v57 = vmax.f32 %v5027_v45, 0.0  ;;  %v675_v4 = vld [vmem:[#allocation2 + $0x9b8] sm:$0xff]  ;;  %v501_v11 = vld [vmem:[#allocation2 + $0x448] sm:$0xff] }
 0x223   :  { %4332 = vst.msk [vmem:[#allocation2 + $0x428] sm:$0xff] %vm19_vm3, %v3988_v41  ;;  %4504 = vst.msk [vmem:[#allocation2 + $0x988] sm:$0xff] %vm19_vm3, %v4160_v42  ;;  %v5542_v58 = vmax.f32 %v5199_v46, 0.0  ;;  %v8122_v61 = vpack.c.bf16 %v5367_v49, %v5367_v49  ;;  %v5368_v63 = vmax.f32 %v5025_v51, 0.0  ;;  %v673_v12 = vld [vmem:[#allocation2 + $0x9a8] sm:$0xff]  ;;  %v3991_v19 = vadd.f32 %v3025_v9, %v500_v59  ;;  %v8654_v21 = vpop.f32.mrb[138].mxu0 }
 0x224   :  { %v8294_v62 = vpack.c.bf16 %v5539_v50, %v5539_v50  ;;  %v5540_v0 = vmax.f32 %v5197_v53, 0.0  ;;  %7086 = vst.msk [vmem:[%s12548_s3 + $0x208] sm:$0xf] %vm6955_vm4, %v8124_v55  ;;  %7258 = vst.msk [vmem:[%s12548_s3 + $0x4b8] sm:$0xf] %vm6955_vm4, %v8296_v56  ;;  %v8125_v5 = vpack.c.bf16 %v5370_v57, %v5370_v57  ;;  %v4163_v20 = vadd.f32 %v3713_v10, %v672_v60  ;;  %v8826_v15 = vpop.f32.mrb[138].mxu1 }
 0x225   :  { %v8297_v6 = vpack.c.bf16 %v5542_v58, %v5542_v58  ;;  %7084 = vst.msk [vmem:[%s12548_s3 + $0x200] sm:$0xf] %vm6955_vm4, %v8122_v61  ;;  %v8123_v13 = vpack.c.bf16 %v5368_v63, %v5368_v63  ;;  %v3994_v26 = vadd.f32 %v8654_v21, %v503_v3  ;;  %v4166_v27 = vadd.f32 %v8826_v15, %v675_v4  ;;  %v3028_v28 = vpop.f32.mrb[139].mxu0  ;;  %v3716_v29 = vpop.f32.mrb[139].mxu1  ;;  %v506_v47 = vld [vmem:[#allocation2 + $0x470] sm:$0xff]  ;;  %v504_v54 = vld [vmem:[#allocation2 + $0x460] sm:$0xff] }
 0x226   :  { %7256 = vst.msk [vmem:[%s12548_s3 + $0x4b0] sm:$0xf] %vm6955_vm4, %v8294_v62  ;;  %v8295_v14 = vpack.c.bf16 %v5540_v0, %v5540_v0  ;;  %v4680_v16 = vld [vmem:[#allocation2 + $0x430] sm:$0xff]  ;;  %7087 = vst.msk [vmem:[%s12548_s3 + $0x20c] sm:$0xf] %vm6955_vm4, %v8125_v5  ;;  %v3992_v34 = vadd.f32 %v3028_v28, %v501_v11  ;;  %v4164_v35 = vadd.f32 %v3716_v29, %v673_v12  ;;  %v676_v18 = vld [vmem:[#allocation2 + $0x9c0] sm:$0xff] }
 0x227   :  { %v4852_v17 = vld [vmem:[#allocation2 + $0x990] sm:$0xff]  ;;  %7259 = vst.msk [vmem:[%s12548_s3 + $0x4bc] sm:$0xf] %vm6955_vm4, %v8297_v6  ;;  %v5030_v22 = vadd.f32 %v11788_v38, %v4680_v16  ;;  %7085 = vst.msk [vmem:[%s12548_s3 + $0x204] sm:$0xf] %vm6955_vm4, %v8123_v13  ;;  %v8657_v59 = vpop.f32.mrb[140].mxu0 }
 0x228   :  { %v5202_v23 = vadd.f32 %v11788_v38, %v4852_v17  ;;  %v4678_v24 = vld [vmem:[#allocation2 + $0x420] sm:$0xff]  ;;  %4337 = vst.msk [vmem:[#allocation2 + $0x450] sm:$0xff] %vm19_vm3, %v3993_v7  ;;  %4509 = vst.msk [vmem:[#allocation2 + $0x9b0] sm:$0xff] %vm19_vm3, %v4165_v8  ;;  %v678_v48 = vld [vmem:[#allocation2 + $0x9d0] sm:$0xff]  ;;  %v8829_v60 = vpop.f32.mrb[140].mxu1  ;;  %v3997_v1 = vadd.f32 %v8657_v59, %v506_v47  ;;  %v3041_v3 = vpop.f32.mrb[141].mxu0 }
 0x229   :  { %v4850_v25 = vld [vmem:[#allocation2 + $0x980] sm:$0xff]  ;;  %7257 = vst.msk [vmem:[%s12548_s3 + $0x4b4] sm:$0xf] %vm6955_vm4, %v8295_v14  ;;  %v5028_v30 = vadd.f32 %v11788_v38, %v4678_v24  ;;  %v4681_v32 = vld [vmem:[#allocation2 + $0x438] sm:$0xff]  ;;  %v5373_v36 = vmax.f32 %v5030_v22, 0.0  ;;  %v4169_v2 = vadd.f32 %v8829_v60, %v678_v48  ;;  %v3729_v4 = vpop.f32.mrb[141].mxu1  ;;  %v3995_v11 = vadd.f32 %v3041_v3, %v504_v54 }
 0x22a   :  { %v5200_v31 = vadd.f32 %v11788_v38, %v4850_v25  ;;  %v4853_v33 = vld [vmem:[#allocation2 + $0x998] sm:$0xff]  ;;  %4335 = vst.msk [vmem:[#allocation2 + $0x440] sm:$0xff] %vm19_vm3, %v3991_v19  ;;  %4507 = vst.msk [vmem:[#allocation2 + $0x9a0] sm:$0xff] %vm19_vm3, %v4163_v20  ;;  %v5545_v37 = vmax.f32 %v5202_v23, 0.0  ;;  %v5031_v39 = vadd.f32 %v11788_v38, %v4681_v32  ;;  %v4679_v41 = vld [vmem:[#allocation2 + $0x428] sm:$0xff]  ;;  %v4167_v12 = vadd.f32 %v3729_v4, %v676_v18  ;;  %v8658_v13 = vpop.f32.mrb[142].mxu0 }
 0x22b   :  { %v5203_v40 = vadd.f32 %v11788_v38, %v4853_v33  ;;  %v4851_v42 = vld [vmem:[#allocation2 + $0x988] sm:$0xff]  ;;  %4338 = vst.msk [vmem:[#allocation2 + $0x458] sm:$0xff] %vm19_vm3, %v3994_v26  ;;  %4510 = vst.msk [vmem:[#allocation2 + $0x9b8] sm:$0xff] %vm19_vm3, %v4166_v27  ;;  %v5371_v43 = vmax.f32 %v5028_v30, 0.0  ;;  %v5029_v45 = vadd.f32 %v11788_v38, %v4679_v41  ;;  %v8128_v49 = vpack.c.bf16 %v5373_v36, %v5373_v36  ;;  %v507_v61 = vld [vmem:[#allocation2 + $0x478] sm:$0xff]  ;;  %v8830_v14 = vpop.f32.mrb[142].mxu1 }
 0x22c   :  { %v5543_v44 = vmax.f32 %v5200_v31, 0.0  ;;  %v5201_v46 = vadd.f32 %v11788_v38, %v4851_v42  ;;  %4336 = vst.msk [vmem:[#allocation2 + $0x448] sm:$0xff] %vm19_vm3, %v3992_v34  ;;  %4508 = vst.msk [vmem:[#allocation2 + $0x9a8] sm:$0xff] %vm19_vm3, %v4164_v35  ;;  %v8300_v50 = vpack.c.bf16 %v5545_v37, %v5545_v37  ;;  %v5374_v51 = vmax.f32 %v5031_v39, 0.0  ;;  %v679_v62 = vld [vmem:[#allocation2 + $0x9d8] sm:$0xff]  ;;  %v505_v5 = vld [vmem:[#allocation2 + $0x468] sm:$0xff] }
 0x22d   :  { %v5546_v53 = vmax.f32 %v5203_v40, 0.0  ;;  %v8126_v55 = vpack.c.bf16 %v5371_v43, %v5371_v43  ;;  %v5372_v57 = vmax.f32 %v5029_v45, 0.0  ;;  %7090 = vst.msk [vmem:[%s12548_s3 + $0x218] sm:$0xf] %vm6955_vm4, %v8128_v49  ;;  %v677_v6 = vld [vmem:[#allocation2 + $0x9c8] sm:$0xff]  ;;  %v3998_v21 = vadd.f32 %v8658_v13, %v507_v61  ;;  %v3044_v22 = vpop.f32.mrb[143].mxu0 }
 0x22e   :  { %v8298_v56 = vpack.c.bf16 %v5543_v44, %v5543_v44  ;;  %v5544_v58 = vmax.f32 %v5201_v46, 0.0  ;;  %7262 = vst.msk [vmem:[%s12548_s3 + $0x4c8] sm:$0xf] %vm6955_vm4, %v8300_v50  ;;  %v8129_v63 = vpack.c.bf16 %v5374_v51, %v5374_v51  ;;  %v4170_v15 = vadd.f32 %v8830_v14, %v679_v62  ;;  %v3732_v23 = vpop.f32.mrb[143].mxu1  ;;  %v12133_v32 = vld [vmem:[%s12547_s2] ss:$0 sm:$0xff] }
 0x22f   :  { %v8301_v0 = vpack.c.bf16 %v5546_v53, %v5546_v53  ;;  %7088 = vst.msk [vmem:[%s12548_s3 + $0x210] sm:$0xf] %vm6955_vm4, %v8126_v55  ;;  %v8127_v7 = vpack.c.bf16 %v5372_v57, %v5372_v57  ;;  %v4684_v9 = vld [vmem:[#allocation2 + $0x450] sm:$0xff]  ;;  %v3996_v28 = vadd.f32 %v3044_v22, %v505_v5  ;;  %v4168_v29 = vadd.f32 %v3732_v23, %v677_v6  ;;  %v508_v47 = vld [vmem:[#allocation2 + $0x480] sm:$0xff]  ;;  %v8661_v54 = vpop.f32.mrb[144].mxu0  ;;  %v8833_v18 = vpop.f32.mrb[144].mxu1 }
 0x230   :  { %7260 = vst.msk [vmem:[%s12548_s3 + $0x4c0] sm:$0xf] %vm6955_vm4, %v8298_v56  ;;  %v8299_v8 = vpack.c.bf16 %v5544_v58, %v5544_v58  ;;  %v4856_v10 = vld [vmem:[#allocation2 + $0x9b0] sm:$0xff]  ;;  %7091 = vst.msk [vmem:[%s12548_s3 + $0x21c] sm:$0xf] %vm6955_vm4, %v8129_v63  ;;  %v5034_v16 = vadd.f32 %v11788_v38, %v4684_v9  ;;  %v680_v48 = vld [vmem:[#allocation2 + $0x9e0] sm:$0xff] }
 0x231   :  { %7263 = vst.msk [vmem:[%s12548_s3 + $0x4cc] sm:$0xf] %vm6955_vm4, %v8301_v0  ;;  %v5206_v17 = vadd.f32 %v11788_v38, %v4856_v10  ;;  %v4682_v19 = vld [vmem:[#allocation2 + $0x440] sm:$0xff]  ;;  %7089 = vst.msk [vmem:[%s12548_s3 + $0x214] sm:$0xf] %vm6955_vm4, %v8127_v7  ;;  %v510_v41 = vld [vmem:[#allocation2 + $0x490] sm:$0xff] }
 0x232   :  { %v4854_v20 = vld [vmem:[#allocation2 + $0x9a0] sm:$0xff]  ;;  %4341 = vst.msk [vmem:[#allocation2 + $0x470] sm:$0xff] %vm19_vm3, %v3997_v1  ;;  %4513 = vst.msk [vmem:[#allocation2 + $0x9d0] sm:$0xff] %vm19_vm3, %v4169_v2  ;;  %v5032_v24 = vadd.f32 %v11788_v38, %v4682_v19  ;;  %v4685_v26 = vld [vmem:[#allocation2 + $0x458] sm:$0xff]  ;;  %v5377_v30 = vmax.f32 %v5034_v16, 0.0  ;;  %v4001_v59 = vadd.f32 %v8661_v54, %v510_v41  ;;  %v3057_v61 = vpop.f32.mrb[145].mxu0 }
 0x233   :  { %7261 = vst.msk [vmem:[%s12548_s3 + $0x4c4] sm:$0xf] %vm6955_vm4, %v8299_v8  ;;  %v5204_v25 = vadd.f32 %v11788_v38, %v4854_v20  ;;  %v4857_v27 = vld [vmem:[#allocation2 + $0x9b8] sm:$0xff]  ;;  %v5549_v31 = vmax.f32 %v5206_v17, 0.0  ;;  %v5035_v33 = vadd.f32 %v12133_v32, %v4685_v26  ;;  %v4683_v38 = vld [vmem:[#allocation2 + $0x448] sm:$0xff]  ;;  %v682_v42 = vld [vmem:[#allocation2 + $0x9f0] sm:$0xff]  ;;  %v3999_v5 = vadd.f32 %v3057_v61, %v508_v47 }
 0x234   :  { %4339 = vst.msk [vmem:[#allocation2 + $0x460] sm:$0xff] %vm19_vm3, %v3995_v11  ;;  %4511 = vst.msk [vmem:[#allocation2 + $0x9c0] sm:$0xff] %vm19_vm3, %v4167_v12  ;;  %v5207_v34 = vadd.f32 %v12133_v32, %v4857_v27  ;;  %v4855_v35 = vld [vmem:[#allocation2 + $0x9a8] sm:$0xff]  ;;  %v5375_v36 = vmax.f32 %v5032_v24, 0.0  ;;  %v5033_v39 = vadd.f32 %v12133_v32, %v4683_v38  ;;  %v8132_v43 = vpack.c.bf16 %v5377_v30, %v5377_v30  ;;  %v511_v55 = vld [vmem:[#allocation2 + $0x498] sm:$0xff]  ;;  %v3745_v62 = vpop.f32.mrb[145].mxu1 }
 0x235   :  { %4342 = vst.msk [vmem:[#allocation2 + $0x478] sm:$0xff] %vm19_vm3, %v3998_v21  ;;  %4514 = vst.msk [vmem:[#allocation2 + $0x9d8] sm:$0xff] %vm19_vm3, %v4170_v15  ;;  %v5547_v37 = vmax.f32 %v5204_v25, 0.0  ;;  %v5205_v40 = vadd.f32 %v12133_v32, %v4855_v35  ;;  %v8304_v44 = vpack.c.bf16 %v5549_v31, %v5549_v31  ;;  %v5378_v45 = vmax.f32 %v5035_v33, 0.0  ;;  %v683_v56 = vld [vmem:[#allocation2 + $0x9f8] sm:$0xff]  ;;  %v509_v63 = vld [vmem:[#allocation2 + $0x488] sm:$0xff] }
 0x236   :  { %4340 = vst.msk [vmem:[#allocation2 + $0x468] sm:$0xff] %vm19_vm3, %v3996_v28  ;;  %4512 = vst.msk [vmem:[#allocation2 + $0x9c8] sm:$0xff] %vm19_vm3, %v4168_v29  ;;  %v5550_v46 = vmax.f32 %v5207_v34, 0.0  ;;  %v8130_v49 = vpack.c.bf16 %v5375_v36, %v5375_v36  ;;  %v5376_v51 = vmax.f32 %v5033_v39, 0.0  ;;  %v4173_v60 = vadd.f32 %v8833_v18, %v682_v42  ;;  %v681_v0 = vld [vmem:[#allocation2 + $0x9e8] sm:$0xff]  ;;  %v8662_v7 = vpop.f32.mrb[146].mxu0 }
 0x237   :  { %v8302_v50 = vpack.c.bf16 %v5547_v37, %v5547_v37  ;;  %v5548_v53 = vmax.f32 %v5205_v40, 0.0  ;;  %7094 = vst.msk [vmem:[%s12548_s3 + $0x228] sm:$0xf] %vm6955_vm4, %v8132_v43  ;;  %7266 = vst.msk [vmem:[%s12548_s3 + $0x4d8] sm:$0xf] %vm6955_vm4, %v8304_v44  ;;  %v8133_v57 = vpack.c.bf16 %v5378_v45, %v5378_v45  ;;  %v4171_v6 = vadd.f32 %v3745_v62, %v680_v48  ;;  %v8834_v8 = vpop.f32.mrb[146].mxu1 }
 0x238   :  { %v8305_v58 = vpack.c.bf16 %v5550_v46, %v5550_v46  ;;  %7092 = vst.msk [vmem:[%s12548_s3 + $0x220] sm:$0xf] %vm6955_vm4, %v8130_v49  ;;  %v8131_v1 = vpack.c.bf16 %v5376_v51, %v5376_v51  ;;  %v4002_v13 = vadd.f32 %v8662_v7, %v511_v55  ;;  %v4174_v14 = vadd.f32 %v8834_v8, %v683_v56  ;;  %v3060_v16 = vpop.f32.mrb[147].mxu0  ;;  %v3748_v17 = vpop.f32.mrb[147].mxu1  ;;  %v514_v38 = vld [vmem:[#allocation2 + $0x4b0] sm:$0xff]  ;;  %v512_v41 = vld [vmem:[#allocation2 + $0x4a0] sm:$0xff] }
 0x239   :  { %7264 = vst.msk [vmem:[%s12548_s3 + $0x4d0] sm:$0xf] %vm6955_vm4, %v8302_v50  ;;  %v8303_v2 = vpack.c.bf16 %v5548_v53, %v5548_v53  ;;  %v4688_v3 = vld [vmem:[#allocation2 + $0x470] sm:$0xff]  ;;  %7095 = vst.msk [vmem:[%s12548_s3 + $0x22c] sm:$0xf] %vm6955_vm4, %v8133_v57  ;;  %v4000_v22 = vadd.f32 %v3060_v16, %v509_v63  ;;  %v4172_v23 = vadd.f32 %v3748_v17, %v681_v0  ;;  %v684_v42 = vld [vmem:[#allocation2 + $0xa00] sm:$0xff] }
 0x23a   :  { %v4860_v4 = vld [vmem:[#allocation2 + $0x9d0] sm:$0xff]  ;;  %7267 = vst.msk [vmem:[%s12548_s3 + $0x4dc] sm:$0xf] %vm6955_vm4, %v8305_v58  ;;  %v5038_v9 = vadd.f32 %v12133_v32, %v4688_v3  ;;  %7093 = vst.msk [vmem:[%s12548_s3 + $0x224] sm:$0xf] %vm6955_vm4, %v8131_v1  ;;  %v8665_v47 = vpop.f32.mrb[148].mxu0 }
 0x23b   :  { %v5210_v10 = vadd.f32 %v12133_v32, %v4860_v4  ;;  %v4686_v11 = vld [vmem:[#allocation2 + $0x460] sm:$0xff]  ;;  %4345 = vst.msk [vmem:[#allocation2 + $0x490] sm:$0xff] %vm19_vm3, %v4001_v59  ;;  %4517 = vst.msk [vmem:[#allocation2 + $0x9f0] sm:$0xff] %vm19_vm3, %v4173_v60  ;;  %v686_v35 = vld [vmem:[#allocation2 + $0xa10] sm:$0xff]  ;;  %v8837_v48 = vpop.f32.mrb[148].mxu1  ;;  %v4005_v54 = vadd.f32 %v8665_v47, %v514_v38  ;;  %v3073_v55 = vpop.f32.mrb[149].mxu0 }
 0x23c   :  { %v4858_v12 = vld [vmem:[#allocation2 + $0x9c0] sm:$0xff]  ;;  %7265 = vst.msk [vmem:[%s12548_s3 + $0x4d4] sm:$0xf] %vm6955_vm4, %v8303_v2  ;;  %v5036_v19 = vadd.f32 %v12133_v32, %v4686_v11  ;;  %v4689_v21 = vld [vmem:[#allocation2 + $0x478] sm:$0xff]  ;;  %v5381_v24 = vmax.f32 %v5038_v9, 0.0  ;;  %v4177_v18 = vadd.f32 %v8837_v48, %v686_v35  ;;  %v3761_v56 = vpop.f32.mrb[149].mxu1  ;;  %v4003_v63 = vadd.f32 %v3073_v55, %v512_v41 }
 0x23d   :  { %v5208_v20 = vadd.f32 %v12133_v32, %v4858_v12  ;;  %v4861_v15 = vld [vmem:[#allocation2 + $0x9d8] sm:$0xff]  ;;  %4343 = vst.msk [vmem:[#allocation2 + $0x480] sm:$0xff] %vm19_vm3, %v3999_v5  ;;  %4515 = vst.msk [vmem:[#allocation2 + $0x9e0] sm:$0xff] %vm19_vm3, %v4171_v6  ;;  %v5553_v25 = vmax.f32 %v5210_v10, 0.0  ;;  %v5039_v26 = vadd.f32 %v12133_v32, %v4689_v21  ;;  %v4687_v28 = vld [vmem:[#allocation2 + $0x468] sm:$0xff]  ;;  %v4175_v0 = vadd.f32 %v3761_v56, %v684_v42  ;;  %v8666_v1 = vpop.f32.mrb[150].mxu0 }
 0x23e   :  { %v5211_v27 = vadd.f32 %v12133_v32, %v4861_v15  ;;  %v4859_v29 = vld [vmem:[#allocation2 + $0x9c8] sm:$0xff]  ;;  %4346 = vst.msk [vmem:[#allocation2 + $0x498] sm:$0xff] %vm19_vm3, %v4002_v13  ;;  %4518 = vst.msk [vmem:[#allocation2 + $0x9f8] sm:$0xff] %vm19_vm3, %v4174_v14  ;;  %v5379_v30 = vmax.f32 %v5036_v19, 0.0  ;;  %v5037_v33 = vadd.f32 %v12133_v32, %v4687_v28  ;;  %v8136_v36 = vpack.c.bf16 %v5381_v24, %v5381_v24  ;;  %v515_v49 = vld [vmem:[#allocation2 + $0x4b8] sm:$0xff]  ;;  %v8838_v2 = vpop.f32.mrb[150].mxu1 }
 0x23f   :  { %v5551_v31 = vmax.f32 %v5208_v20, 0.0  ;;  %v5209_v34 = vadd.f32 %v12133_v32, %v4859_v29  ;;  %4344 = vst.msk [vmem:[#allocation2 + $0x488] sm:$0xff] %vm19_vm3, %v4000_v22  ;;  %4516 = vst.msk [vmem:[#allocation2 + $0x9e8] sm:$0xff] %vm19_vm3, %v4172_v23  ;;  %v8308_v37 = vpack.c.bf16 %v5553_v25, %v5553_v25  ;;  %v5382_v39 = vmax.f32 %v5039_v26, 0.0  ;;  %v687_v50 = vld [vmem:[#allocation2 + $0xa18] sm:$0xff]  ;;  %v513_v57 = vld [vmem:[#allocation2 + $0x4a8] sm:$0xff] }
 0x240   :  { %v5554_v40 = vmax.f32 %v5211_v27, 0.0  ;;  %v8134_v43 = vpack.c.bf16 %v5379_v30, %v5379_v30  ;;  %v5380_v45 = vmax.f32 %v5037_v33, 0.0  ;;  %7098 = vst.msk [vmem:[%s12548_s3 + $0x238] sm:$0xf] %vm6955_vm4, %v8136_v36  ;;  %v685_v58 = vld [vmem:[#allocation2 + $0xa08] sm:$0xff]  ;;  %v4006_v7 = vadd.f32 %v8666_v1, %v515_v49  ;;  %v3076_v9 = vpop.f32.mrb[151].mxu0 }
 0x241   :  { %v8306_v44 = vpack.c.bf16 %v5551_v31, %v5551_v31  ;;  %v5552_v46 = vmax.f32 %v5209_v34, 0.0  ;;  %7270 = vst.msk [vmem:[%s12548_s3 + $0x4e8] sm:$0xf] %vm6955_vm4, %v8308_v37  ;;  %v8137_v51 = vpack.c.bf16 %v5382_v39, %v5382_v39  ;;  %v4178_v8 = vadd.f32 %v8838_v2, %v687_v50  ;;  %v3764_v10 = vpop.f32.mrb[151].mxu1  ;;  %v518_v28 = vld [vmem:[#allocation2 + $0x4d0] sm:$0xff]  ;;  %v516_v38 = vld [vmem:[#allocation2 + $0x4c0] sm:$0xff] }
 0x242   :  { %v8309_v53 = vpack.c.bf16 %v5554_v40, %v5554_v40  ;;  %7096 = vst.msk [vmem:[%s12548_s3 + $0x230] sm:$0xf] %vm6955_vm4, %v8134_v43  ;;  %v8135_v59 = vpack.c.bf16 %v5380_v45, %v5380_v45  ;;  %v4692_v61 = vld [vmem:[#allocation2 + $0x490] sm:$0xff]  ;;  %v4004_v16 = vadd.f32 %v3076_v9, %v513_v57  ;;  %v4176_v17 = vadd.f32 %v3764_v10, %v685_v58  ;;  %v688_v35 = vld [vmem:[#allocation2 + $0xa20] sm:$0xff]  ;;  %v8669_v41 = vpop.f32.mrb[152].mxu0  ;;  %v8841_v42 = vpop.f32.mrb[152].mxu1 }
 0x243   :  { %7268 = vst.msk [vmem:[%s12548_s3 + $0x4e0] sm:$0xf] %vm6955_vm4, %v8306_v44  ;;  %v8307_v60 = vpack.c.bf16 %v5552_v46, %v5552_v46  ;;  %v4864_v62 = vld [vmem:[#allocation2 + $0x9f0] sm:$0xff]  ;;  %7099 = vst.msk [vmem:[%s12548_s3 + $0x23c] sm:$0xf] %vm6955_vm4, %v8137_v51  ;;  %v5042_v3 = vadd.f32 %v12133_v32, %v4692_v61  ;;  %v519_v43 = vld [vmem:[#allocation2 + $0x4d8] sm:$0xff]  ;;  %v4009_v47 = vadd.f32 %v8669_v41, %v518_v28 }
 0x244   :  { %7271 = vst.msk [vmem:[%s12548_s3 + $0x4ec] sm:$0xf] %vm6955_vm4, %v8309_v53  ;;  %v5214_v4 = vadd.f32 %v12133_v32, %v4864_v62  ;;  %v4690_v5 = vld [vmem:[#allocation2 + $0x480] sm:$0xff]  ;;  %7097 = vst.msk [vmem:[%s12548_s3 + $0x234] sm:$0xf] %vm6955_vm4, %v8135_v59  ;;  %v690_v29 = vld [vmem:[#allocation2 + $0xa30] sm:$0xff] }
 0x245   :  { %v4862_v6 = vld [vmem:[#allocation2 + $0x9e0] sm:$0xff]  ;;  %4349 = vst.msk [vmem:[#allocation2 + $0x4b0] sm:$0xff] %vm19_vm3, %v4005_v54  ;;  %4521 = vst.msk [vmem:[#allocation2 + $0xa10] sm:$0xff] %vm19_vm3, %v4177_v18  ;;  %v5040_v11 = vadd.f32 %v12133_v32, %v4690_v5  ;;  %v4693_v13 = vld [vmem:[#allocation2 + $0x498] sm:$0xff]  ;;  %v5385_v19 = vmax.f32 %v5042_v3, 0.0  ;;  %v4181_v48 = vadd.f32 %v8841_v42, %v690_v29  ;;  %v3089_v49 = vpop.f32.mrb[153].mxu0 }
 0x246   :  { %7269 = vst.msk [vmem:[%s12548_s3 + $0x4e4] sm:$0xf] %vm6955_vm4, %v8307_v60  ;;  %v5212_v12 = vadd.f32 %v12133_v32, %v4862_v6  ;;  %v4865_v14 = vld [vmem:[#allocation2 + $0x9f8] sm:$0xff]  ;;  %v5557_v20 = vmax.f32 %v5214_v4, 0.0  ;;  %v5043_v21 = vadd.f32 %v12133_v32, %v4693_v13  ;;  %v4691_v22 = vld [vmem:[#allocation2 + $0x488] sm:$0xff]  ;;  %v3777_v50 = vpop.f32.mrb[153].mxu1  ;;  %v4007_v57 = vadd.f32 %v3089_v49, %v516_v38 }
 0x247   :  { %4347 = vst.msk [vmem:[#allocation2 + $0x4a0] sm:$0xff] %vm19_vm3, %v4003_v63  ;;  %4519 = vst.msk [vmem:[#allocation2 + $0xa00] sm:$0xff] %vm19_vm3, %v4175_v0  ;;  %v5215_v15 = vadd.f32 %v12133_v32, %v4865_v14  ;;  %v4863_v23 = vld [vmem:[#allocation2 + $0x9e8] sm:$0xff]  ;;  %v5383_v24 = vmax.f32 %v5040_v11, 0.0  ;;  %v5041_v26 = vadd.f32 %v12133_v32, %v4691_v22  ;;  %v8140_v30 = vpack.c.bf16 %v5385_v19, %v5385_v19  ;;  %v691_v44 = vld [vmem:[#allocation2 + $0xa38] sm:$0xff]  ;;  %v8670_v59 = vpop.f32.mrb[154].mxu0 }
 0x248   :  { %4350 = vst.msk [vmem:[#allocation2 + $0x4b8] sm:$0xff] %vm19_vm3, %v4006_v7  ;;  %4522 = vst.msk [vmem:[#allocation2 + $0xa18] sm:$0xff] %vm19_vm3, %v4178_v8  ;;  %v5555_v25 = vmax.f32 %v5212_v12, 0.0  ;;  %v5213_v27 = vadd.f32 %v12133_v32, %v4863_v23  ;;  %v8312_v31 = vpack.c.bf16 %v5557_v20, %v5557_v20  ;;  %v5386_v33 = vmax.f32 %v5043_v21, 0.0  ;;  %v517_v51 = vld [vmem:[#allocation2 + $0x4c8] sm:$0xff]  ;;  %v8842_v60 = vpop.f32.mrb[154].mxu1 }
 0x249   :  { %4348 = vst.msk [vmem:[#allocation2 + $0x4a8] sm:$0xff] %vm19_vm3, %v4004_v16  ;;  %4520 = vst.msk [vmem:[#allocation2 + $0xa08] sm:$0xff] %vm19_vm3, %v4176_v17  ;;  %v5558_v34 = vmax.f32 %v5215_v15, 0.0  ;;  %v8138_v36 = vpack.c.bf16 %v5383_v24, %v5383_v24  ;;  %v5384_v39 = vmax.f32 %v5041_v26, 0.0  ;;  %v689_v53 = vld [vmem:[#allocation2 + $0xa28] sm:$0xff]  ;;  %v4179_v58 = vadd.f32 %v3777_v50, %v688_v35  ;;  %v3092_v3 = vpop.f32.mrb[155].mxu0 }
 0x24a   :  { %v8310_v37 = vpack.c.bf16 %v5555_v25, %v5555_v25  ;;  %v5556_v40 = vmax.f32 %v5213_v27, 0.0  ;;  %7102 = vst.msk [vmem:[%s12548_s3 + $0x248] sm:$0xf] %vm6955_vm4, %v8140_v30  ;;  %7274 = vst.msk [vmem:[%s12548_s3 + $0x4f8] sm:$0xf] %vm6955_vm4, %v8312_v31  ;;  %v8141_v45 = vpack.c.bf16 %v5386_v33, %v5386_v33  ;;  %v4010_v1 = vadd.f32 %v8670_v59, %v519_v43  ;;  %v3780_v4 = vpop.f32.mrb[155].mxu1 }
 0x24b   :  { %v8313_v46 = vpack.c.bf16 %v5558_v34, %v5558_v34  ;;  %7100 = vst.msk [vmem:[%s12548_s3 + $0x240] sm:$0xf] %vm6955_vm4, %v8138_v36  ;;  %v8139_v54 = vpack.c.bf16 %v5384_v39, %v5384_v39  ;;  %v4182_v2 = vadd.f32 %v8842_v60, %v691_v44  ;;  %v4008_v9 = vadd.f32 %v3092_v3, %v517_v51  ;;  %v522_v22 = vld [vmem:[#allocation2 + $0x4f0] sm:$0xff]  ;;  %v520_v28 = vld [vmem:[#allocation2 + $0x4e0] sm:$0xff]  ;;  %v8673_v38 = vpop.f32.mrb[156].mxu0  ;;  %v8845_v35 = vpop.f32.mrb[156].mxu1 }
 0x24c   :  { %7272 = vst.msk [vmem:[%s12548_s3 + $0x4f0] sm:$0xf] %vm6955_vm4, %v8310_v37  ;;  %v8311_v18 = vpack.c.bf16 %v5556_v40, %v5556_v40  ;;  %v4696_v55 = vld [vmem:[#allocation2 + $0x4b0] sm:$0xff]  ;;  %7103 = vst.msk [vmem:[%s12548_s3 + $0x24c] sm:$0xf] %vm6955_vm4, %v8141_v45  ;;  %v4180_v10 = vadd.f32 %v3780_v4, %v689_v53  ;;  %v692_v29 = vld [vmem:[#allocation2 + $0xa40] sm:$0xff]  ;;  %v4013_v41 = vadd.f32 %v8673_v38, %v522_v22 }
 0x24d   :  { %v4868_v56 = vld [vmem:[#allocation2 + $0xa10] sm:$0xff]  ;;  %7275 = vst.msk [vmem:[%s12548_s3 + $0x4fc] sm:$0xf] %vm6955_vm4, %v8313_v46  ;;  %v5046_v61 = vadd.f32 %v12133_v32, %v4696_v55  ;;  %7101 = vst.msk [vmem:[%s12548_s3 + $0x244] sm:$0xf] %vm6955_vm4, %v8139_v54  ;;  %v523_v36 = vld [vmem:[#allocation2 + $0x4f8] sm:$0xff] }
 0x24e   :  { %v5218_v62 = vadd.f32 %v12133_v32, %v4868_v56  ;;  %v4694_v63 = vld [vmem:[#allocation2 + $0x4a0] sm:$0xff]  ;;  %4353 = vst.msk [vmem:[#allocation2 + $0x4d0] sm:$0xff] %vm19_vm3, %v4009_v47  ;;  %4525 = vst.msk [vmem:[#allocation2 + $0xa30] sm:$0xff] %vm19_vm3, %v4181_v48  ;;  %v694_v23 = vld [vmem:[#allocation2 + $0xa50] sm:$0xff]  ;;  %v3105_v43 = vpop.f32.mrb[157].mxu0  ;;  %v3793_v44 = vpop.f32.mrb[157].mxu1 }
 0x24f   :  { %v4866_v0 = vld [vmem:[#allocation2 + $0xa00] sm:$0xff]  ;;  %7273 = vst.msk [vmem:[%s12548_s3 + $0x4f4] sm:$0xf] %vm6955_vm4, %v8311_v18  ;;  %v5044_v5 = vadd.f32 %v12133_v32, %v4694_v63  ;;  %v4697_v7 = vld [vmem:[#allocation2 + $0x4b8] sm:$0xff]  ;;  %v5389_v11 = vmax.f32 %v5046_v61, 0.0  ;;  %v4185_v42 = vadd.f32 %v8845_v35, %v694_v23  ;;  %v521_v45 = vld [vmem:[#allocation2 + $0x4e8] sm:$0xff]  ;;  %v4011_v51 = vadd.f32 %v3105_v43, %v520_v28 }
 0x250   :  { %v5216_v6 = vadd.f32 %v12133_v32, %v4866_v0  ;;  %v4869_v8 = vld [vmem:[#allocation2 + $0xa18] sm:$0xff]  ;;  %4351 = vst.msk [vmem:[#allocation2 + $0x4c0] sm:$0xff] %vm19_vm3, %v4007_v57  ;;  %4523 = vst.msk [vmem:[#allocation2 + $0xa20] sm:$0xff] %vm19_vm3, %v4179_v58  ;;  %v5561_v12 = vmax.f32 %v5218_v62, 0.0  ;;  %v5047_v13 = vadd.f32 %v12133_v32, %v4697_v7  ;;  %v4695_v16 = vld [vmem:[#allocation2 + $0x4a8] sm:$0xff]  ;;  %v4183_v53 = vadd.f32 %v3793_v44, %v692_v29  ;;  %v8674_v54 = vpop.f32.mrb[158].mxu0 }
 0x251   :  { %v5219_v14 = vadd.f32 %v12133_v32, %v4869_v8  ;;  %v4867_v17 = vld [vmem:[#allocation2 + $0xa08] sm:$0xff]  ;;  %4354 = vst.msk [vmem:[#allocation2 + $0x4d8] sm:$0xff] %vm19_vm3, %v4010_v1  ;;  %4526 = vst.msk [vmem:[#allocation2 + $0xa38] sm:$0xff] %vm19_vm3, %v4182_v2  ;;  %v5387_v19 = vmax.f32 %v5044_v5, 0.0  ;;  %v5045_v21 = vadd.f32 %v12133_v32, %v4695_v16  ;;  %v8144_v24 = vpack.c.bf16 %v5389_v11, %v5389_v11  ;;  %v695_v37 = vld [vmem:[#allocation2 + $0xa58] sm:$0xff]  ;;  %v8846_v18 = vpop.f32.mrb[158].mxu1 }
 0x252   :  { %v5559_v20 = vmax.f32 %v5216_v6, 0.0  ;;  %v5217_v15 = vadd.f32 %v12133_v32, %v4867_v17  ;;  %4352 = vst.msk [vmem:[#allocation2 + $0x4c8] sm:$0xff] %vm19_vm3, %v4008_v9  ;;  %4524 = vst.msk [vmem:[#allocation2 + $0xa28] sm:$0xff] %vm19_vm3, %v4180_v10  ;;  %v8316_v25 = vpack.c.bf16 %v5561_v12, %v5561_v12  ;;  %v5390_v26 = vmax.f32 %v5047_v13, 0.0  ;;  %v693_v46 = vld [vmem:[#allocation2 + $0xa48] sm:$0xff]  ;;  %v3108_v61 = vpop.f32.mrb[159].mxu0 }
 0x253   :  { %v5562_v27 = vmax.f32 %v5219_v14, 0.0  ;;  %v8142_v30 = vpack.c.bf16 %v5387_v19, %v5387_v19  ;;  %v5388_v33 = vmax.f32 %v5045_v21, 0.0  ;;  %7106 = vst.msk [vmem:[%s12548_s3 + $0x258] sm:$0xf] %vm6955_vm4, %v8144_v24  ;;  %v4014_v59 = vadd.f32 %v8674_v54, %v523_v36  ;;  %v3796_v62 = vpop.f32.mrb[159].mxu1  ;;  %v526_v16 = vld [vmem:[#allocation2 + $0x510] sm:$0xff] }
 0x254   :  { %v8314_v31 = vpack.c.bf16 %v5559_v20, %v5559_v20  ;;  %v5560_v34 = vmax.f32 %v5217_v15, 0.0  ;;  %7278 = vst.msk [vmem:[%s12548_s3 + $0x508] sm:$0xf] %vm6955_vm4, %v8316_v25  ;;  %v8145_v39 = vpack.c.bf16 %v5390_v26, %v5390_v26  ;;  %v4186_v60 = vadd.f32 %v8846_v18, %v695_v37  ;;  %v698_v17 = vld [vmem:[#allocation2 + $0xa70] sm:$0xff]  ;;  %v524_v22 = vld [vmem:[#allocation2 + $0x500] sm:$0xff]  ;;  %v8677_v28 = vpop.f32.mrb[160].mxu0 }
 0x255   :  { %v8317_v40 = vpack.c.bf16 %v5562_v27, %v5562_v27  ;;  %7104 = vst.msk [vmem:[%s12548_s3 + $0x250] sm:$0xf] %vm6955_vm4, %v8142_v30  ;;  %v8143_v47 = vpack.c.bf16 %v5388_v33, %v5388_v33  ;;  %v4700_v49 = vld [vmem:[#allocation2 + $0x4d0] sm:$0xff]  ;;  %v4012_v3 = vadd.f32 %v3108_v61, %v521_v45  ;;  %v4184_v4 = vadd.f32 %v3796_v62, %v693_v46  ;;  %v696_v23 = vld [vmem:[#allocation2 + $0xa60] sm:$0xff]  ;;  %v8849_v29 = vpop.f32.mrb[160].mxu1  ;;  %v527_v30 = vld [vmem:[#allocation2 + $0x518] sm:$0xff] }
 0x256   :  { %7276 = vst.msk [vmem:[%s12548_s3 + $0x500] sm:$0xf] %vm6955_vm4, %v8314_v31  ;;  %v8315_v48 = vpack.c.bf16 %v5560_v34, %v5560_v34  ;;  %v4872_v50 = vld [vmem:[#allocation2 + $0xa30] sm:$0xff]  ;;  %7107 = vst.msk [vmem:[%s12548_s3 + $0x25c] sm:$0xf] %vm6955_vm4, %v8145_v39  ;;  %v5050_v55 = vadd.f32 %v12133_v32, %v4700_v49  ;;  %v699_v31 = vld [vmem:[#allocation2 + $0xa78] sm:$0xff]  ;;  %v4017_v38 = vadd.f32 %v8677_v28, %v526_v16 }
 0x257   :  { %7279 = vst.msk [vmem:[%s12548_s3 + $0x50c] sm:$0xf] %vm6955_vm4, %v8317_v40  ;;  %v5222_v56 = vadd.f32 %v12133_v32, %v4872_v50  ;;  %v4698_v57 = vld [vmem:[#allocation2 + $0x4c0] sm:$0xff]  ;;  %7105 = vst.msk [vmem:[%s12548_s3 + $0x254] sm:$0xf] %vm6955_vm4, %v8143_v47  ;;  %v4189_v35 = vadd.f32 %v8849_v29, %v698_v17  ;;  %v3121_v36 = vpop.f32.mrb[161].mxu0 }
 0x258   :  { %v4870_v58 = vld [vmem:[#allocation2 + $0xa20] sm:$0xff]  ;;  %4357 = vst.msk [vmem:[#allocation2 + $0x4f0] sm:$0xff] %vm19_vm3, %v4013_v41  ;;  %4529 = vst.msk [vmem:[#allocation2 + $0xa50] sm:$0xff] %vm19_vm3, %v4185_v42  ;;  %v5048_v63 = vadd.f32 %v12133_v32, %v4698_v57  ;;  %v4701_v1 = vld [vmem:[#allocation2 + $0x4d8] sm:$0xff]  ;;  %v5393_v5 = vmax.f32 %v5050_v55, 0.0  ;;  %v3809_v37 = vpop.f32.mrb[161].mxu1  ;;  %v4015_v45 = vadd.f32 %v3121_v36, %v524_v22 }
 0x259   :  { %7277 = vst.msk [vmem:[%s12548_s3 + $0x504] sm:$0xf] %vm6955_vm4, %v8315_v48  ;;  %v5220_v0 = vadd.f32 %v12133_v32, %v4870_v58  ;;  %v4873_v2 = vld [vmem:[#allocation2 + $0xa38] sm:$0xff]  ;;  %v5565_v6 = vmax.f32 %v5222_v56, 0.0  ;;  %v5051_v7 = vadd.f32 %v12133_v32, %v4701_v1  ;;  %v4699_v9 = vld [vmem:[#allocation2 + $0x4c8] sm:$0xff]  ;;  %v4187_v46 = vadd.f32 %v3809_v37, %v696_v23  ;;  %v8678_v47 = vpop.f32.mrb[162].mxu0 }
 0x25a   :  { %4355 = vst.msk [vmem:[#allocation2 + $0x4e0] sm:$0xff] %vm19_vm3, %v4011_v51  ;;  %4527 = vst.msk [vmem:[#allocation2 + $0xa40] sm:$0xff] %vm19_vm3, %v4183_v53  ;;  %v5223_v8 = vadd.f32 %v12133_v32, %v4873_v2  ;;  %v4871_v10 = vld [vmem:[#allocation2 + $0xa28] sm:$0xff]  ;;  %v5391_v11 = vmax.f32 %v5048_v63, 0.0  ;;  %v5049_v13 = vadd.f32 %v12133_v32, %v4699_v9  ;;  %v8148_v19 = vpack.c.bf16 %v5393_v5, %v5393_v5  ;;  %v8850_v48 = vpop.f32.mrb[162].mxu1  ;;  %v3124_v55 = vpop.f32.mrb[163].mxu0 }
 0x25b   :  { %4358 = vst.msk [vmem:[#allocation2 + $0x4f8] sm:$0xff] %vm19_vm3, %v4014_v59  ;;  %4530 = vst.msk [vmem:[#allocation2 + $0xa58] sm:$0xff] %vm19_vm3, %v4186_v60  ;;  %v5563_v12 = vmax.f32 %v5220_v0, 0.0  ;;  %v5221_v14 = vadd.f32 %v12133_v32, %v4871_v10  ;;  %v8320_v20 = vpack.c.bf16 %v5565_v6, %v5565_v6  ;;  %v5394_v21 = vmax.f32 %v5051_v7, 0.0  ;;  %v525_v39 = vld [vmem:[#allocation2 + $0x508] sm:$0xff]  ;;  %v3812_v56 = vpop.f32.mrb[163].mxu1 }
 0x25c   :  { %4356 = vst.msk [vmem:[#allocation2 + $0x4e8] sm:$0xff] %vm19_vm3, %v4012_v3  ;;  %4528 = vst.msk [vmem:[#allocation2 + $0xa48] sm:$0xff] %vm19_vm3, %v4184_v4  ;;  %v5566_v15 = vmax.f32 %v5223_v8, 0.0  ;;  %v8146_v24 = vpack.c.bf16 %v5391_v11, %v5391_v11  ;;  %v5392_v26 = vmax.f32 %v5049_v13, 0.0  ;;  %v697_v40 = vld [vmem:[#allocation2 + $0xa68] sm:$0xff]  ;;  %v4018_v54 = vadd.f32 %v8678_v47, %v527_v30  ;;  %v530_v9 = vld [vmem:[#allocation2 + $0x530] sm:$0xff] }
 0x25d   :  { %v8318_v25 = vpack.c.bf16 %v5563_v12, %v5563_v12  ;;  %v5564_v27 = vmax.f32 %v5221_v14, 0.0  ;;  %7110 = vst.msk [vmem:[%s12548_s3 + $0x268] sm:$0xf] %vm6955_vm4, %v8148_v19  ;;  %7282 = vst.msk [vmem:[%s12548_s3 + $0x518] sm:$0xf] %vm6955_vm4, %v8320_v20  ;;  %v8149_v33 = vpack.c.bf16 %v5394_v21, %v5394_v21  ;;  %v4190_v18 = vadd.f32 %v8850_v48, %v699_v31  ;;  %v702_v10 = vld [vmem:[#allocation2 + $0xa90] sm:$0xff] }
 0x25e   :  { %v8321_v34 = vpack.c.bf16 %v5566_v15, %v5566_v15  ;;  %7108 = vst.msk [vmem:[%s12548_s3 + $0x260] sm:$0xf] %vm6955_vm4, %v8146_v24  ;;  %v8147_v41 = vpack.c.bf16 %v5392_v26, %v5392_v26  ;;  %v4016_v61 = vadd.f32 %v3124_v55, %v525_v39  ;;  %v4188_v62 = vadd.f32 %v3812_v56, %v697_v40  ;;  %v528_v16 = vld [vmem:[#allocation2 + $0x520] sm:$0xff]  ;;  %v8681_v22 = vpop.f32.mrb[164].mxu0  ;;  %v8853_v23 = vpop.f32.mrb[164].mxu1  ;;  %v531_v24 = vld [vmem:[#allocation2 + $0x538] sm:$0xff] }
 0x25f   :  { %7280 = vst.msk [vmem:[%s12548_s3 + $0x510] sm:$0xf] %vm6955_vm4, %v8318_v25  ;;  %v8319_v42 = vpack.c.bf16 %v5564_v27, %v5564_v27  ;;  %v4704_v43 = vld [vmem:[#allocation2 + $0x4f0] sm:$0xff]  ;;  %7111 = vst.msk [vmem:[%s12548_s3 + $0x26c] sm:$0xf] %vm6955_vm4, %v8149_v33  ;;  %v700_v17 = vld [vmem:[#allocation2 + $0xa80] sm:$0xff]  ;;  %v4021_v28 = vadd.f32 %v8681_v22, %v530_v9  ;;  %v4193_v29 = vadd.f32 %v8853_v23, %v702_v10 }
 0x260   :  { %v4876_v44 = vld [vmem:[#allocation2 + $0xa50] sm:$0xff]  ;;  %7283 = vst.msk [vmem:[%s12548_s3 + $0x51c] sm:$0xf] %vm6955_vm4, %v8321_v34  ;;  %v5054_v49 = vadd.f32 %v12133_v32, %v4704_v43  ;;  %7109 = vst.msk [vmem:[%s12548_s3 + $0x264] sm:$0xf] %vm6955_vm4, %v8147_v41  ;;  %v703_v25 = vld [vmem:[#allocation2 + $0xa98] sm:$0xff] }
 0x261   :  { %v5226_v50 = vadd.f32 %v12133_v32, %v4876_v44  ;;  %v4702_v51 = vld [vmem:[#allocation2 + $0x4e0] sm:$0xff]  ;;  %4361 = vst.msk [vmem:[#allocation2 + $0x510] sm:$0xff] %vm19_vm3, %v4017_v38  ;;  %4533 = vst.msk [vmem:[#allocation2 + $0xa70] sm:$0xff] %vm19_vm3, %v4189_v35  ;;  %v3137_v30 = vpop.f32.mrb[165].mxu0  ;;  %v3825_v31 = vpop.f32.mrb[165].mxu1  ;;  %v529_v33 = vld [vmem:[#allocation2 + $0x528] sm:$0xff] }
 0x262   :  { %v4874_v53 = vld [vmem:[#allocation2 + $0xa40] sm:$0xff]  ;;  %7281 = vst.msk [vmem:[%s12548_s3 + $0x514] sm:$0xf] %vm6955_vm4, %v8319_v42  ;;  %v5052_v57 = vadd.f32 %v12133_v32, %v4702_v51  ;;  %v4705_v59 = vld [vmem:[#allocation2 + $0x4f8] sm:$0xff]  ;;  %v5397_v63 = vmax.f32 %v5054_v49, 0.0  ;;  %v701_v34 = vld [vmem:[#allocation2 + $0xa88] sm:$0xff]  ;;  %v4019_v39 = vadd.f32 %v3137_v30, %v528_v16  ;;  %v4191_v40 = vadd.f32 %v3825_v31, %v700_v17 }
 0x263   :  { %v5224_v58 = vadd.f32 %v12133_v32, %v4874_v53  ;;  %v4877_v60 = vld [vmem:[#allocation2 + $0xa58] sm:$0xff]  ;;  %4359 = vst.msk [vmem:[#allocation2 + $0x500] sm:$0xff] %vm19_vm3, %v4015_v45  ;;  %4531 = vst.msk [vmem:[#allocation2 + $0xa60] sm:$0xff] %vm19_vm3, %v4187_v46  ;;  %v5569_v0 = vmax.f32 %v5226_v50, 0.0  ;;  %v5055_v1 = vadd.f32 %v12133_v32, %v4705_v59  ;;  %v4703_v3 = vld [vmem:[#allocation2 + $0x4e8] sm:$0xff]  ;;  %v8682_v41 = vpop.f32.mrb[166].mxu0 }
 0x264   :  { %v5227_v2 = vadd.f32 %v12133_v32, %v4877_v60  ;;  %v4875_v4 = vld [vmem:[#allocation2 + $0xa48] sm:$0xff]  ;;  %4362 = vst.msk [vmem:[#allocation2 + $0x518] sm:$0xff] %vm19_vm3, %v4018_v54  ;;  %4534 = vst.msk [vmem:[#allocation2 + $0xa78] sm:$0xff] %vm19_vm3, %v4190_v18  ;;  %v5395_v5 = vmax.f32 %v5052_v57, 0.0  ;;  %v5053_v7 = vadd.f32 %v12133_v32, %v4703_v3  ;;  %v8152_v11 = vpack.c.bf16 %v5397_v63, %v5397_v63  ;;  %v8854_v42 = vpop.f32.mrb[166].mxu1  ;;  %v3140_v49 = vpop.f32.mrb[167].mxu0 }
 0x265   :  { %v5567_v6 = vmax.f32 %v5224_v58, 0.0  ;;  %v5225_v8 = vadd.f32 %v12133_v32, %v4875_v4  ;;  %4360 = vst.msk [vmem:[#allocation2 + $0x508] sm:$0xff] %vm19_vm3, %v4016_v61  ;;  %4532 = vst.msk [vmem:[#allocation2 + $0xa68] sm:$0xff] %vm19_vm3, %v4188_v62  ;;  %v8324_v12 = vpack.c.bf16 %v5569_v0, %v5569_v0  ;;  %v5398_v13 = vmax.f32 %v5055_v1, 0.0  ;;  %v3828_v50 = vpop.f32.mrb[167].mxu1  ;;  %v534_v3 = vld [vmem:[#allocation2 + $0x550] sm:$0xff] }
 0x266   :  { %v5570_v14 = vmax.f32 %v5227_v2, 0.0  ;;  %v8150_v19 = vpack.c.bf16 %v5395_v5, %v5395_v5  ;;  %v5396_v21 = vmax.f32 %v5053_v7, 0.0  ;;  %7114 = vst.msk [vmem:[%s12548_s3 + $0x278] sm:$0xf] %vm6955_vm4, %v8152_v11  ;;  %v4022_v47 = vadd.f32 %v8682_v41, %v531_v24  ;;  %v704_v16 = vld [vmem:[#allocation2 + $0xaa0] sm:$0xff]  ;;  %v535_v17 = vld [vmem:[#allocation2 + $0x558] sm:$0xff] }
 0x267   :  { %v8322_v20 = vpack.c.bf16 %v5567_v6, %v5567_v6  ;;  %v5568_v15 = vmax.f32 %v5225_v8, 0.0  ;;  %7286 = vst.msk [vmem:[%s12548_s3 + $0x528] sm:$0xf] %vm6955_vm4, %v8324_v12  ;;  %v8153_v26 = vpack.c.bf16 %v5398_v13, %v5398_v13  ;;  %v4194_v48 = vadd.f32 %v8854_v42, %v703_v25  ;;  %v532_v8 = vld [vmem:[#allocation2 + $0x540] sm:$0xff]  ;;  %v8685_v13 = vpop.f32.mrb[168].mxu0  ;;  %v533_v23 = vld [vmem:[#allocation2 + $0x548] sm:$0xff] }
 0x268   :  { %v8325_v27 = vpack.c.bf16 %v5570_v14, %v5570_v14  ;;  %7112 = vst.msk [vmem:[%s12548_s3 + $0x270] sm:$0xf] %vm6955_vm4, %v8150_v19  ;;  %v8151_v38 = vpack.c.bf16 %v5396_v21, %v5396_v21  ;;  %v4708_v36 = vld [vmem:[#allocation2 + $0x510] sm:$0xff]  ;;  %v4020_v55 = vadd.f32 %v3140_v49, %v529_v33  ;;  %v4192_v56 = vadd.f32 %v3828_v50, %v701_v34  ;;  %v12431_v14 = vpop.f32.mrb[168].mxu1  ;;  %v705_v24 = vld [vmem:[#allocation2 + $0xaa8] sm:$0xff] }
 0x269   :  { %7284 = vst.msk [vmem:[%s12548_s3 + $0x520] sm:$0xf] %vm6955_vm4, %v8322_v20  ;;  %v8323_v35 = vpack.c.bf16 %v5568_v15, %v5568_v15  ;;  %v4880_v37 = vld [vmem:[#allocation2 + $0xa70] sm:$0xff]  ;;  %7115 = vst.msk [vmem:[%s12548_s3 + $0x27c] sm:$0xf] %vm6955_vm4, %v8153_v26  ;;  %v5058_v43 = vadd.f32 %v12133_v32, %v4708_v36  ;;  %v4025_v21 = vadd.f32 %v8685_v13, %v534_v3  ;;  %v3153_v15 = vpop.f32.mrb[169].mxu0 }
 0x26a   :  { %7287 = vst.msk [vmem:[%s12548_s3 + $0x52c] sm:$0xf] %vm6955_vm4, %v8325_v27  ;;  %v5230_v44 = vadd.f32 %v12133_v32, %v4880_v37  ;;  %v4706_v45 = vld [vmem:[#allocation2 + $0x500] sm:$0xff]  ;;  %7113 = vst.msk [vmem:[%s12548_s3 + $0x274] sm:$0xf] %vm6955_vm4, %v8151_v38  ;;  %v3841_v22 = vpop.f32.mrb[169].mxu1 }
 0x26b   :  { %v4878_v46 = vld [vmem:[#allocation2 + $0xa60] sm:$0xff]  ;;  %4365 = vst.msk [vmem:[#allocation2 + $0x530] sm:$0xff] %vm19_vm3, %v4021_v28  ;;  %4537 = vst.msk [vmem:[#allocation2 + $0xa90] sm:$0xff] %vm19_vm3, %v4193_v29  ;;  %v5056_v51 = vadd.f32 %v12133_v32, %v4706_v45  ;;  %v4709_v54 = vld [vmem:[#allocation2 + $0x518] sm:$0xff]  ;;  %v5401_v57 = vmax.f32 %v5058_v43, 0.0  ;;  %v4023_v29 = vadd.f32 %v3153_v15, %v532_v8  ;;  %v8686_v30 = vpop.f32.mrb[170].mxu0  ;;  %v4195_v52 = vadd.f32 %v3841_v22, %v704_v16 }
 0x26c   :  { %7285 = vst.msk [vmem:[%s12548_s3 + $0x524] sm:$0xf] %vm6955_vm4, %v8323_v35  ;;  %v5228_v53 = vadd.f32 %v12133_v32, %v4878_v46  ;;  %v4881_v18 = vld [vmem:[#allocation2 + $0xa78] sm:$0xff]  ;;  %v5573_v58 = vmax.f32 %v5230_v44, 0.0  ;;  %v5059_v59 = vadd.f32 %v12133_v32, %v4709_v54  ;;  %v4707_v61 = vld [vmem:[#allocation2 + $0x508] sm:$0xff]  ;;  %v8858_v31 = vpop.f32.mrb[170].mxu1  ;;  %v4026_v36 = vadd.f32 %v8686_v30, %v535_v17 }
 0x26d   :  { %4363 = vst.msk [vmem:[#allocation2 + $0x520] sm:$0xff] %vm19_vm3, %v4019_v39  ;;  %4535 = vst.msk [vmem:[#allocation2 + $0xa80] sm:$0xff] %vm19_vm3, %v4191_v40  ;;  %v5231_v60 = vadd.f32 %v12133_v32, %v4881_v18  ;;  %v4879_v62 = vld [vmem:[#allocation2 + $0xa68] sm:$0xff]  ;;  %v5399_v63 = vmax.f32 %v5056_v51, 0.0  ;;  %v5057_v1 = vadd.f32 %v12133_v32, %v4707_v61  ;;  %v8156_v4 = vpack.c.bf16 %v5401_v57, %v5401_v57  ;;  %v3156_v37 = vpop.f32.mrb[171].mxu0  ;;  %v3844_v39 = vpop.f32.mrb[171].mxu1 }
 0x26e   :  { %4366 = vst.msk [vmem:[#allocation2 + $0x538] sm:$0xff] %vm19_vm3, %v4022_v47  ;;  %4538 = vst.msk [vmem:[#allocation2 + $0xa98] sm:$0xff] %vm19_vm3, %v4194_v48  ;;  %v5571_v0 = vmax.f32 %v5228_v53, 0.0  ;;  %v5229_v2 = vadd.f32 %v12133_v32, %v4879_v62  ;;  %v8328_v5 = vpack.c.bf16 %v5573_v58, %v5573_v58  ;;  %v5402_v6 = vmax.f32 %v5059_v59, 0.0 }
 0x26f   :  { %4364 = vst.msk [vmem:[#allocation2 + $0x528] sm:$0xff] %vm19_vm3, %v4020_v55  ;;  %4536 = vst.msk [vmem:[#allocation2 + $0xa88] sm:$0xff] %vm19_vm3, %v4192_v56  ;;  %v5574_v7 = vmax.f32 %v5231_v60, 0.0  ;;  %v8154_v9 = vpack.c.bf16 %v5399_v63, %v5399_v63  ;;  %v5400_v11 = vmax.f32 %v5057_v1, 0.0  ;;  %v4024_v44 = vadd.f32 %v3156_v37, %v533_v23  ;;  %v706_v1 = vld [vmem:[#allocation2 + $0xab0] sm:$0x3] }
 0x270   :  { %v8326_v10 = vpack.c.bf16 %v5571_v0, %v5571_v0  ;;  %v5572_v12 = vmax.f32 %v5229_v2, 0.0  ;;  %7118 = vst.msk [vmem:[%s12548_s3 + $0x288] sm:$0xf] %vm6955_vm4, %v8156_v4  ;;  %7290 = vst.msk [vmem:[%s12548_s3 + $0x538] sm:$0xf] %vm6955_vm4, %v8328_v5  ;;  %v8157_v19 = vpack.c.bf16 %v5402_v6, %v5402_v6  ;;  %v4196_v45 = vadd.f32 %v3844_v39, %v705_v24 }
 0x271   :  { %v8329_v20 = vpack.c.bf16 %v5574_v7, %v5574_v7  ;;  %7116 = vst.msk [vmem:[%s12548_s3 + $0x280] sm:$0xf] %vm6955_vm4, %v8154_v9  ;;  %v8155_v25 = vpack.c.bf16 %v5400_v11, %v5400_v11  ;;  %v4197_v5 = vadd.f32 %v12431_v14, %v706_v1  ;;  %v9044_v6 = vld [vmem:[%s12547_s2] ss:$0 sm:$0xff] }
 0x272   :  { %7288 = vst.msk [vmem:[%s12548_s3 + $0x530] sm:$0xf] %vm6955_vm4, %v8326_v10  ;;  %v8327_v26 = vpack.c.bf16 %v5572_v12, %v5572_v12  ;;  %v4712_v27 = vld [vmem:[#allocation2 + $0x530] sm:$0xff]  ;;  %7119 = vst.msk [vmem:[%s12548_s3 + $0x28c] sm:$0xf] %vm6955_vm4, %v8157_v19 }
 0x273   :  { %v4884_v28 = vld [vmem:[#allocation2 + $0xa90] sm:$0xff]  ;;  %7291 = vst.msk [vmem:[%s12548_s3 + $0x53c] sm:$0xf] %vm6955_vm4, %v8329_v20  ;;  %v5062_v33 = vadd.f32 %v12133_v32, %v4712_v27  ;;  %7117 = vst.msk [vmem:[%s12548_s3 + $0x284] sm:$0xf] %vm6955_vm4, %v8155_v25 }
 0x274   :  { %v5234_v34 = vadd.f32 %v12133_v32, %v4884_v28  ;;  %v4710_v38 = vld [vmem:[#allocation2 + $0x520] sm:$0xff]  ;;  %4369 = vst.msk [vmem:[#allocation2 + $0x550] sm:$0xff] %vm19_vm3, %v4025_v21  ;;  %4367 = vst.msk [vmem:[#allocation2 + $0x540] sm:$0xff] %vm19_vm3, %v4023_v29 }
 0x275   :  { %v4882_v35 = vld [vmem:[#allocation2 + $0xa80] sm:$0xff]  ;;  %7289 = vst.msk [vmem:[%s12548_s3 + $0x534] sm:$0xf] %vm6955_vm4, %v8327_v26  ;;  %v5060_v40 = vadd.f32 %v12133_v32, %v4710_v38  ;;  %v4713_v42 = vld [vmem:[#allocation2 + $0x538] sm:$0xff]  ;;  %v5405_v46 = vmax.f32 %v5062_v33, 0.0 }
 0x276   :  { %v5232_v41 = vadd.f32 %v12133_v32, %v4882_v35  ;;  %v4885_v43 = vld [vmem:[#allocation2 + $0xa98] sm:$0xff]  ;;  %v5577_v47 = vmax.f32 %v5234_v34, 0.0  ;;  %v5063_v48 = vadd.f32 %v12133_v32, %v4713_v42  ;;  %v4711_v50 = vld [vmem:[#allocation2 + $0x528] sm:$0xff]  ;;  %4539 = vst.msk [vmem:[#allocation2 + $0xaa0] sm:$0xff] %vm19_vm3, %v4195_v52  ;;  %4370 = vst.msk [vmem:[#allocation2 + $0x558] sm:$0xff] %vm19_vm3, %v4026_v36 }
 0x277   :  { %v5235_v49 = vadd.f32 %v12133_v32, %v4885_v43  ;;  %v4883_v51 = vld [vmem:[#allocation2 + $0xa88] sm:$0xff]  ;;  %v5403_v53 = vmax.f32 %v5060_v40, 0.0  ;;  %v5061_v18 = vadd.f32 %v12133_v32, %v4711_v50  ;;  %4368 = vst.msk [vmem:[#allocation2 + $0x548] sm:$0xff] %vm19_vm3, %v4024_v44  ;;  %4540 = vst.msk [vmem:[#allocation2 + $0xaa8] sm:$0xff] %vm19_vm3, %v4196_v45  ;;  %v8160_v56 = vpack.c.bf16 %v5405_v46, %v5405_v46 }
 0x278   :  { %v5575_v54 = vmax.f32 %v5232_v41, 0.0  ;;  %v5233_v55 = vadd.f32 %v12133_v32, %v4883_v51  ;;  %v8332_v57 = vpack.c.bf16 %v5577_v47, %v5577_v47  ;;  %v5406_v58 = vmax.f32 %v5063_v48, 0.0  ;;  %4542 = vst.msk [vmem:[#allocation2 + $0xab0] sm:$0x3] %vm362_vm5, %v4197_v5 }
 0x279   :  { %v5578_v59 = vmax.f32 %v5235_v49, 0.0  ;;  %v8158_v60 = vpack.c.bf16 %v5403_v53, %v5403_v53  ;;  %v5404_v62 = vmax.f32 %v5061_v18, 0.0  ;;  %7122 = vst.msk [vmem:[%s12548_s3 + $0x298] sm:$0xf] %vm6955_vm4, %v8160_v56 }
 0x27a   :  { %v8330_v61 = vpack.c.bf16 %v5575_v54, %v5575_v54  ;;  %v5576_v63 = vmax.f32 %v5233_v55, 0.0  ;;  %7294 = vst.msk [vmem:[%s12548_s3 + $0x548] sm:$0xf] %vm6955_vm4, %v8332_v57  ;;  %v8161_v32 = vpack.c.bf16 %v5406_v58, %v5406_v58 }
 0x27b   :  { %v8333_v0 = vpack.c.bf16 %v5578_v59, %v5578_v59  ;;  %7120 = vst.msk [vmem:[%s12548_s3 + $0x290] sm:$0xf] %vm6955_vm4, %v8158_v60  ;;  %v8159_v2 = vpack.c.bf16 %v5404_v62, %v5404_v62  ;;  %v4716_v4 = vld [vmem:[#allocation2 + $0x550] sm:$0xff]  ;;  %v4714_v8 = vld [vmem:[#allocation2 + $0x540] sm:$0xff] }
 0x27c   :  { %7292 = vst.msk [vmem:[%s12548_s3 + $0x540] sm:$0xf] %vm6955_vm4, %v8330_v61  ;;  %v8331_v3 = vpack.c.bf16 %v5576_v63, %v5576_v63  ;;  %7123 = vst.msk [vmem:[%s12548_s3 + $0x29c] sm:$0xf] %vm6955_vm4, %v8161_v32  ;;  %v5066_v7 = vadd.f32 %v9044_v6, %v4716_v4  ;;  %v5064_v9 = vadd.f32 %v9044_v6, %v4714_v8 }
 0x27d   :  { %7295 = vst.msk [vmem:[%s12548_s3 + $0x54c] sm:$0xf] %vm6955_vm4, %v8333_v0  ;;  %7121 = vst.msk [vmem:[%s12548_s3 + $0x294] sm:$0xf] %vm6955_vm4, %v8159_v2  ;;  %v4886_v10 = vld [vmem:[#allocation2 + $0xaa0] sm:$0xff]  ;;  %v4717_v11 = vld [vmem:[#allocation2 + $0x558] sm:$0xff] }
 0x27e   :  { %7293 = vst.msk [vmem:[%s12548_s3 + $0x544] sm:$0xf] %vm6955_vm4, %v8331_v3  ;;  %v5409_v12 = vmax.f32 %v5066_v7, 0.0  ;;  %v5236_v13 = vadd.f32 %v9044_v6, %v4886_v10  ;;  %v5067_v14 = vadd.f32 %v9044_v6, %v4717_v11  ;;  %v4715_v16 = vld [vmem:[#allocation2 + $0x548] sm:$0xff]  ;;  %v5407_v19 = vmax.f32 %v5064_v9, 0.0 }
 0x27f   :  { %v4887_v17 = vld [vmem:[#allocation2 + $0xaa8] sm:$0xff]  ;;  %v5065_v20 = vadd.f32 %v9044_v6, %v4715_v16  ;;  %v4888_v31 = vld [vmem:[#allocation2 + $0xab0] sm:$0x3] }
 0x280   :  { %v5237_v21 = vadd.f32 %v9044_v6, %v4887_v17  ;;  %v8164_v15 = vpack.c.bf16 %v5409_v12, %v5409_v12  ;;  %v5579_v22 = vmax.f32 %v5236_v13, 0.0  ;;  %v5410_v23 = vmax.f32 %v5067_v14, 0.0 }
 0x281   :  { %v8162_v24 = vpack.c.bf16 %v5407_v19, %v5407_v19  ;;  %v5408_v25 = vmax.f32 %v5065_v20, 0.0  ;;  %v5238_v33 = vadd.f32 %v9044_v6, %v4888_v31 }
 0x282   :  { %v5580_v26 = vmax.f32 %v5237_v21, 0.0  ;;  %7126 = vst.msk [vmem:[%s12548_s3 + $0x2a8] sm:$0xf] %vm6955_vm4, %v8164_v15  ;;  %v8334_v27 = vpack.c.bf16 %v5579_v22, %v5579_v22  ;;  %v8165_v28 = vpack.c.bf16 %v5410_v23, %v5410_v23 }
 0x283   :  { %7124 = vst.msk [vmem:[%s12548_s3 + $0x2a0] sm:$0xf] %vm6955_vm4, %v8162_v24  ;;  %v8163_v29 = vpack.c.bf16 %v5408_v25, %v5408_v25  ;;  %v5581_v34 = vmax.f32 %v5238_v33, 0.0 }
 0x284   :  { %v8335_v30 = vpack.c.bf16 %v5580_v26, %v5580_v26  ;;  %7296 = vst.msk [vmem:[%s12548_s3 + $0x550] sm:$0xf] %vm6955_vm4, %v8334_v27  ;;  %7127 = vst.msk [vmem:[%s12548_s3 + $0x2ac] sm:$0xf] %vm6955_vm4, %v8165_v28 }
 0x285   :  { %7125 = vst.msk [vmem:[%s12548_s3 + $0x2a4] sm:$0xf] %vm6955_vm4, %v8163_v29  ;;  %v8336_v38 = vpack.c.bf16 %v5581_v34, %v5581_v34 }
 0x286   :  { %7297 = vst.msk [vmem:[%s12548_s3 + $0x554] sm:$0xf] %vm6955_vm4, %v8335_v30 }
 0x287   :  { %7299 = vst.msk [vmem:[%s12548_s3 + $0x558] sm:$0x1] %vm7298_vm6, %v8336_v38 }

</bundles_post_ra>
